<compile_context>
chip_gen: v7x
topology: tpu7x:2x2x1
jax: 0.10.0
libtpu: 0.0.40
codegen_flags: <defaults>
</compile_context>

<pallas_src>
import functools

import jax
import jax.numpy as jnp
from jax.experimental import pallas as pl
from jax.experimental.pallas import tpu as pltpu

EPS = 1e-5  # nn.LayerNorm default eps


# ----------------------------------------------------------------------------
# shared math helpers (traced inside the kernel and in the pure-JAX reference)
# ----------------------------------------------------------------------------
def _layernorm(x, gamma, beta):
    mu = jnp.mean(x, axis=-1, keepdims=True)
    var = jnp.mean(jnp.square(x - mu), axis=-1, keepdims=True)
    return (x - mu) * jax.lax.rsqrt(var + EPS) * gamma + beta


# ----------------------------------------------------------------------------
# fused Pallas kernel (B_tile batch elements per grid step)
# ----------------------------------------------------------------------------
def datm_fused_kernel(x_ref, par_ref, w_ref, m2_ref, perm_ref, o_ref, s_ref,
                      *, num_heads):
    bt, c, n = x_ref.shape
    r = n // c                       # rows-per-channel in the .view_as scramble
    d = c // num_heads
    hidden = w_ref.shape[1] - 4 * c
    cr = (par_ref.shape[0] - 4) // 2

    # ---- packed parameters (f32) and weights (bf16) --------------------------
    g1, b1 = par_ref[0:1, :], par_ref[1:2, :]
    g2, b2 = par_ref[2:3, :], par_ref[3:4, :]
    sg1t = par_ref[4:4 + cr, :]               # (Cr, C)  SGCA conv1 (row-major)
    sg2t = par_ref[4 + cr:4 + 2 * cr, :]      # (Cr, C)  SGCA conv2^T

    wqkv = w_ref[:, 0:3 * c]                  # (C, 3C) bf16, scale folded in Q
    wo = w_ref[:, 3 * c:4 * c]                # (C, C)  bf16 out_proj
    m1 = w_ref[:, 4 * c:4 * c + hidden]       # (C, hidden) bf16
    m2 = m2_ref[...]                          # (hidden, C) bf16
    perm = perm_ref[...]                      # (N, N) bf16 one-hot(pi) rows

    # ---- load x, token-major view, norm1 (f32 stats) --------------------------
    x_cn = [x_ref[b] for b in range(bt)]            # each (C, N) f32
    x_tok = [x_cn[b].T for b in range(bt)]          # each (N, C) f32
    x_tok_all = jnp.concatenate(x_tok, axis=0)      # (Bt*N, C)
    ln1 = _layernorm(x_tok_all, g1, b1).astype(jnp.bfloat16)

    # ---- `.view_as(x)` scramble per batch: bf16 row permute + slice/concat ----
    t_blocks = []
    for b in range(bt):
        ln_re = jnp.dot(perm, ln1[b * n:(b + 1) * n, :],
                        preferred_element_type=jnp.float32)     # exact permute
        scr = jnp.concatenate([ln_re[a * c:(a + 1) * c, :] for a in range(r)],
                              axis=1)                           # (C, N)
        t_blocks.append(scr.T)                                  # (N, C)
    t_all = jnp.concatenate(t_blocks, axis=0).astype(jnp.bfloat16)  # (Bt*N, C)

    # ---- fused QKV projection: one MXU push instead of three ------------------
    qkv = jnp.dot(t_all, wqkv,
                  preferred_element_type=jnp.float32).astype(jnp.bfloat16)

    # ---- attention per (batch, head); scores staged via ONE VMEM scratch ------
    head_blocks = []
    for b in range(bt):
        r0 = b * n
        oh_list = []
        for h in range(num_heads):
            qh = qkv[r0:r0 + n, h * d:(h + 1) * d]
            kh = qkv[r0:r0 + n, c + h * d:c + (h + 1) * d]
            vh = qkv[r0:r0 + n, 2 * c + h * d:2 * c + (h + 1) * d]
            # q.k^T without materializing kh.T (contract last dims)
            s_ref[...] = jax.lax.dot_general(
                qh, kh, (((1,), (1,)), ((), ())),
                preferred_element_type=jnp.float32)             # (N, N)
            s = s_ref[...]
            s = s - jnp.max(s, axis=-1, keepdims=True)
            p = jnp.exp(s)
            p = (p * pl.reciprocal(jnp.sum(p, axis=-1, keepdims=True),
                                   approx=True)).astype(jnp.bfloat16)
            oh_list.append(jnp.dot(p, vh,
                                   preferred_element_type=jnp.float32))  # (N,d)
        head_blocks.append(
            jnp.concatenate(oh_list, axis=1).astype(jnp.bfloat16))       # (N,C)
    heads_all = jnp.concatenate(head_blocks, axis=0)                     # (Bt*N,C)

    # ---- out_proj: ONE matmul over all batches & heads -------------------------
    attn_all = jnp.dot(heads_all, wo, preferred_element_type=jnp.float32)

    # ---- SGCA gate (pure VPU/XLU, no M=1 MXU drains) + residual 1 --------------
    x1_tok, x1_cn = [], []
    for b in range(bt):
        attn_b = attn_all[b * n:(b + 1) * n, :]                 # (N, C) f32
        pooled = jnp.mean(attn_b, axis=0, keepdims=True)        # (1, C)
        ys = [jnp.maximum(jnp.sum(pooled * sg1t[i:i + 1, :],
                                  axis=-1, keepdims=True), 0.0)
              for i in range(cr)]                               # each (1, 1)
        gate = ys[0] * sg2t[0:1, :]
        for i in range(1, cr):
            gate = gate + ys[i] * sg2t[i:i + 1, :]
        gate = jax.nn.sigmoid(gate)                             # (1, C)
        attn_y = attn_b * gate                                  # (N, C)
        x1_tok.append(x_tok[b] + attn_y)                        # (N, C)
        x1_cn.append(x_cn[b] + attn_y.T)                        # (C, N)

    # ---- norm2 in original token order (f32), then bf16 permute, then MLP ------
    ln2 = _layernorm(jnp.concatenate(x1_tok, axis=0), g2, b2).astype(jnp.bfloat16)
    ln2_re = jnp.concatenate(
        [jnp.dot(perm, ln2[b * n:(b + 1) * n, :],
                 preferred_element_type=jnp.float32) for b in range(bt)],
        axis=0).astype(jnp.bfloat16)                            # (Bt*N, C) pi-order
    hmid = jnp.dot(ln2_re, m1, preferred_element_type=jnp.float32)
    # TODO(synk): PyTorch nn.GELU() default is exact erf; tanh approximation used.
    hmid = jax.nn.gelu(hmid, approximate=True).astype(jnp.bfloat16)
    mlp_re = jnp.dot(hmid, m2, preferred_element_type=jnp.float32)      # (Bt*N, C)

    # ---- residual 2 with the second `.view_as` scramble; lane-dense NCHW store -
    for b in range(bt):
        blk = mlp_re[b * n:(b + 1) * n, :]                      # (N, C), pi order
        mlp_cn = jnp.concatenate([blk[a * c:(a + 1) * c, :] for a in range(r)],
                                 axis=1)                        # (C, N)
        o_ref[b] = x1_cn[b] + mlp_cn


# ----------------------------------------------------------------------------
# weight preparation (exact algebraic folding; no biases anywhere)
# ----------------------------------------------------------------------------
def _split_weights(p, c):
    """Reference-form (unfolded) weights, all f32."""
    return dict(
        wcq=p["wc_qkv"][:c].T, wck=p["wc_qkv"][c:2 * c].T, wcv=p["wc_qkv"][2 * c:].T,
        wq=p["in_proj"][:c].T, wk=p["in_proj"][c:2 * c].T, wv=p["in_proj"][2 * c:].T,
        wo=p["out_proj"].T,
        w1=p["sg_w1"].T, w2=p["sg_w2"].T,
        m1=p["mlp_w1"].T, m2=p["mlp_w2"].T,
    )


def _pi_permutation(n, c):
    """Permutation matrix P with (P @ M)[i] = M[pi(i)], pi(i) = (i%C)*(N//C) + i//C."""
    r = n // c
    idx = jnp.arange(n)
    pi = (idx % c) * r + (idx // c)
    return jax.nn.one_hot(pi, n, dtype=jnp.float32)


def _prep_kernel_inputs(p, c, n, num_heads):
    """Packed kernel inputs: qkv conv folded into in_proj, scale folded into Q,
    weights packed into one bf16 slab + m2, small params into one f32 slab."""
    w = _split_weights(p, c)
    d = c // num_heads
    wq_eff = (w["wcq"] @ w["wq"]) * (1.0 / (d ** 0.5))
    wk_eff = w["wck"] @ w["wk"]
    wv_eff = w["wcv"] @ w["wv"]
    w_slab = jnp.concatenate(
        [wq_eff, wk_eff, wv_eff, w["wo"], w["m1"]], axis=1).astype(jnp.bfloat16)
    m2_b = w["m2"].astype(jnp.bfloat16)                    # (hidden, C)
    par_slab = jnp.concatenate(
        [p["g1"].reshape(1, c), p["b1"].reshape(1, c),
         p["g2"].reshape(1, c), p["b2"].reshape(1, c),
         w["w1"].T,                                        # (Cr, C) = SGCA conv1
         w["w2"]], axis=0).astype(jnp.float32)             # (Cr, C) = SGCA conv2^T
    perm_b = _pi_permutation(n, c).astype(jnp.bfloat16)
    return par_slab, w_slab, m2_b, perm_b


def _pick_b_tile(bsz):
    """Largest small batch tile that keeps grid length >= 2 (v7x has 2 TCs)."""
    for bt in (4, 3, 2):
        if bsz % bt == 0 and bsz // bt >= 2:
            return bt
    return 1


# ----------------------------------------------------------------------------
# fused forward (single pallas_call) and pure-JAX f32 reference
# ----------------------------------------------------------------------------
@functools.partial(jax.jit, static_argnums=(2,))
def datm_forward_pallas(x, p, num_heads):
    bsz, c, hgt, wid = x.shape
    n = hgt * wid
    assert c % num_heads == 0
    assert n % c == 0, "fused kernel assumes H*W % C == 0 (holds for demo shapes)"

    par_slab, w_slab, m2_b, perm_b = _prep_kernel_inputs(p, c, n, num_heads)
    x_cn = x.reshape(bsz, c, n)                       # free NCHW view

    b_tile = _pick_b_tile(bsz)
    grid = (bsz // b_tile,)
    batched = pl.BlockSpec((b_tile, c, n), lambda i: (i, 0, 0))

    def shared(a):
        return pl.BlockSpec(a.shape, lambda i: (0,) * a.ndim)

    out_cn = pl.pallas_call(
        functools.partial(datm_fused_kernel, num_heads=num_heads),
        out_shape=jax.ShapeDtypeStruct((bsz, c, n), jnp.float32),
        grid=grid,
        in_specs=[batched, shared(par_slab), shared(w_slab),
                  shared(m2_b), shared(perm_b)],
        out_specs=batched,
        scratch_shapes=[pltpu.VMEM((n, n), jnp.float32)],
        compiler_params=pltpu.CompilerParams(dimension_semantics=("parallel",)),
    )(x_cn, par_slab, w_slab, m2_b, perm_b)
    return out_cn.reshape(bsz, c, hgt, wid)           # free reshape to NCHW


@functools.partial(jax.jit, static_argnums=(2,))
def datm_reference(x, p, num_heads):
    """Pure-JAX, all-f32, unfolded-weight reference of the module forward."""
    bsz, c, hgt, wid = x.shape
    n = hgt * wid
    d = c // num_heads
    w = _split_weights(p, c)

    x_tok = jnp.transpose(x.reshape(bsz, c, n), (0, 2, 1))
    ln1 = _layernorm(x_tok, p["g1"], p["b1"])
    t = jnp.transpose(ln1.reshape(bsz, c, n), (0, 2, 1))   # `.view_as` scramble

    q0, k0, v0 = t @ w["wcq"], t @ w["wck"], t @ w["wcv"]
    q, k, v = q0 @ w["wq"], k0 @ w["wk"], v0 @ w["wv"]
    qh = q.reshape(bsz, n, num_heads, d)
    kh = k.reshape(bsz, n, num_heads, d)
    vh = v.reshape(bsz, n, num_heads, d)
    s = jnp.einsum("bqhd,bkhd->bhqk", qh, kh) * (1.0 / (d ** 0.5))
    prob = jax.nn.softmax(s, axis=-1)
    attn = jnp.einsum("bhqk,bkhd->bqhd", prob, vh).reshape(bsz, n, c) @ w["wo"]

    pooled = jnp.mean(attn, axis=1, keepdims=True)
    y = jax.nn.sigmoid(jnp.maximum(pooled @ w["w1"], 0.0) @ w["w2"])
    x1 = x_tok + attn * y

    xn = _layernorm(x1, p["g2"], p["b2"])
    mlp = jax.nn.gelu(xn @ w["m1"], approximate=True) @ w["m2"]

    x1_nchw = jnp.transpose(x1, (0, 2, 1)).reshape(bsz, c, hgt, wid)
    return x1_nchw + mlp.reshape(bsz, c, hgt, wid)


# ----------------------------------------------------------------------------
# deterministic parameter init (synthetic, no checkpoint)
# ----------------------------------------------------------------------------
def init_params(key, c, hidden, reduction=8):
    cr = c // reduction
    ks = jax.random.split(key, 11)

    def dense(k, shape, fan_in):
        return jax.random.normal(k, shape, jnp.float32) / (fan_in ** 0.5)

    return dict(
        g1=(1.0 + 0.1 * jax.random.normal(ks[0], (1, c), jnp.float32)),
        b1=0.1 * jax.random.normal(ks[1], (1, c), jnp.float32),
        wc_qkv=dense(ks[2], (3 * c, c), c),      # Conv2d(dim, 3*dim, 1, bias=False)
        in_proj=dense(ks[3], (3 * c, c), c),     # MHA in_proj_weight
        out_proj=dense(ks[4], (c, c), c),        # MHA out_proj.weight
        sg_w1=dense(ks[5], (cr, c), c),          # SGCA conv1
        sg_w2=dense(ks[6], (c, cr), cr),         # SGCA conv2
        g2=(1.0 + 0.1 * jax.random.normal(ks[7], (1, c), jnp.float32)),
        b2=0.1 * jax.random.normal(ks[8], (1, c), jnp.float32),
        mlp_w1=dense(ks[9], (hidden, c), c),     # Linear(dim, hidden)
        mlp_w2=dense(ks[10], (c, hidden), hidden),  # Linear(hidden, dim)
    )


if __name__ == "__main__":
    # small shapes consistent with the module (N = H*W = 128 tokens, N % C == 0);
    # B=4 exercises B_tile=2 batching with grid=(2,) (both v7x TensorCores busy).
    B, C, H, W = 4, 32, 8, 16
    NUM_HEADS = 4
    MLP_RATIO = 4.0
    HIDDEN = int(C * MLP_RATIO)

    key = jax.random.PRNGKey(0)
    k_x, k_p = jax.random.split(key)
    x = jax.random.normal(k_x, (B, C, H, W), jnp.float32)
    params = init_params(k_p, C, HIDDEN)

    out = jax.block_until_ready(datm_forward_pallas(x, params, NUM_HEADS))
    ref = jax.block_until_ready(datm_reference(x, params, NUM_HEADS))

    # Kernel uses bf16 matmul operands (f32 accumulation); tolerance sized for
    # bf16 rounding through ~128-deep contractions of O(1) activations versus
    # the pure-f32 reference.
    if out.shape != (B, C, H, W) or not bool(
            jnp.allclose(out, ref, atol=5e-2, rtol=5e-2)):
        raise AssertionError(
            f"mismatch: shape={out.shape}, "
            f"max_abs_diff={float(jnp.max(jnp.abs(out - ref)))}")

    print("KERNEL_OK")
</pallas_src>

<mosaic_0001>
module attributes {stable_mosaic.version = 11 : i64} {
  func.func @datm_fused_kernel(%arg0: i32, %arg1: memref<2x32x128xf32, #tpu.memory_space<vmem>>, %arg2: memref<12x32xf32, #tpu.memory_space<vmem>>, %arg3: memref<32x256xbf16, #tpu.memory_space<vmem>>, %arg4: memref<128x32xbf16, #tpu.memory_space<vmem>>, %arg5: memref<128x128xbf16, #tpu.memory_space<vmem>>, %arg6: memref<2x32x128xf32, #tpu.memory_space<vmem>>, %arg7: memref<128x128xf32, #tpu.memory_space<vmem>>) attributes {dimension_semantics = [#tpu.dimension_semantics<parallel>], iteration_bounds = array<i64: 2>, scalar_prefetch = 0 : i64, scratch_operands = 1 : i64, tpu.core_type = #tpu.core_type<tc>, window_params = [{transform_indices = @transform_0, window_bounds = array<i64: 2, 32, 128>}, {pipeline_mode = #tpu.pipeline_mode<synchronous>, transform_indices = @transform_1, window_bounds = array<i64: 12, 32>}, {pipeline_mode = #tpu.pipeline_mode<synchronous>, transform_indices = @transform_2, window_bounds = array<i64: 32, 256>}, {pipeline_mode = #tpu.pipeline_mode<synchronous>, transform_indices = @transform_3, window_bounds = array<i64: 128, 32>}, {pipeline_mode = #tpu.pipeline_mode<synchronous>, transform_indices = @transform_4, window_bounds = array<i64: 128, 128>}, {transform_indices = @transform_5, window_bounds = array<i64: 2, 32, 128>}]} {
    %c0 = arith.constant 0 : index
    %c0_0 = arith.constant 0 : index
    %0 = vector.load %arg2[%c0, %c0_0] : memref<12x32xf32, #tpu.memory_space<vmem>>, vector<1x32xf32>
    %c1 = arith.constant 1 : index
    %c0_1 = arith.constant 0 : index
    %1 = vector.load %arg2[%c1, %c0_1] : memref<12x32xf32, #tpu.memory_space<vmem>>, vector<1x32xf32>
    %c2 = arith.constant 2 : index
    %c0_2 = arith.constant 0 : index
    %2 = vector.load %arg2[%c2, %c0_2] : memref<12x32xf32, #tpu.memory_space<vmem>>, vector<1x32xf32>
    %c3 = arith.constant 3 : index
    %c0_3 = arith.constant 0 : index
    %3 = vector.load %arg2[%c3, %c0_3] : memref<12x32xf32, #tpu.memory_space<vmem>>, vector<1x32xf32>
    %c4 = arith.constant 4 : index
    %c0_4 = arith.constant 0 : index
    %4 = vector.load %arg2[%c4, %c0_4] : memref<12x32xf32, #tpu.memory_space<vmem>>, vector<4x32xf32>
    %c8 = arith.constant 8 : index
    %c0_5 = arith.constant 0 : index
    %5 = vector.load %arg2[%c8, %c0_5] : memref<12x32xf32, #tpu.memory_space<vmem>>, vector<4x32xf32>
    %c0_6 = arith.constant 0 : index
    %c0_7 = arith.constant 0 : index
    %6 = vector.load %arg3[%c0_6, %c0_7] : memref<32x256xbf16, #tpu.memory_space<vmem>>, vector<32x96xbf16>
    %c0_8 = arith.constant 0 : index
    %c96 = arith.constant 96 : index
    %7 = vector.load %arg3[%c0_8, %c96] : memref<32x256xbf16, #tpu.memory_space<vmem>>, vector<32x32xbf16>
    %c0_9 = arith.constant 0 : index
    %c128 = arith.constant 128 : index
    %8 = vector.load %arg3[%c0_9, %c128] : memref<32x256xbf16, #tpu.memory_space<vmem>>, vector<32x128xbf16>
    %c0_10 = arith.constant 0 : index
    %c0_11 = arith.constant 0 : index
    %9 = vector.load %arg4[%c0_10, %c0_11] : memref<128x32xbf16, #tpu.memory_space<vmem>>, vector<128x32xbf16>
    %c0_12 = arith.constant 0 : index
    %c0_13 = arith.constant 0 : index
    %10 = vector.load %arg5[%c0_12, %c0_13] : memref<128x128xbf16, #tpu.memory_space<vmem>>, vector<128x128xbf16>
    %c0_14 = arith.constant 0 : index
    %c0_15 = arith.constant 0 : index
    %c0_16 = arith.constant 0 : index
    %11 = vector.load %arg1[%c0_14, %c0_15, %c0_16] : memref<2x32x128xf32, #tpu.memory_space<vmem>>, vector<1x32x128xf32>
    %12 = vector.shape_cast %11 : vector<1x32x128xf32> to vector<32x128xf32>
    %c1_17 = arith.constant 1 : index
    %c0_18 = arith.constant 0 : index
    %c0_19 = arith.constant 0 : index
    %13 = vector.load %arg1[%c1_17, %c0_18, %c0_19] : memref<2x32x128xf32, #tpu.memory_space<vmem>>, vector<1x32x128xf32>
    %14 = vector.shape_cast %13 : vector<1x32x128xf32> to vector<32x128xf32>
    %15 = tpu.transpose %12, [1, 0] : vector<32x128xf32> -> vector<128x32xf32>
    %16 = tpu.transpose %14, [1, 0] : vector<32x128xf32> -> vector<128x32xf32>
    %17 = tpu.concatenate %15, %16 in 0 : vector<128x32xf32>, vector<128x32xf32> -> vector<256x32xf32>
    %cst = arith.constant dense<0.000000e+00> : vector<256xf32>
    %18 = vector.multi_reduction <add>, %17, %cst [1] : vector<256x32xf32> to vector<256xf32>
    %19 = vector.shape_cast %18 : vector<256xf32> to vector<256x1xf32>
    %cst_20 = arith.constant 3.200000e+01 : f32
    %20 = vector.broadcast %cst_20 : f32 to vector<256x1xf32>
    %21 = arith.divf %19, %20 : vector<256x1xf32>
    %22 = vector.broadcast %21 : vector<256x1xf32> to vector<256x32xf32>
    %23 = arith.subf %17, %22 : vector<256x32xf32>
    %24 = arith.mulf %23, %23 : vector<256x32xf32>
    %cst_21 = arith.constant dense<0.000000e+00> : vector<256xf32>
    %25 = vector.multi_reduction <add>, %24, %cst_21 [1] : vector<256x32xf32> to vector<256xf32>
    %26 = vector.shape_cast %25 : vector<256xf32> to vector<256x1xf32>
    %cst_22 = arith.constant 3.200000e+01 : f32
    %27 = vector.broadcast %cst_22 : f32 to vector<256x1xf32>
    %28 = arith.divf %26, %27 : vector<256x1xf32>
    %29 = vector.broadcast %21 : vector<256x1xf32> to vector<256x32xf32>
    %30 = arith.subf %17, %29 : vector<256x32xf32>
    %cst_23 = arith.constant 9.99999974E-6 : f32
    %31 = vector.broadcast %cst_23 : f32 to vector<256x1xf32>
    %32 = arith.addf %28, %31 : vector<256x1xf32>
    %33 = math.rsqrt %32 : vector<256x1xf32>
    %34 = vector.broadcast %33 : vector<256x1xf32> to vector<256x32xf32>
    %35 = arith.mulf %30, %34 : vector<256x32xf32>
    %36 = vector.broadcast %0 : vector<1x32xf32> to vector<256x32xf32>
    %37 = arith.mulf %35, %36 : vector<256x32xf32>
    %38 = vector.broadcast %1 : vector<1x32xf32> to vector<256x32xf32>
    %39 = arith.addf %37, %38 : vector<256x32xf32>
    %40 = arith.truncf %39 : vector<256x32xf32> to vector<256x32xbf16>
    %41 = vector.extract_strided_slice %40 {offsets = [0, 0], sizes = [128, 32], strides = [1, 1]} : vector<256x32xbf16> to vector<128x32xbf16>
    %cst_24 = arith.constant dense<0.000000e+00> : vector<128x32xf32>
    %42 = tpu.matmul %10, %41, %cst_24 {dimension_numbers = #tpu.dot_dimension_numbers<[1], [0], [0], [1], [0, 0, 1, 1], [], []>} : vector<128x128xbf16>, vector<128x32xbf16>, vector<128x32xf32> -> vector<128x32xf32>
    %43 = vector.extract_strided_slice %42 {offsets = [0, 0], sizes = [32, 32], strides = [1, 1]} : vector<128x32xf32> to vector<32x32xf32>
    %44 = vector.extract_strided_slice %42 {offsets = [32, 0], sizes = [32, 32], strides = [1, 1]} : vector<128x32xf32> to vector<32x32xf32>
    %45 = vector.extract_strided_slice %42 {offsets = [64, 0], sizes = [32, 32], strides = [1, 1]} : vector<128x32xf32> to vector<32x32xf32>
    %46 = vector.extract_strided_slice %42 {offsets = [96, 0], sizes = [32, 32], strides = [1, 1]} : vector<128x32xf32> to vector<32x32xf32>
    %47 = tpu.concatenate %43, %44, %45, %46 in 1 : vector<32x32xf32>, vector<32x32xf32>, vector<32x32xf32>, vector<32x32xf32> -> vector<32x128xf32>
    %48 = tpu.transpose %47, [1, 0] : vector<32x128xf32> -> vector<128x32xf32>
    %49 = vector.extract_strided_slice %40 {offsets = [128, 0], sizes = [128, 32], strides = [1, 1]} : vector<256x32xbf16> to vector<128x32xbf16>
    %cst_25 = arith.constant dense<0.000000e+00> : vector<128x32xf32>
    %50 = tpu.matmul %10, %49, %cst_25 {dimension_numbers = #tpu.dot_dimension_numbers<[1], [0], [0], [1], [0, 0, 1, 1], [], []>} : vector<128x128xbf16>, vector<128x32xbf16>, vector<128x32xf32> -> vector<128x32xf32>
    %51 = vector.extract_strided_slice %50 {offsets = [0, 0], sizes = [32, 32], strides = [1, 1]} : vector<128x32xf32> to vector<32x32xf32>
    %52 = vector.extract_strided_slice %50 {offsets = [32, 0], sizes = [32, 32], strides = [1, 1]} : vector<128x32xf32> to vector<32x32xf32>
    %53 = vector.extract_strided_slice %50 {offsets = [64, 0], sizes = [32, 32], strides = [1, 1]} : vector<128x32xf32> to vector<32x32xf32>
    %54 = vector.extract_strided_slice %50 {offsets = [96, 0], sizes = [32, 32], strides = [1, 1]} : vector<128x32xf32> to vector<32x32xf32>
    %55 = tpu.concatenate %51, %52, %53, %54 in 1 : vector<32x32xf32>, vector<32x32xf32>, vector<32x32xf32>, vector<32x32xf32> -> vector<32x128xf32>
    %56 = tpu.transpose %55, [1, 0] : vector<32x128xf32> -> vector<128x32xf32>
    %57 = tpu.concatenate %48, %56 in 0 : vector<128x32xf32>, vector<128x32xf32> -> vector<256x32xf32>
    %58 = arith.truncf %57 : vector<256x32xf32> to vector<256x32xbf16>
    %cst_26 = arith.constant dense<0.000000e+00> : vector<256x96xf32>
    %59 = tpu.matmul %58, %6, %cst_26 {dimension_numbers = #tpu.dot_dimension_numbers<[1], [0], [0], [1], [0, 0, 1, 1], [], []>} : vector<256x32xbf16>, vector<32x96xbf16>, vector<256x96xf32> -> vector<256x96xf32>
    %60 = arith.truncf %59 : vector<256x96xf32> to vector<256x96xbf16>
    %61 = vector.extract_strided_slice %60 {offsets = [0, 0], sizes = [128, 8], strides = [1, 1]} : vector<256x96xbf16> to vector<128x8xbf16>
    %62 = vector.extract_strided_slice %60 {offsets = [0, 32], sizes = [128, 8], strides = [1, 1]} : vector<256x96xbf16> to vector<128x8xbf16>
    %63 = vector.extract_strided_slice %60 {offsets = [0, 64], sizes = [128, 8], strides = [1, 1]} : vector<256x96xbf16> to vector<128x8xbf16>
    %cst_27 = arith.constant dense<0.000000e+00> : vector<128x128xf32>
    %64 = tpu.matmul %61, %62, %cst_27 {dimension_numbers = #tpu.dot_dimension_numbers<[1], [1], [0], [0], [0, 0, 1, 0], [], []>} : vector<128x8xbf16>, vector<128x8xbf16>, vector<128x128xf32> -> vector<128x128xf32>
    %c0_28 = arith.constant 0 : index
    %c0_29 = arith.constant 0 : index
    %65 = vector.load %arg7[%c0_28, %c0_29] : memref<128x128xf32, #tpu.memory_space<vmem>>, vector<128x128xf32>
    tpu.vector_store %arg7[%c0_28, %c0_29], %64 {strides = array<i32>} : memref<128x128xf32, #tpu.memory_space<vmem>>, vector<128x128xf32>,
    %c0_30 = arith.constant 0 : index
    %c0_31 = arith.constant 0 : index
    %66 = vector.load %arg7[%c0_30, %c0_31] : memref<128x128xf32, #tpu.memory_space<vmem>>, vector<128x128xf32>
    %cst_32 = arith.constant dense<0xFF800000> : vector<128xf32>
    %67 = vector.multi_reduction <maximumf>, %66, %cst_32 [1] : vector<128x128xf32> to vector<128xf32>
    %68 = vector.shape_cast %67 : vector<128xf32> to vector<128x1xf32>
    %69 = vector.broadcast %68 : vector<128x1xf32> to vector<128x128xf32>
    %70 = arith.subf %66, %69 : vector<128x128xf32>
    %71 = math.exp %70 : vector<128x128xf32>
    %cst_33 = arith.constant dense<0.000000e+00> : vector<128xf32>
    %72 = vector.multi_reduction <add>, %71, %cst_33 [1] : vector<128x128xf32> to vector<128xf32>
    %73 = vector.shape_cast %72 : vector<128xf32> to vector<128x1xf32>
    %74 = tpu.reciprocal %73 {approx = true} : vector<128x1xf32> -> vector<128x1xf32>
    %75 = vector.broadcast %74 : vector<128x1xf32> to vector<128x128xf32>
    %76 = arith.mulf %71, %75 : vector<128x128xf32>
    %77 = arith.truncf %76 : vector<128x128xf32> to vector<128x128xbf16>
    %cst_34 = arith.constant dense<0.000000e+00> : vector<128x8xf32>
    %78 = tpu.matmul %77, %63, %cst_34 {dimension_numbers = #tpu.dot_dimension_numbers<[1], [0], [0], [1], [0, 0, 1, 1], [], []>} : vector<128x128xbf16>, vector<128x8xbf16>, vector<128x8xf32> -> vector<128x8xf32>
    %79 = vector.extract_strided_slice %60 {offsets = [0, 8], sizes = [128, 8], strides = [1, 1]} : vector<256x96xbf16> to vector<128x8xbf16>
    %80 = vector.extract_strided_slice %60 {offsets = [0, 40], sizes = [128, 8], strides = [1, 1]} : vector<256x96xbf16> to vector<128x8xbf16>
    %81 = vector.extract_strided_slice %60 {offsets = [0, 72], sizes = [128, 8], strides = [1, 1]} : vector<256x96xbf16> to vector<128x8xbf16>
    %cst_35 = arith.constant dense<0.000000e+00> : vector<128x128xf32>
    %82 = tpu.matmul %79, %80, %cst_35 {dimension_numbers = #tpu.dot_dimension_numbers<[1], [1], [0], [0], [0, 0, 1, 0], [], []>} : vector<128x8xbf16>, vector<128x8xbf16>, vector<128x128xf32> -> vector<128x128xf32>
    %c0_36 = arith.constant 0 : index
    %c0_37 = arith.constant 0 : index
    %83 = vector.load %arg7[%c0_36, %c0_37] : memref<128x128xf32, #tpu.memory_space<vmem>>, vector<128x128xf32>
    tpu.vector_store %arg7[%c0_36, %c0_37], %82 {strides = array<i32>} : memref<128x128xf32, #tpu.memory_space<vmem>>, vector<128x128xf32>,
    %c0_38 = arith.constant 0 : index
    %c0_39 = arith.constant 0 : index
    %84 = vector.load %arg7[%c0_38, %c0_39] : memref<128x128xf32, #tpu.memory_space<vmem>>, vector<128x128xf32>
    %cst_40 = arith.constant dense<0xFF800000> : vector<128xf32>
    %85 = vector.multi_reduction <maximumf>, %84, %cst_40 [1] : vector<128x128xf32> to vector<128xf32>
    %86 = vector.shape_cast %85 : vector<128xf32> to vector<128x1xf32>
    %87 = vector.broadcast %86 : vector<128x1xf32> to vector<128x128xf32>
    %88 = arith.subf %84, %87 : vector<128x128xf32>
    %89 = math.exp %88 : vector<128x128xf32>
    %cst_41 = arith.constant dense<0.000000e+00> : vector<128xf32>
    %90 = vector.multi_reduction <add>, %89, %cst_41 [1] : vector<128x128xf32> to vector<128xf32>
    %91 = vector.shape_cast %90 : vector<128xf32> to vector<128x1xf32>
    %92 = tpu.reciprocal %91 {approx = true} : vector<128x1xf32> -> vector<128x1xf32>
    %93 = vector.broadcast %92 : vector<128x1xf32> to vector<128x128xf32>
    %94 = arith.mulf %89, %93 : vector<128x128xf32>
    %95 = arith.truncf %94 : vector<128x128xf32> to vector<128x128xbf16>
    %cst_42 = arith.constant dense<0.000000e+00> : vector<128x8xf32>
    %96 = tpu.matmul %95, %81, %cst_42 {dimension_numbers = #tpu.dot_dimension_numbers<[1], [0], [0], [1], [0, 0, 1, 1], [], []>} : vector<128x128xbf16>, vector<128x8xbf16>, vector<128x8xf32> -> vector<128x8xf32>
    %97 = vector.extract_strided_slice %60 {offsets = [0, 16], sizes = [128, 8], strides = [1, 1]} : vector<256x96xbf16> to vector<128x8xbf16>
    %98 = vector.extract_strided_slice %60 {offsets = [0, 48], sizes = [128, 8], strides = [1, 1]} : vector<256x96xbf16> to vector<128x8xbf16>
    %99 = vector.extract_strided_slice %60 {offsets = [0, 80], sizes = [128, 8], strides = [1, 1]} : vector<256x96xbf16> to vector<128x8xbf16>
    %cst_43 = arith.constant dense<0.000000e+00> : vector<128x128xf32>
    %100 = tpu.matmul %97, %98, %cst_43 {dimension_numbers = #tpu.dot_dimension_numbers<[1], [1], [0], [0], [0, 0, 1, 0], [], []>} : vector<128x8xbf16>, vector<128x8xbf16>, vector<128x128xf32> -> vector<128x128xf32>
    %c0_44 = arith.constant 0 : index
    %c0_45 = arith.constant 0 : index
    %101 = vector.load %arg7[%c0_44, %c0_45] : memref<128x128xf32, #tpu.memory_space<vmem>>, vector<128x128xf32>
    tpu.vector_store %arg7[%c0_44, %c0_45], %100 {strides = array<i32>} : memref<128x128xf32, #tpu.memory_space<vmem>>, vector<128x128xf32>,
    %c0_46 = arith.constant 0 : index
    %c0_47 = arith.constant 0 : index
    %102 = vector.load %arg7[%c0_46, %c0_47] : memref<128x128xf32, #tpu.memory_space<vmem>>, vector<128x128xf32>
    %cst_48 = arith.constant dense<0xFF800000> : vector<128xf32>
    %103 = vector.multi_reduction <maximumf>, %102, %cst_48 [1] : vector<128x128xf32> to vector<128xf32>
    %104 = vector.shape_cast %103 : vector<128xf32> to vector<128x1xf32>
    %105 = vector.broadcast %104 : vector<128x1xf32> to vector<128x128xf32>
    %106 = arith.subf %102, %105 : vector<128x128xf32>
    %107 = math.exp %106 : vector<128x128xf32>
    %cst_49 = arith.constant dense<0.000000e+00> : vector<128xf32>
    %108 = vector.multi_reduction <add>, %107, %cst_49 [1] : vector<128x128xf32> to vector<128xf32>
    %109 = vector.shape_cast %108 : vector<128xf32> to vector<128x1xf32>
    %110 = tpu.reciprocal %109 {approx = true} : vector<128x1xf32> -> vector<128x1xf32>
    %111 = vector.broadcast %110 : vector<128x1xf32> to vector<128x128xf32>
    %112 = arith.mulf %107, %111 : vector<128x128xf32>
    %113 = arith.truncf %112 : vector<128x128xf32> to vector<128x128xbf16>
    %cst_50 = arith.constant dense<0.000000e+00> : vector<128x8xf32>
    %114 = tpu.matmul %113, %99, %cst_50 {dimension_numbers = #tpu.dot_dimension_numbers<[1], [0], [0], [1], [0, 0, 1, 1], [], []>} : vector<128x128xbf16>, vector<128x8xbf16>, vector<128x8xf32> -> vector<128x8xf32>
    %115 = vector.extract_strided_slice %60 {offsets = [0, 24], sizes = [128, 8], strides = [1, 1]} : vector<256x96xbf16> to vector<128x8xbf16>
    %116 = vector.extract_strided_slice %60 {offsets = [0, 56], sizes = [128, 8], strides = [1, 1]} : vector<256x96xbf16> to vector<128x8xbf16>
    %117 = vector.extract_strided_slice %60 {offsets = [0, 88], sizes = [128, 8], strides = [1, 1]} : vector<256x96xbf16> to vector<128x8xbf16>
    %cst_51 = arith.constant dense<0.000000e+00> : vector<128x128xf32>
    %118 = tpu.matmul %115, %116, %cst_51 {dimension_numbers = #tpu.dot_dimension_numbers<[1], [1], [0], [0], [0, 0, 1, 0], [], []>} : vector<128x8xbf16>, vector<128x8xbf16>, vector<128x128xf32> -> vector<128x128xf32>
    %c0_52 = arith.constant 0 : index
    %c0_53 = arith.constant 0 : index
    %119 = vector.load %arg7[%c0_52, %c0_53] : memref<128x128xf32, #tpu.memory_space<vmem>>, vector<128x128xf32>
    tpu.vector_store %arg7[%c0_52, %c0_53], %118 {strides = array<i32>} : memref<128x128xf32, #tpu.memory_space<vmem>>, vector<128x128xf32>,
    %c0_54 = arith.constant 0 : index
    %c0_55 = arith.constant 0 : index
    %120 = vector.load %arg7[%c0_54, %c0_55] : memref<128x128xf32, #tpu.memory_space<vmem>>, vector<128x128xf32>
    %cst_56 = arith.constant dense<0xFF800000> : vector<128xf32>
    %121 = vector.multi_reduction <maximumf>, %120, %cst_56 [1] : vector<128x128xf32> to vector<128xf32>
    %122 = vector.shape_cast %121 : vector<128xf32> to vector<128x1xf32>
    %123 = vector.broadcast %122 : vector<128x1xf32> to vector<128x128xf32>
    %124 = arith.subf %120, %123 : vector<128x128xf32>
    %125 = math.exp %124 : vector<128x128xf32>
    %cst_57 = arith.constant dense<0.000000e+00> : vector<128xf32>
    %126 = vector.multi_reduction <add>, %125, %cst_57 [1] : vector<128x128xf32> to vector<128xf32>
    %127 = vector.shape_cast %126 : vector<128xf32> to vector<128x1xf32>
    %128 = tpu.reciprocal %127 {approx = true} : vector<128x1xf32> -> vector<128x1xf32>
    %129 = vector.broadcast %128 : vector<128x1xf32> to vector<128x128xf32>
    %130 = arith.mulf %125, %129 : vector<128x128xf32>
    %131 = arith.truncf %130 : vector<128x128xf32> to vector<128x128xbf16>
    %cst_58 = arith.constant dense<0.000000e+00> : vector<128x8xf32>
    %132 = tpu.matmul %131, %117, %cst_58 {dimension_numbers = #tpu.dot_dimension_numbers<[1], [0], [0], [1], [0, 0, 1, 1], [], []>} : vector<128x128xbf16>, vector<128x8xbf16>, vector<128x8xf32> -> vector<128x8xf32>
    %133 = tpu.concatenate %78, %96, %114, %132 in 1 : vector<128x8xf32>, vector<128x8xf32>, vector<128x8xf32>, vector<128x8xf32> -> vector<128x32xf32>
    %134 = arith.truncf %133 : vector<128x32xf32> to vector<128x32xbf16>
    %135 = vector.extract_strided_slice %60 {offsets = [128, 0], sizes = [128, 8], strides = [1, 1]} : vector<256x96xbf16> to vector<128x8xbf16>
    %136 = vector.extract_strided_slice %60 {offsets = [128, 32], sizes = [128, 8], strides = [1, 1]} : vector<256x96xbf16> to vector<128x8xbf16>
    %137 = vector.extract_strided_slice %60 {offsets = [128, 64], sizes = [128, 8], strides = [1, 1]} : vector<256x96xbf16> to vector<128x8xbf16>
    %cst_59 = arith.constant dense<0.000000e+00> : vector<128x128xf32>
    %138 = tpu.matmul %135, %136, %cst_59 {dimension_numbers = #tpu.dot_dimension_numbers<[1], [1], [0], [0], [0, 0, 1, 0], [], []>} : vector<128x8xbf16>, vector<128x8xbf16>, vector<128x128xf32> -> vector<128x128xf32>
    %c0_60 = arith.constant 0 : index
    %c0_61 = arith.constant 0 : index
    %139 = vector.load %arg7[%c0_60, %c0_61] : memref<128x128xf32, #tpu.memory_space<vmem>>, vector<128x128xf32>
    tpu.vector_store %arg7[%c0_60, %c0_61], %138 {strides = array<i32>} : memref<128x128xf32, #tpu.memory_space<vmem>>, vector<128x128xf32>,
    %c0_62 = arith.constant 0 : index
    %c0_63 = arith.constant 0 : index
    %140 = vector.load %arg7[%c0_62, %c0_63] : memref<128x128xf32, #tpu.memory_space<vmem>>, vector<128x128xf32>
    %cst_64 = arith.constant dense<0xFF800000> : vector<128xf32>
    %141 = vector.multi_reduction <maximumf>, %140, %cst_64 [1] : vector<128x128xf32> to vector<128xf32>
    %142 = vector.shape_cast %141 : vector<128xf32> to vector<128x1xf32>
    %143 = vector.broadcast %142 : vector<128x1xf32> to vector<128x128xf32>
    %144 = arith.subf %140, %143 : vector<128x128xf32>
    %145 = math.exp %144 : vector<128x128xf32>
    %cst_65 = arith.constant dense<0.000000e+00> : vector<128xf32>
    %146 = vector.multi_reduction <add>, %145, %cst_65 [1] : vector<128x128xf32> to vector<128xf32>
    %147 = vector.shape_cast %146 : vector<128xf32> to vector<128x1xf32>
    %148 = tpu.reciprocal %147 {approx = true} : vector<128x1xf32> -> vector<128x1xf32>
    %149 = vector.broadcast %148 : vector<128x1xf32> to vector<128x128xf32>
    %150 = arith.mulf %145, %149 : vector<128x128xf32>
    %151 = arith.truncf %150 : vector<128x128xf32> to vector<128x128xbf16>
    %cst_66 = arith.constant dense<0.000000e+00> : vector<128x8xf32>
    %152 = tpu.matmul %151, %137, %cst_66 {dimension_numbers = #tpu.dot_dimension_numbers<[1], [0], [0], [1], [0, 0, 1, 1], [], []>} : vector<128x128xbf16>, vector<128x8xbf16>, vector<128x8xf32> -> vector<128x8xf32>
    %153 = vector.extract_strided_slice %60 {offsets = [128, 8], sizes = [128, 8], strides = [1, 1]} : vector<256x96xbf16> to vector<128x8xbf16>
    %154 = vector.extract_strided_slice %60 {offsets = [128, 40], sizes = [128, 8], strides = [1, 1]} : vector<256x96xbf16> to vector<128x8xbf16>
    %155 = vector.extract_strided_slice %60 {offsets = [128, 72], sizes = [128, 8], strides = [1, 1]} : vector<256x96xbf16> to vector<128x8xbf16>
    %cst_67 = arith.constant dense<0.000000e+00> : vector<128x128xf32>
    %156 = tpu.matmul %153, %154, %cst_67 {dimension_numbers = #tpu.dot_dimension_numbers<[1], [1], [0], [0], [0, 0, 1, 0], [], []>} : vector<128x8xbf16>, vector<128x8xbf16>, vector<128x128xf32> -> vector<128x128xf32>
    %c0_68 = arith.constant 0 : index
    %c0_69 = arith.constant 0 : index
    %157 = vector.load %arg7[%c0_68, %c0_69] : memref<128x128xf32, #tpu.memory_space<vmem>>, vector<128x128xf32>
    tpu.vector_store %arg7[%c0_68, %c0_69], %156 {strides = array<i32>} : memref<128x128xf32, #tpu.memory_space<vmem>>, vector<128x128xf32>,
    %c0_70 = arith.constant 0 : index
    %c0_71 = arith.constant 0 : index
    %158 = vector.load %arg7[%c0_70, %c0_71] : memref<128x128xf32, #tpu.memory_space<vmem>>, vector<128x128xf32>
    %cst_72 = arith.constant dense<0xFF800000> : vector<128xf32>
    %159 = vector.multi_reduction <maximumf>, %158, %cst_72 [1] : vector<128x128xf32> to vector<128xf32>
    %160 = vector.shape_cast %159 : vector<128xf32> to vector<128x1xf32>
    %161 = vector.broadcast %160 : vector<128x1xf32> to vector<128x128xf32>
    %162 = arith.subf %158, %161 : vector<128x128xf32>
    %163 = math.exp %162 : vector<128x128xf32>
    %cst_73 = arith.constant dense<0.000000e+00> : vector<128xf32>
    %164 = vector.multi_reduction <add>, %163, %cst_73 [1] : vector<128x128xf32> to vector<128xf32>
    %165 = vector.shape_cast %164 : vector<128xf32> to vector<128x1xf32>
    %166 = tpu.reciprocal %165 {approx = true} : vector<128x1xf32> -> vector<128x1xf32>
    %167 = vector.broadcast %166 : vector<128x1xf32> to vector<128x128xf32>
    %168 = arith.mulf %163, %167 : vector<128x128xf32>
    %169 = arith.truncf %168 : vector<128x128xf32> to vector<128x128xbf16>
    %cst_74 = arith.constant dense<0.000000e+00> : vector<128x8xf32>
    %170 = tpu.matmul %169, %155, %cst_74 {dimension_numbers = #tpu.dot_dimension_numbers<[1], [0], [0], [1], [0, 0, 1, 1], [], []>} : vector<128x128xbf16>, vector<128x8xbf16>, vector<128x8xf32> -> vector<128x8xf32>
    %171 = vector.extract_strided_slice %60 {offsets = [128, 16], sizes = [128, 8], strides = [1, 1]} : vector<256x96xbf16> to vector<128x8xbf16>
    %172 = vector.extract_strided_slice %60 {offsets = [128, 48], sizes = [128, 8], strides = [1, 1]} : vector<256x96xbf16> to vector<128x8xbf16>
    %173 = vector.extract_strided_slice %60 {offsets = [128, 80], sizes = [128, 8], strides = [1, 1]} : vector<256x96xbf16> to vector<128x8xbf16>
    %cst_75 = arith.constant dense<0.000000e+00> : vector<128x128xf32>
    %174 = tpu.matmul %171, %172, %cst_75 {dimension_numbers = #tpu.dot_dimension_numbers<[1], [1], [0], [0], [0, 0, 1, 0], [], []>} : vector<128x8xbf16>, vector<128x8xbf16>, vector<128x128xf32> -> vector<128x128xf32>
    %c0_76 = arith.constant 0 : index
    %c0_77 = arith.constant 0 : index
    %175 = vector.load %arg7[%c0_76, %c0_77] : memref<128x128xf32, #tpu.memory_space<vmem>>, vector<128x128xf32>
    tpu.vector_store %arg7[%c0_76, %c0_77], %174 {strides = array<i32>} : memref<128x128xf32, #tpu.memory_space<vmem>>, vector<128x128xf32>,
    %c0_78 = arith.constant 0 : index
    %c0_79 = arith.constant 0 : index
    %176 = vector.load %arg7[%c0_78, %c0_79] : memref<128x128xf32, #tpu.memory_space<vmem>>, vector<128x128xf32>
    %cst_80 = arith.constant dense<0xFF800000> : vector<128xf32>
    %177 = vector.multi_reduction <maximumf>, %176, %cst_80 [1] : vector<128x128xf32> to vector<128xf32>
    %178 = vector.shape_cast %177 : vector<128xf32> to vector<128x1xf32>
    %179 = vector.broadcast %178 : vector<128x1xf32> to vector<128x128xf32>
    %180 = arith.subf %176, %179 : vector<128x128xf32>
    %181 = math.exp %180 : vector<128x128xf32>
    %cst_81 = arith.constant dense<0.000000e+00> : vector<128xf32>
    %182 = vector.multi_reduction <add>, %181, %cst_81 [1] : vector<128x128xf32> to vector<128xf32>
    %183 = vector.shape_cast %182 : vector<128xf32> to vector<128x1xf32>
    %184 = tpu.reciprocal %183 {approx = true} : vector<128x1xf32> -> vector<128x1xf32>
    %185 = vector.broadcast %184 : vector<128x1xf32> to vector<128x128xf32>
    %186 = arith.mulf %181, %185 : vector<128x128xf32>
    %187 = arith.truncf %186 : vector<128x128xf32> to vector<128x128xbf16>
    %cst_82 = arith.constant dense<0.000000e+00> : vector<128x8xf32>
    %188 = tpu.matmul %187, %173, %cst_82 {dimension_numbers = #tpu.dot_dimension_numbers<[1], [0], [0], [1], [0, 0, 1, 1], [], []>} : vector<128x128xbf16>, vector<128x8xbf16>, vector<128x8xf32> -> vector<128x8xf32>
    %189 = vector.extract_strided_slice %60 {offsets = [128, 24], sizes = [128, 8], strides = [1, 1]} : vector<256x96xbf16> to vector<128x8xbf16>
    %190 = vector.extract_strided_slice %60 {offsets = [128, 56], sizes = [128, 8], strides = [1, 1]} : vector<256x96xbf16> to vector<128x8xbf16>
    %191 = vector.extract_strided_slice %60 {offsets = [128, 88], sizes = [128, 8], strides = [1, 1]} : vector<256x96xbf16> to vector<128x8xbf16>
    %cst_83 = arith.constant dense<0.000000e+00> : vector<128x128xf32>
    %192 = tpu.matmul %189, %190, %cst_83 {dimension_numbers = #tpu.dot_dimension_numbers<[1], [1], [0], [0], [0, 0, 1, 0], [], []>} : vector<128x8xbf16>, vector<128x8xbf16>, vector<128x128xf32> -> vector<128x128xf32>
    %c0_84 = arith.constant 0 : index
    %c0_85 = arith.constant 0 : index
    %193 = vector.load %arg7[%c0_84, %c0_85] : memref<128x128xf32, #tpu.memory_space<vmem>>, vector<128x128xf32>
    tpu.vector_store %arg7[%c0_84, %c0_85], %192 {strides = array<i32>} : memref<128x128xf32, #tpu.memory_space<vmem>>, vector<128x128xf32>,
    %c0_86 = arith.constant 0 : index
    %c0_87 = arith.constant 0 : index
    %194 = vector.load %arg7[%c0_86, %c0_87] : memref<128x128xf32, #tpu.memory_space<vmem>>, vector<128x128xf32>
    %cst_88 = arith.constant dense<0xFF800000> : vector<128xf32>
    %195 = vector.multi_reduction <maximumf>, %194, %cst_88 [1] : vector<128x128xf32> to vector<128xf32>
    %196 = vector.shape_cast %195 : vector<128xf32> to vector<128x1xf32>
    %197 = vector.broadcast %196 : vector<128x1xf32> to vector<128x128xf32>
    %198 = arith.subf %194, %197 : vector<128x128xf32>
    %199 = math.exp %198 : vector<128x128xf32>
    %cst_89 = arith.constant dense<0.000000e+00> : vector<128xf32>
    %200 = vector.multi_reduction <add>, %199, %cst_89 [1] : vector<128x128xf32> to vector<128xf32>
    %201 = vector.shape_cast %200 : vector<128xf32> to vector<128x1xf32>
    %202 = tpu.reciprocal %201 {approx = true} : vector<128x1xf32> -> vector<128x1xf32>
    %203 = vector.broadcast %202 : vector<128x1xf32> to vector<128x128xf32>
    %204 = arith.mulf %199, %203 : vector<128x128xf32>
    %205 = arith.truncf %204 : vector<128x128xf32> to vector<128x128xbf16>
    %cst_90 = arith.constant dense<0.000000e+00> : vector<128x8xf32>
    %206 = tpu.matmul %205, %191, %cst_90 {dimension_numbers = #tpu.dot_dimension_numbers<[1], [0], [0], [1], [0, 0, 1, 1], [], []>} : vector<128x128xbf16>, vector<128x8xbf16>, vector<128x8xf32> -> vector<128x8xf32>
    %207 = tpu.concatenate %152, %170, %188, %206 in 1 : vector<128x8xf32>, vector<128x8xf32>, vector<128x8xf32>, vector<128x8xf32> -> vector<128x32xf32>
    %208 = arith.truncf %207 : vector<128x32xf32> to vector<128x32xbf16>
    %209 = tpu.concatenate %134, %208 in 0 : vector<128x32xbf16>, vector<128x32xbf16> -> vector<256x32xbf16>
    %cst_91 = arith.constant dense<0.000000e+00> : vector<256x32xf32>
    %210 = tpu.matmul %209, %7, %cst_91 {dimension_numbers = #tpu.dot_dimension_numbers<[1], [0], [0], [1], [0, 0, 1, 1], [], []>} : vector<256x32xbf16>, vector<32x32xbf16>, vector<256x32xf32> -> vector<256x32xf32>
    %211 = vector.extract_strided_slice %210 {offsets = [0, 0], sizes = [128, 32], strides = [1, 1]} : vector<256x32xf32> to vector<128x32xf32>
    %cst_92 = arith.constant dense<0.000000e+00> : vector<32xf32>
    %212 = vector.multi_reduction <add>, %211, %cst_92 [0] : vector<128x32xf32> to vector<32xf32>
    %213 = vector.shape_cast %212 : vector<32xf32> to vector<1x32xf32>
    %cst_93 = arith.constant 1.280000e+02 : f32
    %214 = vector.broadcast %cst_93 : f32 to vector<1x32xf32>
    %215 = arith.divf %213, %214 : vector<1x32xf32>
    %216 = vector.extract_strided_slice %4 {offsets = [0, 0], sizes = [1, 32], strides = [1, 1]} : vector<4x32xf32> to vector<1x32xf32>
    %217 = arith.mulf %215, %216 : vector<1x32xf32>
    %cst_94 = arith.constant dense<0.000000e+00> : vector<1xf32>
    %218 = vector.multi_reduction <add>, %217, %cst_94 [1] : vector<1x32xf32> to vector<1xf32>
    %219 = vector.shape_cast %218 : vector<1xf32> to vector<1x1xf32>
    %cst_95 = arith.constant 0.000000e+00 : f32
    %220 = vector.broadcast %cst_95 : f32 to vector<1x1xf32>
    %221 = arith.maximumf %219, %220 : vector<1x1xf32>
    %222 = vector.extract_strided_slice %4 {offsets = [1, 0], sizes = [1, 32], strides = [1, 1]} : vector<4x32xf32> to vector<1x32xf32>
    %223 = arith.mulf %215, %222 : vector<1x32xf32>
    %cst_96 = arith.constant dense<0.000000e+00> : vector<1xf32>
    %224 = vector.multi_reduction <add>, %223, %cst_96 [1] : vector<1x32xf32> to vector<1xf32>
    %225 = vector.shape_cast %224 : vector<1xf32> to vector<1x1xf32>
    %cst_97 = arith.constant 0.000000e+00 : f32
    %226 = vector.broadcast %cst_97 : f32 to vector<1x1xf32>
    %227 = arith.maximumf %225, %226 : vector<1x1xf32>
    %228 = vector.extract_strided_slice %4 {offsets = [2, 0], sizes = [1, 32], strides = [1, 1]} : vector<4x32xf32> to vector<1x32xf32>
    %229 = arith.mulf %215, %228 : vector<1x32xf32>
    %cst_98 = arith.constant dense<0.000000e+00> : vector<1xf32>
    %230 = vector.multi_reduction <add>, %229, %cst_98 [1] : vector<1x32xf32> to vector<1xf32>
    %231 = vector.shape_cast %230 : vector<1xf32> to vector<1x1xf32>
    %cst_99 = arith.constant 0.000000e+00 : f32
    %232 = vector.broadcast %cst_99 : f32 to vector<1x1xf32>
    %233 = arith.maximumf %231, %232 : vector<1x1xf32>
    %234 = vector.extract_strided_slice %4 {offsets = [3, 0], sizes = [1, 32], strides = [1, 1]} : vector<4x32xf32> to vector<1x32xf32>
    %235 = arith.mulf %215, %234 : vector<1x32xf32>
    %cst_100 = arith.constant dense<0.000000e+00> : vector<1xf32>
    %236 = vector.multi_reduction <add>, %235, %cst_100 [1] : vector<1x32xf32> to vector<1xf32>
    %237 = vector.shape_cast %236 : vector<1xf32> to vector<1x1xf32>
    %cst_101 = arith.constant 0.000000e+00 : f32
    %238 = vector.broadcast %cst_101 : f32 to vector<1x1xf32>
    %239 = arith.maximumf %237, %238 : vector<1x1xf32>
    %240 = vector.extract_strided_slice %5 {offsets = [0, 0], sizes = [1, 32], strides = [1, 1]} : vector<4x32xf32> to vector<1x32xf32>
    %241 = vector.broadcast %221 : vector<1x1xf32> to vector<1x32xf32>
    %242 = arith.mulf %241, %240 : vector<1x32xf32>
    %243 = vector.extract_strided_slice %5 {offsets = [1, 0], sizes = [1, 32], strides = [1, 1]} : vector<4x32xf32> to vector<1x32xf32>
    %244 = vector.broadcast %227 : vector<1x1xf32> to vector<1x32xf32>
    %245 = arith.mulf %244, %243 : vector<1x32xf32>
    %246 = arith.addf %242, %245 : vector<1x32xf32>
    %247 = vector.extract_strided_slice %5 {offsets = [2, 0], sizes = [1, 32], strides = [1, 1]} : vector<4x32xf32> to vector<1x32xf32>
    %248 = vector.broadcast %233 : vector<1x1xf32> to vector<1x32xf32>
    %249 = arith.mulf %248, %247 : vector<1x32xf32>
    %250 = arith.addf %246, %249 : vector<1x32xf32>
    %251 = vector.extract_strided_slice %5 {offsets = [3, 0], sizes = [1, 32], strides = [1, 1]} : vector<4x32xf32> to vector<1x32xf32>
    %252 = vector.broadcast %239 : vector<1x1xf32> to vector<1x32xf32>
    %253 = arith.mulf %252, %251 : vector<1x32xf32>
    %254 = arith.addf %250, %253 : vector<1x32xf32>
    %255 = arith.negf %254 : vector<1x32xf32>
    %256 = math.exp %255 : vector<1x32xf32>
    %cst_102 = arith.constant 1.000000e+00 : f32
    %257 = vector.broadcast %cst_102 : f32 to vector<1x32xf32>
    %258 = arith.addf %257, %256 : vector<1x32xf32>
    %259 = arith.divf %257, %258 : vector<1x32xf32>
    %260 = vector.broadcast %259 : vector<1x32xf32> to vector<128x32xf32>
    %261 = arith.mulf %211, %260 : vector<128x32xf32>
    %262 = arith.addf %15, %261 : vector<128x32xf32>
    %263 = tpu.transpose %261, [1, 0] : vector<128x32xf32> -> vector<32x128xf32>
    %264 = arith.addf %12, %263 : vector<32x128xf32>
    %265 = vector.extract_strided_slice %210 {offsets = [128, 0], sizes = [128, 32], strides = [1, 1]} : vector<256x32xf32> to vector<128x32xf32>
    %cst_103 = arith.constant dense<0.000000e+00> : vector<32xf32>
    %266 = vector.multi_reduction <add>, %265, %cst_103 [0] : vector<128x32xf32> to vector<32xf32>
    %267 = vector.shape_cast %266 : vector<32xf32> to vector<1x32xf32>
    %cst_104 = arith.constant 1.280000e+02 : f32
    %268 = vector.broadcast %cst_104 : f32 to vector<1x32xf32>
    %269 = arith.divf %267, %268 : vector<1x32xf32>
    %270 = vector.extract_strided_slice %4 {offsets = [0, 0], sizes = [1, 32], strides = [1, 1]} : vector<4x32xf32> to vector<1x32xf32>
    %271 = arith.mulf %269, %270 : vector<1x32xf32>
    %cst_105 = arith.constant dense<0.000000e+00> : vector<1xf32>
    %272 = vector.multi_reduction <add>, %271, %cst_105 [1] : vector<1x32xf32> to vector<1xf32>
    %273 = vector.shape_cast %272 : vector<1xf32> to vector<1x1xf32>
    %cst_106 = arith.constant 0.000000e+00 : f32
    %274 = vector.broadcast %cst_106 : f32 to vector<1x1xf32>
    %275 = arith.maximumf %273, %274 : vector<1x1xf32>
    %276 = vector.extract_strided_slice %4 {offsets = [1, 0], sizes = [1, 32], strides = [1, 1]} : vector<4x32xf32> to vector<1x32xf32>
    %277 = arith.mulf %269, %276 : vector<1x32xf32>
    %cst_107 = arith.constant dense<0.000000e+00> : vector<1xf32>
    %278 = vector.multi_reduction <add>, %277, %cst_107 [1] : vector<1x32xf32> to vector<1xf32>
    %279 = vector.shape_cast %278 : vector<1xf32> to vector<1x1xf32>
    %cst_108 = arith.constant 0.000000e+00 : f32
    %280 = vector.broadcast %cst_108 : f32 to vector<1x1xf32>
    %281 = arith.maximumf %279, %280 : vector<1x1xf32>
    %282 = vector.extract_strided_slice %4 {offsets = [2, 0], sizes = [1, 32], strides = [1, 1]} : vector<4x32xf32> to vector<1x32xf32>
    %283 = arith.mulf %269, %282 : vector<1x32xf32>
    %cst_109 = arith.constant dense<0.000000e+00> : vector<1xf32>
    %284 = vector.multi_reduction <add>, %283, %cst_109 [1] : vector<1x32xf32> to vector<1xf32>
    %285 = vector.shape_cast %284 : vector<1xf32> to vector<1x1xf32>
    %cst_110 = arith.constant 0.000000e+00 : f32
    %286 = vector.broadcast %cst_110 : f32 to vector<1x1xf32>
    %287 = arith.maximumf %285, %286 : vector<1x1xf32>
    %288 = vector.extract_strided_slice %4 {offsets = [3, 0], sizes = [1, 32], strides = [1, 1]} : vector<4x32xf32> to vector<1x32xf32>
    %289 = arith.mulf %269, %288 : vector<1x32xf32>
    %cst_111 = arith.constant dense<0.000000e+00> : vector<1xf32>
    %290 = vector.multi_reduction <add>, %289, %cst_111 [1] : vector<1x32xf32> to vector<1xf32>
    %291 = vector.shape_cast %290 : vector<1xf32> to vector<1x1xf32>
    %cst_112 = arith.constant 0.000000e+00 : f32
    %292 = vector.broadcast %cst_112 : f32 to vector<1x1xf32>
    %293 = arith.maximumf %291, %292 : vector<1x1xf32>
    %294 = vector.extract_strided_slice %5 {offsets = [0, 0], sizes = [1, 32], strides = [1, 1]} : vector<4x32xf32> to vector<1x32xf32>
    %295 = vector.broadcast %275 : vector<1x1xf32> to vector<1x32xf32>
    %296 = arith.mulf %295, %294 : vector<1x32xf32>
    %297 = vector.extract_strided_slice %5 {offsets = [1, 0], sizes = [1, 32], strides = [1, 1]} : vector<4x32xf32> to vector<1x32xf32>
    %298 = vector.broadcast %281 : vector<1x1xf32> to vector<1x32xf32>
    %299 = arith.mulf %298, %297 : vector<1x32xf32>
    %300 = arith.addf %296, %299 : vector<1x32xf32>
    %301 = vector.extract_strided_slice %5 {offsets = [2, 0], sizes = [1, 32], strides = [1, 1]} : vector<4x32xf32> to vector<1x32xf32>
    %302 = vector.broadcast %287 : vector<1x1xf32> to vector<1x32xf32>
    %303 = arith.mulf %302, %301 : vector<1x32xf32>
    %304 = arith.addf %300, %303 : vector<1x32xf32>
    %305 = vector.extract_strided_slice %5 {offsets = [3, 0], sizes = [1, 32], strides = [1, 1]} : vector<4x32xf32> to vector<1x32xf32>
    %306 = vector.broadcast %293 : vector<1x1xf32> to vector<1x32xf32>
    %307 = arith.mulf %306, %305 : vector<1x32xf32>
    %308 = arith.addf %304, %307 : vector<1x32xf32>
    %309 = arith.negf %308 : vector<1x32xf32>
    %310 = math.exp %309 : vector<1x32xf32>
    %cst_113 = arith.constant 1.000000e+00 : f32
    %311 = vector.broadcast %cst_113 : f32 to vector<1x32xf32>
    %312 = arith.addf %311, %310 : vector<1x32xf32>
    %313 = arith.divf %311, %312 : vector<1x32xf32>
    %314 = vector.broadcast %313 : vector<1x32xf32> to vector<128x32xf32>
    %315 = arith.mulf %265, %314 : vector<128x32xf32>
    %316 = arith.addf %16, %315 : vector<128x32xf32>
    %317 = tpu.transpose %315, [1, 0] : vector<128x32xf32> -> vector<32x128xf32>
    %318 = arith.addf %14, %317 : vector<32x128xf32>
    %319 = tpu.concatenate %262, %316 in 0 : vector<128x32xf32>, vector<128x32xf32> -> vector<256x32xf32>
    %cst_114 = arith.constant dense<0.000000e+00> : vector<256xf32>
    %320 = vector.multi_reduction <add>, %319, %cst_114 [1] : vector<256x32xf32> to vector<256xf32>
    %321 = vector.shape_cast %320 : vector<256xf32> to vector<256x1xf32>
    %cst_115 = arith.constant 3.200000e+01 : f32
    %322 = vector.broadcast %cst_115 : f32 to vector<256x1xf32>
    %323 = arith.divf %321, %322 : vector<256x1xf32>
    %324 = vector.broadcast %323 : vector<256x1xf32> to vector<256x32xf32>
    %325 = arith.subf %319, %324 : vector<256x32xf32>
    %326 = arith.mulf %325, %325 : vector<256x32xf32>
    %cst_116 = arith.constant dense<0.000000e+00> : vector<256xf32>
    %327 = vector.multi_reduction <add>, %326, %cst_116 [1] : vector<256x32xf32> to vector<256xf32>
    %328 = vector.shape_cast %327 : vector<256xf32> to vector<256x1xf32>
    %cst_117 = arith.constant 3.200000e+01 : f32
    %329 = vector.broadcast %cst_117 : f32 to vector<256x1xf32>
    %330 = arith.divf %328, %329 : vector<256x1xf32>
    %331 = vector.broadcast %323 : vector<256x1xf32> to vector<256x32xf32>
    %332 = arith.subf %319, %331 : vector<256x32xf32>
    %cst_118 = arith.constant 9.99999974E-6 : f32
    %333 = vector.broadcast %cst_118 : f32 to vector<256x1xf32>
    %334 = arith.addf %330, %333 : vector<256x1xf32>
    %335 = math.rsqrt %334 : vector<256x1xf32>
    %336 = vector.broadcast %335 : vector<256x1xf32> to vector<256x32xf32>
    %337 = arith.mulf %332, %336 : vector<256x32xf32>
    %338 = vector.broadcast %2 : vector<1x32xf32> to vector<256x32xf32>
    %339 = arith.mulf %337, %338 : vector<256x32xf32>
    %340 = vector.broadcast %3 : vector<1x32xf32> to vector<256x32xf32>
    %341 = arith.addf %339, %340 : vector<256x32xf32>
    %342 = arith.truncf %341 : vector<256x32xf32> to vector<256x32xbf16>
    %343 = vector.extract_strided_slice %342 {offsets = [0, 0], sizes = [128, 32], strides = [1, 1]} : vector<256x32xbf16> to vector<128x32xbf16>
    %cst_119 = arith.constant dense<0.000000e+00> : vector<128x32xf32>
    %344 = tpu.matmul %10, %343, %cst_119 {dimension_numbers = #tpu.dot_dimension_numbers<[1], [0], [0], [1], [0, 0, 1, 1], [], []>} : vector<128x128xbf16>, vector<128x32xbf16>, vector<128x32xf32> -> vector<128x32xf32>
    %345 = vector.extract_strided_slice %342 {offsets = [128, 0], sizes = [128, 32], strides = [1, 1]} : vector<256x32xbf16> to vector<128x32xbf16>
    %cst_120 = arith.constant dense<0.000000e+00> : vector<128x32xf32>
    %346 = tpu.matmul %10, %345, %cst_120 {dimension_numbers = #tpu.dot_dimension_numbers<[1], [0], [0], [1], [0, 0, 1, 1], [], []>} : vector<128x128xbf16>, vector<128x32xbf16>, vector<128x32xf32> -> vector<128x32xf32>
    %347 = tpu.concatenate %344, %346 in 0 : vector<128x32xf32>, vector<128x32xf32> -> vector<256x32xf32>
    %348 = arith.truncf %347 : vector<256x32xf32> to vector<256x32xbf16>
    %cst_121 = arith.constant dense<0.000000e+00> : vector<256x128xf32>
    %349 = tpu.matmul %348, %8, %cst_121 {dimension_numbers = #tpu.dot_dimension_numbers<[1], [0], [0], [1], [0, 0, 1, 1], [], []>} : vector<256x32xbf16>, vector<32x128xbf16>, vector<256x128xf32> -> vector<256x128xf32>
    %350 = arith.mulf %349, %349 : vector<256x128xf32>
    %351 = arith.mulf %349, %350 : vector<256x128xf32>
    %cst_122 = arith.constant 4.471500e-02 : f32
    %352 = vector.broadcast %cst_122 : f32 to vector<256x128xf32>
    %353 = arith.mulf %352, %351 : vector<256x128xf32>
    %354 = arith.addf %349, %353 : vector<256x128xf32>
    %cst_123 = arith.constant 0.797884583 : f32
    %355 = vector.broadcast %cst_123 : f32 to vector<256x128xf32>
    %356 = arith.mulf %355, %354 : vector<256x128xf32>
    %357 = math.tanh %356 : vector<256x128xf32>
    %cst_124 = arith.constant 1.000000e+00 : f32
    %358 = vector.broadcast %cst_124 : f32 to vector<256x128xf32>
    %359 = arith.addf %358, %357 : vector<256x128xf32>
    %cst_125 = arith.constant 5.000000e-01 : f32
    %360 = vector.broadcast %cst_125 : f32 to vector<256x128xf32>
    %361 = arith.mulf %360, %359 : vector<256x128xf32>
    %362 = arith.mulf %349, %361 : vector<256x128xf32>
    %363 = arith.truncf %362 : vector<256x128xf32> to vector<256x128xbf16>
    %cst_126 = arith.constant dense<0.000000e+00> : vector<256x32xf32>
    %364 = tpu.matmul %363, %9, %cst_126 {dimension_numbers = #tpu.dot_dimension_numbers<[1], [0], [0], [1], [0, 0, 1, 1], [], []>} : vector<256x128xbf16>, vector<128x32xbf16>, vector<256x32xf32> -> vector<256x32xf32>
    %365 = vector.extract_strided_slice %364 {offsets = [0, 0], sizes = [128, 32], strides = [1, 1]} : vector<256x32xf32> to vector<128x32xf32>
    %366 = vector.extract_strided_slice %365 {offsets = [0, 0], sizes = [32, 32], strides = [1, 1]} : vector<128x32xf32> to vector<32x32xf32>
    %367 = vector.extract_strided_slice %365 {offsets = [32, 0], sizes = [32, 32], strides = [1, 1]} : vector<128x32xf32> to vector<32x32xf32>
    %368 = vector.extract_strided_slice %365 {offsets = [64, 0], sizes = [32, 32], strides = [1, 1]} : vector<128x32xf32> to vector<32x32xf32>
    %369 = vector.extract_strided_slice %365 {offsets = [96, 0], sizes = [32, 32], strides = [1, 1]} : vector<128x32xf32> to vector<32x32xf32>
    %370 = tpu.concatenate %366, %367, %368, %369 in 1 : vector<32x32xf32>, vector<32x32xf32>, vector<32x32xf32>, vector<32x32xf32> -> vector<32x128xf32>
    %371 = arith.addf %264, %370 : vector<32x128xf32>
    %c0_127 = arith.constant 0 : index
    %c0_128 = arith.constant 0 : index
    %c0_129 = arith.constant 0 : index
    %372 = vector.load %arg6[%c0_127, %c0_128, %c0_129] : memref<2x32x128xf32, #tpu.memory_space<vmem>>, vector<1x32x128xf32>
    %373 = vector.shape_cast %372 : vector<1x32x128xf32> to vector<32x128xf32>
    %374 = vector.shape_cast %371 : vector<32x128xf32> to vector<1x32x128xf32>
    tpu.vector_store %arg6[%c0_127, %c0_128, %c0_129], %374 {strides = array<i32>} : memref<2x32x128xf32, #tpu.memory_space<vmem>>, vector<1x32x128xf32>,
    %375 = vector.extract_strided_slice %364 {offsets = [128, 0], sizes = [128, 32], strides = [1, 1]} : vector<256x32xf32> to vector<128x32xf32>
    %376 = vector.extract_strided_slice %375 {offsets = [0, 0], sizes = [32, 32], strides = [1, 1]} : vector<128x32xf32> to vector<32x32xf32>
    %377 = vector.extract_strided_slice %375 {offsets = [32, 0], sizes = [32, 32], strides = [1, 1]} : vector<128x32xf32> to vector<32x32xf32>
    %378 = vector.extract_strided_slice %375 {offsets = [64, 0], sizes = [32, 32], strides = [1, 1]} : vector<128x32xf32> to vector<32x32xf32>
    %379 = vector.extract_strided_slice %375 {offsets = [96, 0], sizes = [32, 32], strides = [1, 1]} : vector<128x32xf32> to vector<32x32xf32>
    %380 = tpu.concatenate %376, %377, %378, %379 in 1 : vector<32x32xf32>, vector<32x32xf32>, vector<32x32xf32>, vector<32x32xf32> -> vector<32x128xf32>
    %381 = arith.addf %318, %380 : vector<32x128xf32>
    %c1_130 = arith.constant 1 : index
    %c0_131 = arith.constant 0 : index
    %c0_132 = arith.constant 0 : index
    %382 = vector.load %arg6[%c1_130, %c0_131, %c0_132] : memref<2x32x128xf32, #tpu.memory_space<vmem>>, vector<1x32x128xf32>
    %383 = vector.shape_cast %382 : vector<1x32x128xf32> to vector<32x128xf32>
    %384 = vector.shape_cast %381 : vector<32x128xf32> to vector<1x32x128xf32>
    tpu.vector_store %arg6[%c1_130, %c0_131, %c0_132], %384 {strides = array<i32>} : memref<2x32x128xf32, #tpu.memory_space<vmem>>, vector<1x32x128xf32>,
    return
  }
  func.func @transform_0(%arg0: i32) -> (i32, i32, i32) {
    %c0_i32 = arith.constant 0 : i32
    %c0_i32_0 = arith.constant 0 : i32
    %c0_i32_1 = arith.constant 0 : i32
    return %arg0, %c0_i32, %c0_i32_0 : i32, i32, i32
  }
  func.func @transform_1(%arg0: i32) -> (i32, i32) {
    %c0_i32 = arith.constant 0 : i32
    %c0_i32_0 = arith.constant 0 : i32
    %c0_i32_1 = arith.constant 0 : i32
    return %c0_i32, %c0_i32_0 : i32, i32
  }
  func.func @transform_2(%arg0: i32) -> (i32, i32) {
    %c0_i32 = arith.constant 0 : i32
    %c0_i32_0 = arith.constant 0 : i32
    %c0_i32_1 = arith.constant 0 : i32
    return %c0_i32, %c0_i32_0 : i32, i32
  }
  func.func @transform_3(%arg0: i32) -> (i32, i32) {
    %c0_i32 = arith.constant 0 : i32
    %c0_i32_0 = arith.constant 0 : i32
    %c0_i32_1 = arith.constant 0 : i32
    return %c0_i32, %c0_i32_0 : i32, i32
  }
  func.func @transform_4(%arg0: i32) -> (i32, i32) {
    %c0_i32 = arith.constant 0 : i32
    %c0_i32_0 = arith.constant 0 : i32
    %c0_i32_1 = arith.constant 0 : i32
    return %c0_i32, %c0_i32_0 : i32, i32
  }
  func.func @transform_5(%arg0: i32) -> (i32, i32, i32) {
    %c0_i32 = arith.constant 0 : i32
    %c0_i32_0 = arith.constant 0 : i32
    %c0_i32_1 = arith.constant 0 : i32
    return %arg0, %c0_i32, %c0_i32_0 : i32, i32, i32
  }
}

</mosaic_0001>

<bundles_post_ra>
// kernel: datm_forward_pallas.1
= control target key start
LH: loop header
LB: loop body
LE: loop exit
PB: predicated region body
PF: predicated region fallthrough
CT: control target
= control target key end

     0   :  { %s10584_s18 = smov 0   ;;  %s14642_s0 = inlined_call_operand.vmem [shape: f32[4,32,128], index: 0, kind: input, shape index: {}]   ;;  %s14643_s1 = inlined_call_operand.vmem [shape: f32[12,32], index: 1, kind: input, shape index: {}]   ;;  %s14644_s2 = inlined_call_operand.vmem [shape: bf16[32,256], index: 2, kind: input, shape index: {}]   ;;  %s14645_s3 = inlined_call_operand.vmem [shape: bf16[128,32], index: 3, kind: input, shape index: {}]   ;;  %s14646_s4 = inlined_call_operand.vmem [shape: bf16[128,128], index: 4, kind: input, shape index: {}]   ;;  %s14647_s5 = inlined_call_operand.vmem [shape: f32[4,32,128], index: 5, kind: output, shape index: {}]  }
   0x1 LB: > { %s8040_s19 = sadd.s32 4294967295, %s10537_s18   ;;  %p8044_p0 = scmp.ge.s32.totalorder %s10537_s18, 1  ;;  %s10537_s18 = sphi %s10584_s18, %s15_s18  }
   0x2   : > { %p189_p1 = scmp.lt.s32.totalorder %s10537_s18, 3 }
   0x4   : > { %p190_p2 = pnand %p8044_p0, %p189_p1 }
   0x6   : > { %193 = sbr.rel (%p190_p2) target bundleno = 8246 (0x2036), region = 40 }
   0xd   : > { %s8045_s20 = sshll.u32 %s8040_s19, 1  ;;  %vm353_vm0 = vcmask 261120   ;;  %s10539_s23 = smov 32   ;;  %vm1056_vm1 = vcmask 523264   ;;  %vm1061_vm2 = vcmask 785408   ;;  %vm1564_vm3 = vcmask 64512  }
   0xe   : > { %p220_p3 = scmp.lt.s32.totalorder %s8045_s20, 3  ;;  %s10540_s25 = smov 64   ;;  %vm3669_vm4 = vcmask 130048   ;;  %vm3686_vm5 = vcmask 195584   ;;  %vm6139_vm6 = vcmask 254977   ;;  %vm6134_vm7 = vcmask 253952  }
   0xf   : > { %s10541_s26 = smov 96   ;;  %s10542_s6 = smov 88   ;;  %vm6149_vm8 = vcmask 257027   ;;  %vm6144_vm9 = vcmask 256002  }
  0x10   : > { %s15109_s20 = smov (!%p220_p3, %s8045_s20), 3  ;;  %s10543_s11 = smov 120  }
  0x11   : > { %s8199_s21 = sshll.u32 %s15109_s20, 5  ;;  %s10544_s12 = smov 56  }
  0x12   : > { %s10600_s24 = scalar_lea.vmem %s14642_s0, %s8199_s21  ;;  %s10545_s13 = smov 80  }
  0x13   : > { %v280_v0 = vld [vmem:[%s10600_s24] sm:$0xff]  ;;  %v281_v1 = vld [vmem:[%s10600_s24 + $0x8] sm:$0xff]  ;;  %v282_v2 = vld [vmem:[%s10600_s24 + $0x10] sm:$0xff]  ;;  %s10546_s14 = smov 112   ;;  %s10547_s15 = smov 48  }
  0x14   : > { %289 = vxpose.xlu0.b32.start [1/4] (short) %v280_v0, 128  ;;  %v283_v3 = vld [vmem:[%s10600_s24 + $0x18] sm:$0xff]  ;;  %s10548_s16 = smov 72   ;;  %s10549_s17 = smov 104  }
  0x15   : > { %s10550_s19 = smov 40   ;;  %s10551_s28 = smov 8  }
  0x16   : > { %s10552_s29 = smov 16   ;;  %s10553_s7 = smov 24  }
  0x18   : > { %290 = vxpose.xlu0.b32.cont [2/4] (short) %v281_v1, 128 }
  0x1c   : > { %291 = vxpose.xlu0.b32.cont [3/4] (short) %v282_v2, 128 }
  0x20   : > { %292 = vxpose.xlu0.b32.end [4/4] (short) %v283_v3, 128 }
  0x94   : > { %v10606_v4 = vpop.trf.xlu0 }
  0x95   : > { %14767 = vst [vmem:[#allocation3_spill] sm:$0xff] %v10606_v4  ;;  %v354_v5 = vsel %vm353_vm0, %v10606_v4, 0.0 }
  0x96   : > { %355 = vadd.xlane.f32.xlu1 %v354_v5 }
  0x98   : > { %v10610_v6 = vpop.trf.xlu0 }
  0x99   : > { %14768 = vst [vmem:[#allocation4_spill] sm:$0xff] %v10610_v6  ;;  %v357_v7 = vsel %vm353_vm0, %v10610_v6, 0.0 }
  0x9a   : > { %358 = vadd.xlane.f32.xlu1 %v357_v7 }
  0x9c   : > { %v10614_v8 = vpop.trf.xlu0 }
  0x9d   : > { %14769 = vst [vmem:[#allocation5_spill] sm:$0xff] %v10614_v8  ;;  %v360_v9 = vsel %vm353_vm0, %v10614_v8, 0.0 }
  0x9e   : > { %361 = vadd.xlane.f32.xlu1 %v360_v9 }
  0xa0   : > { %v10618_v10 = vpop.trf.xlu0 }
  0xa1   : > { %14770 = vst [vmem:[#allocation6_spill] sm:$0xff] %v10618_v10  ;;  %v363_v11 = vsel %vm353_vm0, %v10618_v10, 0.0 }
  0xa2   : > { %364 = vadd.xlane.f32.xlu1 %v363_v11 }
  0xa4   : > { %v10622_v12 = vpop.trf.xlu0 }
  0xa5   : > { %14771 = vst [vmem:[#allocation7_spill] sm:$0xff] %v10622_v12  ;;  %v366_v13 = vsel %vm353_vm0, %v10622_v12, 0.0 }
  0xa6   : > { %367 = vadd.xlane.f32.xlu0 %v366_v13 }
  0xa8   : > { %v10626_v14 = vpop.trf.xlu0 }
  0xa9   : > { %14772 = vst [vmem:[#allocation8_spill] sm:$0xff] %v10626_v14  ;;  %v369_v15 = vsel %vm353_vm0, %v10626_v14, 0.0 }
  0xaa   : > { %370 = vadd.xlane.f32.xlu1 %v369_v15 }
  0xac   : > { %v10630_v16 = vpop.trf.xlu0 }
  0xad   : > { %14773 = vst [vmem:[#allocation9_spill] sm:$0xff] %v10630_v16  ;;  %v372_v17 = vsel %vm353_vm0, %v10630_v16, 0.0 }
  0xae   : > { %373 = vadd.xlane.f32.xlu1 %v372_v17 }
  0xb0   : > { %v10634_v18 = vpop.trf.xlu0 }
  0xb1   : > { %14774 = vst [vmem:[#allocation10_spill] sm:$0xff] %v10634_v18  ;;  %v375_v19 = vsel %vm353_vm0, %v10634_v18, 0.0 }
  0xb2   : > { %376 = vadd.xlane.f32.xlu1 %v375_v19 }
  0xb4   : > { %v10638_v20 = vpop.trf.xlu0 }
  0xb5   : > { %14775 = vst [vmem:[#allocation11_spill] sm:$0xff] %v10638_v20  ;;  %v378_v21 = vsel %vm353_vm0, %v10638_v20, 0.0 }
  0xb6   : > { %379 = vadd.xlane.f32.xlu1 %v378_v21 }
  0xb8   : > { %v10642_v22 = vpop.trf.xlu0 }
  0xb9   : > { %14776 = vst [vmem:[#allocation12_spill] sm:$0xff] %v10642_v22  ;;  %v381_v23 = vsel %vm353_vm0, %v10642_v22, 0.0 }
  0xba   : > { %382 = vadd.xlane.f32.xlu1 %v381_v23 }
  0xbc   : > { %v10646_v24 = vpop.trf.xlu0 }
  0xbd   : > { %14777 = vst [vmem:[#allocation13_spill] sm:$0xff] %v10646_v24  ;;  %v384_v25 = vsel %vm353_vm0, %v10646_v24, 0.0 }
  0xbe   : > { %385 = vadd.xlane.f32.xlu1 %v384_v25 }
  0xc0   : > { %v10650_v26 = vpop.trf.xlu0 }
  0xc1   : > { %14778 = vst [vmem:[#allocation14_spill] sm:$0xff] %v10650_v26  ;;  %v387_v27 = vsel %vm353_vm0, %v10650_v26, 0.0 }
  0xc2   : > { %388 = vadd.xlane.f32.xlu1 %v387_v27 }
  0xc4   : > { %v10654_v28 = vpop.trf.xlu0 }
  0xc5   : > { %14779 = vst [vmem:[#allocation15_spill] sm:$0xff] %v10654_v28  ;;  %v390_v29 = vsel %vm353_vm0, %v10654_v28, 0.0 }
  0xc6   : > { %391 = vadd.xlane.f32.xlu1 %v390_v29 }
  0xc8   : > { %v10658_v30 = vpop.trf.xlu0 }
  0xc9   : > { %14780 = vst [vmem:[#allocation16_spill] sm:$0xff] %v10658_v30  ;;  %v393_v31 = vsel %vm353_vm0, %v10658_v30, 0.0 }
  0xca   : > { %394 = vadd.xlane.f32.xlu1 %v393_v31 }
  0xcc   : > { %v10662_v32 = vpop.trf.xlu0 }
  0xcd   : > { %14781 = vst [vmem:[#allocation17_spill] sm:$0xff] %v10662_v32  ;;  %v396_v33 = vsel %vm353_vm0, %v10662_v32, 0.0 }
  0xce   : > { %397 = vadd.xlane.f32.xlu1 %v396_v33 }
  0xd0   : > { %v10666_v34 = vpop.trf.xlu0 }
  0xd1   : > { %14782 = vst [vmem:[#allocation18_spill] sm:$0xff] %v10666_v34  ;;  %v399_v35 = vsel %vm353_vm0, %v10666_v34, 0.0 }
  0xd2   : > { %400 = vadd.xlane.f32.xlu1 %v399_v35 }
 0x123   : > { %v356_v36 = vpop.xlane.xlu1 %355 }
 0x124   : > { %v451_v37 = vmul.f32 0.03125, %v356_v36 }
 0x126   : > { %v10671_v38 = vsub.f32 %v10606_v4, %v451_v37 }
 0x127   : > { %v359_v39 = vpop.xlane.xlu1 %358 }
 0x128   : > { %v452_v40 = vmul.f32 0.03125, %v359_v39  ;;  %v515_v41 = vmul.f32 %v10671_v38, %v10671_v38 }
 0x12a   : > { %v10676_v42 = vsub.f32 %v10610_v6, %v452_v40  ;;  %v547_v43 = vsel %vm353_vm0, %v515_v41, 0.0 }
 0x12b   : > { %v362_v44 = vpop.xlane.xlu1 %361  ;;  %548 = vadd.xlane.f32.xlu1 %v547_v43 }
 0x12c   : > { %v453_v45 = vmul.f32 0.03125, %v362_v44  ;;  %v516_v46 = vmul.f32 %v10676_v42, %v10676_v42 }
 0x12e   : > { %v10682_v47 = vsub.f32 %v10614_v8, %v453_v45  ;;  %v550_v48 = vsel %vm353_vm0, %v516_v46, 0.0 }
 0x12f   : > { %v365_v49 = vpop.xlane.xlu1 %364  ;;  %551 = vadd.xlane.f32.xlu1 %v550_v48 }
 0x130   : > { %v454_v50 = vmul.f32 0.03125, %v365_v49  ;;  %v517_v51 = vmul.f32 %v10682_v47, %v10682_v47 }
 0x132   : > { %v10688_v52 = vsub.f32 %v10618_v10, %v454_v50  ;;  %v553_v53 = vsel %vm353_vm0, %v517_v51, 0.0 }
 0x133   : > { %554 = vadd.xlane.f32.xlu1 %v553_v53  ;;  %v368_v54 = vpop.xlane.xlu0 %367 }
 0x134   : > { %v455_v55 = vmul.f32 0.03125, %v368_v54  ;;  %v518_v56 = vmul.f32 %v10688_v52, %v10688_v52 }
 0x136   : > { %v10694_v57 = vsub.f32 %v10622_v12, %v455_v55  ;;  %v556_v58 = vsel %vm353_vm0, %v518_v56, 0.0 }
 0x137   : > { %v371_v59 = vpop.xlane.xlu1 %370  ;;  %557 = vadd.xlane.f32.xlu1 %v556_v58 }
 0x138   : > { %v456_v60 = vmul.f32 0.03125, %v371_v59  ;;  %v519_v61 = vmul.f32 %v10694_v57, %v10694_v57 }
 0x13a   : > { %v10700_v62 = vsub.f32 %v10626_v14, %v456_v60  ;;  %v559_v63 = vsel %vm353_vm0, %v519_v61, 0.0 }
 0x13b   : > { %v374_v0 = vpop.xlane.xlu1 %373  ;;  %560 = vadd.xlane.f32.xlu1 %v559_v63 }
 0x13c   : > { %v457_v1 = vmul.f32 0.03125, %v374_v0  ;;  %v520_v2 = vmul.f32 %v10700_v62, %v10700_v62 }
 0x13e   : > { %v10706_v3 = vsub.f32 %v10630_v16, %v457_v1  ;;  %v562_v5 = vsel %vm353_vm0, %v520_v2, 0.0 }
 0x13f   : > { %v377_v7 = vpop.xlane.xlu1 %376  ;;  %563 = vadd.xlane.f32.xlu1 %v562_v5 }
 0x140   : > { %v458_v9 = vmul.f32 0.03125, %v377_v7  ;;  %v521_v11 = vmul.f32 %v10706_v3, %v10706_v3 }
 0x142   : > { %v10712_v13 = vsub.f32 %v10634_v18, %v458_v9  ;;  %v565_v15 = vsel %vm353_vm0, %v521_v11, 0.0 }
 0x143   : > { %v380_v17 = vpop.xlane.xlu1 %379  ;;  %566 = vadd.xlane.f32.xlu1 %v565_v15 }
 0x144   : > { %v459_v19 = vmul.f32 0.03125, %v380_v17  ;;  %v522_v21 = vmul.f32 %v10712_v13, %v10712_v13 }
 0x146   : > { %v10718_v23 = vsub.f32 %v10638_v20, %v459_v19  ;;  %v568_v25 = vsel %vm353_vm0, %v522_v21, 0.0  ;;  %v9778_v21 = vld [vmem:[%s14646_s4] sm:$0xff]  }
 0x147   : > { %v383_v27 = vpop.xlane.xlu1 %382  ;;  %569 = vadd.xlane.f32.xlu1 %v568_v25  ;;  %8615 = vmatprep.mubr.bf16.mxu0 %v9778_v21 }
 0x148   : > { %v460_v29 = vmul.f32 0.03125, %v383_v27  ;;  %v523_v31 = vmul.f32 %v10718_v23, %v10718_v23  ;;  %8647 = vmatprep.mubr.bf16.mxu1 %v9778_v21 }
 0x14a   : > { %v10724_v33 = vsub.f32 %v10642_v22, %v460_v29  ;;  %v571_v35 = vsel %vm353_vm0, %v523_v31, 0.0 }
 0x14b   : > { %v386_v36 = vpop.xlane.xlu1 %385  ;;  %572 = vadd.xlane.f32.xlu1 %v571_v35 }
 0x14c   : > { %v461_v37 = vmul.f32 0.03125, %v386_v36  ;;  %v524_v39 = vmul.f32 %v10724_v33, %v10724_v33 }
 0x14e   : > { %v10730_v40 = vsub.f32 %v10646_v24, %v461_v37  ;;  %v574_v41 = vsel %vm353_vm0, %v524_v39, 0.0 }
 0x14f   : > { %v389_v43 = vpop.xlane.xlu1 %388  ;;  %575 = vadd.xlane.f32.xlu1 %v574_v41 }
 0x150   : > { %v462_v44 = vmul.f32 0.03125, %v389_v43  ;;  %v525_v45 = vmul.f32 %v10730_v40, %v10730_v40 }
 0x152   : > { %v10736_v46 = vsub.f32 %v10650_v26, %v462_v44  ;;  %v577_v48 = vsel %vm353_vm0, %v525_v45, 0.0 }
 0x153   : > { %v392_v49 = vpop.xlane.xlu1 %391  ;;  %578 = vadd.xlane.f32.xlu1 %v577_v48 }
 0x154   : > { %v463_v50 = vmul.f32 0.03125, %v392_v49  ;;  %v526_v51 = vmul.f32 %v10736_v46, %v10736_v46 }
 0x156   : > { %v10742_v53 = vsub.f32 %v10654_v28, %v463_v50  ;;  %v580_v54 = vsel %vm353_vm0, %v526_v51, 0.0 }
 0x157   : > { %v395_v55 = vpop.xlane.xlu1 %394  ;;  %581 = vadd.xlane.f32.xlu1 %v580_v54  ;;  %v10773_v54 = vld [vmem:[%s14643_s1] ss:$0 sm:$0xff] }
 0x158   : > { %v464_v56 = vmul.f32 0.03125, %v395_v55  ;;  %v527_v58 = vmul.f32 %v10742_v53, %v10742_v53 }
 0x15a   : > { %v10748_v59 = vsub.f32 %v10658_v30, %v464_v56  ;;  %v583_v60 = vsel %vm353_vm0, %v527_v58, 0.0 }
 0x15b   : > { %v398_v61 = vpop.xlane.xlu1 %397  ;;  %584 = vadd.xlane.f32.xlu1 %v583_v60 }
 0x15c   : > { %v465_v63 = vmul.f32 0.03125, %v398_v61  ;;  %v528_v0 = vmul.f32 %v10748_v59, %v10748_v59 }
 0x15e   : > { %v10754_v1 = vsub.f32 %v10662_v32, %v465_v63  ;;  %v586_v2 = vsel %vm353_vm0, %v528_v0, 0.0 }
 0x15f   : > { %587 = vadd.xlane.f32.xlu0 %v586_v2  ;;  %v401_v5 = vpop.xlane.xlu1 %400 }
 0x160   : > { %v466_v7 = vmul.f32 0.03125, %v401_v5  ;;  %v529_v9 = vmul.f32 %v10754_v1, %v10754_v1 }
 0x162   : > { %v10760_v11 = vsub.f32 %v10666_v34, %v466_v7  ;;  %v589_v15 = vsel %vm353_vm0, %v529_v9, 0.0 }
 0x163   : > { %590 = vadd.xlane.f32.xlu1 %v589_v15 }
 0x164   : > { %v530_v17 = vmul.f32 %v10760_v11, %v10760_v11 }
 0x166   : > { %v592_v19 = vsel %vm353_vm0, %v530_v17, 0.0 }
 0x167   : > { %593 = vadd.xlane.f32.xlu0 %v592_v19 }
 0x1b8   : > { %v549_v25 = vpop.xlane.xlu1 %548 }
 0x1b9   : > { %v643_v27 = vmul.f32 0.03125, %v549_v25 }
 0x1bb   : > { %v675_v29 = vadd.f32 1e-05, %v643_v27 }
 0x1bc   : > { %v552_v31 = vpop.xlane.xlu1 %551 }
 0x1bd   : > { %9798 = vrsqrt.f32 %v675_v29  ;;  %v644_v35 = vmul.f32 0.03125, %v552_v31 }
 0x1bf   : > { %v676_v36 = vadd.f32 1e-05, %v644_v35 }
 0x1c0   : > { %v555_v37 = vpop.xlane.xlu1 %554 }
 0x1c1   : > { %9800 = vrsqrt.f32 %v676_v36  ;;  %v645_v39 = vmul.f32 0.03125, %v555_v37 }
 0x1c3   : > { %v677_v41 = vadd.f32 1e-05, %v645_v39 }
 0x1c4   : > { %v558_v43 = vpop.xlane.xlu1 %557 }
 0x1c5   : > { %9802 = vrsqrt.f32 %v677_v41  ;;  %v646_v44 = vmul.f32 0.03125, %v558_v43 }
 0x1c7   : > { %v9799_v45 = vpop.eup %9798  ;;  %v678_v48 = vadd.f32 1e-05, %v646_v44 }
 0x1c8   : > { %v561_v49 = vpop.xlane.xlu1 %560  ;;  %v739_v50 = vmul.f32 %v9799_v45, %v10671_v38  ;;  %v10780_v38 = vld [vmem:[%s14643_s1 + $0x1] ss:$0 sm:$0xff] }
 0x1c9   : > { %9804 = vrsqrt.f32 %v678_v48  ;;  %v647_v51 = vmul.f32 0.03125, %v561_v49 }
 0x1ca   : > { %v775_v61 = vmul.f32 %v10773_v54, %v739_v50 }
 0x1cb   : > { %v9801_v55 = vpop.eup %9800  ;;  %v679_v56 = vadd.f32 1e-05, %v647_v51 }
 0x1cc   : > { %v564_v58 = vpop.xlane.xlu1 %563  ;;  %v740_v60 = vmul.f32 %v9801_v55, %v10676_v42  ;;  %v811_v9 = vadd.f32 %v10780_v38, %v775_v61 }
 0x1cd   : > { %9806 = vrsqrt.f32 %v679_v56  ;;  %v648_v63 = vmul.f32 0.03125, %v564_v58 }
 0x1ce   : > { %v776_v0 = vmul.f32 %v10773_v54, %v740_v60 }
 0x1cf   : > { %v9803_v2 = vpop.eup %9802  ;;  %v680_v5 = vadd.f32 1e-05, %v648_v63 }
 0x1d0   : > { %v567_v7 = vpop.xlane.xlu1 %566  ;;  %v812_v15 = vadd.f32 %v10780_v38, %v776_v0  ;;  %v741_v42 = vmul.f32 %v9803_v2, %v10682_v47 }
 0x1d1   : > { %9808 = vrsqrt.f32 %v680_v5  ;;  %v649_v17 = vmul.f32 0.03125, %v567_v7 }
 0x1d2   : > { %v843_v19 = vpack.c.bf16 %v812_v15, %v811_v9  ;;  %v777_v31 = vmul.f32 %v10773_v54, %v741_v42 }
 0x1d3   : > { %v9805_v21 = vpop.eup %9804  ;;  %v681_v25 = vadd.f32 1e-05, %v649_v17 }
 0x1d4   : > { %8599 = vmatprep.subr.bf16.mxu0 %v843_v19  ;;  %v570_v27 = vpop.xlane.xlu1 %569  ;;  %v742_v29 = vmul.f32 %v9805_v21, %v10688_v52  ;;  %v813_v47 = vadd.f32 %v10780_v38, %v777_v31 }
 0x1d5   : > { %9810 = vrsqrt.f32 %v681_v25  ;;  %v650_v35 = vmul.f32 0.03125, %v570_v27  ;;  %8600 = vmatpush3.bf16.msra.mxu0 %v843_v19 }
 0x1d6   : > { %v778_v36 = vmul.f32 %v10773_v54, %v742_v29 }
 0x1d7   : > { %v9807_v37 = vpop.eup %9806  ;;  %v682_v39 = vadd.f32 1e-05, %v650_v35 }
 0x1d8   : > { %v573_v41 = vpop.xlane.xlu1 %572  ;;  %v814_v43 = vadd.f32 %v10780_v38, %v778_v36  ;;  %v743_v44 = vmul.f32 %v9807_v37, %v10694_v57 }
 0x1d9   : > { %9812 = vrsqrt.f32 %v682_v39  ;;  %v651_v45 = vmul.f32 0.03125, %v573_v41 }
 0x1da   : > { %v844_v48 = vpack.c.bf16 %v814_v43, %v813_v47  ;;  %v779_v55 = vmul.f32 %v10773_v54, %v743_v44 }
 0x1db   : > { %v9809_v52 = vpop.eup %9808  ;;  %v683_v49 = vadd.f32 1e-05, %v651_v45 }
 0x1dc   : > { %8601 = vmatprep.subr.bf16.mxu0 %v844_v48  ;;  %v576_v50 = vpop.xlane.xlu1 %575  ;;  %v744_v51 = vmul.f32 %v9809_v52, %v10700_v62  ;;  %v815_v57 = vadd.f32 %v10780_v38, %v779_v55 }
 0x1dd   : > { %9814 = vrsqrt.f32 %v683_v49  ;;  %v652_v56 = vmul.f32 0.03125, %v576_v50  ;;  %8602 = vmatpush3.bf16.msra.mxu0 %v844_v48 }
 0x1de   : > { %v780_v58 = vmul.f32 %v10773_v54, %v744_v51 }
 0x1df   : > { %v9811_v60 = vpop.eup %9810  ;;  %v684_v61 = vadd.f32 1e-05, %v652_v56 }
 0x1e0   : > { %v579_v63 = vpop.xlane.xlu1 %578  ;;  %v816_v0 = vadd.f32 %v10780_v38, %v780_v58  ;;  %v745_v2 = vmul.f32 %v9811_v60, %v10706_v3 }
 0x1e1   : > { %9816 = vrsqrt.f32 %v684_v61  ;;  %v653_v5 = vmul.f32 0.03125, %v579_v63 }
 0x1e2   : > { %v845_v7 = vpack.c.bf16 %v816_v0, %v815_v57  ;;  %v781_v17 = vmul.f32 %v10773_v54, %v745_v2 }
 0x1e3   : > { %v9813_v62 = vpop.eup %9812  ;;  %v685_v9 = vadd.f32 1e-05, %v653_v5 }
 0x1e4   : > { %8603 = vmatprep.subr.bf16.mxu0 %v845_v7  ;;  %v582_v15 = vpop.xlane.xlu1 %581  ;;  %v746_v42 = vmul.f32 %v9813_v62, %v10712_v13  ;;  %v817_v3 = vadd.f32 %v10780_v38, %v781_v17 }
 0x1e5   : > { %9818 = vrsqrt.f32 %v685_v9  ;;  %v654_v19 = vmul.f32 0.03125, %v582_v15  ;;  %8604 = vmatpush3.bf16.msra.mxu0 %v845_v7 }
 0x1e6   : > { %v782_v21 = vmul.f32 %v10773_v54, %v746_v42 }
 0x1e7   : > { %v9815_v25 = vpop.eup %9814  ;;  %v686_v27 = vadd.f32 1e-05, %v654_v19 }
 0x1e8   : > { %v585_v29 = vpop.xlane.xlu1 %584  ;;  %v818_v31 = vadd.f32 %v10780_v38, %v782_v21  ;;  %v747_v35 = vmul.f32 %v9815_v25, %v10718_v23 }
 0x1e9   : > { %9820 = vrsqrt.f32 %v686_v27  ;;  %v655_v36 = vmul.f32 0.03125, %v585_v29 }
 0x1ea   : > { %v846_v37 = vpack.c.bf16 %v818_v31, %v817_v3  ;;  %v783_v43 = vmul.f32 %v10773_v54, %v747_v35 }
 0x1eb   : > { %v9817_v13 = vpop.eup %9816  ;;  %v687_v39 = vadd.f32 1e-05, %v655_v36 }
 0x1ec   : > { %8605 = vmatprep.subr.bf16.mxu0 %v846_v37  ;;  %v588_v41 = vpop.xlane.xlu0 %587  ;;  %v748_v47 = vmul.f32 %v9817_v13, %v10724_v33  ;;  %v819_v23 = vadd.f32 %v10780_v38, %v783_v43  ;;  %v10842_v13 = vld [vmem:[%s14646_s4 + $0x18] sm:$0xff]  }
 0x1ed   : > { %9822 = vrsqrt.f32 %v687_v39  ;;  %v656_v44 = vmul.f32 0.03125, %v588_v41  ;;  %8606 = vmatpush3.bf16.msra.mxu0 %v846_v37  ;;  %v10847_v39 = vld [vmem:[%s14646_s4 + $0x20] sm:$0xff]   ;;  %v10854_v41 = vld [vmem:[%s14646_s4 + $0x28] sm:$0xff]   ;;  %v10866_v43 = vld [vmem:[%s14646_s4 + $0x38] sm:$0xff]  }
 0x1ee   : > { %v784_v45 = vmul.f32 %v10773_v54, %v748_v47  ;;  %v10859_v47 = vld [vmem:[%s14646_s4 + $0x30] sm:$0xff]  }
 0x1ef   : > { %v9819_v48 = vpop.eup %9818  ;;  %v688_v52 = vadd.f32 1e-05, %v656_v44 }
 0x1f0   : > { %v591_v49 = vpop.xlane.xlu1 %590  ;;  %v820_v50 = vadd.f32 %v10780_v38, %v784_v45  ;;  %v749_v51 = vmul.f32 %v9819_v48, %v10730_v40 }
 0x1f1   : > { %9824 = vrsqrt.f32 %v688_v52  ;;  %v657_v55 = vmul.f32 0.03125, %v591_v49 }
 0x1f2   : > { %v847_v56 = vpack.c.bf16 %v820_v50, %v819_v23  ;;  %v785_v63 = vmul.f32 %v10773_v54, %v749_v51 }
 0x1f3   : > { %v9821_v33 = vpop.eup %9820  ;;  %v689_v58 = vadd.f32 1e-05, %v657_v55 }
 0x1f4   : > { %8607 = vmatprep.subr.bf16.mxu0 %v847_v56  ;;  %v594_v60 = vpop.xlane.xlu0 %593  ;;  %v750_v61 = vmul.f32 %v9821_v33, %v10736_v46  ;;  %v821_v40 = vadd.f32 %v10780_v38, %v785_v63 }
 0x1f5   : > { %9826 = vrsqrt.f32 %v689_v58  ;;  %v658_v57 = vmul.f32 0.03125, %v594_v60  ;;  %8608 = vmatpush3.bf16.msra.mxu0 %v847_v56 }
 0x1f6   : > { %v786_v0 = vmul.f32 %v10773_v54, %v750_v61 }
 0x1f7   : > { %v9823_v2 = vpop.eup %9822  ;;  %v690_v5 = vadd.f32 1e-05, %v658_v57 }
 0x1f8   : > { %v822_v7 = vadd.f32 %v10780_v38, %v786_v0  ;;  %v751_v62 = vmul.f32 %v9823_v2, %v10742_v53 }
 0x1f9   : > { %9828 = vrsqrt.f32 %v690_v5 }
 0x1fa   : > { %v848_v9 = vpack.c.bf16 %v822_v7, %v821_v40  ;;  %v787_v42 = vmul.f32 %v10773_v54, %v751_v62  ;;  %v8051_v62 = vld [vmem:[%s10600_s24 + $0x20] sm:$0xff] }
 0x1fb   : > { %v9825_v15 = vpop.eup %9824 }
 0x1fc   : > { %8609 = vmatprep.subr.bf16.mxu0 %v848_v9  ;;  %v752_v46 = vmul.f32 %v9825_v15, %v10748_v59  ;;  %v823_v21 = vadd.f32 %v10780_v38, %v787_v42  ;;  %v8053_v15 = vld [vmem:[%s10600_s24 + $0x30] sm:$0xff] }
 0x1fd   : > { %8610 = vmatpush3.bf16.msra.mxu0 %v848_v9  ;;  %v8052_v9 = vld [vmem:[%s10600_s24 + $0x28] sm:$0xff] }
 0x1fe   : > { %v788_v17 = vmul.f32 %v10773_v54, %v752_v46  ;;  %v8054_v46 = vld [vmem:[%s10600_s24 + $0x38] sm:$0xff] }
 0x1ff   : > { %v9827_v19 = vpop.eup %9826 }
 0x200   : > { %v824_v25 = vadd.f32 %v10780_v38, %v788_v17  ;;  %v753_v27 = vmul.f32 %v9827_v19, %v10754_v1  ;;  %v10830_v1 = vld [vmem:[%s14646_s4 + $0x8] sm:$0xff]  }
 0x202   : > { %v849_v29 = vpack.c.bf16 %v824_v25, %v823_v21  ;;  %v789_v31 = vmul.f32 %v10773_v54, %v753_v27 }
 0x203   : > { %v9829_v53 = vpop.eup %9828 }
 0x204   : > { %8611 = vmatprep.subr.bf16.mxu0 %v849_v29  ;;  %v754_v3 = vmul.f32 %v9829_v53, %v10760_v11  ;;  %v825_v35 = vadd.f32 %v10780_v38, %v789_v31  ;;  %v10835_v11 = vld [vmem:[%s14646_s4 + $0x10] sm:$0xff]  }
 0x205   : > { %8612 = vmatpush3.bf16.msra.mxu0 %v849_v29 }
 0x206   : > { %v790_v59 = vmul.f32 %v10773_v54, %v754_v3 }
 0x208   : > { %v826_v36 = vadd.f32 %v10780_v38, %v790_v59 }
 0x20a   : > { %v850_v37 = vpack.c.bf16 %v826_v36, %v825_v35 }
 0x20c   : > { %8613 = vmatprep.subr.bf16.mxu0 %v850_v37 }
 0x20d   : > { %8614 = vmatpush3.bf16.msra.mxu0 %v850_v37 }
 0x210   : > { %8616 = vmatmul.mubr.bf16.vlgmr.msra.gmra.mrb[0].mxu0 %v10830_v1 }
 0x211   : > { %8619 = vmatprep.mubr.bf16.mxu0 %v10835_v11 }
 0x218   : > { %8620 = vmatmul.mubr.bf16.gmra.mrb[4].mxu0 %v10842_v13 }
 0x219   : > { %8623 = vmatprep.mubr.bf16.mxu0 %v10847_v39 }
 0x220   : > { %8624 = vmatmul.mubr.bf16.gmra.mrb[8].mxu0 %v10854_v41 }
 0x221   : > { %8627 = vmatprep.mubr.bf16.mxu0 %v10859_v47 }
 0x228   : > { %8628 = vmatmul.mubr.bf16.gmra.mrb[12].mxu0 %v10866_v43 }
 0x2e3   : > { %v10869_v44 = vpop.f32.mrb[0].mxu0 }
 0x2e4   : > { %v941_v45 = vpop.f32.mrb[1].mxu0 }
 0x2e5   : > { %v10871_v48 = vpop.f32.mrb[2].mxu0 }
 0x2e6   : > { %v944_v52 = vpop.f32.mrb[3].mxu0 }
 0x2eb   : > { %v8621_v49 = vpop.f32.mrb[4].mxu0 }
 0x2ec   : > { %v957_v23 = vpop.f32.mrb[5].mxu0 }
 0x2ed   : > { %v8622_v50 = vpop.f32.mrb[6].mxu0 }
 0x2ee   : > { %v9483_v51 = vpack.i.bf16 %v8622_v50, %v8621_v49  ;;  %v960_v55 = vpop.f32.mrb[7].mxu0 }
 0x2ef   : > { %v9488_v56 = vpack.i.bf16 %v960_v55, %v957_v23 }
 0x2f0   : > { %9484 = vrot.lane.b32.xlu1 %v9483_v51, %s10539_s23 }
 0x2f3   : > { %v8625_v33 = vpop.f32.mrb[8].mxu0 }
 0x2f4   : > { %9489 = vrot.lane.b32.xlu1 %v9488_v56, %s10539_s23  ;;  %v973_v58 = vpop.f32.mrb[9].mxu0 }
 0x2f5   : > { %v8626_v60 = vpop.f32.mrb[10].mxu0 }
 0x2f6   : > { %v9498_v61 = vpack.i.bf16 %v8626_v60, %v8625_v33  ;;  %v976_v63 = vpop.f32.mrb[11].mxu0  ;;  %v9786_v60 = vld [vmem:[%s14644_s2] ss:$8 sps:$4 sm:$0xff]  }
 0x2f7   : > { %v9493_v57 = vpack.i.bf16 %v976_v63, %v973_v58  ;;  %8663 = vmatprep.subr.bf16.mxu0 %v9786_v60 }
 0x2f8   : > { %8664 = vmatpush3.bf16.msra.mxu0 %v9786_v60 }
 0x2f9   : > { %9494 = vrot.lane.b32.xlu0 %v9493_v57, %s10540_s25 }
 0x2fb   : > { %v8629_v0 = vpop.f32.mrb[12].mxu0 }
 0x2fc   : > { %v989_v2 = vpop.f32.mrb[13].mxu0 }
 0x2fd   : > { %9499 = vrot.lane.b32.xlu0 %v9498_v61, %s10540_s25  ;;  %v8630_v5 = vpop.f32.mrb[14].mxu0 }
 0x2fe   : > { %v992_v40 = vpop.f32.mrb[15].mxu0 }
 0x2ff   : > { %v9503_v7 = vpack.i.bf16 %v992_v40, %v989_v2 }
 0x301   : > { %1046 = vrot.lane.b32.xlu0 %v8630_v5, %s10541_s26  ;;  %9504 = vrot.lane.b32.xlu1 %v9503_v7, %s10541_s26 }
 0x305   : > { %1044 = vrot.lane.b32.xlu1 %v8629_v0, %s10541_s26 }
 0x31f   : > { %321 = vxpose.xlu0.b32.start [1/4] (short) %v8051_v62, 128 }
 0x323   : > { %322 = vxpose.xlu0.b32.cont [2/4] (short) %v8052_v9, 128 }
 0x327   : > { %323 = vxpose.xlu0.b32.cont [3/4] (short) %v8053_v15, 128 }
 0x32b   : > { %324 = vxpose.xlu0.b32.end [4/4] (short) %v8054_v46, 128 }
 0x362   : > { %v9485_v42 = vpop.permute.xlu1 %9484 }
 0x363   : > { %v9486_v49 = vunpack.i.l.bf16 %v9485_v42  ;;  %v9487_v55 = vunpack.i.h.bf16 %v9485_v42 }
 0x365   : > { %v1054_v58 = vsel %vm353_vm0, %v10869_v44, %v9486_v49  ;;  %v1055_v63 = vsel %vm353_vm0, %v10871_v48, %v9487_v55  ;;  %v9787_v44 = vld [vmem:[%s14644_s2 + $0x10] ss:$8 sps:$4 sm:$0xff]  }
 0x366   : > { %v9490_v17 = vpop.permute.xlu1 %9489  ;;  %8665 = vmatprep.subr.bf16.mxu0 %v9787_v44 }
 0x367   : > { %v9491_v21 = vunpack.i.l.bf16 %v9490_v17  ;;  %v9492_v29 = vunpack.i.h.bf16 %v9490_v17  ;;  %8666 = vmatpush3.bf16.msra.mxu0 %v9787_v44 }
 0x369   : > { %v1052_v3 = vsel %vm353_vm0, %v941_v45, %v9491_v21  ;;  %v1053_v23 = vsel %vm353_vm0, %v944_v52, %v9492_v29 }
 0x36b   : > { %v9495_v19 = vpop.permute.xlu0 %9494 }
 0x36c   : > { %v9496_v25 = vunpack.i.l.bf16 %v9495_v19  ;;  %v9497_v31 = vunpack.i.h.bf16 %v9495_v19 }
 0x36e   : > { %v1057_v59 = vsel %vm1056_vm1, %v1052_v3, %v9496_v25  ;;  %v1058_v51 = vsel %vm1056_vm1, %v1053_v23, %v9497_v31 }
 0x36f   : > { %v9500_v35 = vpop.permute.xlu0 %9499 }
 0x370   : > { %v9501_v50 = vunpack.i.l.bf16 %v9500_v35  ;;  %v9502_v33 = vunpack.i.h.bf16 %v9500_v35 }
 0x372   : > { %v1059_v61 = vsel %vm1056_vm1, %v1054_v58, %v9501_v50  ;;  %v1060_v0 = vsel %vm1056_vm1, %v1055_v63, %v9502_v33 }
 0x373   : > { %v9505_v27 = vpop.permute.xlu1 %9504  ;;  %v1047_v57 = vpop.permute.xlu0 %1046 }
 0x374   : > { %v9506_v53 = vunpack.i.l.bf16 %v9505_v27  ;;  %v9507_v36 = vunpack.i.h.bf16 %v9505_v27  ;;  %v1065_v2 = vsel %vm1061_vm2, %v1060_v0, %v1047_v57 }
 0x376   : > { %v1062_v37 = vsel %vm1061_vm2, %v1057_v59, %v9506_v53  ;;  %v1063_v56 = vsel %vm1061_vm2, %v1058_v51, %v9507_v36 }
 0x377   : > { %1066 = vxpose.xlu1.b32.start [1/4] (short) %v1062_v37, 128  ;;  %v1045_v45 = vpop.permute.xlu1 %1044 }
 0x378   : > { %v1064_v52 = vsel %vm1061_vm2, %v1059_v61, %v1045_v45 }
 0x37b   : > { %1067 = vxpose.xlu1.b32.cont [2/4] (short) %v1063_v56, 128 }
 0x37f   : > { %1068 = vxpose.xlu1.b32.cont [3/4] (short) %v1064_v52, 128 }
 0x383   : > { %1069 = vxpose.xlu1.b32.end [4/4] (short) %v1065_v2, 128 }
 0x39f   : > { %v10904_v5 = vpop.trf.xlu0 }
 0x3a0   : > { %14783 = vst [vmem:[#allocation19_spill] sm:$0xff] %v10904_v5  ;;  %v402_v48 = vsel %vm353_vm0, %v10904_v5, 0.0 }
 0x3a1   : > { %403 = vadd.xlane.f32.xlu0 %v402_v48 }
 0x3a3   : > { %v10908_v40 = vpop.trf.xlu0 }
 0x3a4   : > { %14784 = vst [vmem:[#allocation20_spill] sm:$0xff] %v10908_v40  ;;  %v405_v23 = vsel %vm353_vm0, %v10908_v40, 0.0 }
 0x3a7   : > { %v10910_v7 = vpop.trf.xlu0 }
 0x3a8   : > { %14785 = vst [vmem:[#allocation21_spill] sm:$0xff] %v10910_v7  ;;  %v408_v62 = vsel %vm353_vm0, %v10910_v7, 0.0 }
 0x3a9   : > { %409 = vadd.xlane.f32.xlu0 %v408_v62 }
 0x3ab   : > { %v10914_v9 = vpop.trf.xlu0 }
 0x3ac   : > { %14786 = vst [vmem:[#allocation22_spill] sm:$0xff] %v10914_v9  ;;  %v411_v50 = vsel %vm353_vm0, %v10914_v9, 0.0 }
 0x3af   : > { %v10916_v15 = vpop.trf.xlu0 }
 0x3b0   : > { %14787 = vst [vmem:[#allocation23_spill] sm:$0xff] %v10916_v15  ;;  %v414_v46 = vsel %vm353_vm0, %v10916_v15, 0.0 }
 0x3b1   : > { %415 = vadd.xlane.f32.xlu0 %v414_v46 }
 0x3b3   : > { %v10920_v42 = vpop.trf.xlu0 }
 0x3b4   : > { %14788 = vst [vmem:[#allocation24_spill] sm:$0xff] %v10920_v42  ;;  %v417_v51 = vsel %vm353_vm0, %v10920_v42, 0.0 }
 0x3b7   : > { %v10922_v17 = vpop.trf.xlu0 }
 0x3b8   : > { %14789 = vst [vmem:[#allocation25_spill] sm:$0xff] %v10922_v17  ;;  %v420_v19 = vsel %vm353_vm0, %v10922_v17, 0.0 }
 0x3b9   : > { %421 = vadd.xlane.f32.xlu0 %v420_v19 }
 0x3bb   : > { %v10926_v21 = vpop.trf.xlu0 }
 0x3bc   : > { %14790 = vst [vmem:[#allocation26_spill] sm:$0xff] %v10926_v21  ;;  %v423_v55 = vsel %vm353_vm0, %v10926_v21, 0.0 }
 0x3bf   : > { %v10928_v25 = vpop.trf.xlu0 }
 0x3c0   : > { %14791 = vst [vmem:[#allocation27_spill] sm:$0xff] %v10928_v25  ;;  %v426_v27 = vsel %vm353_vm0, %v10928_v25, 0.0 }
 0x3c1   : > { %427 = vadd.xlane.f32.xlu0 %v426_v27 }
 0x3c3   : > { %v10932_v29 = vpop.trf.xlu0 }
 0x3c4   : > { %14792 = vst [vmem:[#allocation28_spill] sm:$0xff] %v10932_v29  ;;  %v429_v56 = vsel %vm353_vm0, %v10932_v29, 0.0 }
 0x3c7   : > { %v10934_v53 = vpop.trf.xlu0 }
 0x3c8   : > { %14793 = vst [vmem:[#allocation29_spill] sm:$0xff] %v10934_v53  ;;  %v432_v3 = vsel %vm353_vm0, %v10934_v53, 0.0 }
 0x3c9   : > { %433 = vadd.xlane.f32.xlu0 %v432_v3 }
 0x3cb   : > { %v10938_v31 = vpop.trf.xlu0 }
 0x3cc   : > { %14794 = vst [vmem:[#allocation30_spill] sm:$0xff] %v10938_v31  ;;  %v435_v33 = vsel %vm353_vm0, %v10938_v31, 0.0 }
 0x3cf   : > { %v10940_v59 = vpop.trf.xlu0 }
 0x3d0   : > { %14795 = vst [vmem:[#allocation31_spill] sm:$0xff] %v10940_v59  ;;  %v438_v35 = vsel %vm353_vm0, %v10940_v59, 0.0 }
 0x3d1   : > { %439 = vadd.xlane.f32.xlu0 %v438_v35 }
 0x3d3   : > { %v10944_v36 = vpop.trf.xlu0 }
 0x3d4   : > { %14796 = vst [vmem:[#allocation32_spill] sm:$0xff] %v10944_v36  ;;  %v441_v58 = vsel %vm353_vm0, %v10944_v36, 0.0 }
 0x3d7   : > { %v10946_v37 = vpop.trf.xlu0 }
 0x3d8   : > { %14797 = vst [vmem:[#allocation33_spill] sm:$0xff] %v10946_v37  ;;  %v444_v49 = vsel %vm353_vm0, %v10946_v37, 0.0 }
 0x3d9   : > { %445 = vadd.xlane.f32.xlu0 %v444_v49 }
 0x3da   : > { %406 = vadd.xlane.f32.xlu1 %v405_v23 }
 0x3db   : > { %v10962_v45 = vpop.trf.xlu0 }
 0x3dc   : > { %14798 = vst [vmem:[#allocation34_spill] sm:$0xff] %v10962_v45  ;;  %v447_v60 = vsel %vm353_vm0, %v10962_v45, 0.0 }
 0x3de   : > { %412 = vadd.xlane.f32.xlu1 %v411_v50 }
 0x3e2   : > { %418 = vadd.xlane.f32.xlu1 %v417_v51 }
 0x3e6   : > { %424 = vadd.xlane.f32.xlu1 %v423_v55 }
 0x3ea   : > { %430 = vadd.xlane.f32.xlu1 %v429_v56 }
 0x3ee   : > { %436 = vadd.xlane.f32.xlu1 %v435_v33 }
 0x3f2   : > { %442 = vadd.xlane.f32.xlu1 %v441_v58 }
 0x3f6   : > { %448 = vadd.xlane.f32.xlu1 %v447_v60 }
 0x3f7   : > { %v1082_v61 = vpop.trf.xlu1 }
 0x3fb   : > { %v1083_v52 = vpop.trf.xlu1 }
 0x3fc   : > { %v1287_v63 = vpack.c.bf16 %v1083_v52, %v1082_v61 }
 0x3fe   : > { %8667 = vmatprep.mubr.msk.bf16.mxu0 %vm353_vm0, %v1287_v63 }
 0x3ff   : > { %v1084_v57 = vpop.trf.xlu1 }
 0x403   : > { %v1085_v0 = vpop.trf.xlu1 }
 0x404   : > { %v1288_v44 = vpack.c.bf16 %v1085_v0, %v1084_v57 }
 0x406   : > { %8668 = vmatmul.mubr.msk.bf16.vlgmr.msra.gmra.mrb[16].mxu0 %vm353_vm0, %v1288_v44 }
 0x407   : > { %v1086_v2 = vpop.trf.xlu1 }
 0x40b   : > { %v1087_v48 = vpop.trf.xlu1 }
 0x40c   : > { %v1289_v62 = vpack.c.bf16 %v1087_v48, %v1086_v2 }
 0x40e   : > { %8671 = vmatprep.mubr.msk.bf16.mxu0 %vm353_vm0, %v1289_v62 }
 0x40f   : > { %v1088_v46 = vpop.trf.xlu1 }
 0x413   : > { %v1089_v19 = vpop.trf.xlu1 }
 0x414   : > { %v1290_v27 = vpack.c.bf16 %v1089_v19, %v1088_v46 }
 0x416   : > { %8672 = vmatmul.mubr.msk.bf16.gmra.mrb[20].mxu0 %vm353_vm0, %v1290_v27 }
 0x417   : > { %v1090_v3 = vpop.trf.xlu1 }
 0x41b   : > { %v1091_v35 = vpop.trf.xlu1 }
 0x41c   : > { %v1291_v49 = vpack.c.bf16 %v1091_v35, %v1090_v3 }
 0x41e   : > { %8675 = vmatprep.mubr.msk.bf16.mxu0 %vm353_vm0, %v1291_v49 }
 0x41f   : > { %v1092_v23 = vpop.trf.xlu1 }
 0x423   : > { %v1093_v50 = vpop.trf.xlu1 }
 0x424   : > { %v1292_v51 = vpack.c.bf16 %v1093_v50, %v1092_v23 }
 0x426   : > { %8676 = vmatmul.mubr.msk.bf16.gmra.mrb[24].mxu0 %vm353_vm0, %v1292_v51 }
 0x427   : > { %v1094_v55 = vpop.trf.xlu1 }
 0x42b   : > { %v1095_v56 = vpop.trf.xlu1 }
 0x42c   : > { %v1293_v33 = vpack.c.bf16 %v1095_v56, %v1094_v55 }
 0x42e   : > { %v404_v58 = vpop.xlane.xlu0 %403  ;;  %8679 = vmatprep.mubr.msk.bf16.mxu0 %vm353_vm0, %v1293_v33 }
 0x42f   : > { %v467_v60 = vmul.f32 0.03125, %v404_v58  ;;  %v1096_v61 = vpop.trf.xlu1 }
 0x431   : > { %v10976_v52 = vsub.f32 %v10904_v5, %v467_v60 }
 0x433   : > { %v1097_v63 = vpop.trf.xlu1  ;;  %v531_v57 = vmul.f32 %v10976_v52, %v10976_v52 }
 0x434   : > { %v1294_v0 = vpack.c.bf16 %v1097_v63, %v1096_v61 }
 0x435   : > { %v595_v44 = vsel %vm353_vm0, %v531_v57, 0.0 }
 0x436   : > { %596 = vadd.xlane.f32.xlu0 %v595_v44  ;;  %v410_v2 = vpop.xlane.xlu0 %409  ;;  %8680 = vmatmul.mubr.msk.bf16.gmra.mrb[28].mxu0 %vm353_vm0, %v1294_v0 }
 0x437   : > { %v469_v48 = vmul.f32 0.03125, %v410_v2 }
 0x439   : > { %v10983_v62 = vsub.f32 %v10910_v7, %v469_v48 }
 0x43b   : > { %v533_v46 = vmul.f32 %v10983_v62, %v10983_v62 }
 0x43d   : > { %v601_v19 = vsel %vm353_vm0, %v533_v46, 0.0 }
 0x43e   : > { %602 = vadd.xlane.f32.xlu0 %v601_v19  ;;  %v416_v27 = vpop.xlane.xlu0 %415 }
 0x43f   : > { %v471_v3 = vmul.f32 0.03125, %v416_v27 }
 0x441   : > { %v10989_v35 = vsub.f32 %v10916_v15, %v471_v3 }
 0x443   : > { %v535_v49 = vmul.f32 %v10989_v35, %v10989_v35 }
 0x445   : > { %v607_v23 = vsel %vm353_vm0, %v535_v49, 0.0 }
 0x446   : > { %608 = vadd.xlane.f32.xlu0 %v607_v23  ;;  %v422_v50 = vpop.xlane.xlu0 %421 }
 0x447   : > { %v473_v51 = vmul.f32 0.03125, %v422_v50 }
 0x449   : > { %v10995_v55 = vsub.f32 %v10922_v17, %v473_v51 }
 0x44b   : > { %v537_v56 = vmul.f32 %v10995_v55, %v10995_v55 }
 0x44d   : > { %v613_v33 = vsel %vm353_vm0, %v537_v56, 0.0 }
 0x44e   : > { %614 = vadd.xlane.f32.xlu0 %v613_v33  ;;  %v428_v58 = vpop.xlane.xlu0 %427 }
 0x44f   : > { %v475_v60 = vmul.f32 0.03125, %v428_v58 }
 0x451   : > { %v11001_v61 = vsub.f32 %v10928_v25, %v475_v60 }
 0x453   : > { %v539_v63 = vmul.f32 %v11001_v61, %v11001_v61 }
 0x455   : > { %v619_v57 = vsel %vm353_vm0, %v539_v63, 0.0 }
 0x456   : > { %620 = vadd.xlane.f32.xlu0 %v619_v57  ;;  %v434_v0 = vpop.xlane.xlu0 %433 }
 0x457   : > { %v477_v44 = vmul.f32 0.03125, %v434_v0 }
 0x459   : > { %v11007_v2 = vsub.f32 %v10934_v53, %v477_v44 }
 0x45b   : > { %v541_v48 = vmul.f32 %v11007_v2, %v11007_v2 }
 0x45d   : > { %v625_v46 = vsel %vm353_vm0, %v541_v48, 0.0 }
 0x45e   : > { %626 = vadd.xlane.f32.xlu0 %v625_v46  ;;  %v440_v19 = vpop.xlane.xlu0 %439 }
 0x45f   : > { %v479_v27 = vmul.f32 0.03125, %v440_v19 }
 0x461   : > { %v11013_v3 = vsub.f32 %v10940_v59, %v479_v27 }
 0x463   : > { %v543_v49 = vmul.f32 %v11013_v3, %v11013_v3 }
 0x465   : > { %v631_v23 = vsel %vm353_vm0, %v543_v49, 0.0 }
 0x466   : > { %632 = vadd.xlane.f32.xlu0 %v631_v23  ;;  %v446_v50 = vpop.xlane.xlu0 %445 }
 0x467   : > { %v481_v51 = vmul.f32 0.03125, %v446_v50  ;;  %v407_v56 = vpop.xlane.xlu1 %406 }
 0x468   : > { %v468_v33 = vmul.f32 0.03125, %v407_v56 }
 0x469   : > { %v11019_v58 = vsub.f32 %v10946_v37, %v481_v51 }
 0x46a   : > { %v11022_v60 = vsub.f32 %v10908_v40, %v468_v33 }
 0x46b   : > { %v413_v63 = vpop.xlane.xlu1 %412  ;;  %v545_v57 = vmul.f32 %v11019_v58, %v11019_v58 }
 0x46c   : > { %v470_v0 = vmul.f32 0.03125, %v413_v63  ;;  %v532_v44 = vmul.f32 %v11022_v60, %v11022_v60 }
 0x46d   : > { %v637_v48 = vsel %vm353_vm0, %v545_v57, 0.0 }
 0x46e   : > { %v11030_v46 = vsub.f32 %v10914_v9, %v470_v0  ;;  %638 = vadd.xlane.f32.xlu0 %v637_v48  ;;  %v598_v19 = vsel %vm353_vm0, %v532_v44, 0.0 }
 0x46f   : > { %599 = vadd.xlane.f32.xlu1 %v598_v19  ;;  %v419_v27 = vpop.xlane.xlu1 %418 }
 0x470   : > { %v472_v49 = vmul.f32 0.03125, %v419_v27  ;;  %v534_v23 = vmul.f32 %v11030_v46, %v11030_v46 }
 0x472   : > { %v11036_v50 = vsub.f32 %v10920_v42, %v472_v49  ;;  %v604_v51 = vsel %vm353_vm0, %v534_v23, 0.0 }
 0x473   : > { %605 = vadd.xlane.f32.xlu1 %v604_v51  ;;  %v425_v56 = vpop.xlane.xlu1 %424 }
 0x474   : > { %v474_v33 = vmul.f32 0.03125, %v425_v56  ;;  %v536_v63 = vmul.f32 %v11036_v50, %v11036_v50 }
 0x476   : > { %v11042_v57 = vsub.f32 %v10926_v21, %v474_v33  ;;  %v610_v0 = vsel %vm353_vm0, %v536_v63, 0.0 }
 0x477   : > { %611 = vadd.xlane.f32.xlu1 %v610_v0  ;;  %v431_v44 = vpop.xlane.xlu1 %430 }
 0x478   : > { %v476_v48 = vmul.f32 0.03125, %v431_v44  ;;  %v538_v19 = vmul.f32 %v11042_v57, %v11042_v57 }
 0x47a   : > { %v11048_v27 = vsub.f32 %v10932_v29, %v476_v48  ;;  %v616_v49 = vsel %vm353_vm0, %v538_v19, 0.0 }
 0x47b   : > { %617 = vadd.xlane.f32.xlu1 %v616_v49  ;;  %v437_v23 = vpop.xlane.xlu1 %436 }
 0x47c   : > { %v478_v51 = vmul.f32 0.03125, %v437_v23  ;;  %v540_v56 = vmul.f32 %v11048_v27, %v11048_v27 }
 0x47e   : > { %v11054_v33 = vsub.f32 %v10938_v31, %v478_v51  ;;  %v622_v63 = vsel %vm353_vm0, %v540_v56, 0.0 }
 0x47f   : > { %623 = vadd.xlane.f32.xlu1 %v622_v63  ;;  %v443_v0 = vpop.xlane.xlu1 %442 }
 0x480   : > { %v480_v44 = vmul.f32 0.03125, %v443_v0  ;;  %v542_v48 = vmul.f32 %v11054_v33, %v11054_v33 }
 0x482   : > { %v11060_v37 = vsub.f32 %v10944_v36, %v480_v44  ;;  %v628_v19 = vsel %vm353_vm0, %v542_v48, 0.0 }
 0x483   : > { %629 = vadd.xlane.f32.xlu1 %v628_v19  ;;  %v449_v49 = vpop.xlane.xlu1 %448 }
 0x484   : > { %v482_v23 = vmul.f32 0.03125, %v449_v49  ;;  %v544_v51 = vmul.f32 %v11060_v37, %v11060_v37 }
 0x486   : > { %v11066_v59 = vsub.f32 %v10962_v45, %v482_v23  ;;  %v634_v56 = vsel %vm353_vm0, %v544_v51, 0.0 }
 0x487   : > { %635 = vadd.xlane.f32.xlu1 %v634_v56 }
 0x488   : > { %v546_v63 = vmul.f32 %v11066_v59, %v11066_v59 }
 0x48a   : > { %v640_v0 = vsel %vm353_vm0, %v546_v63, 0.0 }
 0x48b   : > { %641 = vadd.xlane.f32.xlu1 %v640_v0 }
 0x4d9   : > { %v8669_v44 = vpop.f32.mrb[16].mxu0 }
 0x4da   : > { %v1397_v48 = vpop.f32.mrb[17].mxu0 }
 0x4db   : > { %v8670_v19 = vpop.f32.mrb[18].mxu0 }
 0x4dc   : > { %v11072_v36 = vpack.c.bf16 %v8670_v19, %v8669_v44  ;;  %v1400_v49 = vpop.f32.mrb[19].mxu0  ;;  %v597_v44 = vpop.xlane.xlu0 %596 }
 0x4dd   : > { %v11074_v53 = vpack.c.bf16 %v1400_v49, %v1397_v48  ;;  %v659_v48 = vmul.f32 0.03125, %v597_v44 }
 0x4de   : > { %1550 = vrot.lane.b32.xlu1 %v11072_v36, %s10541_s26 }
 0x4df   : > { %1548 = vrot.lane.b32.xlu0 %v11074_v53, %s10541_s26  ;;  %v691_v49 = vadd.f32 1e-05, %v659_v48 }
 0x4e0   : > { %v603_v19 = vpop.xlane.xlu0 %602 }
 0x4e1   : > { %v661_v31 = vmul.f32 0.03125, %v603_v19  ;;  %9830 = vrsqrt.f32 %v691_v49 }
 0x4e4   : > { %v609_v25 = vpop.xlane.xlu0 %608 }
 0x4e5   : > { %v663_v17 = vmul.f32 0.03125, %v609_v25 }
 0x4e7   : > { %v695_v5 = vadd.f32 1e-05, %v663_v17 }
 0x4e9   : > { %v8673_v23 = vpop.f32.mrb[20].mxu0 }
 0x4ea   : > { %v1413_v51 = vpop.f32.mrb[21].mxu0 }
 0x4eb   : > { %v8674_v56 = vpop.f32.mrb[22].mxu0  ;;  %v9831_v17 = vpop.eup %9830 }
 0x4ec   : > { %v11080_v45 = vpack.c.bf16 %v8674_v56, %v8673_v23  ;;  %v1416_v63 = vpop.f32.mrb[23].mxu0  ;;  %v693_v23 = vadd.f32 1e-05, %v661_v31  ;;  %v615_v56 = vpop.xlane.xlu0 %614  ;;  %v755_v32 = vmul.f32 %v9831_v17, %v10976_v52 }
 0x4ed   : > { %v11082_v0 = vpack.c.bf16 %v1416_v63, %v1413_v51  ;;  %v665_v44 = vmul.f32 0.03125, %v615_v56 }
 0x4ee   : > { %1554 = vrot.lane.b32.xlu0 %v11080_v45, %s10541_s26  ;;  %9832 = vrsqrt.f32 %v693_v23  ;;  %v791_v52 = vmul.f32 %v10773_v54, %v755_v32 }
 0x4ef   : > { %1552 = vrot.lane.b32.xlu1 %v11082_v0, %s10541_s26  ;;  %v697_v19 = vadd.f32 1e-05, %v665_v44 }
 0x4f0   : > { %v621_v48 = vpop.xlane.xlu0 %620 }
 0x4f1   : > { %v667_v49 = vmul.f32 0.03125, %v621_v48 }
 0x4f3   : > { %v699_v23 = vadd.f32 1e-05, %v667_v49 }
 0x4f8   : > { %v9833_v30 = vpop.eup %9832 }
 0x4f9   : > { %v8677_v29 = vpop.f32.mrb[24].mxu0 }
 0x4fa   : > { %v1429_v21 = vpop.f32.mrb[25].mxu0 }
 0x4fb   : > { %v8678_v51 = vpop.f32.mrb[26].mxu0 }
 0x4fc   : > { %v11088_v63 = vpack.c.bf16 %v8678_v51, %v8677_v29  ;;  %v1432_v15 = vpop.f32.mrb[27].mxu0  ;;  %v600_v42 = vpop.xlane.xlu1 %599 }
 0x4fd   : > { %v11090_v7 = vpack.c.bf16 %v1432_v15, %v1429_v21  ;;  %v660_v9 = vmul.f32 0.03125, %v600_v42  ;;  %v627_v15 = vpop.xlane.xlu0 %626 }
 0x4fe   : > { %1558 = vrot.lane.b32.xlu0 %v11088_v63, %s10541_s26  ;;  %v669_v40 = vmul.f32 0.03125, %v627_v15 }
 0x4ff   : > { %v692_v25 = vadd.f32 1e-05, %v660_v9  ;;  %1556 = vrot.lane.b32.xlu1 %v11090_v7, %s10541_s26 }
 0x500   : > { %v606_v31 = vpop.xlane.xlu1 %605  ;;  %v701_v44 = vadd.f32 1e-05, %v669_v40 }
 0x501   : > { %9834 = vrsqrt.f32 %v692_v25  ;;  %v662_v29 = vmul.f32 0.03125, %v606_v31  ;;  %v633_v56 = vpop.xlane.xlu0 %632 }
 0x502   : > { %9836 = vrsqrt.f32 %v695_v5 }
 0x503   : > { %v694_v21 = vadd.f32 1e-05, %v662_v29  ;;  %v671_v29 = vmul.f32 0.03125, %v633_v56 }
 0x504   : > { %v612_v42 = vpop.xlane.xlu1 %611 }
 0x505   : > { %9838 = vrsqrt.f32 %v694_v21  ;;  %v664_v51 = vmul.f32 0.03125, %v612_v42  ;;  %v639_v28 = vpop.xlane.xlu0 %638 }
 0x506   : > { %9840 = vrsqrt.f32 %v697_v19 }
 0x507   : > { %v696_v9 = vadd.f32 1e-05, %v664_v51 }
 0x508   : > { %v618_v34 = vpop.xlane.xlu1 %617 }
 0x509   : > { %9842 = vrsqrt.f32 %v696_v9  ;;  %v666_v25 = vmul.f32 0.03125, %v618_v34  ;;  %v8681_v5 = vpop.f32.mrb[28].mxu0  ;;  %v757_v34 = vmul.f32 %v9833_v30, %v10983_v62  ;;  %v703_v9 = vadd.f32 1e-05, %v671_v29 }
 0x50a   : > { %v1445_v48 = vpop.f32.mrb[29].mxu0  ;;  %9844 = vrsqrt.f32 %v699_v23  ;;  %v827_v62 = vadd.f32 %v10780_v38, %v791_v52 }
 0x50b   : > { %v9835_v31 = vpop.eup %9834  ;;  %v698_v21 = vadd.f32 1e-05, %v666_v25  ;;  %v8682_v42 = vpop.f32.mrb[30].mxu0  ;;  %v673_v25 = vmul.f32 0.03125, %v639_v28 }
 0x50c   : > { %v9837_v15 = vpop.eup %9836  ;;  %v11097_v19 = vpack.c.bf16 %v8682_v42, %v8681_v5  ;;  %v1448_v49 = vpop.f32.mrb[31].mxu0  ;;  %v756_v26 = vmul.f32 %v9835_v31, %v11022_v60 }
 0x50d   : > { %v624_v51 = vpop.xlane.xlu1 %623  ;;  %9846 = vrsqrt.f32 %v698_v21  ;;  %v11102_v40 = vpack.c.bf16 %v1448_v49, %v1445_v48  ;;  %v759_v32 = vmul.f32 %v9837_v15, %v10989_v35  ;;  %v793_v48 = vmul.f32 %v10773_v54, %v757_v34 }
 0x50e   : > { %v668_v17 = vmul.f32 0.03125, %v624_v51  ;;  %9848 = vrsqrt.f32 %v701_v44  ;;  %1562 = vrot.lane.b32.xlu0 %v11097_v19, %s10541_s26  ;;  %v792_v23 = vmul.f32 %v10773_v54, %v756_v26  ;;  %v705_v21 = vadd.f32 1e-05, %v673_v25 }
 0x50f   : > { %v9839_v56 = vpop.eup %9838  ;;  %1560 = vrot.lane.b32.xlu1 %v11102_v40, %s10541_s26  ;;  %v829_v51 = vadd.f32 %v10780_v38, %v793_v48 }
 0x510   : > { %v700_v5 = vadd.f32 1e-05, %v668_v17  ;;  %v828_v60 = vadd.f32 %v10780_v38, %v792_v23  ;;  %v758_v44 = vmul.f32 %v9839_v56, %v11030_v46  ;;  %v9841_v31 = vpop.eup %9840  ;;  %v11122_v46 = vld [vmem:[%s14643_s1] ss:$0 sm:$0xff] }
 0x511   : > { %v630_v30 = vpop.xlane.xlu1 %629  ;;  %v795_v15 = vmul.f32 %v11122_v46, %v759_v32  ;;  %v761_v34 = vmul.f32 %v9841_v31, %v10995_v55 }
 0x512   : > { %9850 = vrsqrt.f32 %v700_v5  ;;  %v670_v26 = vmul.f32 0.03125, %v630_v30  ;;  %2033 = vrot.lane.b32.xlu0 %v11072_v36, %s10542_s6  ;;  %v851_v28 = vpack.c.bf16 %v828_v60, %v827_v62  ;;  %v794_v29 = vmul.f32 %v10773_v54, %v758_v44 }
 0x513   : > { %v9843_v35 = vpop.eup %9842  ;;  %9852 = vrsqrt.f32 %v703_v9  ;;  %2031 = vrot.lane.b32.xlu1 %v11074_v53, %s10542_s6  ;;  %v797_v60 = vmul.f32 %v11122_v46, %v761_v34 }
 0x514   : > { %v702_v42 = vadd.f32 1e-05, %v670_v26  ;;  %8631 = vmatprep.subr.bf16.mxu1 %v851_v28  ;;  %v830_v54 = vadd.f32 %v10780_v38, %v794_v29  ;;  %v760_v52 = vmul.f32 %v9843_v35, %v11036_v50  ;;  %v9845_v17 = vpop.eup %9844  ;;  %v11137_v38 = vld [vmem:[%s14643_s1 + $0x1] ss:$0 sm:$0xff] }
 0x515   : > { %v636_v49 = vpop.xlane.xlu1 %635  ;;  %8632 = vmatpush3.bf16.msra.mxu1 %v851_v28  ;;  %v831_v55 = vadd.f32 %v11137_v38, %v795_v15  ;;  %v763_v44 = vmul.f32 %v9845_v17, %v11001_v61  ;;  %v833_v35 = vadd.f32 %v11137_v38, %v797_v60 }
 0x516   : > { %9854 = vrsqrt.f32 %v702_v42  ;;  %v672_v23 = vmul.f32 0.03125, %v636_v49  ;;  %2037 = vrot.lane.b32.xlu0 %v11080_v45, %s10542_s6  ;;  %v852_v56 = vpack.c.bf16 %v830_v54, %v829_v51  ;;  %v796_v9 = vmul.f32 %v11122_v46, %v760_v52 }
 0x517   : > { %v9847_v25 = vpop.eup %9846  ;;  %9856 = vrsqrt.f32 %v705_v21  ;;  %2035 = vrot.lane.b32.xlu1 %v11082_v0, %s10542_s6  ;;  %v799_v42 = vmul.f32 %v11122_v46, %v763_v44 }
 0x518   : > { %v704_v5 = vadd.f32 1e-05, %v672_v23  ;;  %v9849_v50 = vpop.eup %9848  ;;  %8633 = vmatprep.subr.bf16.mxu1 %v852_v56  ;;  %v832_v30 = vadd.f32 %v11137_v38, %v796_v9  ;;  %v762_v62 = vmul.f32 %v9847_v25, %v11042_v57 }
 0x519   : > { %v642_v32 = vpop.xlane.xlu1 %641  ;;  %8634 = vmatpush3.bf16.msra.mxu1 %v852_v56  ;;  %v765_v57 = vmul.f32 %v9849_v50, %v11007_v2 }
 0x51a   : > { %9858 = vrsqrt.f32 %v704_v5  ;;  %v674_v48 = vmul.f32 0.03125, %v642_v32  ;;  %2041 = vrot.lane.b32.xlu0 %v11088_v63, %s10542_s6  ;;  %v853_v31 = vpack.c.bf16 %v832_v30, %v831_v55  ;;  %v798_v26 = vmul.f32 %v11122_v46, %v762_v62 }
 0x51b   : > { %2039 = vrot.lane.b32.xlu1 %v11090_v7, %s10542_s6  ;;  %v801_v2 = vmul.f32 %v11122_v46, %v765_v57 }
 0x51c   : > { %v9851_v28 = vpop.eup %9850  ;;  %v706_v29 = vadd.f32 1e-05, %v674_v48  ;;  %8635 = vmatprep.subr.bf16.mxu1 %v853_v31  ;;  %v834_v61 = vadd.f32 %v11137_v38, %v798_v26 }
 0x51d   : > { %v764_v21 = vmul.f32 %v9851_v28, %v11048_v27  ;;  %v9853_v15 = vpop.eup %9852  ;;  %8636 = vmatpush3.bf16.msra.mxu1 %v853_v31  ;;  %v835_v27 = vadd.f32 %v11137_v38, %v799_v42  ;;  %v837_v5 = vadd.f32 %v11137_v38, %v801_v2 }
 0x51e   : > { %9860 = vrsqrt.f32 %v706_v29  ;;  %2045 = vrot.lane.b32.xlu0 %v11097_v19, %s10542_s6  ;;  %v854_v49 = vpack.c.bf16 %v834_v61, %v833_v35  ;;  %v767_v17 = vmul.f32 %v9853_v15, %v11013_v3 }
 0x51f   : > { %v800_v51 = vmul.f32 %v11122_v46, %v764_v21  ;;  %2043 = vrot.lane.b32.xlu1 %v11102_v40, %s10542_s6 }
 0x520   : > { %v9855_v54 = vpop.eup %9854  ;;  %8637 = vmatprep.subr.bf16.mxu1 %v854_v49  ;;  %v803_v55 = vmul.f32 %v11122_v46, %v767_v17 }
 0x521   : > { %v836_v52 = vadd.f32 %v11137_v38, %v800_v51  ;;  %v766_v34 = vmul.f32 %v9855_v54, %v11054_v33  ;;  %v9857_v23 = vpop.eup %9856  ;;  %8638 = vmatpush3.bf16.msra.mxu1 %v854_v49 }
 0x522   : > { %2017 = vrot.lane.b32.xlu0 %v11072_v36, %s10543_s11  ;;  %v769_v50 = vmul.f32 %v9857_v23, %v11019_v58  ;;  %v839_v60 = vadd.f32 %v11137_v38, %v803_v55 }
 0x523   : > { %v855_v56 = vpack.c.bf16 %v836_v52, %v835_v27  ;;  %v802_v9 = vmul.f32 %v11122_v46, %v766_v34  ;;  %2015 = vrot.lane.b32.xlu1 %v11074_v53, %s10543_s11 }
 0x524   : > { %v9859_v25 = vpop.eup %9858  ;;  %v805_v58 = vmul.f32 %v11122_v46, %v769_v50 }
 0x525   : > { %8639 = vmatprep.subr.bf16.mxu1 %v855_v56  ;;  %v838_v33 = vadd.f32 %v11137_v38, %v802_v9  ;;  %v768_v3 = vmul.f32 %v9859_v25, %v11060_v37 }
 0x526   : > { %8640 = vmatpush3.bf16.msra.mxu1 %v855_v56  ;;  %2021 = vrot.lane.b32.xlu0 %v11080_v45, %s10543_s11  ;;  %v841_v26 = vadd.f32 %v11137_v38, %v805_v58 }
 0x527   : > { %v856_v32 = vpack.c.bf16 %v838_v33, %v837_v5  ;;  %v804_v30 = vmul.f32 %v11122_v46, %v768_v3  ;;  %2019 = vrot.lane.b32.xlu1 %v11082_v0, %s10543_s11 }
 0x528   : > { %v9861_v62 = vpop.eup %9860 }
 0x529   : > { %8641 = vmatprep.subr.bf16.mxu1 %v856_v32  ;;  %v840_v37 = vadd.f32 %v11137_v38, %v804_v30  ;;  %v770_v44 = vmul.f32 %v9861_v62, %v11066_v59 }
 0x52a   : > { %8642 = vmatpush3.bf16.msra.mxu1 %v856_v32  ;;  %2025 = vrot.lane.b32.xlu0 %v11088_v63, %s10543_s11 }
 0x52b   : > { %v857_v48 = vpack.c.bf16 %v840_v37, %v839_v60  ;;  %v806_v31 = vmul.f32 %v11122_v46, %v770_v44  ;;  %2023 = vrot.lane.b32.xlu1 %v11090_v7, %s10543_s11 }
 0x52d   : > { %8643 = vmatprep.subr.bf16.mxu1 %v857_v48  ;;  %v842_v28 = vadd.f32 %v11137_v38, %v806_v31 }
 0x52e   : > { %8644 = vmatpush3.bf16.msra.mxu1 %v857_v48  ;;  %2029 = vrot.lane.b32.xlu0 %v11097_v19, %s10543_s11 }
 0x52f   : > { %v858_v29 = vpack.c.bf16 %v842_v28, %v841_v26  ;;  %2027 = vrot.lane.b32.xlu1 %v11102_v40, %s10543_s11 }
 0x531   : > { %8645 = vmatprep.subr.bf16.mxu1 %v858_v29 }
 0x532   : > { %8646 = vmatpush3.bf16.msra.mxu1 %v858_v29 }
 0x535   : > { %8648 = vmatmul.mubr.bf16.vlgmr.msra.gmra.mrb[0].mxu1 %v10830_v1 }
 0x536   : > { %8651 = vmatprep.mubr.bf16.mxu1 %v10835_v11 }
 0x53d   : > { %8652 = vmatmul.mubr.bf16.gmra.mrb[4].mxu1 %v10842_v13 }
 0x53e   : > { %8655 = vmatprep.mubr.bf16.mxu1 %v10847_v39 }
 0x545   : > { %8656 = vmatmul.mubr.bf16.gmra.mrb[8].mxu1 %v10854_v41 }
 0x546   : > { %8659 = vmatprep.mubr.bf16.mxu1 %v10859_v47 }
 0x54d   : > { %8660 = vmatmul.mubr.bf16.gmra.mrb[12].mxu1 %v10866_v43 }
 0x54e   : > { %8715 = vmatprep.mubr.msk.bf16.mxu1 %vm1564_vm3, %v11074_v53 }
 0x550   : > { %v1551_v46 = vpop.permute.xlu1 %1550 }
 0x551   : > { %v1549_v59 = vpop.permute.xlu0 %1548  ;;  %v1593_v11 = vsel %vm1564_vm3, %v1551_v46, 0 }
 0x552   : > { %9395 = vmatprep.subr.msk.bf16.mxu1 %vm1564_vm3, %v1549_v59  ;;  %v1590_v1 = vsel %vm1564_vm3, %v1549_v59, 0 }
 0x553   : > { %8700 = vmatpush3.bf16.xpose.msra.mxu1 %v1590_v1 }
 0x554   : > { %9396 = vmatprep.subr.msk.bf16.mxu1 %vm1564_vm3, %v1551_v46 }
 0x55b   : > { %8702 = vmatpush3.bf16.xpose.msra.mxu1 %v1593_v11 }
 0x560   : > { %v1555_v39 = vpop.permute.xlu0 %1554 }
 0x561   : > { %v1553_v13 = vpop.permute.xlu1 %1552  ;;  %v1599_v47 = vsel %vm1564_vm3, %v1555_v39, 0 }
 0x562   : > { %9397 = vmatprep.subr.msk.bf16.mxu1 %vm1564_vm3, %v1553_v13  ;;  %v1596_v41 = vsel %vm1564_vm3, %v1553_v13, 0 }
 0x563   : > { %8704 = vmatpush3.bf16.xpose.msra.mxu1 %v1596_v41 }
 0x564   : > { %9398 = vmatprep.subr.msk.bf16.mxu1 %vm1564_vm3, %v1555_v39 }
 0x56b   : > { %8706 = vmatpush3.bf16.xpose.msra.mxu1 %v1599_v47 }
 0x570   : > { %v1559_v38 = vpop.permute.xlu0 %1558 }
 0x571   : > { %v1557_v43 = vpop.permute.xlu1 %1556  ;;  %v1605_v35 = vsel %vm1564_vm3, %v1559_v38, 0 }
 0x572   : > { %9399 = vmatprep.subr.msk.bf16.mxu1 %vm1564_vm3, %v1557_v43  ;;  %v1602_v57 = vsel %vm1564_vm3, %v1557_v43, 0 }
 0x573   : > { %8708 = vmatpush3.bf16.xpose.msra.mxu1 %v1602_v57 }
 0x574   : > { %9400 = vmatprep.subr.msk.bf16.mxu1 %vm1564_vm3, %v1559_v38 }
 0x57b   : > { %8710 = vmatpush3.bf16.xpose.msra.mxu1 %v1605_v35 }
 0x580   : > { %v1563_v42 = vpop.permute.xlu0 %1562 }
 0x581   : > { %v1561_v61 = vpop.permute.xlu1 %1560  ;;  %v1611_v15 = vsel %vm1564_vm3, %v1563_v42, 0 }
 0x582   : > { %9401 = vmatprep.subr.msk.bf16.mxu1 %vm1564_vm3, %v1561_v61  ;;  %v1608_v21 = vsel %vm1564_vm3, %v1561_v61, 0 }
 0x583   : > { %8712 = vmatpush3.bf16.xpose.msra.mxu1 %v1608_v21 }
 0x584   : > { %9402 = vmatprep.subr.msk.bf16.mxu1 %vm1564_vm3, %v1563_v42  ;;  %v2034_v54 = vpop.permute.xlu0 %2033 }
 0x585   : > { %v2032_v49 = vpop.permute.xlu1 %2031  ;;  %v2075_v27 = vsel %vm1564_vm3, %v2034_v54, 0 }
 0x586   : > { %v2072_v51 = vsel %vm1564_vm3, %v2032_v49, 0 }
 0x588   : > { %v2038_v17 = vpop.permute.xlu0 %2037 }
 0x589   : > { %v2036_v2 = vpop.permute.xlu1 %2035  ;;  %v2081_v9 = vsel %vm1564_vm3, %v2038_v17, 0 }
 0x58a   : > { %v2078_v34 = vsel %vm1564_vm3, %v2036_v2, 0 }
 0x58b   : > { %8714 = vmatpush3.bf16.xpose.msra.mxu1 %v1611_v15 }
 0x58c   : > { %9403 = vmatprep.subr.msk.bf16.mxu1 %vm1564_vm3, %v2032_v49  ;;  %v2042_v5 = vpop.permute.xlu0 %2041 }
 0x58d   : > { %v2040_v52 = vpop.permute.xlu1 %2039  ;;  %v2087_v33 = vsel %vm1564_vm3, %v2042_v5, 0 }
 0x58e   : > { %v2084_v25 = vsel %vm1564_vm3, %v2040_v52, 0 }
 0x590   : > { %v2046_v55 = vpop.permute.xlu0 %2045 }
 0x591   : > { %v2044_v23 = vpop.permute.xlu1 %2043  ;;  %v2093_v50 = vsel %vm1564_vm3, %v2046_v55, 0 }
 0x592   : > { %8716 = vmatmul.mubr.msk.bf16.vlgmr.msra.gmra.mrb[16].mxu1 %vm1564_vm3, %v11072_v36  ;;  %v2090_v3 = vsel %vm1564_vm3, %v2044_v23, 0 }
 0x593   : > { %8719 = vmatprep.mubr.msk.bf16.mxu1 %vm1564_vm3, %v11082_v0  ;;  %8764 = vmatpush3.bf16.xpose.msra.mxu1 %v2072_v51 }
 0x594   : > { %9404 = vmatprep.subr.msk.bf16.mxu1 %vm1564_vm3, %v2034_v54  ;;  %v2018_v32 = vpop.permute.xlu0 %2017 }
 0x595   : > { %v2016_v56 = vpop.permute.xlu1 %2015 }
 0x598   : > { %v2022_v62 = vpop.permute.xlu0 %2021 }
 0x599   : > { %v2020_v30 = vpop.permute.xlu1 %2019 }
 0x59a   : > { %8720 = vmatmul.mubr.msk.bf16.gmra.mrb[20].mxu1 %vm1564_vm3, %v11080_v45 }
 0x59b   : > { %8723 = vmatprep.mubr.msk.bf16.mxu1 %vm1564_vm3, %v11090_v7  ;;  %8766 = vmatpush3.bf16.xpose.msra.mxu1 %v2075_v27 }
 0x59c   : > { %9405 = vmatprep.subr.msk.bf16.mxu1 %vm1564_vm3, %v2036_v2  ;;  %v2026_v37 = vpop.permute.xlu0 %2025 }
 0x59d   : > { %v2024_v60 = vpop.permute.xlu1 %2023 }
 0x5a0   : > { %v2030_v58 = vpop.permute.xlu0 %2029 }
 0x5a1   : > { %v2028_v44 = vpop.permute.xlu1 %2027 }
 0x5a2   : > { %8724 = vmatmul.mubr.msk.bf16.gmra.mrb[24].mxu1 %vm1564_vm3, %v11088_v63 }
 0x5a3   : > { %8727 = vmatprep.mubr.msk.bf16.mxu1 %vm1564_vm3, %v11102_v40  ;;  %8768 = vmatpush3.bf16.xpose.msra.mxu1 %v2078_v34 }
 0x5a4   : > { %9406 = vmatprep.subr.msk.bf16.mxu1 %vm1564_vm3, %v2038_v17 }
 0x5aa   : > { %8728 = vmatmul.mubr.msk.bf16.gmra.mrb[28].mxu1 %vm1564_vm3, %v11097_v19 }
 0x5ab   : > { %8770 = vmatpush3.bf16.xpose.msra.mxu1 %v2081_v9  ;;  %8779 = vmatprep.mubr.msk.bf16.mxu1 %vm1564_vm3, %v2016_v56 }
 0x5ac   : > { %9407 = vmatprep.subr.msk.bf16.mxu1 %vm1564_vm3, %v2040_v52 }
 0x5b3   : > { %8772 = vmatpush3.bf16.xpose.msra.mxu1 %v2084_v25 }
 0x5b4   : > { %9408 = vmatprep.subr.msk.bf16.mxu1 %vm1564_vm3, %v2042_v5 }
 0x5bb   : > { %8774 = vmatpush3.bf16.xpose.msra.mxu1 %v2087_v33 }
 0x5bc   : > { %9409 = vmatprep.subr.msk.bf16.mxu1 %vm1564_vm3, %v2044_v23 }
 0x5c3   : > { %8776 = vmatpush3.bf16.xpose.msra.mxu1 %v2090_v3 }
 0x5c4   : > { %9410 = vmatprep.subr.msk.bf16.mxu1 %vm1564_vm3, %v2046_v55 }
 0x5cb   : > { %8778 = vmatpush3.bf16.xpose.msra.mxu1 %v2093_v50 }
 0x5d2   : > { %8780 = vmatmul.mubr.msk.bf16.vlgmr.msra.gmra.mrb[32].mxu1 %vm1564_vm3, %v2018_v32 }
 0x5d3   : > { %8783 = vmatprep.mubr.msk.bf16.mxu1 %vm1564_vm3, %v2020_v30 }
 0x5da   : > { %8784 = vmatmul.mubr.msk.bf16.gmra.mrb[36].mxu1 %vm1564_vm3, %v2022_v62 }
 0x5db   : > { %8787 = vmatprep.mubr.msk.bf16.mxu1 %vm1564_vm3, %v2024_v60 }
 0x5e2   : > { %8788 = vmatmul.mubr.msk.bf16.gmra.mrb[40].mxu1 %vm1564_vm3, %v2026_v37 }
 0x5e3   : > { %8791 = vmatprep.mubr.msk.bf16.mxu1 %vm1564_vm3, %v2028_v44 }
 0x5ea   : > { %8792 = vmatmul.mubr.msk.bf16.gmra.mrb[44].mxu1 %vm1564_vm3, %v2030_v58 }
 0x608   : > { %v11257_v48 = vpop.f32.mrb[0].mxu1 }
 0x609   : > { %v11259_v31 = vpop.f32.mrb[1].mxu1 }
 0x60a   : > { %v11261_v26 = vpop.f32.mrb[2].mxu1 }
 0x60b   : > { %v11263_v28 = vpop.f32.mrb[3].mxu1 }
 0x610   : > { %v8653_v29 = vpop.f32.mrb[4].mxu1 }
 0x611   : > { %v1148_v59 = vpop.f32.mrb[5].mxu1 }
 0x612   : > { %v8654_v46 = vpop.f32.mrb[6].mxu1 }
 0x613   : > { %v9523_v1 = vpack.i.bf16 %v8654_v46, %v8653_v29  ;;  %v1151_v11 = vpop.f32.mrb[7].mxu1 }
 0x614   : > { %v9508_v13 = vpack.i.bf16 %v1151_v11, %v1148_v59 }
 0x616   : > { %9509 = vrot.lane.b32.xlu0 %v9508_v13, %s10539_s23 }
 0x618   : > { %v8657_v39 = vpop.f32.mrb[8].mxu1 }
 0x619   : > { %v1164_v41 = vpop.f32.mrb[9].mxu1 }
 0x61a   : > { %9524 = vrot.lane.b32.xlu0 %v9523_v1, %s10539_s23  ;;  %v8658_v47 = vpop.f32.mrb[10].mxu1 }
 0x61b   : > { %v9528_v43 = vpack.i.bf16 %v8658_v47, %v8657_v39  ;;  %v1167_v38 = vpop.f32.mrb[11].mxu1 }
 0x61c   : > { %v9513_v57 = vpack.i.bf16 %v1167_v38, %v1164_v41 }
 0x61e   : > { %9529 = vrot.lane.b32.xlu0 %v9528_v43, %s10540_s25  ;;  %9514 = vrot.lane.b32.xlu1 %v9513_v57, %s10540_s25 }
 0x620   : > { %v8661_v35 = vpop.f32.mrb[12].mxu1 }
 0x621   : > { %v1180_v61 = vpop.f32.mrb[13].mxu1 }
 0x622   : > { %v8662_v21 = vpop.f32.mrb[14].mxu1 }
 0x623   : > { %v9533_v42 = vpack.i.bf16 %v8662_v21, %v8661_v35  ;;  %v1183_v15 = vpop.f32.mrb[15].mxu1 }
 0x624   : > { %v9518_v49 = vpack.i.bf16 %v1183_v15, %v1180_v61 }
 0x626   : > { %9519 = vrot.lane.b32.xlu1 %v9518_v49, %s10541_s26 }
 0x62a   : > { %9534 = vrot.lane.b32.xlu1 %v9533_v42, %s10541_s26 }
 0x62e   : > { %1896 = vrot.lane.b32.xlu1 %v11072_v36, %s10540_s25 }
 0x632   : > { %1898 = vrot.lane.b32.xlu1 %v11082_v0, %s10540_s25 }
 0x636   : > { %1902 = vrot.lane.b32.xlu1 %v11090_v7, %s10540_s25 }
 0x63a   : > { %1904 = vrot.lane.b32.xlu1 %v11088_v63, %s10540_s25 }
 0x63e   : > { %2376 = vrot.lane.b32.xlu1 %v11074_v53, %s10544_s12 }
 0x642   : > { %2380 = vrot.lane.b32.xlu1 %v11082_v0, %s10544_s12 }
 0x646   : > { %2390 = vrot.lane.b32.xlu1 %v11097_v19, %s10544_s12 }
 0x64a   : > { %1906 = vrot.lane.b32.xlu1 %v11102_v40, %s10540_s25 }
 0x665   : > { %v11287_v51 = vpop.f32.mrb[16].mxu1 }
 0x666   : > { %v11289_v54 = vpop.f32.mrb[17].mxu1 }
 0x667   : > { %v11291_v2 = vpop.f32.mrb[18].mxu1 }
 0x668   : > { %v11293_v27 = vpop.f32.mrb[19].mxu1 }
 0x66d   : > { %v11296_v52 = vpop.f32.mrb[20].mxu1 }
 0x66e   : > { %1742 = vmax.xlane.f32.xlu1 %v11289_v54  ;;  %v11298_v34 = vpop.f32.mrb[21].mxu1 }
 0x66f   : > { %v11300_v17 = vpop.f32.mrb[22].mxu1 }
 0x670   : > { %v11302_v23 = vpop.f32.mrb[23].mxu1 }
 0x672   : > { %1748 = vmax.xlane.f32.xlu1 %v11291_v2 }
 0x675   : > { %v11306_v56 = vpop.f32.mrb[24].mxu1 }
 0x676   : > { %1756 = vmax.xlane.f32.xlu1 %v11300_v17  ;;  %v11308_v9 = vpop.f32.mrb[25].mxu1 }
 0x677   : > { %v11310_v25 = vpop.f32.mrb[26].mxu1 }
 0x678   : > { %v11312_v5 = vpop.f32.mrb[27].mxu1 }
 0x67a   : > { %1752 = vmax.xlane.f32.xlu1 %v11302_v23 }
 0x67d   : > { %v11316_v33 = vpop.f32.mrb[28].mxu1 }
 0x67e   : > { %1764 = vmax.xlane.f32.xlu1 %v11310_v25  ;;  %v11318_v3 = vpop.f32.mrb[29].mxu1 }
 0x67f   : > { %v11320_v55 = vpop.f32.mrb[30].mxu1 }
 0x680   : > { %v11322_v50 = vpop.f32.mrb[31].mxu1 }
 0x682   : > { %1760 = vmax.xlane.f32.xlu1 %v11312_v5 }
 0x686   : > { %1772 = vmax.xlane.f32.xlu1 %v11320_v55 }
 0x688   : > { %v9510_v32 = vpop.permute.xlu0 %9509 }
 0x689   : > { %v9511_v62 = vunpack.i.l.bf16 %v9510_v32  ;;  %v9512_v58 = vunpack.i.h.bf16 %v9510_v32 }
 0x68a   : > { %1768 = vmax.xlane.f32.xlu1 %v11322_v50 }
 0x68b   : > { %v1243_v59 = vsel %vm353_vm0, %v11259_v31, %v9511_v62  ;;  %v1244_v43 = vsel %vm353_vm0, %v11263_v28, %v9512_v58 }
 0x68c   : > { %v9525_v60 = vpop.permute.xlu0 %9524 }
 0x68d   : > { %v9526_v47 = vunpack.i.l.bf16 %v9525_v60  ;;  %v9527_v31 = vunpack.i.h.bf16 %v9525_v60 }
 0x68f   : > { %v1245_v21 = vsel %vm353_vm0, %v11257_v48, %v9526_v47  ;;  %v1246_v28 = vsel %vm353_vm0, %v11261_v26, %v9527_v31 }
 0x690   : > { %v9515_v30 = vpop.permute.xlu1 %9514  ;;  %v9530_v11 = vpop.permute.xlu0 %9529 }
 0x691   : > { %v9516_v37 = vunpack.i.l.bf16 %v9515_v30  ;;  %v9517_v46 = vunpack.i.h.bf16 %v9515_v30  ;;  %v9531_v38 = vunpack.i.l.bf16 %v9530_v11  ;;  %v9532_v42 = vunpack.i.h.bf16 %v9530_v11 }
 0x693   : > { %v1247_v1 = vsel %vm1056_vm1, %v1243_v59, %v9516_v37  ;;  %v1248_v57 = vsel %vm1056_vm1, %v1244_v43, %v9517_v46  ;;  %v1249_v15 = vsel %vm1056_vm1, %v1245_v21, %v9531_v38  ;;  %v1250_v62 = vsel %vm1056_vm1, %v1246_v28, %v9532_v42 }
 0x698   : > { %v9520_v44 = vpop.permute.xlu1 %9519 }
 0x699   : > { %v9521_v29 = vunpack.i.l.bf16 %v9520_v44  ;;  %v9522_v13 = vunpack.i.h.bf16 %v9520_v44 }
 0x69b   : > { %v1251_v39 = vsel %vm1061_vm2, %v1247_v1, %v9521_v29  ;;  %v1252_v61 = vsel %vm1061_vm2, %v1248_v57, %v9522_v13 }
 0x69c   : > { %v9535_v41 = vpop.permute.xlu1 %9534  ;;  %1255 = vxpose.xlu0.b32.start [1/4] (short) %v1251_v39, 128 }
 0x69d   : > { %v9536_v35 = vunpack.i.l.bf16 %v9535_v41  ;;  %v9537_v49 = vunpack.i.h.bf16 %v9535_v41 }
 0x69f   : > { %v1253_v32 = vsel %vm1061_vm2, %v1249_v15, %v9536_v35  ;;  %v1254_v48 = vsel %vm1061_vm2, %v1250_v62, %v9537_v49 }
 0x6a0   : > { %1256 = vxpose.xlu0.b32.cont [2/4] (short) %v1252_v61, 128 }
 0x6a4   : > { %1257 = vxpose.xlu0.b32.cont [3/4] (short) %v1253_v32, 128 }
 0x6a5   : > { %v11341_v30 = vpop.f32.mrb[32].mxu1 }
 0x6a6   : > { %2228 = vmax.xlane.f32.xlu1 %v11341_v30  ;;  %v11345_v60 = vpop.f32.mrb[33].mxu1 }
 0x6a7   : > { %v11348_v37 = vpop.f32.mrb[34].mxu1 }
 0x6a8   : > { %1258 = vxpose.xlu0.b32.end [4/4] (short) %v1254_v48, 128  ;;  %v11350_v44 = vpop.f32.mrb[35].mxu1 }
 0x6aa   : > { %2224 = vmax.xlane.f32.xlu1 %v11345_v60 }
 0x6ad   : > { %v11353_v58 = vpop.f32.mrb[36].mxu1 }
 0x6ae   : > { %2230 = vmax.xlane.f32.xlu1 %v11348_v37  ;;  %v11356_v26 = vpop.f32.mrb[37].mxu1 }
 0x6af   : > { %v11358_v29 = vpop.f32.mrb[38].mxu1 }
 0x6b0   : > { %v11360_v59 = vpop.f32.mrb[39].mxu1 }
 0x6b2   : > { %2234 = vmax.xlane.f32.xlu1 %v11360_v59 }
 0x6b5   : > { %v11363_v46 = vpop.f32.mrb[40].mxu1 }
 0x6b6   : > { %2244 = vmax.xlane.f32.xlu1 %v11363_v46  ;;  %v11366_v1 = vpop.f32.mrb[41].mxu1 }
 0x6b7   : > { %v11368_v11 = vpop.f32.mrb[42].mxu1 }
 0x6b8   : > { %v11370_v13 = vpop.f32.mrb[43].mxu1 }
 0x6ba   : > { %2240 = vmax.xlane.f32.xlu1 %v11366_v1 }
 0x6bd   : > { %v11373_v39 = vpop.f32.mrb[44].mxu1 }
 0x6be   : > { %2246 = vmax.xlane.f32.xlu1 %v11368_v11  ;;  %v11376_v41 = vpop.f32.mrb[45].mxu1 }
 0x6bf   : > { %v11378_v47 = vpop.f32.mrb[46].mxu1 }
 0x6c0   : > { %v11380_v43 = vpop.f32.mrb[47].mxu1 }
 0x6c2   : > { %2242 = vmax.xlane.f32.xlu1 %v11370_v13 }
 0x6c6   : > { %2248 = vmax.xlane.f32.xlu1 %v11376_v41 }
 0x701   : > { %1894 = vrot.lane.b32.xlu0 %v11074_v53, %s10540_s25 }
 0x705   : > { %1900 = vrot.lane.b32.xlu0 %v11080_v45, %s10540_s25 }
 0x709   : > { %1908 = vrot.lane.b32.xlu0 %v11097_v19, %s10540_s25 }
 0x70d   : > { %2378 = vrot.lane.b32.xlu0 %v11072_v36, %s10544_s12 }
 0x711   : > { %2382 = vrot.lane.b32.xlu0 %v11080_v45, %s10544_s12 }
 0x715   : > { %2384 = vrot.lane.b32.xlu0 %v11090_v7, %s10544_s12 }
 0x719   : > { %2386 = vrot.lane.b32.xlu0 %v11088_v63, %s10544_s12 }
 0x71c   : > { %v1271_v38 = vpop.trf.xlu0 }
 0x71d   : > { %2513 = vrot.lane.b32.xlu0 %v11074_v53, %s10545_s13 }
 0x720   : > { %v1272_v57 = vpop.trf.xlu0 }
 0x721   : > { %2515 = vrot.lane.b32.xlu0 %v11072_v36, %s10545_s13  ;;  %v1295_v35 = vpack.c.bf16 %v1272_v57, %v1271_v38 }
 0x723   : > { %8683 = vmatprep.mubr.msk.bf16.mxu0 %vm353_vm0, %v1295_v35 }
 0x724   : > { %v1273_v61 = vpop.trf.xlu0 }
 0x725   : > { %2388 = vrot.lane.b32.xlu0 %v11102_v40, %s10544_s12 }
 0x728   : > { %v1274_v31 = vpop.trf.xlu0 }
 0x729   : > { %v1296_v21 = vpack.c.bf16 %v1274_v31, %v1273_v61 }
 0x72b   : > { %8684 = vmatmul.mubr.msk.bf16.gmra.mrb[32].mxu0 %vm353_vm0, %v1296_v21 }
 0x72c   : > { %v1275_v42 = vpop.trf.xlu0 }
 0x730   : > { %v1276_v15 = vpop.trf.xlu0 }
 0x731   : > { %v1297_v49 = vpack.c.bf16 %v1276_v15, %v1275_v42 }
 0x733   : > { %8687 = vmatprep.mubr.msk.bf16.mxu0 %vm353_vm0, %v1297_v49 }
 0x734   : > { %v1277_v32 = vpop.trf.xlu0 }
 0x738   : > { %v1278_v28 = vpop.trf.xlu0 }
 0x739   : > { %v1298_v62 = vpack.c.bf16 %v1278_v28, %v1277_v32 }
 0x73b   : > { %8688 = vmatmul.mubr.msk.bf16.gmra.mrb[36].mxu0 %vm353_vm0, %v1298_v62  ;;  %v1897_v62 = vpop.permute.xlu1 %1896 }
 0x73c   : > { %v1279_v48 = vpop.trf.xlu0 }
 0x740   : > { %v1280_v38 = vpop.trf.xlu0 }
 0x741   : > { %v1299_v57 = vpack.c.bf16 %v1280_v38, %v1279_v48  ;;  %v1899_v48 = vpop.permute.xlu1 %1898 }
 0x743   : > { %8691 = vmatprep.mubr.msk.bf16.mxu0 %vm353_vm0, %v1299_v57 }
 0x744   : > { %1746 = vmax.xlane.f32.xlu0 %v11287_v51  ;;  %v1281_v35 = vpop.trf.xlu0 }
 0x745   : > { %v1903_v38 = vpop.permute.xlu1 %1902 }
 0x748   : > { %1744 = vmax.xlane.f32.xlu0 %v11293_v27  ;;  %v1282_v61 = vpop.trf.xlu0 }
 0x749   : > { %v1300_v31 = vpack.c.bf16 %v1282_v61, %v1281_v35  ;;  %v1905_v57 = vpop.permute.xlu1 %1904 }
 0x74b   : > { %8692 = vmatmul.mubr.msk.bf16.gmra.mrb[40].mxu0 %vm353_vm0, %v1300_v31 }
 0x74c   : > { %1754 = vmax.xlane.f32.xlu0 %v11296_v52  ;;  %v1283_v21 = vpop.trf.xlu0 }
 0x74d   : > { %v11421_v61 = vpop.permute.xlu1 %2376 }
 0x750   : > { %1750 = vmax.xlane.f32.xlu0 %v11298_v34  ;;  %v1284_v42 = vpop.trf.xlu0 }
 0x751   : > { %v1301_v15 = vpack.c.bf16 %v1284_v42, %v1283_v21  ;;  %v11425_v31 = vpop.permute.xlu1 %2380 }
 0x753   : > { %8695 = vmatprep.mubr.msk.bf16.mxu0 %vm353_vm0, %v1301_v15 }
 0x754   : > { %1762 = vmax.xlane.f32.xlu0 %v11306_v56  ;;  %v1285_v49 = vpop.trf.xlu0 }
 0x755   : > { %v11427_v42 = vpop.permute.xlu1 %2390 }
 0x756   : > { %14799 = vst [vmem:[#allocation35_spill] sm:$0xff] %v11427_v42 }
 0x758   : > { %1758 = vmax.xlane.f32.xlu0 %v11308_v9  ;;  %v1286_v32 = vpop.trf.xlu0 }
 0x759   : > { %v1302_v28 = vpack.c.bf16 %v1286_v32, %v1285_v49  ;;  %v1907_v15 = vpop.permute.xlu1 %1906 }
 0x75b   : > { %8696 = vmatmul.mubr.msk.bf16.gmra.mrb[44].mxu0 %vm353_vm0, %v1302_v28 }
 0x75c   : > { %1770 = vmax.xlane.f32.xlu0 %v11316_v33 }
 0x760   : > { %1766 = vmax.xlane.f32.xlu0 %v11318_v3 }
 0x764   : > { %2226 = vmax.xlane.f32.xlu0 %v11350_v44 }
 0x773   : > { %v1895_v35 = vpop.permute.xlu0 %1894 }
 0x774   : > { %8731 = vmatprep.subr.bf16.mxu0 %v1895_v35 }
 0x775   : > { %8732 = vmatpush3.bf16.msra.mxu0 %v1895_v35 }
 0x776   : > { %8733 = vmatprep.subr.bf16.mxu0 %v1897_v62 }
 0x777   : > { %v1901_v21 = vpop.permute.xlu0 %1900 }
 0x779   : > { %8734 = vmatpush3.bf16.msra.mxu0 %v1897_v62 }
 0x77a   : > { %2517 = vrot.lane.b32.xlu0 %v11082_v0, %s10545_s13  ;;  %8735 = vmatprep.subr.bf16.mxu0 %v1899_v48 }
 0x77b   : > { %v1909_v49 = vpop.permute.xlu0 %1908 }
 0x77d   : > { %8736 = vmatpush3.bf16.msra.mxu0 %v1899_v48  ;;  %v1743_v48 = vpop.xlane.xlu1 %1742 }
 0x77e   : > { %8737 = vmatprep.subr.bf16.mxu0 %v1901_v21  ;;  %v1774_v22 = vsub.f32 %v11289_v54, %v1743_v48 }
 0x77f   : > { %v11434_v32 = vpop.permute.xlu0 %2378 }
 0x780   : > { %v1790_v12 = vmul.f32 1.442695, %v1774_v22 }
 0x781   : > { %8738 = vmatpush3.bf16.msra.mxu0 %v1901_v21 }
 0x782   : > { %8739 = vmatprep.subr.bf16.mxu0 %v1903_v38 }
 0x783   : > { %v11438_v28 = vpop.permute.xlu0 %2382 }
 0x785   : > { %8740 = vmatpush3.bf16.msra.mxu0 %v1903_v38 }
 0x786   : > { %8741 = vmatprep.subr.bf16.mxu0 %v1905_v57 }
 0x787   : > { %v11440_v62 = vpop.permute.xlu0 %2384 }
 0x789   : > { %8742 = vmatpush3.bf16.msra.mxu0 %v1905_v57  ;;  %v1749_v57 = vpop.xlane.xlu1 %1748 }
 0x78a   : > { %8743 = vmatprep.subr.bf16.mxu0 %v1907_v15  ;;  %v1777_v10 = vsub.f32 %v11291_v2, %v1749_v57 }
 0x78b   : > { %v11442_v38 = vpop.permute.xlu0 %2386 }
 0x78d   : > { %8744 = vmatpush3.bf16.msra.mxu0 %v1907_v15  ;;  %v1757_v21 = vpop.xlane.xlu1 %1756 }
 0x78e   : > { %8745 = vmatprep.subr.bf16.mxu0 %v1909_v49  ;;  %v1781_v6 = vsub.f32 %v11300_v17, %v1757_v21 }
 0x78f   : > { %v11444_v35 = vpop.permute.xlu0 %2513 }
 0x790   : > { %14800 = vst [vmem:[#allocation36_spill] sm:$0xff] %v11444_v35  ;;  %v1796_v35 = vmul.f32 1.442695, %v1777_v10  ;;  %v1804_v54 = vmul.f32 1.442695, %v1781_v6 }
 0x791   : > { %8746 = vmatpush3.bf16.msra.mxu0 %v1909_v49  ;;  %v1753_v49 = vpop.xlane.xlu1 %1752 }
 0x792   : > { %8795 = vmatprep.subr.bf16.mxu0 %v11421_v61 }
 0x793   : > { %v11446_v15 = vpop.permute.xlu0 %2515 }
 0x794   : > { %14801 = vst [vmem:[#allocation37_spill] sm:$0xff] %v11446_v15 }
 0x795   : > { %v1765_v16 = vpop.xlane.xlu1 %1764 }
 0x797   : > { %v11448_v24 = vpop.permute.xlu0 %2388 }
 0x798   : > { %14802 = vst [vmem:[#allocation38_spill] sm:$0xff] %v11448_v24 }
 0x799   : > { %2236 = vmax.xlane.f32.xlu0 %v11353_v58  ;;  %v1761_v42 = vpop.xlane.xlu1 %1760 }
 0x79d   : > { %2232 = vmax.xlane.f32.xlu0 %v11356_v26  ;;  %v1773_v2 = vpop.xlane.xlu1 %1772 }
 0x7a1   : > { %2238 = vmax.xlane.f32.xlu0 %v11358_v29 }
 0x7a5   : > { %2252 = vmax.xlane.f32.xlu0 %v11373_v39 }
 0x7a9   : > { %2254 = vmax.xlane.f32.xlu0 %v11378_v47 }
 0x7ad   : > { %2250 = vmax.xlane.f32.xlu0 %v11380_v43 }
 0x7d1   : > { %v1747_v20 = vpop.xlane.xlu0 %1746 }
 0x7d2   : > { %v1776_v18 = vsub.f32 %v11287_v51, %v1747_v20 }
 0x7d4   : > { %v1794_v14 = vmul.f32 1.442695, %v1776_v18 }
 0x7d5   : > { %v1745_v8 = vpop.xlane.xlu0 %1744 }
 0x7d6   : > { %9862 = vpow2.f32 %v1794_v14  ;;  %v1775_v4 = vsub.f32 %v11293_v27, %v1745_v8  ;;  %v1779_v8 = vsub.f32 %v11302_v23, %v1753_v49  ;;  %v1769_v27 = vpop.xlane.xlu1 %1768 }
 0x7d7   : > { %9864 = vpow2.f32 %v1790_v12 }
 0x7d8   : > { %v1792_v15 = vmul.f32 1.442695, %v1775_v4 }
 0x7d9   : > { %v1755_v24 = vpop.xlane.xlu0 %1754 }
 0x7da   : > { %9866 = vpow2.f32 %v1792_v15  ;;  %v1780_v20 = vsub.f32 %v11296_v52, %v1755_v24 }
 0x7db   : > { %9868 = vpow2.f32 %v1796_v35  ;;  %v2229_v35 = vpop.xlane.xlu1 %2228 }
 0x7dc   : > { %9870 = vpow2.f32 %v1804_v54  ;;  %v1802_v22 = vmul.f32 1.442695, %v1780_v20 }
 0x7dd   : > { %v1751_v18 = vpop.xlane.xlu0 %1750 }
 0x7de   : > { %v1778_v51 = vsub.f32 %v11298_v34, %v1751_v18  ;;  %9872 = vpow2.f32 %v1802_v22  ;;  %v1800_v34 = vmul.f32 1.442695, %v1779_v8  ;;  %v1783_v18 = vsub.f32 %v11312_v5, %v1761_v42 }
 0x7e0   : > { %v11457_v17 = vpop.eup %9862  ;;  %v1798_v14 = vmul.f32 1.442695, %v1778_v51  ;;  %v1808_v8 = vmul.f32 1.442695, %v1783_v18 }
 0x7e1   : > { %1826 = vadd.xlane.f32.xlu1 %v11457_v17  ;;  %v1763_v4 = vpop.xlane.xlu0 %1762  ;;  %v11462_v10 = vpop.eup %9864 }
 0x7e2   : > { %v1784_v6 = vsub.f32 %v11306_v56, %v1763_v4  ;;  %9874 = vpow2.f32 %v1798_v14  ;;  %v1785_v56 = vsub.f32 %v11310_v25, %v1765_v16  ;;  %v2258_v25 = vsub.f32 %v11341_v30, %v2229_v35  ;;  %v2225_v14 = vpop.xlane.xlu1 %2224 }
 0x7e3   : > { %v2256_v30 = vsub.f32 %v11345_v60, %v2225_v14 }
 0x7e4   : > { %v11464_v12 = vpop.eup %9866  ;;  %v1810_v24 = vmul.f32 1.442695, %v1784_v6  ;;  %v1789_v6 = vsub.f32 %v11320_v55, %v1773_v2  ;;  %v2276_v5 = vmul.f32 1.442695, %v2258_v25 }
 0x7e5   : > { %1822 = vadd.xlane.f32.xlu1 %v11462_v10  ;;  %1824 = vadd.xlane.f32.xlu0 %v11464_v12  ;;  %v1759_v52 = vpop.xlane.xlu0 %1758  ;;  %v11469_v23 = vpop.eup %9868 }
 0x7e6   : > { %9876 = vpow2.f32 %v1810_v24  ;;  %v1782_v48 = vsub.f32 %v11308_v9, %v1759_v52  ;;  %v11471_v57 = vpop.eup %9870  ;;  %v1812_v9 = vmul.f32 1.442695, %v1785_v56  ;;  %v1787_v24 = vsub.f32 %v11322_v50, %v1769_v27  ;;  %v2231_v55 = vpop.xlane.xlu1 %2230 }
 0x7e7   : > { %9878 = vpow2.f32 %v1800_v34  ;;  %v2272_v52 = vmul.f32 1.442695, %v2256_v30 }
 0x7e8   : > { %v1806_v21 = vmul.f32 1.442695, %v1782_v48  ;;  %v11477_v54 = vpop.eup %9872  ;;  %v1816_v60 = vmul.f32 1.442695, %v1787_v24  ;;  %v2259_v48 = vsub.f32 %v11348_v37, %v2231_v55 }
 0x7e9   : > { %1828 = vadd.xlane.f32.xlu1 %v11469_v23  ;;  %1836 = vadd.xlane.f32.xlu0 %v11471_v57  ;;  %v1771_v15 = vpop.xlane.xlu0 %1770 }
 0x7ea   : > { %v1788_v49 = vsub.f32 %v11316_v33, %v1771_v15  ;;  %9880 = vpow2.f32 %v1806_v21  ;;  %v2278_v27 = vmul.f32 1.442695, %v2259_v48 }
 0x7ec   : > { %v1818_v20 = vmul.f32 1.442695, %v1788_v49  ;;  %v11483_v51 = vpop.eup %9874 }
 0x7ed   : > { %1834 = vadd.xlane.f32.xlu1 %v11477_v54  ;;  %v1767_v16 = vpop.xlane.xlu0 %1766 }
 0x7ee   : > { %9882 = vpow2.f32 %v1818_v20  ;;  %v1786_v22 = vsub.f32 %v11318_v3, %v1767_v16  ;;  %v1820_v3 = vmul.f32 1.442695, %v1789_v6 }
 0x7ef   : > { %9884 = vpow2.f32 %v1812_v9 }
 0x7f0   : > { %v11485_v4 = vpop.eup %9876  ;;  %v1814_v33 = vmul.f32 1.442695, %v1786_v22 }
 0x7f1   : > { %1830 = vadd.xlane.f32.xlu1 %v11483_v51  ;;  %1842 = vadd.xlane.f32.xlu0 %v11485_v4  ;;  %v11491_v42 = vpop.eup %9878  ;;  %v2227_v35 = vpop.xlane.xlu0 %2226 }
 0x7f2   : > { %9886 = vpow2.f32 %v1814_v33  ;;  %v2257_v21 = vsub.f32 %v11350_v44, %v2227_v35 }
 0x7f3   : > { %9888 = vpow2.f32 %v1808_v8 }
 0x7f4   : > { %9890 = vpow2.f32 %v2276_v5  ;;  %v11495_v34 = vpop.eup %9880  ;;  %v2274_v25 = vmul.f32 1.442695, %v2257_v21 }
 0x7f5   : > { %1832 = vadd.xlane.f32.xlu1 %v11491_v42  ;;  %9892 = vpow2.f32 %v1820_v3 }
 0x7f6   : > { %9894 = vpow2.f32 %v2272_v52 }
 0x7f7   : > { %9896 = vpow2.f32 %v1816_v60  ;;  %v2235_v60 = vpop.xlane.xlu1 %2234 }
 0x7f8   : > { %v11497_v2 = vpop.eup %9882  ;;  %9898 = vpow2.f32 %v2278_v27 }
 0x7f9   : > { %1838 = vadd.xlane.f32.xlu1 %v11495_v34  ;;  %1850 = vadd.xlane.f32.xlu0 %v11497_v2  ;;  %v11502_v56 = vpop.eup %9884  ;;  %9900 = vpow2.f32 %v2274_v25 }
 0x7fb   : > { %v2245_v48 = vpop.xlane.xlu1 %2244 }
 0x7fc   : > { %v11504_v50 = vpop.eup %9886 }
 0x7fd   : > { %1844 = vadd.xlane.f32.xlu1 %v11502_v56  ;;  %1846 = vadd.xlane.f32.xlu0 %v11504_v50  ;;  %v11509_v49 = vpop.eup %9888 }
 0x7fe   : > { %v8685_v15 = vpop.f32.mrb[32].mxu0  ;;  %v11511_v9 = vpop.eup %9890 }
 0x7ff   : > { %v1461_v20 = vpop.f32.mrb[33].mxu0  ;;  %14803 = vst [vmem:[#allocation39_spill] sm:$0xff] %v11511_v9  ;;  %v11519_v14 = vpop.eup %9892 }
 0x800   : > { %v8686_v37 = vpop.f32.mrb[34].mxu0  ;;  %v11521_v44 = vpop.eup %9894 }
 0x801   : > { %1840 = vadd.xlane.f32.xlu1 %v11509_v49  ;;  %2308 = vadd.xlane.f32.xlu0 %v11511_v9  ;;  %v11515_v18 = vpack.c.bf16 %v8686_v37, %v8685_v15  ;;  %v1464_v16 = vpop.f32.mrb[35].mxu0  ;;  %v11525_v33 = vpop.eup %9896 }
 0x802   : > { %v11517_v22 = vpack.c.bf16 %v1464_v16, %v1461_v20  ;;  %v11528_v8 = vpop.eup %9898  ;;  %v2241_v15 = vpop.xlane.xlu1 %2240 }
 0x803   : > { %14804 = vst [vmem:[#allocation40_spill] sm:$0xff] %v11515_v18  ;;  %v11531_v30 = vpop.eup %9900  ;;  %v11542_v16 = vpop.permute.xlu0 %2517 }
 0x804   : > { %14805 = vst [vmem:[#allocation41_spill] sm:$0xff] %v11517_v22  ;;  %14806 = vst [vmem:[#allocation42_spill] sm:$0xff] %v11531_v30 }
 0x805   : > { %1852 = vadd.xlane.f32.xlu1 %v11519_v14  ;;  %2304 = vadd.xlane.f32.xlu0 %v11521_v44  ;;  %14810 = vst [vmem:[#allocation46_spill] sm:$0xff] %v11542_v16 }
 0x809   : > { %1848 = vadd.xlane.f32.xlu1 %v11525_v33 }
 0x80d   : > { %2310 = vadd.xlane.f32.xlu1 %v11528_v8 }
 0x80e   : > { %v8689_v6 = vpop.f32.mrb[36].mxu0 }
 0x80f   : > { %v1477_v5 = vpop.f32.mrb[37].mxu0 }
 0x810   : > { %v8690_v3 = vpop.f32.mrb[38].mxu0 }
 0x811   : > { %2306 = vadd.xlane.f32.xlu1 %v11531_v30  ;;  %v11534_v24 = vpack.c.bf16 %v8690_v3, %v8689_v6  ;;  %v1480_v52 = vpop.f32.mrb[39].mxu0 }
 0x812   : > { %v11536_v55 = vpack.c.bf16 %v1480_v52, %v1477_v5  ;;  %v2247_v5 = vpop.xlane.xlu1 %2246 }
 0x813   : > { %14807 = vst [vmem:[#allocation43_spill] sm:$0xff] %v11534_v24 }
 0x814   : > { %14808 = vst [vmem:[#allocation44_spill] sm:$0xff] %v11536_v55 }
 0x816   : > { %v2243_v22 = vpop.xlane.xlu1 %2242 }
 0x81b   : > { %2521 = vrot.lane.b32.xlu0 %v11090_v7, %s10545_s13 }
 0x81e   : > { %v8693_v35 = vpop.f32.mrb[40].mxu0 }
 0x81f   : > { %v1493_v27 = vpop.f32.mrb[41].mxu0 }
 0x820   : > { %v8694_v21 = vpop.f32.mrb[42].mxu0 }
 0x821   : > { %v11540_v20 = vpack.c.bf16 %v8694_v21, %v8693_v35  ;;  %v1496_v37 = vpop.f32.mrb[43].mxu0 }
 0x822   : > { %2519 = vrot.lane.b32.xlu1 %v11080_v45, %s10545_s13  ;;  %v11546_v25 = vpack.c.bf16 %v1496_v37, %v1493_v27  ;;  %v2261_v37 = vsub.f32 %v11360_v59, %v2235_v60  ;;  %v2264_v60 = vsub.f32 %v11366_v1, %v2241_v15  ;;  %v2265_v15 = vsub.f32 %v11370_v13, %v2243_v22 }
 0x823   : > { %14809 = vst [vmem:[#allocation45_spill] sm:$0xff] %v11540_v20 }
 0x824   : > { %14811 = vst [vmem:[#allocation47_spill] sm:$0xff] %v11546_v25 }
 0x826   : > { %v2237_v6 = vpop.xlane.xlu0 %2236 }
 0x827   : > { %v2262_v3 = vsub.f32 %v11353_v58, %v2237_v6 }
 0x829   : > { %v2284_v24 = vmul.f32 1.442695, %v2262_v3  ;;  %v2249_v3 = vpop.xlane.xlu1 %2248 }
 0x82a   : > { %v2233_v52 = vpop.xlane.xlu0 %2232 }
 0x82b   : > { %v2260_v55 = vsub.f32 %v11356_v26, %v2233_v52  ;;  %9902 = vpow2.f32 %v2284_v24  ;;  %v2282_v52 = vmul.f32 1.442695, %v2261_v37  ;;  %v2266_v24 = vsub.f32 %v11363_v46, %v2245_v48 }
 0x82c   : > { %v2288_v46 = vmul.f32 1.442695, %v2264_v60 }
 0x82d   : > { %v2280_v21 = vmul.f32 1.442695, %v2260_v55  ;;  %v2292_v59 = vmul.f32 1.442695, %v2266_v24 }
 0x82e   : > { %v2239_v18 = vpop.xlane.xlu0 %2238  ;;  %v8697_v35 = vpop.f32.mrb[44].mxu0 }
 0x82f   : > { %v2263_v20 = vsub.f32 %v11358_v29, %v2239_v18  ;;  %v1509_v16 = vpop.f32.mrb[45].mxu0  ;;  %9904 = vpow2.f32 %v2280_v21  ;;  %v2268_v29 = vsub.f32 %v11376_v41, %v2249_v3  ;;  %v2267_v41 = vsub.f32 %v11368_v11, %v2247_v5 }
 0x830   : > { %v8698_v9 = vpop.f32.mrb[46].mxu0  ;;  %v2290_v11 = vmul.f32 1.442695, %v2265_v15 }
 0x831   : > { %v11551_v30 = vpack.c.bf16 %v8698_v9, %v8697_v35  ;;  %v1512_v27 = vpop.f32.mrb[47].mxu0  ;;  %v2286_v6 = vmul.f32 1.442695, %v2263_v20  ;;  %v2296_v20 = vmul.f32 1.442695, %v2268_v29 }
 0x832   : > { %v2253_v25 = vpop.xlane.xlu0 %2252  ;;  %v11554_v58 = vpack.c.bf16 %v1512_v27, %v1509_v16  ;;  %v2294_v1 = vmul.f32 1.442695, %v2267_v41 }
 0x833   : > { %v2270_v26 = vsub.f32 %v11373_v39, %v2253_v25  ;;  %9906 = vpow2.f32 %v2286_v6 }
 0x834   : > { %9908 = vpow2.f32 %v2282_v52 }
 0x835   : > { %v2300_v18 = vmul.f32 1.442695, %v2270_v26  ;;  %v11559_v55 = vpop.eup %9902 }
 0x836   : > { %v2255_v9 = vpop.xlane.xlu0 %2254 }
 0x837   : > { %9910 = vpow2.f32 %v2300_v18  ;;  %v2271_v39 = vsub.f32 %v11378_v47, %v2255_v9 }
 0x838   : > { %9912 = vpow2.f32 %v2292_v59 }
 0x839   : > { %v11564_v16 = vpop.eup %9904  ;;  %9914 = vpow2.f32 %v2296_v20  ;;  %v2302_v48 = vmul.f32 1.442695, %v2271_v39 }
 0x83a   : > { %2316 = vadd.xlane.f32.xlu0 %v11559_v55  ;;  %9916 = vpow2.f32 %v2288_v46  ;;  %v2251_v35 = vpop.xlane.xlu0 %2250 }
 0x83b   : > { %9918 = vpow2.f32 %v2302_v48  ;;  %v2269_v5 = vsub.f32 %v11380_v43, %v2251_v35 }
 0x83c   : > { %9920 = vpow2.f32 %v2294_v1 }
 0x83d   : > { %v11568_v25 = vpop.eup %9906  ;;  %9922 = vpow2.f32 %v2290_v11  ;;  %v2298_v13 = vmul.f32 1.442695, %v2269_v5 }
 0x83e   : > { %2312 = vadd.xlane.f32.xlu0 %v11564_v16  ;;  %v11572_v47 = vpop.eup %9908 }
 0x83f   : > { %9924 = vpow2.f32 %v2298_v13 }
 0x841   : > { %v11574_v21 = vpop.eup %9910 }
 0x842   : > { %2318 = vadd.xlane.f32.xlu0 %v11568_v25  ;;  %v11579_v27 = vpop.eup %9912 }
 0x843   : > { %v11581_v37 = vpop.eup %9914 }
 0x844   : > { %v11585_v22 = vpop.eup %9916 }
 0x845   : > { %v11587_v6 = vpop.eup %9918 }
 0x846   : > { %2314 = vadd.xlane.f32.xlu1 %v11572_v47  ;;  %2332 = vadd.xlane.f32.xlu0 %v11574_v21  ;;  %v11591_v43 = vpop.eup %9920 }
 0x847   : > { %v11594_v26 = vpop.eup %9922 }
 0x849   : > { %v11597_v3 = vpop.eup %9924 }
 0x84a   : > { %2324 = vadd.xlane.f32.xlu1 %v11579_v27  ;;  %2328 = vadd.xlane.f32.xlu0 %v11581_v37 }
 0x84e   : > { %2320 = vadd.xlane.f32.xlu1 %v11585_v22  ;;  %2334 = vadd.xlane.f32.xlu0 %v11587_v6 }
 0x852   : > { %2326 = vadd.xlane.f32.xlu1 %v11591_v43 }
 0x856   : > { %2322 = vadd.xlane.f32.xlu1 %v11594_v26 }
 0x85a   : > { %2330 = vadd.xlane.f32.xlu1 %v11597_v3 }
 0x864   : > { %2525 = vrot.lane.b32.xlu0 %v11102_v40, %s10545_s13 }
 0x868   : > { %2527 = vrot.lane.b32.xlu0 %v11097_v19, %s10545_s13 }
 0x86b   : > { %2523 = vrot.lane.b32.xlu1 %v11088_v63, %s10545_s13 }
 0x86c   : > { %2497 = vrot.lane.b32.xlu0 %v11074_v53, %s10546_s14 }
 0x86e   : > { %v1827_v52 = vpop.xlane.xlu1 %1826 }
 0x86f   : > { %2499 = vrot.lane.b32.xlu1 %v11072_v36, %s10546_s14 }
 0x870   : > { %2501 = vrot.lane.b32.xlu0 %v11082_v0, %s10546_s14 }
 0x872   : > { %v1823_v24 = vpop.xlane.xlu1 %1822  ;;  %v1825_v29 = vpop.xlane.xlu0 %1824 }
 0x873   : > { %9926 = vrcp.f32 %v1823_v24  ;;  %2503 = vrot.lane.b32.xlu1 %v11080_v45, %s10546_s14 }
 0x874   : > { %9928 = vrcp.f32 %v1825_v29  ;;  %2505 = vrot.lane.b32.xlu0 %v11090_v7, %s10546_s14 }
 0x875   : > { %9930 = vrcp.f32 %v1827_v52 }
 0x876   : > { %v1829_v18 = vpop.xlane.xlu1 %1828  ;;  %v1837_v41 = vpop.xlane.xlu0 %1836 }
 0x877   : > { %9932 = vrcp.f32 %v1829_v18  ;;  %2507 = vrot.lane.b32.xlu1 %v11088_v63, %s10546_s14 }
 0x878   : > { %2509 = vrot.lane.b32.xlu0 %v11102_v40, %s10546_s14 }
 0x87a   : > { %v1835_v9 = vpop.xlane.xlu1 %1834 }
 0x87b   : > { %2511 = vrot.lane.b32.xlu1 %v11097_v19, %s10546_s14  ;;  %9934 = vrcp.f32 %v1835_v9 }
 0x87c   : > { %2860 = vrot.lane.b32.xlu0 %v11072_v36, %s10547_s15 }
 0x87d   : > { %v9927_v59 = vpop.eup %9926 }
 0x87e   : > { %v9929_v60 = vpop.eup %9928  ;;  %v1831_v20 = vpop.xlane.xlu1 %1830  ;;  %v1870_v39 = vmul.f32 %v9927_v59, %v11462_v10 }
 0x87f   : > { %v9931_v46 = vpop.eup %9930  ;;  %2858 = vrot.lane.b32.xlu1 %v11074_v53, %s10547_s15  ;;  %v1871_v48 = vmul.f32 %v9929_v60, %v11464_v12  ;;  %9936 = vrcp.f32 %v1831_v20  ;;  %v1843_v5 = vpop.xlane.xlu0 %1842 }
 0x880   : > { %2864 = vrot.lane.b32.xlu0 %v11080_v45, %s10547_s15  ;;  %v1872_v35 = vmul.f32 %v9931_v46, %v11457_v17  ;;  %9938 = vrcp.f32 %v1837_v41 }
 0x881   : > { %v9933_v1 = vpop.eup %9932  ;;  %v1886_v15 = vpack.c.bf16 %v1871_v48, %v1870_v39 }
 0x882   : > { %v1873_v11 = vmul.f32 %v9933_v1, %v11469_v23  ;;  %v1833_v10 = vpop.xlane.xlu1 %1832 }
 0x883   : > { %9940 = vrcp.f32 %v1833_v10  ;;  %8747 = vmatprep.mubr.bf16.mxu0 %v1886_v15  ;;  %2862 = vrot.lane.b32.xlu1 %v11082_v0, %s10547_s15  ;;  %v14812_v10 = vld [vmem:[#allocation38_spill] sm:$0xff] }
 0x884   : > { %v1887_v12 = vpack.c.bf16 %v1873_v11, %v1872_v35 }
 0x885   : > { %v9935_v17 = vpop.eup %9934 }
 0x886   : > { %v1839_v13 = vpop.xlane.xlu1 %1838  ;;  %8748 = vmatmul.mubr.bf16.vlgmr.msra.gmra.mrb[48].mxu0 %v1887_v12  ;;  %v1851_v52 = vpop.xlane.xlu0 %1850  ;;  %v1876_v20 = vmul.f32 %v9935_v17, %v11477_v54 }
 0x887   : > { %8796 = vmatpush3.bf16.msra.mxu0 %v11421_v61  ;;  %2866 = vrot.lane.b32.xlu1 %v11090_v7, %s10547_s15  ;;  %9942 = vrcp.f32 %v1839_v13 }
 0x888   : > { %8797 = vmatprep.subr.bf16.mxu0 %v11434_v32 }
 0x889   : > { %v9937_v24 = vpop.eup %9936 }
 0x88a   : > { %v1845_v23 = vpop.xlane.xlu1 %1844  ;;  %v9939_v29 = vpop.eup %9938  ;;  %v1874_v59 = vmul.f32 %v9937_v24, %v11483_v51  ;;  %v14814_v24 = vld [vmem:[#allocation36_spill] sm:$0xff] }
 0x88b   : > { %8798 = vmatpush3.bf16.msra.mxu0 %v11434_v32  ;;  %2868 = vrot.lane.b32.xlu1 %v11088_v63, %s10547_s15  ;;  %9944 = vrcp.f32 %v1845_v23  ;;  %v1847_v61 = vpop.xlane.xlu0 %1846  ;;  %v1877_v39 = vmul.f32 %v9939_v29, %v11471_v57 }
 0x88c   : > { %8799 = vmatprep.subr.bf16.mxu0 %v11425_v31  ;;  %9946 = vrcp.f32 %v1843_v5 }
 0x88d   : > { %v9941_v18 = vpop.eup %9940  ;;  %v1889_v41 = vpack.c.bf16 %v1877_v39, %v1876_v20  ;;  %v14816_v39 = vld [vmem:[#allocation39_spill] sm:$0xff] }
 0x88e   : > { %v1841_v9 = vpop.xlane.xlu1 %1840  ;;  %v1875_v60 = vmul.f32 %v9941_v18, %v11491_v42 }
 0x88f   : > { %9948 = vrcp.f32 %v1841_v9  ;;  %8800 = vmatpush3.bf16.msra.mxu0 %v11425_v31  ;;  %2870 = vrot.lane.b32.xlu1 %v11102_v40, %s10547_s15  ;;  %v2309_v48 = vpop.xlane.xlu0 %2308 }
 0x890   : > { %8801 = vmatprep.subr.bf16.mxu0 %v11438_v28  ;;  %v1888_v32 = vpack.c.bf16 %v1875_v60, %v1874_v59  ;;  %9950 = vrcp.f32 %v1847_v61 }
 0x891   : > { %v9943_v31 = vpop.eup %9942 }
 0x892   : > { %v1853_v46 = vpop.xlane.xlu1 %1852  ;;  %8751 = vmatprep.mubr.bf16.mxu0 %v1888_v32  ;;  %v1878_v15 = vmul.f32 %v9943_v31, %v11495_v34  ;;  %v14817_v31 = vld [vmem:[#allocation37_spill] sm:$0xff] }
 0x893   : > { %8802 = vmatpush3.bf16.msra.mxu0 %v11438_v28  ;;  %2872 = vrot.lane.b32.xlu1 %v11097_v19, %s10547_s15  ;;  %9952 = vrcp.f32 %v1853_v46  ;;  %v2305_v28 = vpop.xlane.xlu0 %2304 }
 0x894   : > { %8752 = vmatmul.mubr.bf16.gmra.mrb[52].mxu0 %v1889_v41  ;;  %8803 = vmatprep.subr.bf16.mxu0 %v11440_v62  ;;  %9954 = vrcp.f32 %v1851_v52 }
 0x895   : > { %v9945_v51 = vpop.eup %9944 }
 0x896   : > { %v1849_v54 = vpop.xlane.xlu1 %1848  ;;  %v9947_v57 = vpop.eup %9946  ;;  %v1881_v11 = vmul.f32 %v9945_v51, %v11502_v56  ;;  %v14813_v56 = vld [vmem:[#allocation35_spill] sm:$0xff] }
 0x897   : > { %9956 = vrcp.f32 %v1849_v54  ;;  %8804 = vmatpush3.bf16.msra.mxu0 %v11440_v62  ;;  %v1880_v62 = vmul.f32 %v9947_v57, %v11485_v4  ;;  %v2522_v57 = vpop.permute.xlu0 %2521 }
 0x898   : > { %8805 = vmatprep.subr.bf16.mxu0 %v11442_v38  ;;  %9958 = vrcp.f32 %v2305_v28 }
 0x899   : > { %v9949_v42 = vpop.eup %9948  ;;  %v1891_v52 = vpack.c.bf16 %v1881_v11, %v1880_v62 }
 0x89a   : > { %v2311_v1 = vpop.xlane.xlu1 %2310  ;;  %v1879_v35 = vmul.f32 %v9949_v42, %v11509_v49  ;;  %v9951_v12 = vpop.eup %9950 }
 0x89b   : > { %8806 = vmatpush3.bf16.msra.mxu0 %v11442_v38  ;;  %9960 = vrcp.f32 %v2311_v1  ;;  %v1882_v49 = vmul.f32 %v9951_v12, %v11504_v50 }
 0x89c   : > { %8807 = vmatprep.subr.bf16.mxu0 %v14812_v10  ;;  %v1890_v5 = vpack.c.bf16 %v1879_v35, %v1878_v15  ;;  %9962 = vrcp.f32 %v2309_v48  ;;  %v2566_v35 = vsel %vm1564_vm3, %v2522_v57, 0 }
 0x89d   : > { %v9953_v17 = vpop.eup %9952 }
 0x89e   : > { %v2307_v13 = vpop.xlane.xlu1 %2306  ;;  %8755 = vmatprep.mubr.bf16.mxu0 %v1890_v5  ;;  %v9955_v34 = vpop.eup %9954  ;;  %v1885_v4 = vmul.f32 %v9953_v17, %v11519_v14  ;;  %v14815_v14 = vld [vmem:[#allocation42_spill] sm:$0xff] }
 0x89f   : > { %9964 = vrcp.f32 %v2307_v13  ;;  %8808 = vmatpush3.bf16.msra.mxu0 %v14812_v10  ;;  %v1884_v18 = vmul.f32 %v9955_v34, %v11497_v2  ;;  %v2554_v2 = vsel %vm1564_vm3, %v14814_v24, 0 }
 0x8a0   : > { %8756 = vmatmul.mubr.bf16.gmra.mrb[56].mxu0 %v1891_v52  ;;  %8809 = vmatprep.subr.bf16.mxu0 %v14813_v56 }
 0x8a1   : > { %v9957_v38 = vpop.eup %9956  ;;  %v1893_v9 = vpack.c.bf16 %v1885_v4, %v1884_v18 }
 0x8a2   : > { %v1883_v23 = vmul.f32 %v9957_v38, %v11525_v33  ;;  %v9959_v61 = vpop.eup %9958  ;;  %v2520_v51 = vpop.permute.xlu1 %2519 }
 0x8a3   : > { %8810 = vmatpush3.bf16.msra.mxu0 %v14813_v56  ;;  %v2352_v33 = vmul.f32 %v9959_v61, %v11521_v44  ;;  %v14818_v44 = vld [vmem:[#allocation46_spill] sm:$0xff]  ;;  %v2563_v28 = vsel %vm1564_vm3, %v2520_v51, 0 }
 0x8a4   : > { %9411 = vmatprep.subr.msk.bf16.mxu0 %vm1564_vm3, %v14814_v24  ;;  %v1892_v29 = vpack.c.bf16 %v1883_v23, %v1882_v49  ;;  %v2560_v54 = vsel %vm1564_vm3, %v14818_v44, 0 }
 0x8a5   : > { %v9961_v59 = vpop.eup %9960 }
 0x8a6   : > { %8759 = vmatprep.mubr.bf16.mxu0 %v1892_v29  ;;  %v9963_v60 = vpop.eup %9962  ;;  %v2355_v50 = vmul.f32 %v9961_v59, %v11528_v8  ;;  %v2557_v8 = vsel %vm1564_vm3, %v14817_v31, 0 }
 0x8a7   : > { %v2354_v46 = vmul.f32 %v9963_v60, %v14816_v39 }
 0x8a8   : > { %8760 = vmatmul.mubr.bf16.gmra.mrb[60].mxu0 %v1893_v9 }
 0x8a9   : > { %v9965_v20 = vpop.eup %9964  ;;  %v2369_v48 = vpack.c.bf16 %v2355_v50, %v2354_v46 }
 0x8aa   : > { %v2353_v32 = vmul.f32 %v9965_v20, %v14815_v14 }
 0x8ac   : > { %v2368_v41 = vpack.c.bf16 %v2353_v32, %v2352_v33 }
 0x8ae   : > { %8811 = vmatprep.mubr.bf16.mxu0 %v2368_v41 }
 0x8b0   : > { %8812 = vmatmul.mubr.bf16.vlgmr.msra.gmra.mrb[64].mxu0 %v2369_v48 }
 0x8b1   : > { %8828 = vmatpush3.bf16.xpose.msra.mxu0 %v2554_v2 }
 0x8b2   : > { %9412 = vmatprep.subr.msk.bf16.mxu0 %vm1564_vm3, %v14817_v31 }
 0x8b9   : > { %8830 = vmatpush3.bf16.xpose.msra.mxu0 %v2557_v8 }
 0x8ba   : > { %9413 = vmatprep.subr.msk.bf16.mxu0 %vm1564_vm3, %v14818_v44 }
 0x8c1   : > { %8832 = vmatpush3.bf16.xpose.msra.mxu0 %v2560_v54 }
 0x8c2   : > { %9414 = vmatprep.subr.msk.bf16.mxu0 %vm1564_vm3, %v2520_v51 }
 0x8c7   : > { %v2317_v42 = vpop.xlane.xlu0 %2316 }
 0x8c9   : > { %8834 = vmatpush3.bf16.xpose.msra.mxu0 %v2563_v28 }
 0x8ca   : > { %9415 = vmatprep.subr.msk.bf16.mxu0 %vm1564_vm3, %v2522_v57 }
 0x8cb   : > { %v2313_v1 = vpop.xlane.xlu0 %2312 }
 0x8cf   : > { %v2319_v15 = vpop.xlane.xlu0 %2318 }
 0x8d0   : > { %9966 = vrcp.f32 %v2319_v15 }
 0x8d1   : > { %8836 = vmatpush3.bf16.xpose.msra.mxu0 %v2566_v35  ;;  %9968 = vrcp.f32 %v2313_v1 }
 0x8d2   : > { %9970 = vrcp.f32 %v2317_v42 }
 0x8d3   : > { %v2315_v11 = vpop.xlane.xlu1 %2314  ;;  %v2333_v10 = vpop.xlane.xlu0 %2332 }
 0x8d4   : > { %9972 = vrcp.f32 %v2315_v11 }
 0x8d7   : > { %v2325_v5 = vpop.xlane.xlu1 %2324  ;;  %v2329_v62 = vpop.xlane.xlu0 %2328 }
 0x8da   : > { %v9967_v12 = vpop.eup %9966 }
 0x8db   : > { %v2321_v13 = vpop.xlane.xlu1 %2320  ;;  %v2335_v52 = vpop.xlane.xlu0 %2334  ;;  %v2359_v38 = vmul.f32 %v9967_v12, %v11568_v25 }
 0x8dc   : > { %v9969_v17 = vpop.eup %9968 }
 0x8dd   : > { %v9971_v34 = vpop.eup %9970  ;;  %v2356_v4 = vmul.f32 %v9969_v17, %v11564_v16 }
 0x8de   : > { %v9973_v56 = vpop.eup %9972  ;;  %v2358_v29 = vmul.f32 %v9971_v34, %v11559_v55 }
 0x8df   : > { %v2327_v49 = vpop.xlane.xlu1 %2326  ;;  %v2526_v23 = vpop.permute.xlu0 %2525  ;;  %v2357_v24 = vmul.f32 %v9973_v56, %v11572_v47 }
 0x8e0   : > { %9974 = vrcp.f32 %v2327_v49  ;;  %v2371_v61 = vpack.c.bf16 %v2359_v38, %v2358_v29 }
 0x8e1   : > { %v2370_v18 = vpack.c.bf16 %v2357_v24, %v2356_v4  ;;  %9976 = vrcp.f32 %v2321_v13 }
 0x8e2   : > { %9978 = vrcp.f32 %v2325_v5 }
 0x8e3   : > { %v2323_v9 = vpop.xlane.xlu1 %2322  ;;  %8815 = vmatprep.mubr.bf16.mxu0 %v2370_v18  ;;  %v2528_v59 = vpop.permute.xlu0 %2527 }
 0x8e4   : > { %9980 = vrcp.f32 %v2323_v9  ;;  %8816 = vmatmul.mubr.bf16.gmra.mrb[68].mxu0 %v2371_v61 }
 0x8e5   : > { %9982 = vrcp.f32 %v2329_v62 }
 0x8e7   : > { %v2331_v25 = vpop.xlane.xlu1 %2330  ;;  %v2498_v60 = vpop.permute.xlu0 %2497 }
 0x8e8   : > { %9984 = vrcp.f32 %v2331_v25 }
 0x8e9   : > { %9986 = vrcp.f32 %v2335_v52 }
 0x8ea   : > { %v9975_v16 = vpop.eup %9974  ;;  %9988 = vrcp.f32 %v2333_v10 }
 0x8eb   : > { %v2524_v47 = vpop.permute.xlu1 %2523  ;;  %v9977_v20 = vpop.eup %9976  ;;  %v2363_v14 = vmul.f32 %v9975_v16, %v11591_v43  ;;  %v2572_v43 = vsel %vm1564_vm3, %v2526_v23, 0 }
 0x8ec   : > { %9416 = vmatprep.subr.msk.bf16.mxu0 %vm1564_vm3, %v2524_v47  ;;  %v2569_v55 = vsel %vm1564_vm3, %v2524_v47, 0  ;;  %v9979_v50 = vpop.eup %9978  ;;  %v2502_v32 = vpop.permute.xlu0 %2501  ;;  %v2360_v46 = vmul.f32 %v9977_v20, %v11585_v22 }
 0x8ed   : > { %8838 = vmatpush3.bf16.xpose.msra.mxu0 %v2569_v55  ;;  %v2362_v2 = vmul.f32 %v9979_v50, %v11579_v27 }
 0x8ee   : > { %v9981_v33 = vpop.eup %9980  ;;  %9417 = vmatprep.subr.msk.bf16.mxu0 %vm1564_vm3, %v2526_v23 }
 0x8ef   : > { %v2500_v39 = vpop.permute.xlu1 %2499  ;;  %v2361_v41 = vmul.f32 %v9981_v33, %v11594_v26  ;;  %v9983_v48 = vpop.eup %9982  ;;  %v2373_v44 = vpack.c.bf16 %v2363_v14, %v2362_v2 }
 0x8f0   : > { %v2364_v57 = vmul.f32 %v9983_v48, %v11581_v37  ;;  %v2506_v22 = vpop.permute.xlu0 %2505 }
 0x8f1   : > { %v2372_v31 = vpack.c.bf16 %v2361_v41, %v2360_v46 }
 0x8f2   : > { %v9985_v8 = vpop.eup %9984 }
 0x8f3   : > { %v9987_v54 = vpop.eup %9986  ;;  %v2504_v51 = vpop.permute.xlu1 %2503  ;;  %8819 = vmatprep.mubr.bf16.mxu0 %v2372_v31  ;;  %v2365_v42 = vmul.f32 %v9985_v8, %v11597_v3  ;;  %v2575_v3 = vsel %vm1564_vm3, %v2528_v59, 0 }
 0x8f4   : > { %8820 = vmatmul.mubr.bf16.gmra.mrb[72].mxu0 %v2373_v44  ;;  %v9989_v28 = vpop.eup %9988  ;;  %v2367_v27 = vmul.f32 %v9987_v54, %v11587_v6  ;;  %v2510_v11 = vpop.permute.xlu0 %2509 }
 0x8f5   : > { %8840 = vmatpush3.bf16.xpose.msra.mxu0 %v2572_v43  ;;  %v2374_v26 = vpack.c.bf16 %v2365_v42, %v2364_v57  ;;  %v2366_v15 = vmul.f32 %v9989_v28, %v11574_v21 }
 0x8f6   : > { %9418 = vmatprep.subr.msk.bf16.mxu0 %vm1564_vm3, %v2528_v59 }
 0x8f7   : > { %v2508_v1 = vpop.permute.xlu1 %2507  ;;  %8823 = vmatprep.mubr.bf16.mxu0 %v2374_v26  ;;  %v2375_v35 = vpack.c.bf16 %v2367_v27, %v2366_v15 }
 0x8f8   : > { %v2861_v5 = vpop.permute.xlu0 %2860 }
 0x8fb   : > { %v2512_v37 = vpop.permute.xlu1 %2511 }
 0x8fc   : > { %8824 = vmatmul.mubr.bf16.gmra.mrb[76].mxu0 %v2375_v35  ;;  %v2865_v6 = vpop.permute.xlu0 %2864 }
 0x8fd   : > { %8842 = vmatpush3.bf16.xpose.msra.mxu0 %v2575_v3  ;;  %8843 = vmatprep.mubr.msk.bf16.mxu0 %vm1564_vm3, %v2498_v60 }
 0x8ff   : > { %v2859_v10 = vpop.permute.xlu1 %2858 }
 0x900   : > { %8859 = vmatprep.subr.bf16.mxu1 %v2859_v10 }
 0x901   : > { %8860 = vmatpush3.bf16.msra.mxu1 %v2859_v10 }
 0x902   : > { %8861 = vmatprep.subr.bf16.mxu1 %v2861_v5 }
 0x903   : > { %v2863_v62 = vpop.permute.xlu1 %2862 }
 0x904   : > { %8844 = vmatmul.mubr.msk.bf16.vlgmr.msra.gmra.mrb[80].mxu0 %vm1564_vm3, %v2500_v39 }
 0x905   : > { %8847 = vmatprep.mubr.msk.bf16.mxu0 %vm1564_vm3, %v2502_v32  ;;  %8862 = vmatpush3.bf16.msra.mxu1 %v2861_v5 }
 0x906   : > { %8863 = vmatprep.subr.bf16.mxu1 %v2863_v62 }
 0x907   : > { %v2867_v21 = vpop.permute.xlu1 %2866 }
 0x909   : > { %8864 = vmatpush3.bf16.msra.mxu1 %v2863_v62 }
 0x90a   : > { %8865 = vmatprep.subr.bf16.mxu1 %v2865_v6 }
 0x90b   : > { %v2869_v12 = vpop.permute.xlu1 %2868 }
 0x90c   : > { %8848 = vmatmul.mubr.msk.bf16.gmra.mrb[84].mxu0 %vm1564_vm3, %v2504_v51 }
 0x90d   : > { %8851 = vmatprep.mubr.msk.bf16.mxu0 %vm1564_vm3, %v2506_v22  ;;  %8866 = vmatpush3.bf16.msra.mxu1 %v2865_v6 }
 0x90e   : > { %8867 = vmatprep.subr.bf16.mxu1 %v2867_v21 }
 0x90f   : > { %v2871_v13 = vpop.permute.xlu1 %2870 }
 0x911   : > { %8868 = vmatpush3.bf16.msra.mxu1 %v2867_v21 }
 0x912   : > { %8869 = vmatprep.subr.bf16.mxu1 %v2869_v12 }
 0x913   : > { %v2873_v52 = vpop.permute.xlu1 %2872 }
 0x914   : > { %8852 = vmatmul.mubr.msk.bf16.gmra.mrb[88].mxu0 %vm1564_vm3, %v2508_v1 }
 0x915   : > { %8855 = vmatprep.mubr.msk.bf16.mxu0 %vm1564_vm3, %v2510_v11  ;;  %8870 = vmatpush3.bf16.msra.mxu1 %v2869_v12 }
 0x916   : > { %8871 = vmatprep.subr.bf16.mxu1 %v2871_v13 }
 0x919   : > { %8872 = vmatpush3.bf16.msra.mxu1 %v2871_v13 }
 0x91a   : > { %8873 = vmatprep.subr.bf16.mxu1 %v2873_v52 }
 0x91c   : > { %8856 = vmatmul.mubr.msk.bf16.gmra.mrb[92].mxu0 %vm1564_vm3, %v2512_v37 }
 0x91d   : > { %8874 = vmatpush3.bf16.msra.mxu1 %v2873_v52 }
 0x959   : > { %v11715_v17 = vpop.f32.mrb[48].mxu0 }
 0x95a   : > { %14819 = vst [vmem:[#allocation38_spill] sm:$0xff] %v11715_v17  ;;  %v11717_v34 = vpop.f32.mrb[49].mxu0 }
 0x95b   : > { %14820 = vst [vmem:[#allocation35_spill] sm:$0xff] %v11717_v34  ;;  %v11719_v56 = vpop.f32.mrb[50].mxu0 }
 0x95c   : > { %14821 = vst [vmem:[#allocation36_spill] sm:$0xff] %v11719_v56  ;;  %v11721_v38 = vpop.f32.mrb[51].mxu0 }
 0x95d   : > { %14822 = vst [vmem:[#allocation42_spill] sm:$0xff] %v11721_v38 }
 0x967   : > { %v11723_v49 = vpop.f32.mrb[52].mxu0 }
 0x968   : > { %14823 = vst [vmem:[#allocation39_spill] sm:$0xff] %v11723_v49  ;;  %v11725_v23 = vpop.f32.mrb[53].mxu0 }
 0x969   : > { %14824 = vst [vmem:[#allocation37_spill] sm:$0xff] %v11725_v23  ;;  %v11727_v4 = vpop.f32.mrb[54].mxu0 }
 0x96a   : > { %14825 = vst [vmem:[#allocation46_spill] sm:$0xff] %v11727_v4  ;;  %v11729_v24 = vpop.f32.mrb[55].mxu0 }
 0x96b   : > { %14826 = vst [vmem:[#allocation48_spill] sm:$0xff] %v11729_v24 }
 0x973   : > { %v11731_v29 = vpop.f32.mrb[56].mxu0 }
 0x974   : > { %14827 = vst [vmem:[#allocation49_spill] sm:$0xff] %v11731_v29  ;;  %v11733_v18 = vpop.f32.mrb[57].mxu0 }
 0x975   : > { %14828 = vst [vmem:[#allocation50_spill] sm:$0xff] %v11733_v18  ;;  %v11735_v61 = vpop.f32.mrb[58].mxu0 }
 0x976   : > { %14829 = vst [vmem:[#allocation51_spill] sm:$0xff] %v11735_v61  ;;  %v11737_v9 = vpop.f32.mrb[59].mxu0 }
 0x977   : > { %14830 = vst [vmem:[#allocation52_spill] sm:$0xff] %v11737_v9 }
 0x97b   : > { %v11739_v59 = vpop.f32.mrb[60].mxu0 }
 0x97c   : > { %14831 = vst [vmem:[#allocation53_spill] sm:$0xff] %v11739_v59  ;;  %v11741_v25 = vpop.f32.mrb[61].mxu0 }
 0x97d   : > { %14832 = vst [vmem:[#allocation54_spill] sm:$0xff] %v11741_v25  ;;  %v11743_v60 = vpop.f32.mrb[62].mxu0 }
 0x97e   : > { %14833 = vst [vmem:[#allocation55_spill] sm:$0xff] %v11743_v60  ;;  %v11745_v16 = vpop.f32.mrb[63].mxu0 }
 0x97f   : > { %14834 = vst [vmem:[#allocation56_spill] sm:$0xff] %v11745_v16 }
 0x983   : > { %v11747_v47 = vpop.f32.mrb[64].mxu0 }
 0x984   : > { %v11749_v20 = vpop.f32.mrb[65].mxu0 }
 0x985   : > { %v11751_v55 = vpop.f32.mrb[66].mxu0 }
 0x986   : > { %v11755_v33 = vpop.f32.mrb[67].mxu0 }
 0x9b7   : > { %v11759_v32 = vpop.f32.mrb[68].mxu0 }
 0x9b8   : > { %14835 = vst [vmem:[#allocation57_spill] sm:$0xff] %v11759_v32  ;;  %v11761_v39 = vpop.f32.mrb[69].mxu0 }
 0x9b9   : > { %v11763_v46 = vpop.f32.mrb[70].mxu0 }
 0x9ba   : > { %14836 = vst [vmem:[#allocation58_spill] sm:$0xff] %v11763_v46  ;;  %v11767_v48 = vpop.f32.mrb[71].mxu0 }
 0x9c7   : > { %v11771_v31 = vpop.f32.mrb[72].mxu0 }
 0x9c8   : > { %14837 = vst [vmem:[#allocation59_spill] sm:$0xff] %v11771_v31  ;;  %v11773_v8 = vpop.f32.mrb[73].mxu0 }
 0x9c9   : > { %v11775_v44 = vpop.f32.mrb[74].mxu0 }
 0x9ca   : > { %14838 = vst [vmem:[#allocation60_spill] sm:$0xff] %v11775_v44  ;;  %v11779_v51 = vpop.f32.mrb[75].mxu0 }
 0x9cf   : > { %v11783_v42 = vpop.f32.mrb[76].mxu0 }
 0x9d0   : > { %14839 = vst [vmem:[#allocation61_spill] sm:$0xff] %v11783_v42  ;;  %v11785_v43 = vpop.f32.mrb[77].mxu0 }
 0x9d1   : > { %v11787_v28 = vpop.f32.mrb[78].mxu0 }
 0x9d2   : > { %14840 = vst [vmem:[#allocation62_spill] sm:$0xff] %v11787_v28  ;;  %v11791_v26 = vpop.f32.mrb[79].mxu0 }
 0x9d7   : > { %v8845_v1 = vpop.f32.mrb[80].mxu0 }
 0x9d8   : > { %2710 = vmax.xlane.f32.xlu0 %v8845_v1  ;;  %v2611_v15 = vpop.f32.mrb[81].mxu0 }
 0x9d9   : > { %v8846_v35 = vpop.f32.mrb[82].mxu0 }
 0x9da   : > { %v2614_v11 = vpop.f32.mrb[83].mxu0 }
 0x9db   : > { %2708 = vmax.xlane.f32.xlu1 %v2614_v11 }
 0x9dc   : > { %2706 = vmax.xlane.f32.xlu0 %v2611_v15 }
 0x9df   : > { %v8849_v37 = vpop.f32.mrb[84].mxu0 }
 0x9e0   : > { %2712 = vmax.xlane.f32.xlu0 %v8846_v35  ;;  %v2627_v3 = vpop.f32.mrb[85].mxu0 }
 0x9e1   : > { %v11795_v10 = vpop.f32.mrb[86].mxu0 }
 0x9e2   : > { %v11797_v5 = vpop.f32.mrb[87].mxu0 }
 0x9e7   : > { %v11799_v62 = vpop.f32.mrb[88].mxu0 }
 0x9e8   : > { %v11801_v21 = vpop.f32.mrb[89].mxu0 }
 0x9e9   : > { %v11803_v6 = vpop.f32.mrb[90].mxu0 }
 0x9ea   : > { %v11805_v12 = vpop.f32.mrb[91].mxu0 }
 0x9ec   : > { %2997 = vrot.lane.b32.xlu1 %v11072_v36, %s10548_s16 }
 0x9ef   : > { %v11809_v13 = vpop.f32.mrb[92].mxu0 }
 0x9f0   : > { %v11811_v52 = vpop.f32.mrb[93].mxu0 }
 0x9f1   : > { %v11813_v22 = vpop.f32.mrb[94].mxu0 }
 0x9f2   : > { %v11815_v54 = vpop.f32.mrb[95].mxu0 }
 0x9f6   : > { %2995 = vrot.lane.b32.xlu0 %v11074_v53, %s10548_s16 }
 0xa10   : > { %2718 = vmax.xlane.f32.xlu1 %v8849_v37 }
 0xa14   : > { %2714 = vmax.xlane.f32.xlu1 %v2627_v3 }
 0xa15   : > { %2720 = vmax.xlane.f32.xlu0 %v11795_v10 }
 0xa18   : > { %2726 = vmax.xlane.f32.xlu1 %v11799_v62 }
 0xa19   : > { %2716 = vmax.xlane.f32.xlu0 %v11797_v5 }
 0xa1c   : > { %2722 = vmax.xlane.f32.xlu1 %v11801_v21 }
 0xa1d   : > { %2728 = vmax.xlane.f32.xlu0 %v11803_v6 }
 0xa20   : > { %2734 = vmax.xlane.f32.xlu1 %v11809_v13 }
 0xa21   : > { %2724 = vmax.xlane.f32.xlu0 %v11805_v12 }
 0xa24   : > { %2730 = vmax.xlane.f32.xlu1 %v11811_v52 }
 0xa25   : > { %2736 = vmax.xlane.f32.xlu0 %v11813_v22 }
 0xa29   : > { %2732 = vmax.xlane.f32.xlu0 %v11815_v54 }
 0xa35   : > { %2999 = vrot.lane.b32.xlu1 %v11082_v0, %s10548_s16 }
 0xa65   : > { %v2711_v41 = vpop.xlane.xlu0 %2710 }
 0xa66   : > { %v2740_v27 = vsub.f32 %v8845_v1, %v2711_v41 }
 0xa68   : > { %v2758_v57 = vmul.f32 1.442695, %v2740_v27  ;;  %v2709_v14 = vpop.xlane.xlu1 %2708 }
 0xa69   : > { %v2707_v2 = vpop.xlane.xlu0 %2706  ;;  %v2739_v29 = vsub.f32 %v2614_v11, %v2709_v14 }
 0xa6a   : > { %9990 = vpow2.f32 %v2758_v57  ;;  %v2738_v50 = vsub.f32 %v2611_v15, %v2707_v2 }
 0xa6b   : > { %v2756_v17 = vmul.f32 1.442695, %v2739_v29 }
 0xa6c   : > { %v2754_v59 = vmul.f32 1.442695, %v2738_v50 }
 0xa6d   : > { %v2713_v60 = vpop.xlane.xlu0 %2712 }
 0xa6e   : > { %9992 = vpow2.f32 %v2754_v59  ;;  %v2741_v61 = vsub.f32 %v8846_v35, %v2713_v60 }
 0xa70   : > { %v2760_v49 = vmul.f32 1.442695, %v2741_v61 }
 0xa71   : > { %v11831_v4 = vpop.permute.xlu0 %2995 }
 0xa72   : > { %9994 = vpow2.f32 %v2760_v49  ;;  %9419 = vmatprep.subr.msk.bf16.mxu1 %vm1564_vm3, %v11831_v4  ;;  %v11847_v49 = vpop.permute.xlu1 %2997 }
 0xa73   : > { %9996 = vpow2.f32 %v2756_v17 }
 0xa74   : > { %v11835_v56 = vpop.eup %9990 }
 0xa75   : > { %2790 = vadd.xlane.f32.xlu0 %v11835_v56 }
 0xa78   : > { %v11838_v41 = vpop.eup %9992 }
 0xa79   : > { %2786 = vadd.xlane.f32.xlu1 %v11838_v41 }
 0xa7c   : > { %v11841_v50 = vpop.eup %9994 }
 0xa7d   : > { %2792 = vadd.xlane.f32.xlu0 %v11841_v50  ;;  %v11844_v61 = vpop.eup %9996 }
 0xa81   : > { %2788 = vadd.xlane.f32.xlu0 %v11844_v61 }
 0xa9d   : > { %v2719_v29 = vpop.xlane.xlu1 %2718 }
 0xa9e   : > { %v2744_v59 = vsub.f32 %v8849_v37, %v2719_v29 }
 0xaa0   : > { %v2766_v60 = vmul.f32 1.442695, %v2744_v59 }
 0xaa1   : > { %v2715_v14 = vpop.xlane.xlu1 %2714 }
 0xaa2   : > { %9998 = vpow2.f32 %v2766_v60  ;;  %v2742_v17 = vsub.f32 %v2627_v3, %v2715_v14  ;;  %v2721_v2 = vpop.xlane.xlu0 %2720 }
 0xaa3   : > { %v2745_v57 = vsub.f32 %v11795_v10, %v2721_v2 }
 0xaa4   : > { %v2762_v27 = vmul.f32 1.442695, %v2742_v17 }
 0xaa5   : > { %v2768_v1 = vmul.f32 1.442695, %v2745_v57  ;;  %v2727_v14 = vpop.xlane.xlu1 %2726 }
 0xaa6   : > { %10000 = vpow2.f32 %v2762_v27  ;;  %v2717_v15 = vpop.xlane.xlu0 %2716  ;;  %v2748_v2 = vsub.f32 %v11799_v62, %v2727_v14 }
 0xaa7   : > { %v2743_v35 = vsub.f32 %v11797_v5, %v2717_v15  ;;  %10002 = vpow2.f32 %v2768_v1 }
 0xaa8   : > { %v2774_v1 = vmul.f32 1.442695, %v2748_v2 }
 0xaa9   : > { %v2764_v11 = vmul.f32 1.442695, %v2743_v35  ;;  %v2723_v57 = vpop.xlane.xlu1 %2722 }
 0xaaa   : > { %v2729_v5 = vpop.xlane.xlu0 %2728  ;;  %v2746_v15 = vsub.f32 %v11801_v21, %v2723_v57 }
 0xaab   : > { %10004 = vpow2.f32 %v2764_v11  ;;  %v2749_v11 = vsub.f32 %v11803_v6, %v2729_v5 }
 0xaac   : > { %v11851_v34 = vpop.eup %9998  ;;  %v2770_v35 = vmul.f32 1.442695, %v2746_v15 }
 0xaad   : > { %2798 = vadd.xlane.f32.xlu0 %v11851_v34  ;;  %v2735_v38 = vpop.xlane.xlu1 %2734  ;;  %v2776_v25 = vmul.f32 1.442695, %v2749_v11 }
 0xaae   : > { %v2725_v29 = vpop.xlane.xlu0 %2724 }
 0xaaf   : > { %v2747_v16 = vsub.f32 %v11805_v12, %v2725_v29 }
 0xab0   : > { %v11854_v37 = vpop.eup %10000 }
 0xab1   : > { %2794 = vadd.xlane.f32.xlu0 %v11854_v37  ;;  %v11857_v3 = vpop.eup %10002  ;;  %v2772_v62 = vmul.f32 1.442695, %v2747_v16 }
 0xab2   : > { %v2737_v59 = vpop.xlane.xlu0 %2736 }
 0xab5   : > { %v11859_v10 = vpop.eup %10004  ;;  %2800 = vadd.xlane.f32.xlu0 %v11857_v3 }
 0xab6   : > { %2796 = vadd.xlane.f32.xlu1 %v11859_v10  ;;  %v2733_v60 = vpop.xlane.xlu0 %2732 }
 0xab7   : > { %v2751_v17 = vsub.f32 %v11815_v54, %v2733_v60  ;;  %v2752_v54 = vsub.f32 %v11809_v13, %v2735_v38  ;;  %v2731_v60 = vpop.xlane.xlu1 %2730  ;;  %v2753_v38 = vsub.f32 %v11813_v22, %v2737_v59 }
 0xab8   : > { %v2750_v6 = vsub.f32 %v11811_v52, %v2731_v60 }
 0xab9   : > { %v2780_v27 = vmul.f32 1.442695, %v2751_v17  ;;  %v2782_v14 = vmul.f32 1.442695, %v2752_v54  ;;  %v2784_v12 = vmul.f32 1.442695, %v2753_v38 }
 0xaba   : > { %v3036_v38 = vsel %vm1564_vm3, %v11831_v4, 0 }
 0xabb   : > { %10006 = vpow2.f32 %v2780_v27  ;;  %v3000_v59 = vpop.permute.xlu1 %2999 }
 0xabc   : > { %10008 = vpow2.f32 %v2774_v1 }
 0xabd   : > { %10010 = vpow2.f32 %v2770_v35 }
 0xabe   : > { %10012 = vpow2.f32 %v2776_v25  ;;  %v2778_v25 = vmul.f32 1.442695, %v2750_v6 }
 0xabf   : > { %10014 = vpow2.f32 %v2772_v62 }
 0xac0   : > { %10016 = vpow2.f32 %v2782_v14 }
 0xac1   : > { %10018 = vpow2.f32 %v2778_v25 }
 0xac2   : > { %10020 = vpow2.f32 %v2784_v12 }
 0xac5   : > { %v11874_v18 = vpop.eup %10006 }
 0xac6   : > { %v11878_v21 = vpop.eup %10008 }
 0xac7   : > { %3001 = vrot.lane.b32.xlu1 %v11080_v45, %s10548_s16  ;;  %v11882_v5 = vpop.eup %10010 }
 0xac8   : > { %v11886_v16 = vpop.eup %10012 }
 0xac9   : > { %v11889_v13 = vpop.eup %10014 }
 0xaca   : > { %v11894_v52 = vpop.eup %10016 }
 0xacb   : > { %3003 = vrot.lane.b32.xlu0 %v11090_v7, %s10548_s16  ;;  %v11899_v22 = vpop.eup %10018 }
 0xacc   : > { %v11904_v29 = vpop.eup %10020 }
 0xacf   : > { %3005 = vrot.lane.b32.xlu0 %v11088_v63, %s10548_s16 }
 0xaeb   : > { %2812 = vadd.xlane.f32.xlu1 %v11874_v18 }
 0xaee   : > { %2806 = vadd.xlane.f32.xlu0 %v11878_v21 }
 0xaf2   : > { %2802 = vadd.xlane.f32.xlu0 %v11882_v5 }
 0xaf6   : > { %2808 = vadd.xlane.f32.xlu0 %v11886_v16 }
 0xafa   : > { %2804 = vadd.xlane.f32.xlu0 %v11889_v13 }
 0xafc   : > { %3009 = vrot.lane.b32.xlu1 %v11097_v19, %s10548_s16 }
 0xafe   : > { %2814 = vadd.xlane.f32.xlu0 %v11894_v52 }
 0xb00   : > { %2987 = vrot.lane.b32.xlu1 %v11090_v7, %s10549_s17 }
 0xb02   : > { %2810 = vadd.xlane.f32.xlu0 %v11899_v22  ;;  %v2791_v17 = vpop.xlane.xlu0 %2790 }
 0xb04   : > { %2991 = vrot.lane.b32.xlu1 %v11102_v40, %s10549_s17 }
 0xb06   : > { %2816 = vadd.xlane.f32.xlu0 %v11904_v29  ;;  %v2787_v2 = vpop.xlane.xlu1 %2786 }
 0xb08   : > { %3342 = vrot.lane.b32.xlu1 %v11072_v36, %s10550_s19 }
 0xb0a   : > { %v2793_v57 = vpop.xlane.xlu0 %2792 }
 0xb0b   : > { %10022 = vrcp.f32 %v2793_v57 }
 0xb0c   : > { %3346 = vrot.lane.b32.xlu1 %v11080_v45, %s10550_s19  ;;  %10024 = vrcp.f32 %v2787_v2 }
 0xb0d   : > { %10026 = vrcp.f32 %v2791_v17 }
 0xb0e   : > { %v2789_v27 = vpop.xlane.xlu0 %2788 }
 0xb0f   : > { %10028 = vrcp.f32 %v2789_v27 }
 0xb10   : > { %3352 = vrot.lane.b32.xlu1 %v11102_v40, %s10550_s19 }
 0xb15   : > { %v10023_v1 = vpop.eup %10022 }
 0xb16   : > { %v10025_v15 = vpop.eup %10024  ;;  %v2837_v54 = vmul.f32 %v10023_v1, %v11841_v50 }
 0xb17   : > { %v10027_v35 = vpop.eup %10026  ;;  %v2834_v62 = vmul.f32 %v10025_v15, %v11838_v41 }
 0xb18   : > { %v2836_v14 = vmul.f32 %v10027_v35, %v11835_v56  ;;  %v3042_v56 = vsel %vm1564_vm3, %v3000_v59, 0 }
 0xb19   : > { %v10029_v11 = vpop.eup %10028 }
 0xb1a   : > { %v2835_v60 = vmul.f32 %v10029_v11, %v11844_v61  ;;  %v2851_v25 = vpack.c.bf16 %v2837_v54, %v2836_v14 }
 0xb1c   : > { %3007 = vrot.lane.b32.xlu0 %v11102_v40, %s10548_s16  ;;  %v2850_v6 = vpack.c.bf16 %v2835_v60, %v2834_v62  ;;  %v3039_v40 = vsel %vm1564_vm3, %v11847_v49, 0 }
 0xb1e   : > { %8875 = vmatprep.mubr.bf16.mxu1 %v2850_v6 }
 0xb1f   : > { %8876 = vmatmul.mubr.bf16.vlgmr.msra.gmra.mrb[48].mxu1 %v2851_v25 }
 0xb20   : > { %8892 = vmatpush3.bf16.xpose.msra.mxu1 %v3036_v38  ;;  %2979 = vrot.lane.b32.xlu0 %v11074_v53, %s10549_s17 }
 0xb21   : > { %9420 = vmatprep.subr.msk.bf16.mxu1 %vm1564_vm3, %v11847_v49 }
 0xb24   : > { %2981 = vrot.lane.b32.xlu0 %v11072_v36, %s10549_s17 }
 0xb28   : > { %8894 = vmatpush3.bf16.xpose.msra.mxu1 %v3039_v40  ;;  %2983 = vrot.lane.b32.xlu0 %v11082_v0, %s10549_s17 }
 0xb29   : > { %9421 = vmatprep.subr.msk.bf16.mxu1 %vm1564_vm3, %v3000_v59 }
 0xb2c   : > { %2985 = vrot.lane.b32.xlu0 %v11080_v45, %s10549_s17 }
 0xb30   : > { %8896 = vmatpush3.bf16.xpose.msra.mxu1 %v3042_v56  ;;  %2989 = vrot.lane.b32.xlu0 %v11088_v63, %s10549_s17 }
 0xb34   : > { %2993 = vrot.lane.b32.xlu0 %v11097_v19, %s10549_s17 }
 0xb38   : > { %3340 = vrot.lane.b32.xlu0 %v11074_v53, %s10550_s19 }
 0xb3a   : > { %v2799_v36 = vpop.xlane.xlu0 %2798 }
 0xb3b   : > { %10030 = vrcp.f32 %v2799_v36 }
 0xb3c   : > { %3344 = vrot.lane.b32.xlu0 %v11082_v0, %s10550_s19 }
 0xb3e   : > { %v2795_v4 = vpop.xlane.xlu0 %2794 }
 0xb3f   : > { %10032 = vrcp.f32 %v2795_v4 }
 0xb40   : > { %3348 = vrot.lane.b32.xlu0 %v11090_v7, %s10550_s19 }
 0xb42   : > { %v2801_v45 = vpop.xlane.xlu0 %2800 }
 0xb43   : > { %10034 = vrcp.f32 %v2801_v45  ;;  %v2797_v41 = vpop.xlane.xlu1 %2796 }
 0xb44   : > { %10036 = vrcp.f32 %v2797_v41  ;;  %3350 = vrot.lane.b32.xlu0 %v11088_v63, %s10550_s19 }
 0xb45   : > { %v10031_v7 = vpop.eup %10030 }
 0xb46   : > { %v3004_v0 = vpop.permute.xlu0 %3003  ;;  %v2840_v2 = vmul.f32 %v10031_v7, %v11851_v34 }
 0xb47   : > { %v3002_v50 = vpop.permute.xlu1 %3001 }
 0xb48   : > { %3354 = vrot.lane.b32.xlu0 %v11097_v19, %s10550_s19  ;;  %9422 = vmatprep.subr.msk.bf16.mxu1 %vm1564_vm3, %v3002_v50  ;;  %v3045_v53 = vsel %vm1564_vm3, %v3002_v50, 0  ;;  %v3048_v19 = vsel %vm1564_vm3, %v3004_v0, 0 }
 0xb49   : > { %8898 = vmatpush3.bf16.xpose.msra.mxu1 %v3045_v53  ;;  %v10033_v61 = vpop.eup %10032 }
 0xb4a   : > { %9423 = vmatprep.subr.msk.bf16.mxu1 %vm1564_vm3, %v3004_v0  ;;  %v2838_v63 = vmul.f32 %v10033_v61, %v11854_v37  ;;  %v3006_v57 = vpop.permute.xlu0 %3005 }
 0xb4b   : > { %v3051_v15 = vsel %vm1564_vm3, %v3006_v57, 0 }
 0xb4d   : > { %v10035_v49 = vpop.eup %10034 }
 0xb4e   : > { %v10037_v12 = vpop.eup %10036  ;;  %v2841_v59 = vmul.f32 %v10035_v49, %v11857_v3 }
 0xb4f   : > { %v2839_v17 = vmul.f32 %v10037_v12, %v11859_v10 }
 0xb50   : > { %v2853_v1 = vpack.c.bf16 %v2841_v59, %v2840_v2 }
 0xb51   : > { %8900 = vmatpush3.bf16.xpose.msra.mxu1 %v3048_v19  ;;  %v2852_v27 = vpack.c.bf16 %v2839_v17, %v2838_v63 }
 0xb52   : > { %9424 = vmatprep.subr.msk.bf16.mxu1 %vm1564_vm3, %v3006_v57 }
 0xb53   : > { %8879 = vmatprep.mubr.bf16.mxu1 %v2852_v27 }
 0xb54   : > { %8880 = vmatmul.mubr.bf16.gmra.mrb[52].mxu1 %v2853_v1 }
 0xb59   : > { %8902 = vmatpush3.bf16.xpose.msra.mxu1 %v3051_v15 }
 0xb78   : > { %v2813_v34 = vpop.xlane.xlu1 %2812 }
 0xb7b   : > { %v2807_v3 = vpop.xlane.xlu0 %2806 }
 0xb7c   : > { %v3010_v0 = vpop.permute.xlu1 %3009 }
 0xb7d   : > { %v3057_v17 = vsel %vm1564_vm3, %v3010_v0, 0 }
 0xb7f   : > { %v2803_v35 = vpop.xlane.xlu0 %2802 }
 0xb80   : > { %v2988_v57 = vpop.permute.xlu1 %2987 }
 0xb83   : > { %v2809_v37 = vpop.xlane.xlu0 %2808 }
 0xb84   : > { %10038 = vrcp.f32 %v2809_v37  ;;  %v2992_v27 = vpop.permute.xlu1 %2991 }
 0xb85   : > { %10040 = vrcp.f32 %v2803_v35 }
 0xb86   : > { %10042 = vrcp.f32 %v2807_v3 }
 0xb87   : > { %v2805_v10 = vpop.xlane.xlu0 %2804 }
 0xb88   : > { %10044 = vrcp.f32 %v2805_v10 }
 0xb89   : > { %10046 = vrcp.f32 %v2813_v34 }
 0xb8b   : > { %v2815_v11 = vpop.xlane.xlu0 %2814 }
 0xb8e   : > { %v10039_v54 = vpop.eup %10038 }
 0xb8f   : > { %v2811_v62 = vpop.xlane.xlu0 %2810  ;;  %v10041_v60 = vpop.eup %10040  ;;  %v2845_v25 = vmul.f32 %v10039_v54, %v11886_v16 }
 0xb90   : > { %10048 = vrcp.f32 %v2811_v62  ;;  %v10043_v14 = vpop.eup %10042  ;;  %v2842_v40 = vmul.f32 %v10041_v60, %v11882_v5 }
 0xb91   : > { %10050 = vrcp.f32 %v2815_v11  ;;  %v2844_v36 = vmul.f32 %v10043_v14, %v11878_v21 }
 0xb92   : > { %v10045_v6 = vpop.eup %10044 }
 0xb93   : > { %v2817_v38 = vpop.xlane.xlu0 %2816  ;;  %v2843_v56 = vmul.f32 %v10045_v6, %v11889_v13  ;;  %v2855_v45 = vpack.c.bf16 %v2845_v25, %v2844_v36  ;;  %v10047_v50 = vpop.eup %10046 }
 0xb94   : > { %10052 = vrcp.f32 %v2817_v38  ;;  %v2847_v21 = vmul.f32 %v10047_v50, %v11874_v18 }
 0xb95   : > { %v2854_v4 = vpack.c.bf16 %v2843_v56, %v2842_v40 }
 0xb97   : > { %8883 = vmatprep.mubr.bf16.mxu1 %v2854_v4  ;;  %v3008_v41 = vpop.permute.xlu0 %3007 }
 0xb98   : > { %8884 = vmatmul.mubr.bf16.gmra.mrb[56].mxu1 %v2855_v45  ;;  %9425 = vmatprep.subr.msk.bf16.mxu1 %vm1564_vm3, %v3008_v41  ;;  %v3054_v53 = vsel %vm1564_vm3, %v3008_v41, 0 }
 0xb99   : > { %8904 = vmatpush3.bf16.xpose.msra.mxu1 %v3054_v53 }
 0xb9a   : > { %v10049_v16 = vpop.eup %10048  ;;  %9426 = vmatprep.subr.msk.bf16.mxu1 %vm1564_vm3, %v3010_v0 }
 0xb9b   : > { %v2980_v5 = vpop.permute.xlu0 %2979  ;;  %v2846_v13 = vmul.f32 %v10049_v16, %v11899_v22  ;;  %v10051_v7 = vpop.eup %10050 }
 0xb9c   : > { %v2848_v59 = vmul.f32 %v10051_v7, %v11894_v52 }
 0xb9d   : > { %v2856_v61 = vpack.c.bf16 %v2847_v21, %v2846_v13 }
 0xb9e   : > { %v10053_v49 = vpop.eup %10052 }
 0xb9f   : > { %8887 = vmatprep.mubr.bf16.mxu1 %v2856_v61  ;;  %v2982_v12 = vpop.permute.xlu0 %2981  ;;  %v2849_v63 = vmul.f32 %v10053_v49, %v11904_v29  ;;  %v3343_v29 = vpop.permute.xlu1 %3342 }
 0xba1   : > { %8906 = vmatpush3.bf16.xpose.msra.mxu1 %v3057_v17  ;;  %v2857_v19 = vpack.c.bf16 %v2849_v63, %v2848_v59 }
 0xba3   : > { %8888 = vmatmul.mubr.bf16.gmra.mrb[60].mxu1 %v2857_v19  ;;  %v2984_v2 = vpop.permute.xlu0 %2983  ;;  %v3347_v3 = vpop.permute.xlu1 %3346 }
 0xba4   : > { %8907 = vmatprep.mubr.msk.bf16.mxu1 %vm1564_vm3, %v2980_v5 }
 0xba7   : > { %v2986_v22 = vpop.permute.xlu0 %2985  ;;  %v3353_v10 = vpop.permute.xlu1 %3352 }
 0xbab   : > { %8908 = vmatmul.mubr.msk.bf16.vlgmr.msra.gmra.mrb[64].mxu1 %vm1564_vm3, %v2982_v12  ;;  %v2990_v18 = vpop.permute.xlu0 %2989 }
 0xbac   : > { %8911 = vmatprep.mubr.msk.bf16.mxu1 %vm1564_vm3, %v2984_v2 }
 0xbaf   : > { %v2994_v1 = vpop.permute.xlu0 %2993 }
 0xbb3   : > { %8912 = vmatmul.mubr.msk.bf16.gmra.mrb[68].mxu1 %vm1564_vm3, %v2986_v22  ;;  %v3341_v52 = vpop.permute.xlu0 %3340 }
 0xbb4   : > { %8915 = vmatprep.mubr.msk.bf16.mxu1 %vm1564_vm3, %v2988_v57  ;;  %8923 = vmatprep.subr.bf16.mxu0 %v3341_v52 }
 0xbb5   : > { %8924 = vmatpush3.bf16.msra.mxu0 %v3341_v52 }
 0xbb6   : > { %8925 = vmatprep.subr.bf16.mxu0 %v3343_v29 }
 0xbb7   : > { %v3345_v15 = vpop.permute.xlu0 %3344 }
 0xbb9   : > { %8926 = vmatpush3.bf16.msra.mxu0 %v3343_v29  ;;  %v14849_v29 = vld [vmem:[#allocation40_spill] sm:$0xff] }
 0xbba   : > { %8927 = vmatprep.subr.bf16.mxu0 %v3345_v15 }
 0xbbb   : > { %8916 = vmatmul.mubr.msk.bf16.gmra.mrb[72].mxu1 %vm1564_vm3, %v2990_v18  ;;  %v3349_v35 = vpop.permute.xlu0 %3348 }
 0xbbc   : > { %8919 = vmatprep.mubr.msk.bf16.mxu1 %vm1564_vm3, %v2992_v27 }
 0xbbd   : > { %8928 = vmatpush3.bf16.msra.mxu0 %v3345_v15  ;;  %v14850_v15 = vld [vmem:[#allocation41_spill] sm:$0xff] }
 0xbbe   : > { %8929 = vmatprep.subr.bf16.mxu0 %v3347_v3 }
 0xbbf   : > { %v3351_v37 = vpop.permute.xlu0 %3350 }
 0xbc1   : > { %8930 = vmatpush3.bf16.msra.mxu0 %v3347_v3 }
 0xbc2   : > { %8931 = vmatprep.subr.bf16.mxu0 %v3349_v35 }
 0xbc3   : > { %8920 = vmatmul.mubr.msk.bf16.gmra.mrb[76].mxu1 %vm1564_vm3, %v2994_v1  ;;  %v3355_v34 = vpop.permute.xlu0 %3354 }
 0xbc5   : > { %8932 = vmatpush3.bf16.msra.mxu0 %v3349_v35 }
 0xbc6   : > { %8933 = vmatprep.subr.bf16.mxu0 %v3351_v37 }
 0xbc9   : > { %8934 = vmatpush3.bf16.msra.mxu0 %v3351_v37 }
 0xbca   : > { %8935 = vmatprep.subr.bf16.mxu0 %v3353_v10 }
 0xbcd   : > { %8936 = vmatpush3.bf16.msra.mxu0 %v3353_v10 }
 0xbce   : > { %8937 = vmatprep.subr.bf16.mxu0 %v3355_v34 }
 0xbd1   : > { %8938 = vmatpush3.bf16.msra.mxu0 %v3355_v34  ;;  %v14851_v34 = vld [vmem:[#allocation44_spill] sm:$0xff] }
 0xbf2   : > { %v11979_v11 = vpop.f32.mrb[48].mxu1 }
 0xbf3   : > { %v11981_v54 = vpop.f32.mrb[49].mxu1 }
 0xbf4   : > { %14841 = vst [vmem:[#allocation63_spill] sm:$0xff] %v11981_v54  ;;  %v11983_v62 = vpop.f32.mrb[50].mxu1 }
 0xbf5   : > { %v11987_v14 = vpop.f32.mrb[51].mxu1 }
 0xbf6   : > { %14842 = vst [vmem:[#allocation64_spill] sm:$0xff] %v11987_v14 }
 0xc27   : > { %v11991_v25 = vpop.f32.mrb[52].mxu1 }
 0xc28   : > { %14843 = vst [vmem:[#allocation65_spill] sm:$0xff] %v11991_v25  ;;  %v11993_v38 = vpop.f32.mrb[53].mxu1 }
 0xc29   : > { %v11995_v40 = vpop.f32.mrb[54].mxu1 }
 0xc2a   : > { %14844 = vst [vmem:[#allocation66_spill] sm:$0xff] %v11995_v40  ;;  %v11999_v36 = vpop.f32.mrb[55].mxu1 }
 0xc6b   : > { %v12003_v45 = vpop.f32.mrb[56].mxu1 }
 0xc6c   : > { %14845 = vst [vmem:[#allocation67_spill] sm:$0xff] %v12003_v45  ;;  %v12005_v41 = vpop.f32.mrb[57].mxu1 }
 0xc6d   : > { %v12007_v50 = vpop.f32.mrb[58].mxu1 }
 0xc6e   : > { %14846 = vst [vmem:[#allocation68_spill] sm:$0xff] %v12007_v50  ;;  %v12011_v0 = vpop.f32.mrb[59].mxu1 }
 0xc76   : > { %v12015_v5 = vpop.f32.mrb[60].mxu1 }
 0xc77   : > { %14847 = vst [vmem:[#allocation69_spill] sm:$0xff] %v12015_v5  ;;  %v12017_v13 = vpop.f32.mrb[61].mxu1 }
 0xc78   : > { %v12019_v21 = vpop.f32.mrb[62].mxu1 }
 0xc79   : > { %14848 = vst [vmem:[#allocation70_spill] sm:$0xff] %v12019_v21  ;;  %v12023_v61 = vpop.f32.mrb[63].mxu1 }
 0xc7e   : > { %v8909_v12 = vpop.f32.mrb[64].mxu1 }
 0xc7f   : > { %3192 = vmax.xlane.f32.xlu0 %v8909_v12  ;;  %v3093_v59 = vpop.f32.mrb[65].mxu1 }
 0xc80   : > { %3188 = vmax.xlane.f32.xlu1 %v3093_v59  ;;  %v8910_v63 = vpop.f32.mrb[66].mxu1 }
 0xc81   : > { %v3096_v17 = vpop.f32.mrb[67].mxu1 }
 0xc84   : > { %3194 = vmax.xlane.f32.xlu1 %v8910_v63 }
 0xc86   : > { %v12027_v19 = vpop.f32.mrb[68].mxu1 }
 0xc87   : > { %v3109_v2 = vpop.f32.mrb[69].mxu1 }
 0xc88   : > { %v8914_v22 = vpop.f32.mrb[70].mxu1 }
 0xc89   : > { %v12029_v57 = vpop.f32.mrb[71].mxu1 }
 0xc8e   : > { %v12031_v18 = vpop.f32.mrb[72].mxu1 }
 0xc8f   : > { %v12033_v27 = vpop.f32.mrb[73].mxu1 }
 0xc90   : > { %v12035_v1 = vpop.f32.mrb[74].mxu1 }
 0xc91   : > { %v12037_v52 = vpop.f32.mrb[75].mxu1 }
 0xc95   : > { %3721 = vrot.lane.b32.xlu0 %v14849_v29, %s10541_s26  ;;  %3719 = vrot.lane.b32.xlu1 %v14850_v15, %s10541_s26 }
 0xc96   : > { %v12043_v3 = vpop.f32.mrb[76].mxu1 }
 0xc97   : > { %v12045_v35 = vpop.f32.mrb[77].mxu1 }
 0xc98   : > { %v12047_v37 = vpop.f32.mrb[78].mxu1 }
 0xc99   : > { %v12049_v10 = vpop.f32.mrb[79].mxu1 }
 0xcb4   : > { %3190 = vmax.xlane.f32.xlu0 %v3096_v17 }
 0xcb8   : > { %3200 = vmax.xlane.f32.xlu0 %v12027_v19 }
 0xcb9   : > { %3202 = vmax.xlane.f32.xlu1 %v8914_v22 }
 0xcbc   : > { %3196 = vmax.xlane.f32.xlu0 %v3109_v2 }
 0xcbd   : > { %3198 = vmax.xlane.f32.xlu1 %v12029_v57 }
 0xcc0   : > { %3208 = vmax.xlane.f32.xlu0 %v12031_v18 }
 0xcc1   : > { %3210 = vmax.xlane.f32.xlu1 %v12035_v1 }
 0xcc4   : > { %3204 = vmax.xlane.f32.xlu0 %v12033_v27 }
 0xcc5   : > { %3206 = vmax.xlane.f32.xlu1 %v12037_v52 }
 0xcc8   : > { %3216 = vmax.xlane.f32.xlu0 %v12043_v3 }
 0xcc9   : > { %3218 = vmax.xlane.f32.xlu1 %v12047_v37 }
 0xccc   : > { %3212 = vmax.xlane.f32.xlu0 %v12045_v35 }
 0xccd   : > { %3214 = vmax.xlane.f32.xlu1 %v12049_v10 }
 0xce2   : > { %3723 = vrot.lane.b32.xlu0 %v14851_v34, %s10541_s26 }
 0xd0c   : > { %v3193_v7 = vpop.xlane.xlu0 %3192 }
 0xd0d   : > { %v3222_v53 = vsub.f32 %v8909_v12, %v3193_v7  ;;  %v3189_v56 = vpop.xlane.xlu1 %3188 }
 0xd0e   : > { %v3220_v6 = vsub.f32 %v3093_v59, %v3189_v56 }
 0xd0f   : > { %v3240_v49 = vmul.f32 1.442695, %v3222_v53 }
 0xd10   : > { %v3236_v16 = vmul.f32 1.442695, %v3220_v6  ;;  %v12078_v6 = vpop.permute.xlu0 %3721 }
 0xd11   : > { %10054 = vpow2.f32 %v3240_v49  ;;  %v3195_v4 = vpop.xlane.xlu1 %3194 }
 0xd12   : > { %v3223_v60 = vsub.f32 %v8910_v63, %v3195_v4  ;;  %10056 = vpow2.f32 %v3236_v16 }
 0xd14   : > { %v3242_v9 = vmul.f32 1.442695, %v3223_v60  ;;  %v14852_v60 = vld [vmem:[#allocation43_spill] sm:$0xff] }
 0xd15   : > { %v12063_v23 = vpop.permute.xlu1 %3719 }
 0xd16   : > { %9427 = vmatprep.subr.msk.bf16.mxu0 %vm1564_vm3, %v12063_v23  ;;  %10058 = vpow2.f32 %v3242_v9 }
 0xd1b   : > { %v12067_v24 = vpop.eup %10054 }
 0xd1c   : > { %3272 = vadd.xlane.f32.xlu1 %v12067_v24  ;;  %v12070_v7 = vpop.eup %10056 }
 0xd20   : > { %3268 = vadd.xlane.f32.xlu1 %v12070_v7  ;;  %v12073_v56 = vpop.eup %10058 }
 0xd24   : > { %3274 = vadd.xlane.f32.xlu1 %v12073_v56 }
 0xd35   : > { %3725 = vrot.lane.b32.xlu1 %v14852_v60, %s10541_s26 }
 0xd41   : > { %v3191_v4 = vpop.xlane.xlu0 %3190 }
 0xd42   : > { %v3221_v53 = vsub.f32 %v3096_v17, %v3191_v4 }
 0xd44   : > { %v3238_v9 = vmul.f32 1.442695, %v3221_v53 }
 0xd45   : > { %v3201_v16 = vpop.xlane.xlu0 %3200 }
 0xd46   : > { %10060 = vpow2.f32 %v3238_v9  ;;  %v3203_v49 = vpop.xlane.xlu1 %3202 }
 0xd47   : > { %v3227_v59 = vsub.f32 %v8914_v22, %v3203_v49 }
 0xd49   : > { %v3197_v12 = vpop.xlane.xlu0 %3196  ;;  %v3250_v28 = vmul.f32 1.442695, %v3227_v59 }
 0xd4a   : > { %v3224_v63 = vsub.f32 %v3109_v2, %v3197_v12  ;;  %v3199_v5 = vpop.xlane.xlu1 %3198 }
 0xd4c   : > { %v3244_v21 = vmul.f32 1.442695, %v3224_v63 }
 0xd4d   : > { %v3209_v42 = vpop.xlane.xlu0 %3208 }
 0xd4e   : > { %10062 = vpow2.f32 %v3244_v21  ;;  %v3230_v45 = vsub.f32 %v12031_v18, %v3209_v42  ;;  %v3211_v50 = vpop.xlane.xlu1 %3210 }
 0xd4f   : > { %10064 = vpow2.f32 %v3250_v28  ;;  %v3231_v2 = vsub.f32 %v12035_v1, %v3211_v50 }
 0xd50   : > { %v12081_v31 = vpop.eup %10060  ;;  %v3256_v4 = vmul.f32 1.442695, %v3230_v45 }
 0xd51   : > { %3270 = vadd.xlane.f32.xlu0 %v12081_v31  ;;  %v3205_v17 = vpop.xlane.xlu0 %3204  ;;  %v3258_v42 = vmul.f32 1.442695, %v3231_v2  ;;  %v3225_v2 = vsub.f32 %v12029_v57, %v3199_v5 }
 0xd52   : > { %v3228_v53 = vsub.f32 %v12033_v27, %v3205_v17  ;;  %v3207_v9 = vpop.xlane.xlu1 %3206  ;;  %10066 = vpow2.f32 %v3256_v4  ;;  %v3226_v4 = vsub.f32 %v12027_v19, %v3201_v16 }
 0xd53   : > { %v3229_v21 = vsub.f32 %v12037_v52, %v3207_v9  ;;  %v14853_v52 = vld [vmem:[#allocation47_spill] sm:$0xff] }
 0xd54   : > { %v3252_v22 = vmul.f32 1.442695, %v3228_v53  ;;  %v3248_v9 = vmul.f32 1.442695, %v3226_v4 }
 0xd55   : > { %v3254_v28 = vmul.f32 1.442695, %v3229_v21  ;;  %v3217_v53 = vpop.xlane.xlu0 %3216 }
 0xd56   : > { %v3219_v49 = vpop.xlane.xlu1 %3218  ;;  %10068 = vpow2.f32 %v3252_v22  ;;  %v3246_v22 = vmul.f32 1.442695, %v3225_v2 }
 0xd57   : > { %10070 = vpow2.f32 %v3258_v42  ;;  %v3234_v42 = vsub.f32 %v12043_v3, %v3217_v53 }
 0xd58   : > { %v12086_v12 = vpop.eup %10062  ;;  %10072 = vpow2.f32 %v3254_v28 }
 0xd59   : > { %3276 = vadd.xlane.f32.xlu1 %v12086_v12  ;;  %v12090_v59 = vpop.eup %10064  ;;  %v3213_v21 = vpop.xlane.xlu0 %3212 }
 0xd5a   : > { %v3215_v18 = vpop.xlane.xlu1 %3214  ;;  %v3232_v28 = vsub.f32 %v12045_v35, %v3213_v21 }
 0xd5b   : > { %v3233_v45 = vsub.f32 %v12049_v10, %v3215_v18  ;;  %v3264_v18 = vmul.f32 1.442695, %v3234_v42 }
 0xd5c   : > { %v12094_v50 = vpop.eup %10066  ;;  %v3260_v19 = vmul.f32 1.442695, %v3232_v28 }
 0xd5d   : > { %3282 = vadd.xlane.f32.xlu1 %v12090_v59  ;;  %v3262_v27 = vmul.f32 1.442695, %v3233_v45  ;;  %v14854_v45 = vld [vmem:[#allocation45_spill] sm:$0xff] }
 0xd5f   : > { %10074 = vpow2.f32 %v3262_v27  ;;  %v3235_v27 = vsub.f32 %v12047_v37, %v3219_v49 }
 0xd60   : > { %v12097_v1 = vpop.eup %10068  ;;  %10076 = vpow2.f32 %v3248_v9  ;;  %v3724_v9 = vpop.permute.xlu0 %3723 }
 0xd61   : > { %3288 = vadd.xlane.f32.xlu1 %v12094_v50  ;;  %v12102_v63 = vpop.eup %10070  ;;  %10078 = vpow2.f32 %v3246_v22  ;;  %v3266_v5 = vmul.f32 1.442695, %v3235_v27 }
 0xd62   : > { %v12105_v17 = vpop.eup %10072  ;;  %10080 = vpow2.f32 %v3264_v18 }
 0xd63   : > { %10082 = vpow2.f32 %v3260_v19 }
 0xd64   : > { %10084 = vpow2.f32 %v3266_v5 }
 0xd65   : > { %3284 = vadd.xlane.f32.xlu1 %v12097_v1 }
 0xd67   : > { %3727 = vrot.lane.b32.xlu0 %v14853_v52, %s10541_s26 }
 0xd69   : > { %3290 = vadd.xlane.f32.xlu1 %v12102_v63  ;;  %v12108_v10 = vpop.eup %10074 }
 0xd6a   : > { %v12118_v16 = vpop.eup %10076 }
 0xd6b   : > { %v12123_v57 = vpop.eup %10078 }
 0xd6c   : > { %v12128_v3 = vpop.eup %10080 }
 0xd6d   : > { %3286 = vadd.xlane.f32.xlu1 %v12105_v17  ;;  %v12133_v35 = vpop.eup %10082 }
 0xd6e   : > { %v12136_v37 = vpop.eup %10084 }
 0xd71   : > { %3294 = vadd.xlane.f32.xlu1 %v12108_v10 }
 0xd82   : > { %3729 = vrot.lane.b32.xlu1 %v14854_v45, %s10541_s26 }
 0xd86   : > { %3280 = vadd.xlane.f32.xlu0 %v12118_v16  ;;  %4066 = vrot.lane.b32.xlu1 %v14849_v29, %s10540_s25 }
 0xd8a   : > { %3278 = vadd.xlane.f32.xlu0 %v12123_v57  ;;  %4070 = vrot.lane.b32.xlu1 %v14852_v60, %s10540_s25 }
 0xd8e   : > { %4076 = vrot.lane.b32.xlu1 %v11554_v58, %s10540_s25  ;;  %3296 = vadd.xlane.f32.xlu0 %v12128_v3 }
 0xd92   : > { %3292 = vadd.xlane.f32.xlu0 %v12133_v35 }
 0xd96   : > { %3298 = vadd.xlane.f32.xlu0 %v12136_v37 }
 0xda9   : > { %v3273_v49 = vpop.xlane.xlu1 %3272 }
 0xdac   : > { %3731 = vrot.lane.b32.xlu0 %v11554_v58, %s10541_s26 }
 0xdad   : > { %v3269_v4 = vpop.xlane.xlu1 %3268 }
 0xdb0   : > { %3733 = vrot.lane.b32.xlu0 %v11551_v30, %s10541_s26 }
 0xdb1   : > { %v3275_v53 = vpop.xlane.xlu1 %3274 }
 0xdb2   : > { %10086 = vrcp.f32 %v3275_v53 }
 0xdb3   : > { %10088 = vrcp.f32 %v3269_v4 }
 0xdb4   : > { %4064 = vrot.lane.b32.xlu0 %v14850_v15, %s10540_s25  ;;  %10090 = vrcp.f32 %v3273_v49  ;;  %v3760_v49 = vsel %vm1564_vm3, %v12063_v23, 0 }
 0xdb5   : > { %v3726_v22 = vpop.permute.xlu1 %3725 }
 0xdb6   : > { %v3769_v23 = vsel %vm1564_vm3, %v3726_v22, 0 }
 0xdb8   : > { %4068 = vrot.lane.b32.xlu0 %v14851_v34, %s10540_s25 }
 0xdbc   : > { %4072 = vrot.lane.b32.xlu0 %v14853_v52, %s10540_s25  ;;  %v10087_v42 = vpop.eup %10086 }
 0xdbd   : > { %v10089_v18 = vpop.eup %10088  ;;  %v3319_v19 = vmul.f32 %v10087_v42, %v12073_v56 }
 0xdbe   : > { %v10091_v28 = vpop.eup %10090  ;;  %v3316_v5 = vmul.f32 %v10089_v18, %v12070_v7  ;;  %v3763_v7 = vsel %vm1564_vm3, %v12078_v6, 0 }
 0xdbf   : > { %v3318_v25 = vmul.f32 %v10091_v28, %v12067_v24 }
 0xdc0   : > { %4074 = vrot.lane.b32.xlu0 %v14854_v45, %s10540_s25 }
 0xdc1   : > { %v3333_v4 = vpack.c.bf16 %v3319_v19, %v3318_v25 }
 0xdc4   : > { %4078 = vrot.lane.b32.xlu0 %v11551_v30, %s10540_s25 }
 0xdde   : > { %v3271_v2 = vpop.xlane.xlu0 %3270 }
 0xddf   : > { %10092 = vrcp.f32 %v3271_v2 }
 0xde2   : > { %v3728_v25 = vpop.permute.xlu0 %3727 }
 0xde6   : > { %v3277_v21 = vpop.xlane.xlu1 %3276 }
 0xde7   : > { %10094 = vrcp.f32 %v3277_v21 }
 0xde9   : > { %v10093_v27 = vpop.eup %10092 }
 0xdea   : > { %v3317_v44 = vmul.f32 %v10093_v27, %v12081_v31  ;;  %v3283_v40 = vpop.xlane.xlu1 %3282  ;;  %v3766_v31 = vsel %vm1564_vm3, %v3724_v9, 0 }
 0xdeb   : > { %10096 = vrcp.f32 %v3283_v40 }
 0xdec   : > { %v3332_v53 = vpack.c.bf16 %v3317_v44, %v3316_v5 }
 0xdee   : > { %8939 = vmatprep.mubr.bf16.mxu0 %v3332_v53  ;;  %v3289_v2 = vpop.xlane.xlu1 %3288 }
 0xdef   : > { %8940 = vmatmul.mubr.bf16.vlgmr.msra.gmra.mrb[96].mxu0 %v3333_v4 }
 0xdf0   : > { %8956 = vmatpush3.bf16.xpose.msra.mxu0 %v3760_v49 }
 0xdf1   : > { %9428 = vmatprep.subr.msk.bf16.mxu0 %vm1564_vm3, %v12078_v6  ;;  %v3772_v6 = vsel %vm1564_vm3, %v3728_v25, 0  ;;  %v10095_v19 = vpop.eup %10094 }
 0xdf2   : > { %v3285_v56 = vpop.xlane.xlu1 %3284 }
 0xdf5   : > { %v10097_v5 = vpop.eup %10096 }
 0xdf6   : > { %v3291_v24 = vpop.xlane.xlu1 %3290 }
 0xdf8   : > { %8958 = vmatpush3.bf16.xpose.msra.mxu0 %v3763_v7 }
 0xdf9   : > { %9429 = vmatprep.subr.msk.bf16.mxu0 %vm1564_vm3, %v3724_v9 }
 0xdfa   : > { %v3287_v44 = vpop.xlane.xlu1 %3286 }
 0xdfe   : > { %v3295_v42 = vpop.xlane.xlu1 %3294 }
 0xe00   : > { %8960 = vmatpush3.bf16.xpose.msra.mxu0 %v3766_v31  ;;  %v3320_v31 = vmul.f32 %v10095_v19, %v12086_v12 }
 0xe01   : > { %9430 = vmatprep.subr.msk.bf16.mxu0 %vm1564_vm3, %v3726_v22 }
 0xe02   : > { %v3730_v18 = vpop.permute.xlu1 %3729 }
 0xe03   : > { %v3775_v9 = vsel %vm1564_vm3, %v3730_v18, 0 }
 0xe08   : > { %8962 = vmatpush3.bf16.xpose.msra.mxu0 %v3769_v23 }
 0xe09   : > { %9431 = vmatprep.subr.msk.bf16.mxu0 %vm1564_vm3, %v3728_v25 }
 0xe10   : > { %8964 = vmatpush3.bf16.xpose.msra.mxu0 %v3772_v6 }
 0xe11   : > { %9432 = vmatprep.subr.msk.bf16.mxu0 %vm1564_vm3, %v3730_v18 }
 0xe13   : > { %v3281_v28 = vpop.xlane.xlu0 %3280 }
 0xe14   : > { %10098 = vrcp.f32 %v3281_v28 }
 0xe15   : > { %10100 = vrcp.f32 %v3287_v44 }
 0xe16   : > { %10102 = vrcp.f32 %v3285_v56 }
 0xe17   : > { %v3279_v22 = vpop.xlane.xlu0 %3278 }
 0xe18   : > { %8966 = vmatpush3.bf16.xpose.msra.mxu0 %v3775_v9  ;;  %10104 = vrcp.f32 %v3279_v22 }
 0xe19   : > { %10106 = vrcp.f32 %v3291_v24  ;;  %v3323_v24 = vmul.f32 %v10097_v5, %v12090_v59 }
 0xe1a   : > { %10108 = vrcp.f32 %v3289_v2 }
 0xe1b   : > { %v3297_v27 = vpop.xlane.xlu0 %3296  ;;  %10110 = vrcp.f32 %v3295_v42 }
 0xe1e   : > { %v10099_v53 = vpop.eup %10098 }
 0xe1f   : > { %v3293_v4 = vpop.xlane.xlu0 %3292  ;;  %v10101_v49 = vpop.eup %10100  ;;  %v3322_v7 = vmul.f32 %v10099_v53, %v12118_v16 }
 0xe20   : > { %10112 = vrcp.f32 %v3293_v4  ;;  %v10103_v21 = vpop.eup %10102  ;;  %v3325_v23 = vmul.f32 %v10101_v49, %v12105_v17 }
 0xe21   : > { %v3324_v25 = vmul.f32 %v10103_v21, %v12097_v1  ;;  %v3335_v42 = vpack.c.bf16 %v3323_v24, %v3322_v7 }
 0xe22   : > { %v10105_v40 = vpop.eup %10104 }
 0xe23   : > { %v3299_v56 = vpop.xlane.xlu0 %3298  ;;  %v3321_v44 = vmul.f32 %v10105_v40, %v12123_v57  ;;  %v10107_v6 = vpop.eup %10106  ;;  %v3336_v28 = vpack.c.bf16 %v3325_v23, %v3324_v25 }
 0xe24   : > { %10114 = vrcp.f32 %v3299_v56  ;;  %v10109_v16 = vpop.eup %10108  ;;  %v3327_v17 = vmul.f32 %v10107_v6, %v12102_v63  ;;  %v4067_v63 = vpop.permute.xlu1 %4066 }
 0xe25   : > { %v3334_v2 = vpack.c.bf16 %v3321_v44, %v3320_v31  ;;  %10116 = vrcp.f32 %v3297_v27  ;;  %v10111_v57 = vpop.eup %10110  ;;  %v3326_v22 = vmul.f32 %v10109_v16, %v12094_v50 }
 0xe26   : > { %v3329_v27 = vmul.f32 %v10111_v57, %v12108_v10 }
 0xe27   : > { %8943 = vmatprep.mubr.bf16.mxu0 %v3334_v2  ;;  %v3732_v18 = vpop.permute.xlu0 %3731  ;;  %v3337_v19 = vpack.c.bf16 %v3327_v17, %v3326_v22 }
 0xe28   : > { %8944 = vmatmul.mubr.bf16.gmra.mrb[100].mxu0 %v3335_v42  ;;  %9433 = vmatprep.subr.msk.bf16.mxu0 %vm1564_vm3, %v3732_v18  ;;  %v3778_v12 = vsel %vm1564_vm3, %v3732_v18, 0  ;;  %v4071_v7 = vpop.permute.xlu1 %4070 }
 0xe29   : > { %8947 = vmatprep.mubr.bf16.mxu0 %v3336_v28  ;;  %8968 = vmatpush3.bf16.xpose.msra.mxu0 %v3778_v12 }
 0xe2a   : > { %v10113_v59 = vpop.eup %10112 }
 0xe2b   : > { %v3734_v9 = vpop.permute.xlu0 %3733  ;;  %v3328_v1 = vmul.f32 %v10113_v59, %v12133_v35 }
 0xe2c   : > { %9434 = vmatprep.subr.msk.bf16.mxu0 %vm1564_vm3, %v3734_v9  ;;  %v3781_v49 = vsel %vm1564_vm3, %v3734_v9, 0 }
 0xe2d   : > { %v3338_v4 = vpack.c.bf16 %v3329_v27, %v3328_v1 }
 0xe2e   : > { %v10115_v5 = vpop.eup %10114 }
 0xe2f   : > { %v4065_v53 = vpop.permute.xlu0 %4064  ;;  %v10117_v21 = vpop.eup %10116  ;;  %v3331_v35 = vmul.f32 %v10115_v5, %v12136_v37 }
 0xe30   : > { %8948 = vmatmul.mubr.bf16.gmra.mrb[104].mxu0 %v3337_v19  ;;  %8987 = vmatprep.subr.bf16.mxu1 %v4065_v53  ;;  %v3330_v50 = vmul.f32 %v10117_v21, %v12128_v3  ;;  %v4077_v37 = vpop.permute.xlu1 %4076 }
 0xe31   : > { %8951 = vmatprep.mubr.bf16.mxu0 %v3338_v4  ;;  %8970 = vmatpush3.bf16.xpose.msra.mxu0 %v3781_v49 }
 0xe32   : > { %8988 = vmatpush3.bf16.msra.mxu1 %v4065_v53  ;;  %v3339_v10 = vpack.c.bf16 %v3331_v35, %v3330_v50 }
 0xe33   : > { %8989 = vmatprep.subr.bf16.mxu1 %v4067_v63  ;;  %v4069_v40 = vpop.permute.xlu0 %4068 }
 0xe36   : > { %8990 = vmatpush3.bf16.msra.mxu1 %v4067_v63 }
 0xe37   : > { %8991 = vmatprep.subr.bf16.mxu1 %v4069_v40  ;;  %v4073_v56 = vpop.permute.xlu0 %4072 }
 0xe38   : > { %8952 = vmatmul.mubr.bf16.gmra.mrb[108].mxu0 %v3339_v10 }
 0xe39   : > { %8971 = vmatprep.mubr.msk.bf16.mxu0 %vm1564_vm3, %v14850_v15 }
 0xe3a   : > { %8992 = vmatpush3.bf16.msra.mxu1 %v4069_v40 }
 0xe3b   : > { %8993 = vmatprep.subr.bf16.mxu1 %v4071_v7  ;;  %v4075_v3 = vpop.permute.xlu0 %4074 }
 0xe3e   : > { %8994 = vmatpush3.bf16.msra.mxu1 %v4071_v7 }
 0xe3f   : > { %8995 = vmatprep.subr.bf16.mxu1 %v4073_v56  ;;  %v4079_v31 = vpop.permute.xlu0 %4078 }
 0xe40   : > { %8972 = vmatmul.mubr.msk.bf16.vlgmr.msra.gmra.mrb[112].mxu0 %vm1564_vm3, %v14849_v29 }
 0xe41   : > { %8975 = vmatprep.mubr.msk.bf16.mxu0 %vm1564_vm3, %v14851_v34 }
 0xe42   : > { %8996 = vmatpush3.bf16.msra.mxu1 %v4073_v56 }
 0xe43   : > { %8997 = vmatprep.subr.bf16.mxu1 %v4075_v3 }
 0xe46   : > { %8998 = vmatpush3.bf16.msra.mxu1 %v4075_v3 }
 0xe47   : > { %8999 = vmatprep.subr.bf16.mxu1 %v4077_v37 }
 0xe48   : > { %8976 = vmatmul.mubr.msk.bf16.gmra.mrb[116].mxu0 %vm1564_vm3, %v14852_v60 }
 0xe49   : > { %8979 = vmatprep.mubr.msk.bf16.mxu0 %vm1564_vm3, %v14853_v52 }
 0xe4a   : > { %9000 = vmatpush3.bf16.msra.mxu1 %v4077_v37 }
 0xe4b   : > { %9001 = vmatprep.subr.bf16.mxu1 %v4079_v31 }
 0xe4e   : > { %9002 = vmatpush3.bf16.msra.mxu1 %v4079_v31 }
 0xe50   : > { %8980 = vmatmul.mubr.msk.bf16.gmra.mrb[120].mxu0 %vm1564_vm3, %v14854_v45 }
 0xe51   : > { %8983 = vmatprep.mubr.msk.bf16.mxu0 %vm1564_vm3, %v11554_v58 }
 0xe58   : > { %8984 = vmatmul.mubr.msk.bf16.gmra.mrb[124].mxu0 %vm1564_vm3, %v11551_v30 }
 0xec2   : > { %v12203_v44 = vpop.f32.mrb[96].mxu0 }
 0xec3   : > { %14855 = vst [vmem:[#allocation40_spill] sm:$0xff] %v12203_v44  ;;  %v12205_v23 = vpop.f32.mrb[97].mxu0 }
 0xec4   : > { %14856 = vst [vmem:[#allocation41_spill] sm:$0xff] %v12205_v23  ;;  %v12207_v24 = vpop.f32.mrb[98].mxu0 }
 0xec5   : > { %14857 = vst [vmem:[#allocation44_spill] sm:$0xff] %v12207_v24  ;;  %v12211_v25 = vpop.f32.mrb[99].mxu0 }
 0xec6   : > { %14858 = vst [vmem:[#allocation43_spill] sm:$0xff] %v12211_v25 }
 0xefb   : > { %v12215_v6 = vpop.f32.mrb[100].mxu0 }
 0xefc   : > { %14859 = vst [vmem:[#allocation47_spill] sm:$0xff] %v12215_v6  ;;  %v12217_v18 = vpop.f32.mrb[101].mxu0 }
 0xefd   : > { %v12219_v28 = vpop.f32.mrb[102].mxu0 }
 0xefe   : > { %14860 = vst [vmem:[#allocation45_spill] sm:$0xff] %v12219_v28  ;;  %v12223_v12 = vpop.f32.mrb[103].mxu0 }
 0xf03   : > { %v12227_v59 = vpop.f32.mrb[104].mxu0 }
 0xf04   : > { %14861 = vst [vmem:[#allocation71_spill] sm:$0xff] %v12227_v59  ;;  %v12229_v17 = vpop.f32.mrb[105].mxu0 }
 0xf05   : > { %v12231_v9 = vpop.f32.mrb[106].mxu0 }
 0xf06   : > { %14862 = vst [vmem:[#allocation72_spill] sm:$0xff] %v12231_v9  ;;  %v12235_v22 = vpop.f32.mrb[107].mxu0 }
 0xf0b   : > { %v12239_v19 = vpop.f32.mrb[108].mxu0 }
 0xf0c   : > { %14863 = vst [vmem:[#allocation73_spill] sm:$0xff] %v12239_v19  ;;  %v12241_v5 = vpop.f32.mrb[109].mxu0 }
 0xf0d   : > { %14864 = vst [vmem:[#allocation74_spill] sm:$0xff] %v12241_v5  ;;  %v12243_v53 = vpop.f32.mrb[110].mxu0 }
 0xf0e   : > { %14865 = vst [vmem:[#allocation75_spill] sm:$0xff] %v12243_v53  ;;  %v12247_v49 = vpop.f32.mrb[111].mxu0 }
 0xf0f   : > { %14866 = vst [vmem:[#allocation76_spill] sm:$0xff] %v12247_v49 }
 0xf13   : > { %v8973_v63 = vpop.f32.mrb[112].mxu0 }
 0xf14   : > { %3916 = vmax.xlane.f32.xlu0 %v8973_v63  ;;  %v3817_v35 = vpop.f32.mrb[113].mxu0 }
 0xf15   : > { %3912 = vmax.xlane.f32.xlu1 %v3817_v35  ;;  %v8974_v50 = vpop.f32.mrb[114].mxu0 }
 0xf16   : > { %v3820_v40 = vpop.f32.mrb[115].mxu0 }
 0xf19   : > { %3918 = vmax.xlane.f32.xlu1 %v8974_v50 }
 0xf1b   : > { %v12251_v10 = vpop.f32.mrb[116].mxu0 }
 0xf1c   : > { %v3833_v7 = vpop.f32.mrb[117].mxu0 }
 0xf1d   : > { %v8978_v56 = vpop.f32.mrb[118].mxu0 }
 0xf1e   : > { %v12253_v3 = vpop.f32.mrb[119].mxu0 }
 0xf23   : > { %v12255_v37 = vpop.f32.mrb[120].mxu0 }
 0xf24   : > { %v12257_v31 = vpop.f32.mrb[121].mxu0 }
 0xf25   : > { %v12259_v4 = vpop.f32.mrb[122].mxu0 }
 0xf26   : > { %v12261_v1 = vpop.f32.mrb[123].mxu0 }
 0xf2a   : > { %4203 = vrot.lane.b32.xlu0 %v14849_v29, %s10542_s6  ;;  %4201 = vrot.lane.b32.xlu1 %v14850_v15, %s10542_s6 }
 0xf2b   : > { %v12267_v16 = vpop.f32.mrb[124].mxu0 }
 0xf2c   : > { %v12269_v2 = vpop.f32.mrb[125].mxu0 }
 0xf2d   : > { %v12271_v42 = vpop.f32.mrb[126].mxu0 }
 0xf2e   : > { %v12273_v21 = vpop.f32.mrb[127].mxu0 }
 0xf49   : > { %3914 = vmax.xlane.f32.xlu0 %v3820_v40 }
 0xf4d   : > { %3924 = vmax.xlane.f32.xlu0 %v12251_v10 }
 0xf4e   : > { %3926 = vmax.xlane.f32.xlu1 %v8978_v56 }
 0xf51   : > { %3920 = vmax.xlane.f32.xlu0 %v3833_v7 }
 0xf52   : > { %3922 = vmax.xlane.f32.xlu1 %v12253_v3 }
 0xf55   : > { %3932 = vmax.xlane.f32.xlu0 %v12255_v37 }
 0xf56   : > { %3934 = vmax.xlane.f32.xlu1 %v12259_v4 }
 0xf59   : > { %3928 = vmax.xlane.f32.xlu0 %v12257_v31 }
 0xf5a   : > { %3930 = vmax.xlane.f32.xlu1 %v12261_v1 }
 0xf5d   : > { %3940 = vmax.xlane.f32.xlu0 %v12267_v16 }
 0xf5e   : > { %3942 = vmax.xlane.f32.xlu1 %v12271_v42 }
 0xf61   : > { %3936 = vmax.xlane.f32.xlu0 %v12269_v2 }
 0xf62   : > { %3938 = vmax.xlane.f32.xlu1 %v12273_v21 }
 0xf77   : > { %4205 = vrot.lane.b32.xlu0 %v14851_v34, %s10542_s6 }
 0xfa1   : > { %v3917_v27 = vpop.xlane.xlu0 %3916 }
 0xfa2   : > { %v3946_v57 = vsub.f32 %v8973_v63, %v3917_v27  ;;  %v3913_v19 = vpop.xlane.xlu1 %3912 }
 0xfa3   : > { %v3944_v53 = vsub.f32 %v3817_v35, %v3913_v19 }
 0xfa4   : > { %v3964_v59 = vmul.f32 1.442695, %v3946_v57 }
 0xfa5   : > { %v3960_v9 = vmul.f32 1.442695, %v3944_v53 }
 0xfa6   : > { %10118 = vpow2.f32 %v3964_v59  ;;  %v3919_v6 = vpop.xlane.xlu1 %3918 }
 0xfa7   : > { %v3947_v28 = vsub.f32 %v8974_v50, %v3919_v6  ;;  %10120 = vpow2.f32 %v3960_v9  ;;  %v12302_v6 = vpop.permute.xlu0 %4203 }
 0xfa9   : > { %v3966_v32 = vmul.f32 1.442695, %v3947_v28 }
 0xfaa   : > { %v12287_v46 = vpop.permute.xlu1 %4201 }
 0xfab   : > { %9435 = vmatprep.subr.msk.bf16.mxu1 %vm1564_vm3, %v12287_v46  ;;  %10122 = vpow2.f32 %v3966_v32 }
 0xfb0   : > { %v12291_v44 = vpop.eup %10118 }
 0xfb1   : > { %3996 = vadd.xlane.f32.xlu1 %v12291_v44  ;;  %v12294_v27 = vpop.eup %10120 }
 0xfb5   : > { %3992 = vadd.xlane.f32.xlu1 %v12294_v27  ;;  %v12297_v57 = vpop.eup %10122 }
 0xfb9   : > { %3998 = vadd.xlane.f32.xlu1 %v12297_v57 }
 0xfca   : > { %4207 = vrot.lane.b32.xlu1 %v14852_v60, %s10542_s6 }
 0xfd6   : > { %v3915_v28 = vpop.xlane.xlu0 %3914 }
 0xfd7   : > { %v3945_v59 = vsub.f32 %v3820_v40, %v3915_v28 }
 0xfd9   : > { %v3962_v32 = vmul.f32 1.442695, %v3945_v59 }
 0xfda   : > { %v3925_v9 = vpop.xlane.xlu0 %3924 }
 0xfdb   : > { %10124 = vpow2.f32 %v3962_v32  ;;  %v3927_v19 = vpop.xlane.xlu1 %3926 }
 0xfdc   : > { %v3951_v63 = vsub.f32 %v8978_v56, %v3927_v19 }
 0xfde   : > { %v3921_v53 = vpop.xlane.xlu0 %3920  ;;  %v3974_v25 = vmul.f32 1.442695, %v3951_v63 }
 0xfdf   : > { %v3948_v35 = vsub.f32 %v3833_v7, %v3921_v53  ;;  %v3923_v50 = vpop.xlane.xlu1 %3922 }
 0xfe1   : > { %v3968_v24 = vmul.f32 1.442695, %v3948_v35 }
 0xfe2   : > { %v3933_v23 = vpop.xlane.xlu0 %3932 }
 0xfe3   : > { %10126 = vpow2.f32 %v3968_v24  ;;  %v3954_v54 = vsub.f32 %v12255_v37, %v3933_v23  ;;  %v3935_v14 = vpop.xlane.xlu1 %3934 }
 0xfe4   : > { %10128 = vpow2.f32 %v3974_v25  ;;  %v3955_v7 = vsub.f32 %v12259_v4, %v3935_v14 }
 0xfe5   : > { %v12305_v5 = vpop.eup %10124  ;;  %v3980_v28 = vmul.f32 1.442695, %v3954_v54 }
 0xfe6   : > { %3994 = vadd.xlane.f32.xlu0 %v12305_v5  ;;  %v3929_v40 = vpop.xlane.xlu0 %3928  ;;  %v3982_v23 = vmul.f32 1.442695, %v3955_v7 }
 0xfe7   : > { %v3952_v59 = vsub.f32 %v12257_v31, %v3929_v40  ;;  %v3931_v32 = vpop.xlane.xlu1 %3930  ;;  %10130 = vpow2.f32 %v3980_v28  ;;  %v3950_v40 = vsub.f32 %v12251_v10, %v3925_v9 }
 0xfe8   : > { %v3953_v24 = vsub.f32 %v12261_v1, %v3931_v32  ;;  %v3949_v32 = vsub.f32 %v12253_v3, %v3923_v50 }
 0xfe9   : > { %v3976_v56 = vmul.f32 1.442695, %v3952_v59  ;;  %v3972_v59 = vmul.f32 1.442695, %v3950_v40 }
 0xfea   : > { %v3978_v54 = vmul.f32 1.442695, %v3953_v24  ;;  %v3941_v28 = vpop.xlane.xlu0 %3940  ;;  %v3970_v7 = vmul.f32 1.442695, %v3949_v32 }
 0xfeb   : > { %v3943_v19 = vpop.xlane.xlu1 %3942  ;;  %10132 = vpow2.f32 %v3976_v56  ;;  %v3958_v56 = vsub.f32 %v12267_v16, %v3941_v28 }
 0xfec   : > { %10134 = vpow2.f32 %v3982_v23 }
 0xfed   : > { %v12310_v53 = vpop.eup %10126  ;;  %10136 = vpow2.f32 %v3978_v54  ;;  %v3988_v24 = vmul.f32 1.442695, %v3958_v56  ;;  %v3959_v54 = vsub.f32 %v12271_v42, %v3943_v19 }
 0xfee   : > { %4000 = vadd.xlane.f32.xlu1 %v12310_v53  ;;  %v12314_v63 = vpop.eup %10128  ;;  %v3937_v23 = vpop.xlane.xlu0 %3936 }
 0xfef   : > { %v3939_v37 = vpop.xlane.xlu1 %3938  ;;  %v3990_v16 = vmul.f32 1.442695, %v3959_v54 }
 0xff0   : > { %v3957_v25 = vsub.f32 %v12273_v21, %v3939_v37  ;;  %v3956_v37 = vsub.f32 %v12269_v2, %v3937_v23 }
 0xff1   : > { %v12318_v14 = vpop.eup %10130 }
 0xff2   : > { %4006 = vadd.xlane.f32.xlu1 %v12314_v63  ;;  %v3986_v4 = vmul.f32 1.442695, %v3957_v25  ;;  %v3984_v10 = vmul.f32 1.442695, %v3956_v37  ;;  %v4206_v40 = vpop.permute.xlu0 %4205 }
 0xff4   : > { %10138 = vpow2.f32 %v3986_v4 }
 0xff5   : > { %v12321_v31 = vpop.eup %10132  ;;  %10140 = vpow2.f32 %v3972_v59 }
 0xff6   : > { %4012 = vadd.xlane.f32.xlu1 %v12318_v14  ;;  %v12326_v1 = vpop.eup %10134  ;;  %10142 = vpow2.f32 %v3970_v7 }
 0xff7   : > { %v12329_v35 = vpop.eup %10136  ;;  %10144 = vpow2.f32 %v3988_v24 }
 0xff8   : > { %10146 = vpow2.f32 %v3984_v10 }
 0xff9   : > { %10148 = vpow2.f32 %v3990_v16 }
 0xffa   : > { %4008 = vadd.xlane.f32.xlu1 %v12321_v31 }
 0xffc   : > { %4209 = vrot.lane.b32.xlu0 %v14853_v52, %s10542_s6 }
 0xffe   : > { %4014 = vadd.xlane.f32.xlu1 %v12326_v1  ;;  %v12332_v21 = vpop.eup %10138 }
 0xfff   : > { %v12342_v9 = vpop.eup %10140 }
0x1000   : > { %v12347_v3 = vpop.eup %10142 }
0x1001   : > { %v12352_v2 = vpop.eup %10144 }
0x1002   : > { %4010 = vadd.xlane.f32.xlu1 %v12329_v35  ;;  %v12357_v42 = vpop.eup %10146 }
0x1003   : > { %v12362_v50 = vpop.eup %10148 }
0x1006   : > { %4018 = vadd.xlane.f32.xlu1 %v12332_v21 }
0x1017   : > { %4211 = vrot.lane.b32.xlu1 %v14854_v45, %s10542_s6 }
0x101b   : > { %4004 = vadd.xlane.f32.xlu0 %v12342_v9  ;;  %4185 = vrot.lane.b32.xlu1 %v14850_v15, %s10543_s11 }
0x101f   : > { %4002 = vadd.xlane.f32.xlu0 %v12347_v3  ;;  %4189 = vrot.lane.b32.xlu1 %v14851_v34, %s10543_s11 }
0x1023   : > { %4193 = vrot.lane.b32.xlu1 %v14853_v52, %s10543_s11  ;;  %4020 = vadd.xlane.f32.xlu0 %v12352_v2 }
0x1027   : > { %4197 = vrot.lane.b32.xlu1 %v11554_v58, %s10543_s11  ;;  %4016 = vadd.xlane.f32.xlu0 %v12357_v42 }
0x102b   : > { %4548 = vrot.lane.b32.xlu1 %v14849_v29, %s10544_s12  ;;  %4022 = vadd.xlane.f32.xlu0 %v12362_v50 }
0x102f   : > { %4552 = vrot.lane.b32.xlu1 %v14852_v60, %s10544_s12 }
0x1033   : > { %4558 = vrot.lane.b32.xlu1 %v11554_v58, %s10544_s12 }
0x103e   : > { %v3997_v19 = vpop.xlane.xlu1 %3996 }
0x1041   : > { %4213 = vrot.lane.b32.xlu0 %v11554_v58, %s10542_s6 }
0x1042   : > { %v3993_v25 = vpop.xlane.xlu1 %3992 }
0x1045   : > { %4215 = vrot.lane.b32.xlu0 %v11551_v30, %s10542_s6 }
0x1046   : > { %v3999_v4 = vpop.xlane.xlu1 %3998 }
0x1047   : > { %10150 = vrcp.f32 %v3999_v4 }
0x1048   : > { %10152 = vrcp.f32 %v3993_v25 }
0x1049   : > { %4187 = vrot.lane.b32.xlu0 %v14849_v29, %s10543_s11  ;;  %10154 = vrcp.f32 %v3997_v19  ;;  %v4242_v19 = vsel %vm1564_vm3, %v12287_v46, 0 }
0x104a   : > { %v4208_v59 = vpop.permute.xlu1 %4207 }
0x104b   : > { %v4251_v46 = vsel %vm1564_vm3, %v4208_v59, 0 }
0x104d   : > { %4191 = vrot.lane.b32.xlu0 %v14852_v60, %s10543_s11 }
0x1051   : > { %4195 = vrot.lane.b32.xlu0 %v14854_v45, %s10543_s11  ;;  %v10151_v32 = vpop.eup %10150 }
0x1052   : > { %v10153_v56 = vpop.eup %10152  ;;  %v4043_v37 = vmul.f32 %v10151_v32, %v12297_v57 }
0x1053   : > { %v10155_v23 = vpop.eup %10154  ;;  %v4040_v54 = vmul.f32 %v10153_v56, %v12294_v27  ;;  %v4245_v27 = vsel %vm1564_vm3, %v12302_v6, 0 }
0x1054   : > { %v4042_v16 = vmul.f32 %v10155_v23, %v12291_v44 }
0x1055   : > { %4199 = vrot.lane.b32.xlu0 %v11551_v30, %s10543_s11 }
0x1056   : > { %v4057_v25 = vpack.c.bf16 %v4043_v37, %v4042_v16 }
0x1059   : > { %4546 = vrot.lane.b32.xlu0 %v14850_v15, %s10544_s12 }
0x105d   : > { %4550 = vrot.lane.b32.xlu0 %v14851_v34, %s10544_s12 }
0x1061   : > { %4554 = vrot.lane.b32.xlu0 %v14853_v52, %s10544_s12 }
0x1065   : > { %4556 = vrot.lane.b32.xlu0 %v14854_v45, %s10544_s12 }
0x1069   : > { %4560 = vrot.lane.b32.xlu0 %v11551_v30, %s10544_s12 }
0x1073   : > { %v3995_v28 = vpop.xlane.xlu0 %3994 }
0x1074   : > { %10156 = vrcp.f32 %v3995_v28 }
0x1077   : > { %v4210_v56 = vpop.permute.xlu0 %4209 }
0x107b   : > { %v4001_v7 = vpop.xlane.xlu1 %4000 }
0x107c   : > { %10158 = vrcp.f32 %v4001_v7 }
0x107e   : > { %v10157_v24 = vpop.eup %10156 }
0x107f   : > { %v4041_v10 = vmul.f32 %v10157_v24, %v12305_v5  ;;  %v4007_v49 = vpop.xlane.xlu1 %4006  ;;  %v4248_v5 = vsel %vm1564_vm3, %v4206_v40, 0 }
0x1080   : > { %10160 = vrcp.f32 %v4007_v49 }
0x1081   : > { %v4056_v4 = vpack.c.bf16 %v4041_v10, %v4040_v54 }
0x1083   : > { %9003 = vmatprep.mubr.bf16.mxu1 %v4056_v4  ;;  %v4013_v28 = vpop.xlane.xlu1 %4012 }
0x1084   : > { %9004 = vmatmul.mubr.bf16.vlgmr.msra.gmra.mrb[80].mxu1 %v4057_v25 }
0x1085   : > { %9020 = vmatpush3.bf16.xpose.msra.mxu1 %v4242_v19 }
0x1086   : > { %9436 = vmatprep.subr.msk.bf16.mxu1 %vm1564_vm3, %v12302_v6  ;;  %v4254_v6 = vsel %vm1564_vm3, %v4210_v56, 0  ;;  %v10159_v10 = vpop.eup %10158 }
0x1087   : > { %v4009_v57 = vpop.xlane.xlu1 %4008 }
0x108a   : > { %v10161_v16 = vpop.eup %10160 }
0x108b   : > { %v4015_v44 = vpop.xlane.xlu1 %4014 }
0x108d   : > { %9022 = vmatpush3.bf16.xpose.msra.mxu1 %v4245_v27 }
0x108e   : > { %9437 = vmatprep.subr.msk.bf16.mxu1 %vm1564_vm3, %v4206_v40 }
0x108f   : > { %v4011_v32 = vpop.xlane.xlu1 %4010 }
0x1093   : > { %v4019_v23 = vpop.xlane.xlu1 %4018 }
0x1095   : > { %9024 = vmatpush3.bf16.xpose.msra.mxu1 %v4248_v5  ;;  %v4044_v5 = vmul.f32 %v10159_v10, %v12310_v53 }
0x1096   : > { %9438 = vmatprep.subr.msk.bf16.mxu1 %vm1564_vm3, %v4208_v59 }
0x1097   : > { %v4212_v24 = vpop.permute.xlu1 %4211 }
0x1098   : > { %v4257_v40 = vsel %vm1564_vm3, %v4212_v24, 0 }
0x109d   : > { %9026 = vmatpush3.bf16.xpose.msra.mxu1 %v4251_v46 }
0x109e   : > { %9439 = vmatprep.subr.msk.bf16.mxu1 %vm1564_vm3, %v4210_v56 }
0x10a5   : > { %9028 = vmatpush3.bf16.xpose.msra.mxu1 %v4254_v6 }
0x10a6   : > { %9440 = vmatprep.subr.msk.bf16.mxu1 %vm1564_vm3, %v4212_v24 }
0x10a8   : > { %v4005_v37 = vpop.xlane.xlu0 %4004 }
0x10a9   : > { %10162 = vrcp.f32 %v4005_v37 }
0x10aa   : > { %10164 = vrcp.f32 %v4011_v32 }
0x10ab   : > { %10166 = vrcp.f32 %v4009_v57 }
0x10ac   : > { %v4003_v59 = vpop.xlane.xlu0 %4002 }
0x10ad   : > { %9030 = vmatpush3.bf16.xpose.msra.mxu1 %v4257_v40  ;;  %10168 = vrcp.f32 %v4003_v59 }
0x10ae   : > { %10170 = vrcp.f32 %v4015_v44  ;;  %v4047_v44 = vmul.f32 %v10161_v16, %v12314_v63 }
0x10af   : > { %10172 = vrcp.f32 %v4013_v28 }
0x10b0   : > { %v4021_v54 = vpop.xlane.xlu0 %4020  ;;  %10174 = vrcp.f32 %v4019_v23 }
0x10b3   : > { %v10163_v4 = vpop.eup %10162 }
0x10b4   : > { %v4017_v25 = vpop.xlane.xlu0 %4016  ;;  %v10165_v19 = vpop.eup %10164  ;;  %v4046_v27 = vmul.f32 %v10163_v4, %v12342_v9 }
0x10b5   : > { %10176 = vrcp.f32 %v4017_v25  ;;  %v10167_v7 = vpop.eup %10166  ;;  %v4049_v46 = vmul.f32 %v10165_v19, %v12329_v35  ;;  %v4186_v35 = vpop.permute.xlu1 %4185 }
0x10b6   : > { %v4048_v56 = vmul.f32 %v10167_v7, %v12321_v31  ;;  %v4059_v23 = vpack.c.bf16 %v4047_v44, %v4046_v27 }
0x10b7   : > { %v10169_v49 = vpop.eup %10168 }
0x10b8   : > { %v4023_v57 = vpop.xlane.xlu0 %4022  ;;  %v4045_v32 = vmul.f32 %v10169_v49, %v12347_v3  ;;  %v10171_v6 = vpop.eup %10170  ;;  %v4060_v37 = vpack.c.bf16 %v4049_v46, %v4048_v56 }
0x10b9   : > { %10178 = vrcp.f32 %v4023_v57  ;;  %v10173_v9 = vpop.eup %10172  ;;  %v4051_v40 = vmul.f32 %v10171_v6, %v12326_v1  ;;  %v4190_v25 = vpop.permute.xlu1 %4189 }
0x10ba   : > { %v4058_v28 = vpack.c.bf16 %v4045_v32, %v4044_v5  ;;  %10180 = vrcp.f32 %v4021_v54  ;;  %v10175_v3 = vpop.eup %10174  ;;  %v4050_v54 = vmul.f32 %v10173_v9, %v12318_v14 }
0x10bb   : > { %v4053_v10 = vmul.f32 %v10175_v3, %v12332_v21 }
0x10bc   : > { %9007 = vmatprep.mubr.bf16.mxu1 %v4058_v28  ;;  %v4214_v24 = vpop.permute.xlu0 %4213  ;;  %v4061_v16 = vpack.c.bf16 %v4051_v40, %v4050_v54 }
0x10bd   : > { %9008 = vmatmul.mubr.bf16.gmra.mrb[84].mxu1 %v4059_v23  ;;  %9441 = vmatprep.subr.msk.bf16.mxu1 %vm1564_vm3, %v4214_v24  ;;  %v4260_v53 = vsel %vm1564_vm3, %v4214_v24, 0  ;;  %v4194_v5 = vpop.permute.xlu1 %4193 }
0x10be   : > { %9011 = vmatprep.mubr.bf16.mxu1 %v4060_v37  ;;  %9032 = vmatpush3.bf16.xpose.msra.mxu1 %v4260_v53 }
0x10bf   : > { %v10177_v63 = vpop.eup %10176 }
0x10c0   : > { %v4216_v31 = vpop.permute.xlu0 %4215  ;;  %v4052_v59 = vmul.f32 %v10177_v63, %v12357_v42 }
0x10c1   : > { %9442 = vmatprep.subr.msk.bf16.mxu1 %vm1564_vm3, %v4216_v31  ;;  %v4263_v49 = vsel %vm1564_vm3, %v4216_v31, 0  ;;  %v4198_v21 = vpop.permute.xlu1 %4197 }
0x10c2   : > { %v4062_v7 = vpack.c.bf16 %v4053_v10, %v4052_v59 }
0x10c3   : > { %v10179_v4 = vpop.eup %10178 }
0x10c4   : > { %v4188_v19 = vpop.permute.xlu0 %4187  ;;  %v10181_v27 = vpop.eup %10180  ;;  %v4055_v1 = vmul.f32 %v10179_v4, %v12362_v50 }
0x10c5   : > { %9012 = vmatmul.mubr.bf16.gmra.mrb[88].mxu1 %v4061_v16  ;;  %v4054_v57 = vmul.f32 %v10181_v27, %v12352_v2  ;;  %v4549_v28 = vpop.permute.xlu1 %4548 }
0x10c6   : > { %9015 = vmatprep.mubr.bf16.mxu1 %v4062_v7  ;;  %9034 = vmatpush3.bf16.xpose.msra.mxu1 %v4263_v49 }
0x10c7   : > { %v4063_v14 = vpack.c.bf16 %v4055_v1, %v4054_v57 }
0x10c8   : > { %v4192_v42 = vpop.permute.xlu0 %4191 }
0x10c9   : > { %v4553_v2 = vpop.permute.xlu1 %4552 }
0x10cc   : > { %v4196_v32 = vpop.permute.xlu0 %4195 }
0x10cd   : > { %9016 = vmatmul.mubr.bf16.gmra.mrb[92].mxu1 %v4063_v14  ;;  %v4559_v6 = vpop.permute.xlu1 %4558 }
0x10ce   : > { %9035 = vmatprep.mubr.msk.bf16.mxu1 %vm1564_vm3, %v4186_v35 }
0x10d0   : > { %v4200_v46 = vpop.permute.xlu0 %4199 }
0x10d4   : > { %v4547_v44 = vpop.permute.xlu0 %4546 }
0x10d5   : > { %9036 = vmatmul.mubr.msk.bf16.vlgmr.msra.gmra.mrb[96].mxu1 %vm1564_vm3, %v4188_v19  ;;  %9051 = vmatprep.subr.bf16.mxu0 %v4547_v44 }
0x10d6   : > { %9039 = vmatprep.mubr.msk.bf16.mxu1 %vm1564_vm3, %v4190_v25  ;;  %9052 = vmatpush3.bf16.msra.mxu0 %v4547_v44 }
0x10d7   : > { %9053 = vmatprep.subr.bf16.mxu0 %v4549_v28 }
0x10d8   : > { %v4551_v50 = vpop.permute.xlu0 %4550 }
0x10da   : > { %9054 = vmatpush3.bf16.msra.mxu0 %v4549_v28 }
0x10db   : > { %9055 = vmatprep.subr.bf16.mxu0 %v4551_v50 }
0x10dc   : > { %v4555_v56 = vpop.permute.xlu0 %4554 }
0x10dd   : > { %9040 = vmatmul.mubr.msk.bf16.gmra.mrb[100].mxu1 %vm1564_vm3, %v4192_v42 }
0x10de   : > { %9043 = vmatprep.mubr.msk.bf16.mxu1 %vm1564_vm3, %v4194_v5  ;;  %9056 = vmatpush3.bf16.msra.mxu0 %v4551_v50 }
0x10df   : > { %9057 = vmatprep.subr.bf16.mxu0 %v4553_v2 }
0x10e0   : > { %v4557_v23 = vpop.permute.xlu0 %4556 }
0x10e2   : > { %9058 = vmatpush3.bf16.msra.mxu0 %v4553_v2 }
0x10e3   : > { %9059 = vmatprep.subr.bf16.mxu0 %v4555_v56 }
0x10e4   : > { %v4561_v24 = vpop.permute.xlu0 %4560 }
0x10e5   : > { %9044 = vmatmul.mubr.msk.bf16.gmra.mrb[104].mxu1 %vm1564_vm3, %v4196_v32 }
0x10e6   : > { %9047 = vmatprep.mubr.msk.bf16.mxu1 %vm1564_vm3, %v4198_v21  ;;  %9060 = vmatpush3.bf16.msra.mxu0 %v4555_v56 }
0x10e7   : > { %9061 = vmatprep.subr.bf16.mxu0 %v4557_v23 }
0x10ea   : > { %9062 = vmatpush3.bf16.msra.mxu0 %v4557_v23 }
0x10eb   : > { %9063 = vmatprep.subr.bf16.mxu0 %v4559_v6 }
0x10ed   : > { %9048 = vmatmul.mubr.msk.bf16.gmra.mrb[108].mxu1 %vm1564_vm3, %v4200_v46 }
0x10ee   : > { %9064 = vmatpush3.bf16.msra.mxu0 %v4559_v6 }
0x10ef   : > { %9065 = vmatprep.subr.bf16.mxu0 %v4561_v24 }
0x10f2   : > { %9066 = vmatpush3.bf16.msra.mxu0 %v4561_v24 }
0x1157   : > { %v12435_v37 = vpop.f32.mrb[80].mxu1 }
0x1158   : > { %14867 = vst [vmem:[#allocation77_spill] sm:$0xff] %v12435_v37  ;;  %v12437_v9 = vpop.f32.mrb[81].mxu1 }
0x1159   : > { %14868 = vst [vmem:[#allocation78_spill] sm:$0xff] %v12437_v9  ;;  %v12439_v53 = vpop.f32.mrb[82].mxu1 }
0x115a   : > { %14869 = vst [vmem:[#allocation79_spill] sm:$0xff] %v12439_v53  ;;  %v12441_v3 = vpop.f32.mrb[83].mxu1 }
0x115b   : > { %14870 = vst [vmem:[#allocation80_spill] sm:$0xff] %v12441_v3 }
0x1190   : > { %v12443_v35 = vpop.f32.mrb[84].mxu1 }
0x1191   : > { %14871 = vst [vmem:[#allocation81_spill] sm:$0xff] %v12443_v35  ;;  %v12445_v63 = vpop.f32.mrb[85].mxu1 }
0x1192   : > { %14872 = vst [vmem:[#allocation82_spill] sm:$0xff] %v12445_v63  ;;  %v12447_v40 = vpop.f32.mrb[86].mxu1 }
0x1193   : > { %14873 = vst [vmem:[#allocation83_spill] sm:$0xff] %v12447_v40  ;;  %v12449_v31 = vpop.f32.mrb[87].mxu1 }
0x1194   : > { %14874 = vst [vmem:[#allocation84_spill] sm:$0xff] %v12449_v31 }
0x1198   : > { %v12451_v59 = vpop.f32.mrb[88].mxu1 }
0x1199   : > { %14875 = vst [vmem:[#allocation85_spill] sm:$0xff] %v12451_v59  ;;  %v12453_v54 = vpop.f32.mrb[89].mxu1 }
0x119a   : > { %14876 = vst [vmem:[#allocation86_spill] sm:$0xff] %v12453_v54  ;;  %v12455_v10 = vpop.f32.mrb[90].mxu1 }
0x119b   : > { %14877 = vst [vmem:[#allocation87_spill] sm:$0xff] %v12455_v10  ;;  %v12457_v16 = vpop.f32.mrb[91].mxu1 }
0x119c   : > { %14878 = vst [vmem:[#allocation88_spill] sm:$0xff] %v12457_v16 }
0x11a0   : > { %v12459_v4 = vpop.f32.mrb[92].mxu1 }
0x11a1   : > { %14879 = vst [vmem:[#allocation89_spill] sm:$0xff] %v12459_v4  ;;  %v12461_v25 = vpop.f32.mrb[93].mxu1 }
0x11a2   : > { %14880 = vst [vmem:[#allocation90_spill] sm:$0xff] %v12461_v25  ;;  %v12463_v19 = vpop.f32.mrb[94].mxu1 }
0x11a3   : > { %14881 = vst [vmem:[#allocation91_spill] sm:$0xff] %v12463_v19  ;;  %v12465_v7 = vpop.f32.mrb[95].mxu1 }
0x11a4   : > { %14882 = vst [vmem:[#allocation92_spill] sm:$0xff] %v12465_v7 }
0x11a8   : > { %v9037_v49 = vpop.f32.mrb[96].mxu1 }
0x11a9   : > { %4398 = vmax.xlane.f32.xlu0 %v9037_v49  ;;  %v4299_v27 = vpop.f32.mrb[97].mxu1 }
0x11aa   : > { %4394 = vmax.xlane.f32.xlu1 %v4299_v27  ;;  %v9038_v1 = vpop.f32.mrb[98].mxu1 }
0x11ab   : > { %v4302_v42 = vpop.f32.mrb[99].mxu1 }
0x11ae   : > { %4400 = vmax.xlane.f32.xlu1 %v9038_v1 }
0x11b0   : > { %v12467_v57 = vpop.f32.mrb[100].mxu1 }
0x11b1   : > { %v4315_v5 = vpop.f32.mrb[101].mxu1 }
0x11b2   : > { %v9042_v14 = vpop.f32.mrb[102].mxu1 }
0x11b3   : > { %v12469_v32 = vpop.f32.mrb[103].mxu1 }
0x11b8   : > { %v12471_v21 = vpop.f32.mrb[104].mxu1 }
0x11b9   : > { %v12473_v46 = vpop.f32.mrb[105].mxu1 }
0x11ba   : > { %v12475_v44 = vpop.f32.mrb[106].mxu1 }
0x11bb   : > { %v12477_v28 = vpop.f32.mrb[107].mxu1 }
0x11bf   : > { %4685 = vrot.lane.b32.xlu0 %v14849_v29, %s10545_s13  ;;  %4683 = vrot.lane.b32.xlu1 %v14850_v15, %s10545_s13 }
0x11c0   : > { %v12483_v50 = vpop.f32.mrb[108].mxu1 }
0x11c1   : > { %v12485_v2 = vpop.f32.mrb[109].mxu1 }
0x11c2   : > { %v12487_v56 = vpop.f32.mrb[110].mxu1 }
0x11c3   : > { %v12489_v23 = vpop.f32.mrb[111].mxu1 }
0x11de   : > { %4396 = vmax.xlane.f32.xlu0 %v4302_v42 }
0x11e2   : > { %4406 = vmax.xlane.f32.xlu0 %v12467_v57 }
0x11e3   : > { %4408 = vmax.xlane.f32.xlu1 %v9042_v14 }
0x11e6   : > { %4402 = vmax.xlane.f32.xlu0 %v4315_v5 }
0x11e7   : > { %4404 = vmax.xlane.f32.xlu1 %v12469_v32 }
0x11ea   : > { %4414 = vmax.xlane.f32.xlu0 %v12471_v21 }
0x11eb   : > { %4416 = vmax.xlane.f32.xlu1 %v12475_v44 }
0x11ee   : > { %4410 = vmax.xlane.f32.xlu0 %v12473_v46 }
0x11ef   : > { %4412 = vmax.xlane.f32.xlu1 %v12477_v28 }
0x11f2   : > { %4422 = vmax.xlane.f32.xlu0 %v12483_v50 }
0x11f3   : > { %4424 = vmax.xlane.f32.xlu1 %v12487_v56 }
0x11f6   : > { %4418 = vmax.xlane.f32.xlu0 %v12485_v2 }
0x11f7   : > { %4420 = vmax.xlane.f32.xlu1 %v12489_v23 }
0x120c   : > { %4687 = vrot.lane.b32.xlu0 %v14851_v34, %s10545_s13 }
0x1236   : > { %v4399_v6 = vpop.xlane.xlu0 %4398 }
0x1237   : > { %v4428_v24 = vsub.f32 %v9037_v49, %v4399_v6  ;;  %v4395_v25 = vpop.xlane.xlu1 %4394 }
0x1238   : > { %v4426_v7 = vsub.f32 %v4299_v27, %v4395_v25 }
0x1239   : > { %v4446_v4 = vmul.f32 1.442695, %v4428_v24 }
0x123a   : > { %v4442_v19 = vmul.f32 1.442695, %v4426_v7 }
0x123b   : > { %10182 = vpow2.f32 %v4446_v4  ;;  %v4401_v59 = vpop.xlane.xlu1 %4400 }
0x123c   : > { %v4429_v10 = vsub.f32 %v9038_v1, %v4401_v59  ;;  %10184 = vpow2.f32 %v4442_v19  ;;  %v12518_v59 = vpop.permute.xlu0 %4685 }
0x123e   : > { %v4448_v54 = vmul.f32 1.442695, %v4429_v10 }
0x123f   : > { %v12503_v16 = vpop.permute.xlu1 %4683 }
0x1240   : > { %9443 = vmatprep.subr.msk.bf16.mxu0 %vm1564_vm3, %v12503_v16  ;;  %10186 = vpow2.f32 %v4448_v54 }
0x1245   : > { %v12507_v35 = vpop.eup %10182 }
0x1246   : > { %4478 = vadd.xlane.f32.xlu1 %v12507_v35  ;;  %v12510_v49 = vpop.eup %10184 }
0x124a   : > { %4474 = vadd.xlane.f32.xlu1 %v12510_v49  ;;  %v12513_v4 = vpop.eup %10186 }
0x124e   : > { %4480 = vadd.xlane.f32.xlu1 %v12513_v4 }
0x125f   : > { %4689 = vrot.lane.b32.xlu1 %v14852_v60, %s10545_s13 }
0x126b   : > { %v4397_v10 = vpop.xlane.xlu0 %4396 }
0x126c   : > { %v4427_v25 = vsub.f32 %v4302_v42, %v4397_v10 }
0x126e   : > { %v4444_v54 = vmul.f32 1.442695, %v4427_v25 }
0x126f   : > { %v4407_v19 = vpop.xlane.xlu0 %4406 }
0x1270   : > { %10188 = vpow2.f32 %v4444_v54  ;;  %v4409_v7 = vpop.xlane.xlu1 %4408 }
0x1271   : > { %v4433_v1 = vsub.f32 %v9042_v14, %v4409_v7 }
0x1273   : > { %v4403_v27 = vpop.xlane.xlu0 %4402  ;;  %v4456_v31 = vmul.f32 1.442695, %v4433_v1 }
0x1274   : > { %v4430_v6 = vsub.f32 %v4315_v5, %v4403_v27  ;;  %v4405_v24 = vpop.xlane.xlu1 %4404 }
0x1276   : > { %v4450_v40 = vmul.f32 1.442695, %v4430_v6 }
0x1277   : > { %v4415_v63 = vpop.xlane.xlu0 %4414 }
0x1278   : > { %10190 = vpow2.f32 %v4450_v40  ;;  %v4436_v53 = vsub.f32 %v12471_v21, %v4415_v63  ;;  %v4417_v37 = vpop.xlane.xlu1 %4416 }
0x1279   : > { %10192 = vpow2.f32 %v4456_v31  ;;  %v4437_v5 = vsub.f32 %v12475_v44, %v4417_v37 }
0x127a   : > { %v12521_v9 = vpop.eup %10188  ;;  %v4462_v10 = vmul.f32 1.442695, %v4436_v53 }
0x127b   : > { %4476 = vadd.xlane.f32.xlu0 %v12521_v9  ;;  %v4411_v42 = vpop.xlane.xlu0 %4410  ;;  %v4464_v63 = vmul.f32 1.442695, %v4437_v5 }
0x127c   : > { %v4434_v25 = vsub.f32 %v12473_v46, %v4411_v42  ;;  %v4413_v54 = vpop.xlane.xlu1 %4412  ;;  %10194 = vpow2.f32 %v4462_v10  ;;  %v4432_v42 = vsub.f32 %v12467_v57, %v4407_v19 }
0x127d   : > { %v4435_v40 = vsub.f32 %v12477_v28, %v4413_v54  ;;  %v4431_v54 = vsub.f32 %v12469_v32, %v4405_v24 }
0x127e   : > { %v4458_v14 = vmul.f32 1.442695, %v4434_v25  ;;  %v4454_v25 = vmul.f32 1.442695, %v4432_v42 }
0x127f   : > { %v4460_v53 = vmul.f32 1.442695, %v4435_v40  ;;  %v4423_v10 = vpop.xlane.xlu0 %4422  ;;  %v4452_v5 = vmul.f32 1.442695, %v4431_v54 }
0x1280   : > { %v4425_v7 = vpop.xlane.xlu1 %4424  ;;  %10196 = vpow2.f32 %v4458_v14  ;;  %v4440_v14 = vsub.f32 %v12483_v50, %v4423_v10 }
0x1281   : > { %10198 = vpow2.f32 %v4464_v63 }
0x1282   : > { %v12526_v27 = vpop.eup %10190  ;;  %10200 = vpow2.f32 %v4460_v53  ;;  %v4470_v40 = vmul.f32 1.442695, %v4440_v14  ;;  %v4441_v53 = vsub.f32 %v12487_v56, %v4425_v7 }
0x1283   : > { %4482 = vadd.xlane.f32.xlu1 %v12526_v27  ;;  %v12530_v1 = vpop.eup %10192  ;;  %v4419_v63 = vpop.xlane.xlu0 %4418 }
0x1284   : > { %v4421_v21 = vpop.xlane.xlu1 %4420  ;;  %v4472_v32 = vmul.f32 1.442695, %v4441_v53 }
0x1285   : > { %v4439_v31 = vsub.f32 %v12489_v23, %v4421_v21  ;;  %v4438_v21 = vsub.f32 %v12485_v2, %v4419_v63 }
0x1286   : > { %v12534_v37 = vpop.eup %10194 }
0x1287   : > { %4488 = vadd.xlane.f32.xlu1 %v12530_v1  ;;  %v4468_v46 = vmul.f32 1.442695, %v4439_v31  ;;  %v4466_v57 = vmul.f32 1.442695, %v4438_v21  ;;  %v4688_v42 = vpop.permute.xlu0 %4687 }
0x1289   : > { %10202 = vpow2.f32 %v4468_v46 }
0x128a   : > { %v12537_v44 = vpop.eup %10196  ;;  %10204 = vpow2.f32 %v4454_v25 }
0x128b   : > { %4494 = vadd.xlane.f32.xlu1 %v12534_v37  ;;  %v12542_v28 = vpop.eup %10198  ;;  %10206 = vpow2.f32 %v4452_v5 }
0x128c   : > { %v12545_v6 = vpop.eup %10200  ;;  %10208 = vpow2.f32 %v4470_v40 }
0x128d   : > { %10210 = vpow2.f32 %v4466_v57 }
0x128e   : > { %10212 = vpow2.f32 %v4472_v32 }
0x128f   : > { %4490 = vadd.xlane.f32.xlu1 %v12537_v44 }
0x1291   : > { %4691 = vrot.lane.b32.xlu0 %v14853_v52, %s10545_s13 }
0x1293   : > { %4496 = vadd.xlane.f32.xlu1 %v12542_v28  ;;  %v12548_v23 = vpop.eup %10202 }
0x1294   : > { %v12558_v19 = vpop.eup %10204 }
0x1295   : > { %v12563_v50 = vpop.eup %10206 }
0x1296   : > { %v12568_v2 = vpop.eup %10208 }
0x1297   : > { %4492 = vadd.xlane.f32.xlu1 %v12545_v6  ;;  %v12573_v56 = vpop.eup %10210 }
0x1298   : > { %v12578_v24 = vpop.eup %10212 }
0x129b   : > { %4500 = vadd.xlane.f32.xlu1 %v12548_v23 }
0x12ac   : > { %4693 = vrot.lane.b32.xlu1 %v14854_v45, %s10545_s13 }
0x12b0   : > { %4486 = vadd.xlane.f32.xlu0 %v12558_v19  ;;  %4667 = vrot.lane.b32.xlu1 %v14850_v15, %s10546_s14 }
0x12b4   : > { %4484 = vadd.xlane.f32.xlu0 %v12563_v50  ;;  %4671 = vrot.lane.b32.xlu1 %v14851_v34, %s10546_s14 }
0x12b8   : > { %4675 = vrot.lane.b32.xlu1 %v14853_v52, %s10546_s14  ;;  %4502 = vadd.xlane.f32.xlu0 %v12568_v2 }
0x12bc   : > { %4679 = vrot.lane.b32.xlu1 %v11554_v58, %s10546_s14  ;;  %4498 = vadd.xlane.f32.xlu0 %v12573_v56 }
0x12c0   : > { %5030 = vrot.lane.b32.xlu1 %v14849_v29, %s10547_s15  ;;  %4504 = vadd.xlane.f32.xlu0 %v12578_v24 }
0x12c4   : > { %5034 = vrot.lane.b32.xlu1 %v14852_v60, %s10547_s15 }
0x12c8   : > { %5040 = vrot.lane.b32.xlu1 %v11554_v58, %s10547_s15 }
0x12d3   : > { %v4479_v7 = vpop.xlane.xlu1 %4478 }
0x12d6   : > { %4695 = vrot.lane.b32.xlu0 %v11554_v58, %s10545_s13 }
0x12d7   : > { %v4475_v31 = vpop.xlane.xlu1 %4474 }
0x12da   : > { %4697 = vrot.lane.b32.xlu0 %v11551_v30, %s10545_s13 }
0x12db   : > { %v4481_v46 = vpop.xlane.xlu1 %4480 }
0x12dc   : > { %10214 = vrcp.f32 %v4481_v46 }
0x12dd   : > { %10216 = vrcp.f32 %v4475_v31 }
0x12de   : > { %4669 = vrot.lane.b32.xlu0 %v14849_v29, %s10546_s14  ;;  %10218 = vrcp.f32 %v4479_v7  ;;  %v4724_v7 = vsel %vm1564_vm3, %v12503_v16, 0 }
0x12df   : > { %v4690_v25 = vpop.permute.xlu1 %4689 }
0x12e0   : > { %v4733_v16 = vsel %vm1564_vm3, %v4690_v25, 0 }
0x12e2   : > { %4673 = vrot.lane.b32.xlu0 %v14852_v60, %s10546_s14 }
0x12e6   : > { %4677 = vrot.lane.b32.xlu0 %v14854_v45, %s10546_s14  ;;  %v10215_v54 = vpop.eup %10214 }
0x12e7   : > { %v10217_v14 = vpop.eup %10216  ;;  %v4525_v21 = vmul.f32 %v10215_v54, %v12513_v4 }
0x12e8   : > { %v10219_v63 = vpop.eup %10218  ;;  %v4522_v53 = vmul.f32 %v10217_v14, %v12510_v49  ;;  %v4727_v49 = vsel %vm1564_vm3, %v12518_v59, 0 }
0x12e9   : > { %v4524_v32 = vmul.f32 %v10219_v63, %v12507_v35  ;;  %v4730_v35 = vsel %vm1564_vm3, %v4688_v42, 0 }
0x12ea   : > { %4681 = vrot.lane.b32.xlu0 %v11551_v30, %s10546_s14 }
0x12eb   : > { %v4539_v31 = vpack.c.bf16 %v4525_v21, %v4524_v32 }
0x12ee   : > { %5028 = vrot.lane.b32.xlu0 %v14850_v15, %s10547_s15 }
0x12f2   : > { %5032 = vrot.lane.b32.xlu0 %v14851_v34, %s10547_s15 }
0x12f6   : > { %5036 = vrot.lane.b32.xlu0 %v14853_v52, %s10547_s15 }
0x12fa   : > { %5038 = vrot.lane.b32.xlu0 %v14854_v45, %s10547_s15 }
0x12fe   : > { %5042 = vrot.lane.b32.xlu0 %v11551_v30, %s10547_s15 }
0x1308   : > { %v4477_v10 = vpop.xlane.xlu0 %4476 }
0x1309   : > { %10220 = vrcp.f32 %v4477_v10 }
0x130c   : > { %v4692_v14 = vpop.permute.xlu0 %4691 }
0x1310   : > { %v4483_v5 = vpop.xlane.xlu1 %4482 }
0x1311   : > { %10222 = vrcp.f32 %v4483_v5 }
0x1313   : > { %v10221_v40 = vpop.eup %10220 }
0x1314   : > { %v4523_v57 = vmul.f32 %v10221_v40, %v12521_v9  ;;  %v4489_v3 = vpop.xlane.xlu1 %4488 }
0x1315   : > { %10224 = vrcp.f32 %v4489_v3 }
0x1316   : > { %v4538_v46 = vpack.c.bf16 %v4523_v57, %v4522_v53 }
0x1318   : > { %9067 = vmatprep.mubr.bf16.mxu0 %v4538_v46  ;;  %v4495_v10 = vpop.xlane.xlu1 %4494 }
0x1319   : > { %9068 = vmatmul.mubr.bf16.vlgmr.msra.gmra.mrb[128].mxu0 %v4539_v31 }
0x131a   : > { %9084 = vmatpush3.bf16.xpose.msra.mxu0 %v4724_v7 }
0x131b   : > { %9444 = vmatprep.subr.msk.bf16.mxu0 %vm1564_vm3, %v12518_v59  ;;  %v4736_v59 = vsel %vm1564_vm3, %v4692_v14, 0  ;;  %v10223_v57 = vpop.eup %10222 }
0x131c   : > { %v4491_v4 = vpop.xlane.xlu1 %4490 }
0x131f   : > { %v10225_v32 = vpop.eup %10224 }
0x1320   : > { %v4497_v9 = vpop.xlane.xlu1 %4496 }
0x1322   : > { %9086 = vmatpush3.bf16.xpose.msra.mxu0 %v4727_v49 }
0x1323   : > { %9445 = vmatprep.subr.msk.bf16.mxu0 %vm1564_vm3, %v4688_v42 }
0x1324   : > { %v4493_v54 = vpop.xlane.xlu1 %4492 }
0x1328   : > { %v4501_v63 = vpop.xlane.xlu1 %4500 }
0x132a   : > { %9088 = vmatpush3.bf16.xpose.msra.mxu0 %v4730_v35  ;;  %v4526_v35 = vmul.f32 %v10223_v57, %v12526_v27 }
0x132b   : > { %9446 = vmatprep.subr.msk.bf16.mxu0 %vm1564_vm3, %v4690_v25 }
0x132c   : > { %v4694_v40 = vpop.permute.xlu1 %4693 }
0x132d   : > { %v4739_v42 = vsel %vm1564_vm3, %v4694_v40, 0 }
0x1332   : > { %9090 = vmatpush3.bf16.xpose.msra.mxu0 %v4733_v16 }
0x1333   : > { %9447 = vmatprep.subr.msk.bf16.mxu0 %vm1564_vm3, %v4692_v14 }
0x133a   : > { %9092 = vmatpush3.bf16.xpose.msra.mxu0 %v4736_v59 }
0x133b   : > { %9448 = vmatprep.subr.msk.bf16.mxu0 %vm1564_vm3, %v4694_v40 }
0x133d   : > { %v4487_v21 = vpop.xlane.xlu0 %4486 }
0x133e   : > { %10226 = vrcp.f32 %v4487_v21 }
0x133f   : > { %10228 = vrcp.f32 %v4493_v54 }
0x1340   : > { %10230 = vrcp.f32 %v4491_v4 }
0x1341   : > { %v4485_v25 = vpop.xlane.xlu0 %4484 }
0x1342   : > { %9094 = vmatpush3.bf16.xpose.msra.mxu0 %v4739_v42  ;;  %10232 = vrcp.f32 %v4485_v25 }
0x1343   : > { %10234 = vrcp.f32 %v4497_v9  ;;  %v4529_v9 = vmul.f32 %v10225_v32, %v12530_v1 }
0x1344   : > { %10236 = vrcp.f32 %v4495_v10 }
0x1345   : > { %v4503_v53 = vpop.xlane.xlu0 %4502  ;;  %10238 = vrcp.f32 %v4501_v63 }
0x1348   : > { %v10227_v46 = vpop.eup %10226 }
0x1349   : > { %v4499_v31 = vpop.xlane.xlu0 %4498  ;;  %v10229_v7 = vpop.eup %10228  ;;  %v4528_v49 = vmul.f32 %v10227_v46, %v12558_v19 }
0x134a   : > { %10240 = vrcp.f32 %v4499_v31  ;;  %v10231_v5 = vpop.eup %10230  ;;  %v4531_v16 = vmul.f32 %v10229_v7, %v12545_v6  ;;  %v4668_v6 = vpop.permute.xlu1 %4667 }
0x134b   : > { %v4530_v14 = vmul.f32 %v10231_v5, %v12537_v44  ;;  %v4541_v63 = vpack.c.bf16 %v4529_v9, %v4528_v49 }
0x134c   : > { %v10233_v3 = vpop.eup %10232 }
0x134d   : > { %v4505_v4 = vpop.xlane.xlu0 %4504  ;;  %v4527_v54 = vmul.f32 %v10233_v3, %v12563_v50  ;;  %v10235_v59 = vpop.eup %10234  ;;  %v4542_v21 = vpack.c.bf16 %v4531_v16, %v4530_v14 }
0x134e   : > { %10242 = vrcp.f32 %v4505_v4  ;;  %v10237_v19 = vpop.eup %10236  ;;  %v4533_v42 = vmul.f32 %v10235_v59, %v12542_v28  ;;  %v4672_v31 = vpop.permute.xlu1 %4671 }
0x134f   : > { %v4540_v10 = vpack.c.bf16 %v4527_v54, %v4526_v35  ;;  %10244 = vrcp.f32 %v4503_v53  ;;  %v10239_v50 = vpop.eup %10238  ;;  %v4532_v53 = vmul.f32 %v10237_v19, %v12534_v37 }
0x1350   : > { %v4535_v57 = vmul.f32 %v10239_v50, %v12548_v23 }
0x1351   : > { %9071 = vmatprep.mubr.bf16.mxu0 %v4540_v10  ;;  %v4696_v40 = vpop.permute.xlu0 %4695  ;;  %v4543_v32 = vpack.c.bf16 %v4533_v42, %v4532_v53 }
0x1352   : > { %9072 = vmatmul.mubr.bf16.gmra.mrb[132].mxu0 %v4541_v63  ;;  %9449 = vmatprep.subr.msk.bf16.mxu0 %vm1564_vm3, %v4696_v40  ;;  %v4742_v27 = vsel %vm1564_vm3, %v4696_v40, 0  ;;  %v4676_v35 = vpop.permute.xlu1 %4675 }
0x1353   : > { %9075 = vmatprep.mubr.bf16.mxu0 %v4542_v21  ;;  %9096 = vmatpush3.bf16.xpose.msra.mxu0 %v4742_v27 }
0x1354   : > { %v10241_v1 = vpop.eup %10240 }
0x1355   : > { %v4698_v44 = vpop.permute.xlu0 %4697  ;;  %v4534_v25 = vmul.f32 %v10241_v1, %v12573_v56 }
0x1356   : > { %9450 = vmatprep.subr.msk.bf16.mxu0 %vm1564_vm3, %v4698_v44  ;;  %v4745_v3 = vsel %vm1564_vm3, %v4698_v44, 0  ;;  %v4680_v23 = vpop.permute.xlu1 %4679 }
0x1357   : > { %v4544_v5 = vpack.c.bf16 %v4535_v57, %v4534_v25 }
0x1358   : > { %v10243_v46 = vpop.eup %10242 }
0x1359   : > { %v4670_v7 = vpop.permute.xlu0 %4669  ;;  %v10245_v49 = vpop.eup %10244  ;;  %v4537_v28 = vmul.f32 %v10243_v46, %v12578_v24 }
0x135a   : > { %9076 = vmatmul.mubr.bf16.gmra.mrb[136].mxu0 %v4543_v32  ;;  %v4536_v4 = vmul.f32 %v10245_v49, %v12568_v2  ;;  %v5031_v10 = vpop.permute.xlu1 %5030 }
0x135b   : > { %9079 = vmatprep.mubr.bf16.mxu0 %v4544_v5  ;;  %9098 = vmatpush3.bf16.xpose.msra.mxu0 %v4745_v3 }
0x135c   : > { %v4545_v37 = vpack.c.bf16 %v4537_v28, %v4536_v4 }
0x135d   : > { %v4674_v56 = vpop.permute.xlu0 %4673 }
0x135e   : > { %v5035_v2 = vpop.permute.xlu1 %5034 }
0x1361   : > { %v4678_v54 = vpop.permute.xlu0 %4677 }
0x1362   : > { %9080 = vmatmul.mubr.bf16.gmra.mrb[140].mxu0 %v4545_v37  ;;  %v5041_v59 = vpop.permute.xlu1 %5040 }
0x1363   : > { %9099 = vmatprep.mubr.msk.bf16.mxu0 %vm1564_vm3, %v4668_v6 }
0x1365   : > { %v4682_v16 = vpop.permute.xlu0 %4681 }
0x1369   : > { %v5029_v9 = vpop.permute.xlu0 %5028 }
0x136a   : > { %9100 = vmatmul.mubr.msk.bf16.vlgmr.msra.gmra.mrb[144].mxu0 %vm1564_vm3, %v4670_v7  ;;  %9115 = vmatprep.subr.bf16.mxu1 %v5029_v9 }
0x136b   : > { %9103 = vmatprep.mubr.msk.bf16.mxu0 %vm1564_vm3, %v4672_v31  ;;  %9116 = vmatpush3.bf16.msra.mxu1 %v5029_v9 }
0x136c   : > { %9117 = vmatprep.subr.bf16.mxu1 %v5031_v10 }
0x136d   : > { %v5033_v24 = vpop.permute.xlu0 %5032 }
0x136f   : > { %9118 = vmatpush3.bf16.msra.mxu1 %v5031_v10 }
0x1370   : > { %9119 = vmatprep.subr.bf16.mxu1 %v5033_v24 }
0x1371   : > { %v5037_v14 = vpop.permute.xlu0 %5036 }
0x1372   : > { %9104 = vmatmul.mubr.msk.bf16.gmra.mrb[148].mxu0 %vm1564_vm3, %v4674_v56 }
0x1373   : > { %9107 = vmatprep.mubr.msk.bf16.mxu0 %vm1564_vm3, %v4676_v35  ;;  %9120 = vmatpush3.bf16.msra.mxu1 %v5033_v24 }
0x1374   : > { %9121 = vmatprep.subr.bf16.mxu1 %v5035_v2 }
0x1375   : > { %v5039_v63 = vpop.permute.xlu0 %5038 }
0x1377   : > { %9122 = vmatpush3.bf16.msra.mxu1 %v5035_v2 }
0x1378   : > { %9123 = vmatprep.subr.bf16.mxu1 %v5037_v14 }
0x1379   : > { %v5043_v40 = vpop.permute.xlu0 %5042 }
0x137a   : > { %9108 = vmatmul.mubr.msk.bf16.gmra.mrb[152].mxu0 %vm1564_vm3, %v4678_v54 }
0x137b   : > { %9111 = vmatprep.mubr.msk.bf16.mxu0 %vm1564_vm3, %v4680_v23  ;;  %9124 = vmatpush3.bf16.msra.mxu1 %v5037_v14 }
0x137c   : > { %9125 = vmatprep.subr.bf16.mxu1 %v5039_v63 }
0x137f   : > { %9126 = vmatpush3.bf16.msra.mxu1 %v5039_v63 }
0x1380   : > { %9127 = vmatprep.subr.bf16.mxu1 %v5041_v59 }
0x1382   : > { %9112 = vmatmul.mubr.msk.bf16.gmra.mrb[156].mxu0 %vm1564_vm3, %v4682_v16 }
0x1383   : > { %9128 = vmatpush3.bf16.msra.mxu1 %v5041_v59 }
0x1384   : > { %9129 = vmatprep.subr.bf16.mxu1 %v5043_v40 }
0x1387   : > { %9130 = vmatpush3.bf16.msra.mxu1 %v5043_v40 }
0x13ec   : > { %v12651_v21 = vpop.f32.mrb[128].mxu0 }
0x13ed   : > { %14883 = vst [vmem:[#allocation93_spill] sm:$0xff] %v12651_v21  ;;  %v12653_v19 = vpop.f32.mrb[129].mxu0 }
0x13ee   : > { %14884 = vst [vmem:[#allocation94_spill] sm:$0xff] %v12653_v19  ;;  %v12655_v27 = vpop.f32.mrb[130].mxu0 }
0x13ef   : > { %14885 = vst [vmem:[#allocation95_spill] sm:$0xff] %v12655_v27  ;;  %v12659_v6 = vpop.f32.mrb[131].mxu0 }
0x1425   : > { %v12663_v42 = vpop.f32.mrb[132].mxu0 }
0x1426   : > { %14886 = vst [vmem:[#allocation96_spill] sm:$0xff] %v12663_v42  ;;  %v12665_v44 = vpop.f32.mrb[133].mxu0 }
0x1427   : > { %14887 = vst [vmem:[#allocation97_spill] sm:$0xff] %v12665_v44  ;;  %v12667_v25 = vpop.f32.mrb[134].mxu0 }
0x1428   : > { %14888 = vst [vmem:[#allocation98_spill] sm:$0xff] %v12667_v25  ;;  %v12671_v57 = vpop.f32.mrb[135].mxu0 }
0x1429   : > { %14889 = vst [vmem:[#allocation99_spill] sm:$0xff] %v12671_v57 }
0x142d   : > { %v12675_v46 = vpop.f32.mrb[136].mxu0 }
0x142e   : > { %14890 = vst [vmem:[#allocation100_spill] sm:$0xff] %v12675_v46  ;;  %v12677_v31 = vpop.f32.mrb[137].mxu0 }
0x142f   : > { %14891 = vst [vmem:[#allocation101_spill] sm:$0xff] %v12677_v31  ;;  %v12679_v7 = vpop.f32.mrb[138].mxu0 }
0x1430   : > { %14892 = vst [vmem:[#allocation102_spill] sm:$0xff] %v12679_v7  ;;  %v12683_v3 = vpop.f32.mrb[139].mxu0 }
0x1431   : > { %14893 = vst [vmem:[#allocation103_spill] sm:$0xff] %v12683_v3 }
0x1435   : > { %v12687_v28 = vpop.f32.mrb[140].mxu0 }
0x1436   : > { %14894 = vst [vmem:[#allocation104_spill] sm:$0xff] %v12687_v28  ;;  %v12689_v56 = vpop.f32.mrb[141].mxu0 }
0x1437   : > { %14895 = vst [vmem:[#allocation105_spill] sm:$0xff] %v12689_v56  ;;  %v12691_v4 = vpop.f32.mrb[142].mxu0 }
0x1438   : > { %14896 = vst [vmem:[#allocation106_spill] sm:$0xff] %v12691_v4  ;;  %v12695_v37 = vpop.f32.mrb[143].mxu0 }
0x1439   : > { %14897 = vst [vmem:[#allocation107_spill] sm:$0xff] %v12695_v37 }
0x143d   : > { %v9101_v23 = vpop.f32.mrb[144].mxu0 }
0x143e   : > { %4880 = vmax.xlane.f32.xlu0 %v9101_v23  ;;  %v4781_v16 = vpop.f32.mrb[145].mxu0 }
0x143f   : > { %4876 = vmax.xlane.f32.xlu1 %v4781_v16  ;;  %v9102_v9 = vpop.f32.mrb[146].mxu0 }
0x1440   : > { %v4784_v10 = vpop.f32.mrb[147].mxu0 }
0x1443   : > { %4882 = vmax.xlane.f32.xlu1 %v9102_v9 }
0x1445   : > { %v12699_v24 = vpop.f32.mrb[148].mxu0 }
0x1446   : > { %v4797_v2 = vpop.f32.mrb[149].mxu0 }
0x1447   : > { %v9106_v14 = vpop.f32.mrb[150].mxu0 }
0x1448   : > { %v12701_v63 = vpop.f32.mrb[151].mxu0 }
0x144d   : > { %v12703_v59 = vpop.f32.mrb[152].mxu0 }
0x144e   : > { %v12705_v40 = vpop.f32.mrb[153].mxu0 }
0x144f   : > { %v12707_v35 = vpop.f32.mrb[154].mxu0 }
0x1450   : > { %v12709_v54 = vpop.f32.mrb[155].mxu0 }
0x1454   : > { %5167 = vrot.lane.b32.xlu0 %v14849_v29, %s10548_s16  ;;  %5165 = vrot.lane.b32.xlu1 %v14850_v15, %s10548_s16 }
0x1455   : > { %v12715_v5 = vpop.f32.mrb[156].mxu0 }
0x1456   : > { %v12717_v53 = vpop.f32.mrb[157].mxu0 }
0x1457   : > { %v12719_v50 = vpop.f32.mrb[158].mxu0 }
0x1458   : > { %v12721_v49 = vpop.f32.mrb[159].mxu0 }
0x1473   : > { %4878 = vmax.xlane.f32.xlu0 %v4784_v10 }
0x1477   : > { %4888 = vmax.xlane.f32.xlu0 %v12699_v24 }
0x1478   : > { %4890 = vmax.xlane.f32.xlu1 %v9106_v14 }
0x147b   : > { %4884 = vmax.xlane.f32.xlu0 %v4797_v2 }
0x147c   : > { %4886 = vmax.xlane.f32.xlu1 %v12701_v63 }
0x147f   : > { %4896 = vmax.xlane.f32.xlu0 %v12703_v59 }
0x1480   : > { %4898 = vmax.xlane.f32.xlu1 %v12707_v35 }
0x1483   : > { %4892 = vmax.xlane.f32.xlu0 %v12705_v40 }
0x1484   : > { %4894 = vmax.xlane.f32.xlu1 %v12709_v54 }
0x1487   : > { %4904 = vmax.xlane.f32.xlu0 %v12715_v5 }
0x1488   : > { %4906 = vmax.xlane.f32.xlu1 %v12719_v50 }
0x148b   : > { %4900 = vmax.xlane.f32.xlu0 %v12717_v53 }
0x148c   : > { %4902 = vmax.xlane.f32.xlu1 %v12721_v49 }
0x14a1   : > { %5169 = vrot.lane.b32.xlu0 %v14851_v34, %s10548_s16 }
0x14cb   : > { %v4881_v32 = vpop.xlane.xlu0 %4880 }
0x14cc   : > { %v4910_v1 = vsub.f32 %v9101_v23, %v4881_v32  ;;  %v4877_v56 = vpop.xlane.xlu1 %4876 }
0x14cd   : > { %v4908_v37 = vsub.f32 %v4781_v16, %v4877_v56 }
0x14ce   : > { %v4928_v28 = vmul.f32 1.442695, %v4910_v1 }
0x14cf   : > { %v4924_v4 = vmul.f32 1.442695, %v4908_v37 }
0x14d0   : > { %10246 = vpow2.f32 %v4928_v28  ;;  %v4883_v46 = vpop.xlane.xlu1 %4882 }
0x14d1   : > { %v4911_v7 = vsub.f32 %v9102_v9, %v4883_v46  ;;  %10248 = vpow2.f32 %v4924_v4  ;;  %v12750_v46 = vpop.permute.xlu0 %5167 }
0x14d3   : > { %v4930_v42 = vmul.f32 1.442695, %v4911_v7 }
0x14d4   : > { %v12735_v25 = vpop.permute.xlu1 %5165 }
0x14d5   : > { %9451 = vmatprep.subr.msk.bf16.mxu1 %vm1564_vm3, %v12735_v25  ;;  %10250 = vpow2.f32 %v4930_v42 }
0x14da   : > { %v12739_v21 = vpop.eup %10246 }
0x14db   : > { %4960 = vadd.xlane.f32.xlu1 %v12739_v21  ;;  %v12742_v32 = vpop.eup %10248 }
0x14df   : > { %4956 = vadd.xlane.f32.xlu1 %v12742_v32  ;;  %v12745_v1 = vpop.eup %10250 }
0x14e3   : > { %4962 = vadd.xlane.f32.xlu1 %v12745_v1 }
0x14f4   : > { %5171 = vrot.lane.b32.xlu1 %v14852_v60, %s10548_s16 }
0x1500   : > { %v4879_v7 = vpop.xlane.xlu0 %4878 }
0x1501   : > { %v4909_v28 = vsub.f32 %v4784_v10, %v4879_v7 }
0x1503   : > { %v4926_v42 = vmul.f32 1.442695, %v4909_v28 }
0x1504   : > { %v4889_v56 = vpop.xlane.xlu0 %4888 }
0x1505   : > { %10252 = vpow2.f32 %v4926_v42  ;;  %v4891_v4 = vpop.xlane.xlu1 %4890 }
0x1506   : > { %v4915_v23 = vsub.f32 %v9106_v14, %v4891_v4 }
0x1508   : > { %v4885_v37 = vpop.xlane.xlu0 %4884  ;;  %v4938_v3 = vmul.f32 1.442695, %v4915_v23 }
0x1509   : > { %v4912_v16 = vsub.f32 %v4797_v2, %v4885_v37  ;;  %v4887_v9 = vpop.xlane.xlu1 %4886 }
0x150b   : > { %v4932_v27 = vmul.f32 1.442695, %v4912_v16 }
0x150c   : > { %v4897_v31 = vpop.xlane.xlu0 %4896 }
0x150d   : > { %10254 = vpow2.f32 %v4932_v27  ;;  %v4918_v44 = vsub.f32 %v12703_v59, %v4897_v31  ;;  %v4899_v57 = vpop.xlane.xlu1 %4898 }
0x150e   : > { %10256 = vpow2.f32 %v4938_v3  ;;  %v4919_v2 = vsub.f32 %v12707_v35, %v4899_v57 }
0x150f   : > { %v12753_v19 = vpop.eup %10252  ;;  %v4944_v7 = vmul.f32 1.442695, %v4918_v44 }
0x1510   : > { %4958 = vadd.xlane.f32.xlu0 %v12753_v19  ;;  %v4893_v10 = vpop.xlane.xlu0 %4892  ;;  %v4946_v27 = vmul.f32 1.442695, %v4919_v2 }
0x1511   : > { %v4916_v28 = vsub.f32 %v12705_v40, %v4893_v10  ;;  %v4895_v42 = vpop.xlane.xlu1 %4894  ;;  %10258 = vpow2.f32 %v4944_v7  ;;  %v4914_v10 = vsub.f32 %v12699_v24, %v4889_v56 }
0x1512   : > { %v4917_v31 = vsub.f32 %v12709_v54, %v4895_v42  ;;  %v4913_v42 = vsub.f32 %v12701_v63, %v4887_v9 }
0x1513   : > { %v4940_v14 = vmul.f32 1.442695, %v4916_v28  ;;  %v4936_v28 = vmul.f32 1.442695, %v4914_v10 }
0x1514   : > { %v4942_v44 = vmul.f32 1.442695, %v4917_v31  ;;  %v4905_v7 = vpop.xlane.xlu0 %4904  ;;  %v4934_v2 = vmul.f32 1.442695, %v4913_v42 }
0x1515   : > { %v4907_v4 = vpop.xlane.xlu1 %4906  ;;  %10260 = vpow2.f32 %v4940_v14  ;;  %v4922_v14 = vsub.f32 %v12715_v5, %v4905_v7 }
0x1516   : > { %10262 = vpow2.f32 %v4946_v27 }
0x1517   : > { %v12758_v37 = vpop.eup %10254  ;;  %10264 = vpow2.f32 %v4942_v44  ;;  %v4952_v31 = vmul.f32 1.442695, %v4922_v14  ;;  %v4923_v44 = vsub.f32 %v12719_v50, %v4907_v4 }
0x1518   : > { %4964 = vadd.xlane.f32.xlu1 %v12758_v37  ;;  %v12762_v23 = vpop.eup %10256  ;;  %v4901_v27 = vpop.xlane.xlu0 %4900 }
0x1519   : > { %v4903_v59 = vpop.xlane.xlu1 %4902  ;;  %v4954_v5 = vmul.f32 1.442695, %v4923_v44 }
0x151a   : > { %v4921_v3 = vsub.f32 %v12721_v49, %v4903_v59  ;;  %v4920_v59 = vsub.f32 %v12717_v53, %v4901_v27 }
0x151b   : > { %v12766_v57 = vpop.eup %10258 }
0x151c   : > { %4970 = vadd.xlane.f32.xlu1 %v12762_v23  ;;  %v4950_v35 = vmul.f32 1.442695, %v4921_v3  ;;  %v4948_v24 = vmul.f32 1.442695, %v4920_v59  ;;  %v5170_v10 = vpop.permute.xlu0 %5169 }
0x151e   : > { %10266 = vpow2.f32 %v4950_v35 }
0x151f   : > { %v12769_v40 = vpop.eup %10260  ;;  %10268 = vpow2.f32 %v4936_v28 }
0x1520   : > { %4976 = vadd.xlane.f32.xlu1 %v12766_v57  ;;  %v12774_v54 = vpop.eup %10262  ;;  %10270 = vpow2.f32 %v4934_v2 }
0x1521   : > { %v12777_v16 = vpop.eup %10264  ;;  %10272 = vpow2.f32 %v4952_v31 }
0x1522   : > { %10274 = vpow2.f32 %v4948_v24 }
0x1523   : > { %10276 = vpow2.f32 %v4954_v5 }
0x1524   : > { %4972 = vadd.xlane.f32.xlu1 %v12769_v40 }
0x1526   : > { %5173 = vrot.lane.b32.xlu0 %v14853_v52, %s10548_s16 }
0x1528   : > { %4978 = vadd.xlane.f32.xlu1 %v12774_v54  ;;  %v12780_v49 = vpop.eup %10266 }
0x1529   : > { %v12790_v56 = vpop.eup %10268 }
0x152a   : > { %v12795_v63 = vpop.eup %10270 }
0x152b   : > { %v12800_v53 = vpop.eup %10272 }
0x152c   : > { %4974 = vadd.xlane.f32.xlu1 %v12777_v16  ;;  %v12805_v50 = vpop.eup %10274 }
0x152d   : > { %v12810_v9 = vpop.eup %10276 }
0x1530   : > { %4982 = vadd.xlane.f32.xlu1 %v12780_v49 }
0x1541   : > { %5175 = vrot.lane.b32.xlu1 %v14854_v45, %s10548_s16 }
0x1545   : > { %4968 = vadd.xlane.f32.xlu0 %v12790_v56  ;;  %5149 = vrot.lane.b32.xlu1 %v14850_v15, %s10549_s17 }
0x1549   : > { %4966 = vadd.xlane.f32.xlu0 %v12795_v63  ;;  %5153 = vrot.lane.b32.xlu1 %v14851_v34, %s10549_s17 }
0x154d   : > { %5157 = vrot.lane.b32.xlu1 %v14853_v52, %s10549_s17  ;;  %4984 = vadd.xlane.f32.xlu0 %v12800_v53 }
0x1551   : > { %5161 = vrot.lane.b32.xlu1 %v11554_v58, %s10549_s17  ;;  %4980 = vadd.xlane.f32.xlu0 %v12805_v50 }
0x1555   : > { %5512 = vrot.lane.b32.xlu1 %v14849_v29, %s10550_s19  ;;  %4986 = vadd.xlane.f32.xlu0 %v12810_v9 }
0x1568   : > { %v4961_v4 = vpop.xlane.xlu1 %4960 }
0x156b   : > { %5177 = vrot.lane.b32.xlu0 %v11554_v58, %s10548_s16 }
0x156c   : > { %v4957_v3 = vpop.xlane.xlu1 %4956 }
0x156f   : > { %5179 = vrot.lane.b32.xlu0 %v11551_v30, %s10548_s16 }
0x1570   : > { %v4963_v35 = vpop.xlane.xlu1 %4962 }
0x1571   : > { %10278 = vrcp.f32 %v4963_v35 }
0x1572   : > { %10280 = vrcp.f32 %v4957_v3 }
0x1573   : > { %5151 = vrot.lane.b32.xlu0 %v14849_v29, %s10549_s17  ;;  %10282 = vrcp.f32 %v4961_v4  ;;  %v5206_v4 = vsel %vm1564_vm3, %v12735_v25, 0 }
0x1574   : > { %v5172_v7 = vpop.permute.xlu1 %5171 }
0x1575   : > { %v5215_v25 = vsel %vm1564_vm3, %v5172_v7, 0 }
0x1577   : > { %5155 = vrot.lane.b32.xlu0 %v14852_v60, %s10549_s17 }
0x157b   : > { %5159 = vrot.lane.b32.xlu0 %v14854_v45, %s10549_s17  ;;  %v10279_v28 = vpop.eup %10278 }
0x157c   : > { %v10281_v2 = vpop.eup %10280  ;;  %v5007_v31 = vmul.f32 %v10279_v28, %v12745_v1 }
0x157d   : > { %v10283_v14 = vpop.eup %10282  ;;  %v5004_v59 = vmul.f32 %v10281_v2, %v12742_v32  ;;  %v5209_v32 = vsel %vm1564_vm3, %v12750_v46, 0 }
0x157e   : > { %v5006_v44 = vmul.f32 %v10283_v14, %v12739_v21 }
0x157f   : > { %5163 = vrot.lane.b32.xlu0 %v11551_v30, %s10549_s17 }
0x1580   : > { %v5021_v3 = vpack.c.bf16 %v5007_v31, %v5006_v44 }
0x1583   : > { %5510 = vrot.lane.b32.xlu0 %v14850_v15, %s10550_s19 }
0x159d   : > { %v4959_v29 = vpop.xlane.xlu0 %4958 }
0x159e   : > { %10284 = vrcp.f32 %v4959_v29 }
0x15a1   : > { %v5174_v28 = vpop.permute.xlu0 %5173 }
0x15a5   : > { %v4965_v42 = vpop.xlane.xlu1 %4964 }
0x15a6   : > { %10286 = vrcp.f32 %v4965_v42 }
0x15a8   : > { %v10285_v27 = vpop.eup %10284 }
0x15a9   : > { %v5005_v15 = vmul.f32 %v10285_v27, %v12753_v19  ;;  %v4971_v24 = vpop.xlane.xlu1 %4970  ;;  %v5212_v19 = vsel %vm1564_vm3, %v5170_v10, 0 }
0x15aa   : > { %10288 = vrcp.f32 %v4971_v24 }
0x15ab   : > { %v5020_v5 = vpack.c.bf16 %v5005_v15, %v5004_v59 }
0x15ad   : > { %9131 = vmatprep.mubr.bf16.mxu1 %v5020_v5  ;;  %v4977_v35 = vpop.xlane.xlu1 %4976 }
0x15ae   : > { %9132 = vmatmul.mubr.bf16.vlgmr.msra.gmra.mrb[112].mxu1 %v5021_v3 }
0x15af   : > { %9148 = vmatpush3.bf16.xpose.msra.mxu1 %v5206_v4 }
0x15b0   : > { %9452 = vmatprep.subr.msk.bf16.mxu1 %vm1564_vm3, %v12750_v46  ;;  %v5218_v46 = vsel %vm1564_vm3, %v5174_v28, 0  ;;  %v10287_v59 = vpop.eup %10286 }
0x15b1   : > { %v4973_v1 = vpop.xlane.xlu1 %4972 }
0x15b4   : > { %v10289_v15 = vpop.eup %10288 }
0x15b5   : > { %v4979_v21 = vpop.xlane.xlu1 %4978 }
0x15b7   : > { %9150 = vmatpush3.bf16.xpose.msra.mxu1 %v5209_v32 }
0x15b8   : > { %9453 = vmatprep.subr.msk.bf16.mxu1 %vm1564_vm3, %v5170_v10 }
0x15b9   : > { %v4975_v29 = vpop.xlane.xlu1 %4974 }
0x15bd   : > { %v4983_v2 = vpop.xlane.xlu1 %4982 }
0x15bf   : > { %9152 = vmatpush3.bf16.xpose.msra.mxu1 %v5212_v19 }
0x15c0   : > { %9454 = vmatprep.subr.msk.bf16.mxu1 %vm1564_vm3, %v5172_v7 }
0x15c1   : > { %v5176_v14 = vpop.permute.xlu1 %5175 }
0x15c2   : > { %v5221_v10 = vsel %vm1564_vm3, %v5176_v14, 0 }
0x15c7   : > { %9154 = vmatpush3.bf16.xpose.msra.mxu1 %v5215_v25 }
0x15c8   : > { %9455 = vmatprep.subr.msk.bf16.mxu1 %vm1564_vm3, %v5174_v28 }
0x15cf   : > { %9156 = vmatpush3.bf16.xpose.msra.mxu1 %v5218_v46 }
0x15d0   : > { %9456 = vmatprep.subr.msk.bf16.mxu1 %vm1564_vm3, %v5176_v14 }
0x15d2   : > { %v4969_v27 = vpop.xlane.xlu0 %4968 }
0x15d3   : > { %10290 = vrcp.f32 %v4969_v27 }
0x15d4   : > { %10292 = vrcp.f32 %v4975_v29 }
0x15d5   : > { %10294 = vrcp.f32 %v4973_v1  ;;  %v5008_v1 = vmul.f32 %v10287_v59, %v12758_v37 }
0x15d6   : > { %v4967_v7 = vpop.xlane.xlu0 %4966 }
0x15d7   : > { %9158 = vmatpush3.bf16.xpose.msra.mxu1 %v5221_v10  ;;  %10296 = vrcp.f32 %v4967_v7 }
0x15d8   : > { %10298 = vrcp.f32 %v4979_v21  ;;  %v5011_v21 = vmul.f32 %v10289_v15, %v12762_v23 }
0x15d9   : > { %10300 = vrcp.f32 %v4977_v35 }
0x15da   : > { %v4985_v31 = vpop.xlane.xlu0 %4984  ;;  %10302 = vrcp.f32 %v4983_v2 }
0x15dd   : > { %v10291_v44 = vpop.eup %10290 }
0x15de   : > { %v4981_v5 = vpop.xlane.xlu0 %4980  ;;  %v10293_v3 = vpop.eup %10292  ;;  %v5010_v4 = vmul.f32 %v10291_v44, %v12790_v56 }
0x15df   : > { %10304 = vrcp.f32 %v4981_v5  ;;  %v10295_v42 = vpop.eup %10294  ;;  %v5013_v29 = vmul.f32 %v10293_v3, %v12777_v16  ;;  %v5150_v16 = vpop.permute.xlu1 %5149 }
0x15e0   : > { %v5012_v25 = vmul.f32 %v10295_v42, %v12769_v40  ;;  %v5023_v28 = vpack.c.bf16 %v5011_v21, %v5010_v4 }
0x15e1   : > { %v10297_v24 = vpop.eup %10296 }
0x15e2   : > { %v4987_v32 = vpop.xlane.xlu0 %4986  ;;  %v5009_v19 = vmul.f32 %v10297_v24, %v12795_v63  ;;  %v10299_v2 = vpop.eup %10298  ;;  %v5024_v14 = vpack.c.bf16 %v5013_v29, %v5012_v25 }
0x15e3   : > { %10306 = vrcp.f32 %v4987_v32  ;;  %v10301_v56 = vpop.eup %10300  ;;  %v5015_v27 = vmul.f32 %v10299_v2, %v12774_v54  ;;  %v5154_v44 = vpop.permute.xlu1 %5153 }
0x15e4   : > { %v5022_v35 = vpack.c.bf16 %v5009_v19, %v5008_v1  ;;  %10308 = vrcp.f32 %v4985_v31  ;;  %v10303_v63 = vpop.eup %10302  ;;  %v5014_v7 = vmul.f32 %v10301_v56, %v12766_v57 }
0x15e5   : > { %v5017_v31 = vmul.f32 %v10303_v63, %v12780_v49 }
0x15e6   : > { %9135 = vmatprep.mubr.bf16.mxu1 %v5022_v35  ;;  %v5178_v46 = vpop.permute.xlu0 %5177  ;;  %v5025_v59 = vpack.c.bf16 %v5015_v27, %v5014_v7 }
0x15e7   : > { %9136 = vmatmul.mubr.bf16.gmra.mrb[116].mxu1 %v5023_v28  ;;  %9457 = vmatprep.subr.msk.bf16.mxu1 %vm1564_vm3, %v5178_v46  ;;  %v5224_v37 = vsel %vm1564_vm3, %v5178_v46, 0  ;;  %v5158_v32 = vpop.permute.xlu1 %5157 }
0x15e8   : > { %9139 = vmatprep.mubr.bf16.mxu1 %v5024_v14  ;;  %9160 = vmatpush3.bf16.xpose.msra.mxu1 %v5224_v37 }
0x15e9   : > { %v10305_v23 = vpop.eup %10304 }
0x15ea   : > { %v5180_v40 = vpop.permute.xlu0 %5179  ;;  %v5016_v10 = vmul.f32 %v10305_v23, %v12805_v50 }
0x15eb   : > { %9458 = vmatprep.subr.msk.bf16.mxu1 %vm1564_vm3, %v5180_v40  ;;  %v5227_v42 = vsel %vm1564_vm3, %v5180_v40, 0  ;;  %v5162_v49 = vpop.permute.xlu1 %5161 }
0x15ec   : > { %v5026_v3 = vpack.c.bf16 %v5017_v31, %v5016_v10 }
0x15ed   : > { %v10307_v15 = vpop.eup %10306 }
0x15ee   : > { %v5152_v5 = vpop.permute.xlu0 %5151  ;;  %v10309_v24 = vpop.eup %10308  ;;  %v5019_v54 = vmul.f32 %v10307_v15, %v12810_v9 }
0x15ef   : > { %9140 = vmatmul.mubr.bf16.gmra.mrb[120].mxu1 %v5025_v59  ;;  %v5018_v4 = vmul.f32 %v10309_v24, %v12800_v53  ;;  %v5513_v21 = vpop.permute.xlu1 %5512  ;;  %v10512_v53 = vld [vmem:[%s14646_s4] sm:$0xff]  }
0x15f0   : > { %9143 = vmatprep.mubr.bf16.mxu1 %v5026_v3  ;;  %9162 = vmatpush3.bf16.xpose.msra.mxu1 %v5227_v42 }
0x15f1   : > { %v5027_v57 = vpack.c.bf16 %v5019_v54, %v5018_v4 }
0x15f2   : > { %v5156_v50 = vpop.permute.xlu0 %5155 }
0x15f6   : > { %v5160_v1 = vpop.permute.xlu0 %5159 }
0x15f7   : > { %9144 = vmatmul.mubr.bf16.gmra.mrb[124].mxu1 %v5027_v57 }
0x15f8   : > { %9163 = vmatprep.mubr.msk.bf16.mxu1 %vm1564_vm3, %v5150_v16 }
0x15fa   : > { %v5164_v19 = vpop.permute.xlu0 %5163 }
0x15fe   : > { %v5511_v29 = vpop.permute.xlu0 %5510 }
0x15ff   : > { %9164 = vmatmul.mubr.msk.bf16.vlgmr.msra.gmra.mrb[128].mxu1 %vm1564_vm3, %v5152_v5  ;;  %9179 = vmatprep.subr.bf16.mxu0 %v5511_v29 }
0x1600   : > { %9167 = vmatprep.mubr.msk.bf16.mxu1 %vm1564_vm3, %v5154_v44  ;;  %9180 = vmatpush3.bf16.msra.mxu0 %v5511_v29 }
0x1601   : > { %9181 = vmatprep.subr.bf16.mxu0 %v5513_v21 }
0x1604   : > { %9182 = vmatpush3.bf16.msra.mxu0 %v5513_v21 }
0x1607   : > { %9168 = vmatmul.mubr.msk.bf16.gmra.mrb[132].mxu1 %vm1564_vm3, %v5156_v50 }
0x1608   : > { %9171 = vmatprep.mubr.msk.bf16.mxu1 %vm1564_vm3, %v5158_v32 }
0x160f   : > { %9172 = vmatmul.mubr.msk.bf16.gmra.mrb[136].mxu1 %vm1564_vm3, %v5160_v1 }
0x1610   : > { %9175 = vmatprep.mubr.msk.bf16.mxu1 %vm1564_vm3, %v5162_v49 }
0x1617   : > { %9176 = vmatmul.mubr.msk.bf16.gmra.mrb[140].mxu1 %vm1564_vm3, %v5164_v19 }
0x1618   : > { %9263 = vmatprep.mubr.bf16.mxu1 %v10512_v53 }
0x1681   : > { %v12874_v9 = vpop.f32.mrb[112].mxu1 }
0x1682   : > { %v12876_v35 = vpop.f32.mrb[113].mxu1 }
0x1683   : > { %v12878_v25 = vpop.f32.mrb[114].mxu1 }
0x1684   : > { %v12882_v2 = vpop.f32.mrb[115].mxu1 }
0x16ba   : > { %v12886_v14 = vpop.f32.mrb[116].mxu1 }
0x16bb   : > { %14898 = vst [vmem:[#allocation108_spill] sm:$0xff] %v12886_v14  ;;  %v12888_v56 = vpop.f32.mrb[117].mxu1 }
0x16bc   : > { %v12890_v37 = vpop.f32.mrb[118].mxu1 }
0x16bd   : > { %14899 = vst [vmem:[#allocation109_spill] sm:$0xff] %v12890_v37  ;;  %v12894_v16 = vpop.f32.mrb[119].mxu1 }
0x16c2   : > { %v12898_v27 = vpop.f32.mrb[120].mxu1 }
0x16c3   : > { %14900 = vst [vmem:[#allocation110_spill] sm:$0xff] %v12898_v27  ;;  %v12900_v40 = vpop.f32.mrb[121].mxu1 }
0x16c4   : > { %14901 = vst [vmem:[#allocation111_spill] sm:$0xff] %v12900_v40  ;;  %v12902_v10 = vpop.f32.mrb[122].mxu1 }
0x16c5   : > { %14902 = vst [vmem:[#allocation112_spill] sm:$0xff] %v12902_v10  ;;  %v12906_v31 = vpop.f32.mrb[123].mxu1 }
0x16c6   : > { %14903 = vst [vmem:[#allocation113_spill] sm:$0xff] %v12906_v31 }
0x16ca   : > { %v12910_v15 = vpop.f32.mrb[124].mxu1 }
0x16cb   : > { %14904 = vst [vmem:[#allocation114_spill] sm:$0xff] %v12910_v15  ;;  %v12912_v44 = vpop.f32.mrb[125].mxu1 }
0x16cc   : > { %14905 = vst [vmem:[#allocation115_spill] sm:$0xff] %v12912_v44  ;;  %v12914_v5 = vpop.f32.mrb[126].mxu1 }
0x16cd   : > { %14906 = vst [vmem:[#allocation116_spill] sm:$0xff] %v12914_v5  ;;  %v12918_v42 = vpop.f32.mrb[127].mxu1 }
0x16ce   : > { %14907 = vst [vmem:[#allocation117_spill] sm:$0xff] %v12918_v42 }
0x16d2   : > { %v9165_v54 = vpop.f32.mrb[128].mxu1 }
0x16d3   : > { %5362 = vmax.xlane.f32.xlu0 %v9165_v54  ;;  %v5263_v50 = vpop.f32.mrb[129].mxu1 }
0x16d4   : > { %5358 = vmax.xlane.f32.xlu1 %v5263_v50  ;;  %v9166_v4 = vpop.f32.mrb[130].mxu1 }
0x16d5   : > { %v5266_v32 = vpop.f32.mrb[131].mxu1 }
0x16d7   : > { %5360 = vmax.xlane.f32.xlu0 %v5266_v32 }
0x16d8   : > { %5364 = vmax.xlane.f32.xlu1 %v9166_v4 }
0x16da   : > { %v9169_v57 = vpop.f32.mrb[132].mxu1 }
0x16db   : > { %5370 = vmax.xlane.f32.xlu0 %v9169_v57  ;;  %v5279_v1 = vpop.f32.mrb[133].mxu1 }
0x16dc   : > { %v9170_v49 = vpop.f32.mrb[134].mxu1 }
0x16dd   : > { %5372 = vmax.xlane.f32.xlu1 %v9170_v49  ;;  %v5282_v19 = vpop.f32.mrb[135].mxu1 }
0x16df   : > { %5366 = vmax.xlane.f32.xlu0 %v5279_v1 }
0x16e1   : > { %5368 = vmax.xlane.f32.xlu1 %v5282_v19 }
0x16e2   : > { %v9173_v29 = vpop.f32.mrb[136].mxu1 }
0x16e3   : > { %5378 = vmax.xlane.f32.xlu0 %v9173_v29  ;;  %v12922_v21 = vpop.f32.mrb[137].mxu1 }
0x16e4   : > { %v12924_v53 = vpop.f32.mrb[138].mxu1 }
0x16e5   : > { %5380 = vmax.xlane.f32.xlu1 %v12924_v53  ;;  %v12927_v24 = vpop.f32.mrb[139].mxu1 }
0x16e7   : > { %5374 = vmax.xlane.f32.xlu0 %v12922_v21 }
0x16e9   : > { %5376 = vmax.xlane.f32.xlu1 %v12927_v24 }
0x16ea   : > { %v12931_v3 = vpop.f32.mrb[140].mxu1 }
0x16eb   : > { %5386 = vmax.xlane.f32.xlu0 %v12931_v3  ;;  %v12934_v59 = vpop.f32.mrb[141].mxu1 }
0x16ec   : > { %v12936_v7 = vpop.f32.mrb[142].mxu1 }
0x16ed   : > { %v12938_v63 = vpop.f32.mrb[143].mxu1 }
0x16ef   : > { %5382 = vmax.xlane.f32.xlu0 %v12934_v59 }
0x16fa   : > { %5518 = vrot.lane.b32.xlu1 %v14853_v52, %s10550_s19 }
0x1705   : > { %5514 = vrot.lane.b32.xlu0 %v14851_v34, %s10550_s19 }
0x1709   : > { %5516 = vrot.lane.b32.xlu0 %v14852_v60, %s10550_s19 }
0x170d   : > { %5522 = vrot.lane.b32.xlu0 %v11554_v58, %s10550_s19 }
0x171e   : > { %5388 = vmax.xlane.f32.xlu1 %v12936_v7 }
0x1722   : > { %5384 = vmax.xlane.f32.xlu1 %v12938_v63 }
0x1733   : > { %5520 = vrot.lane.b32.xlu1 %v14854_v45, %s10550_s19 }
0x1760   : > { %v5363_v28 = vpop.xlane.xlu0 %5362 }
0x1761   : > { %v5392_v23 = vsub.f32 %v9165_v54, %v5363_v28  ;;  %v5359_v46 = vpop.xlane.xlu1 %5358 }
0x1762   : > { %v5390_v52 = vsub.f32 %v5263_v50, %v5359_v46 }
0x1763   : > { %v5410_v44 = vmul.f32 1.442695, %v5392_v23 }
0x1764   : > { %v5361_v42 = vpop.xlane.xlu0 %5360  ;;  %v5406_v34 = vmul.f32 1.442695, %v5390_v52 }
0x1765   : > { %10310 = vpow2.f32 %v5410_v44  ;;  %v5365_v15 = vpop.xlane.xlu1 %5364  ;;  %v5391_v5 = vsub.f32 %v5266_v32, %v5361_v42 }
0x1766   : > { %v5393_v60 = vsub.f32 %v9166_v4, %v5365_v15  ;;  %10312 = vpow2.f32 %v5406_v34 }
0x1767   : > { %v5408_v14 = vmul.f32 1.442695, %v5391_v5 }
0x1768   : > { %v5412_v40 = vmul.f32 1.442695, %v5393_v60  ;;  %v5371_v58 = vpop.xlane.xlu0 %5370 }
0x1769   : > { %v5396_v31 = vsub.f32 %v9169_v57, %v5371_v58 }
0x176a   : > { %v5373_v27 = vpop.xlane.xlu1 %5372  ;;  %10314 = vpow2.f32 %v5412_v40 }
0x176b   : > { %v5418_v10 = vmul.f32 1.442695, %v5396_v31  ;;  %v5397_v45 = vsub.f32 %v9170_v49, %v5373_v27 }
0x176c   : > { %v5367_v37 = vpop.xlane.xlu0 %5366 }
0x176d   : > { %10316 = vpow2.f32 %v5418_v10  ;;  %v5394_v28 = vsub.f32 %v5279_v1, %v5367_v37  ;;  %v5420_v15 = vmul.f32 1.442695, %v5397_v45 }
0x176e   : > { %v5369_v46 = vpop.xlane.xlu1 %5368  ;;  %10318 = vpow2.f32 %v5408_v14 }
0x176f   : > { %v12953_v23 = vpop.eup %10310  ;;  %v5414_v44 = vmul.f32 1.442695, %v5394_v28  ;;  %v5395_v54 = vsub.f32 %v5282_v19, %v5369_v46 }
0x1770   : > { %5442 = vadd.xlane.f32.xlu1 %v12953_v23  ;;  %v5379_v42 = vpop.xlane.xlu0 %5378  ;;  %v12956_v5 = vpop.eup %10312 }
0x1771   : > { %10320 = vpow2.f32 %v5414_v44  ;;  %v5416_v50 = vmul.f32 1.442695, %v5395_v54  ;;  %v5400_v4 = vsub.f32 %v9173_v29, %v5379_v42 }
0x1772   : > { %v5381_v31 = vpop.xlane.xlu1 %5380  ;;  %10322 = vpow2.f32 %v5420_v15 }
0x1773   : > { %10324 = vpow2.f32 %v5416_v50  ;;  %v5426_v27 = vmul.f32 1.442695, %v5400_v4  ;;  %v5401_v1 = vsub.f32 %v12924_v53, %v5381_v31 }
0x1774   : > { %5438 = vadd.xlane.f32.xlu1 %v12956_v5  ;;  %v5375_v37 = vpop.xlane.xlu0 %5374  ;;  %v12960_v10 = vpop.eup %10314 }
0x1775   : > { %v5398_v40 = vsub.f32 %v12922_v21, %v5375_v37  ;;  %10326 = vpow2.f32 %v5426_v27  ;;  %v5428_v53 = vmul.f32 1.442695, %v5401_v1  ;;  %v14908_v37 = vpack.i.bf16 %v11755_v33, %v11749_v20 }
0x1776   : > { %v5377_v14 = vpop.xlane.xlu1 %5376  ;;  %v14909_v27 = vpack.i.bf16 %v11751_v55, %v11747_v47  ;;  %v14911_v1 = vpack.i.bf16 %v11767_v48, %v11761_v39  ;;  %v14914_v48 = vpack.i.bf16 %v11779_v51, %v11773_v8  ;;  %v14918_v8 = vpack.i.bf16 %v12023_v61, %v12017_v13  ;;  %v14919_v51 = vld [vmem:[#allocation76_spill] sm:$0xff]  ;;  %v14926_v61 = vld [vmem:[#allocation63_spill] sm:$0xff] }
0x1777   : > { %v12962_v32 = vpop.eup %10316  ;;  %v5399_v57 = vsub.f32 %v12927_v24, %v5377_v14  ;;  %v5422_v19 = vmul.f32 1.442695, %v5398_v40  ;;  %v14910_v14 = vpack.i.bf16 %v11983_v62, %v11979_v11  ;;  %v14925_v13 = vld [vmem:[#allocation64_spill] sm:$0xff] }
0x1778   : > { %5444 = vadd.xlane.f32.xlu1 %v12960_v10  ;;  %5450 = vadd.xlane.f32.xlu0 %v12962_v32  ;;  %v5387_v49 = vpop.xlane.xlu0 %5386  ;;  %v12969_v21 = vpop.eup %10318 }
0x1779   : > { %v5424_v29 = vmul.f32 1.442695, %v5399_v57  ;;  %v5404_v52 = vsub.f32 %v12931_v3, %v5387_v49  ;;  %v14912_v49 = vpack.i.bf16 %v11999_v36, %v11993_v38  ;;  %v14915_v38 = vpack.i.bf16 %v12011_v0, %v12005_v41  ;;  %v14922_v0 = vld [vmem:[#allocation94_spill] sm:$0xff] }
0x177a   : > { %v5519_v15 = vpop.permute.xlu1 %5518  ;;  %v14916_v36 = vpack.i.bf16 %v12235_v22, %v12229_v17  ;;  %v14923_v17 = vpack.i.bf16 %v12659_v6, %v14922_v0  ;;  %v14927_v22 = vpack.i.bf16 %v14925_v13, %v14926_v61  ;;  %v14929_v6 = vld [vmem:[#allocation97_spill] sm:$0xff] }
0x177b   : > { %v12971_v34 = vpop.eup %10320  ;;  %10328 = vpow2.f32 %v5424_v29  ;;  %v5434_v60 = vmul.f32 1.442695, %v5404_v52  ;;  %v14931_v52 = vld [vmem:[#allocation43_spill] sm:$0xff]  ;;  %v14966_v13 = vld [vmem:[#allocation73_spill] sm:$0xff] }
0x177c   : > { %5440 = vadd.xlane.f32.xlu1 %v12969_v21  ;;  %5446 = vadd.xlane.f32.xlu0 %v12971_v34  ;;  %v5383_v24 = vpop.xlane.xlu0 %5382  ;;  %10330 = vpow2.f32 %v5422_v19  ;;  %v12976_v45 = vpop.eup %10322  ;;  %v14928_v19 = vld [vmem:[#allocation99_spill] sm:$0xff] }
0x177d   : > { %v5402_v58 = vsub.f32 %v12934_v59, %v5383_v24  ;;  %v12978_v28 = vpop.eup %10324  ;;  %10332 = vpow2.f32 %v5434_v60  ;;  %v14930_v29 = vpack.i.bf16 %v14928_v19, %v14929_v6  ;;  %v14932_v60 = vld [vmem:[#allocation41_spill] sm:$0xff]  ;;  %v14968_v19 = vld [vmem:[#allocation95_spill] sm:$0xff] }
0x177e   : > { %10334 = vpow2.f32 %v5428_v53  ;;  %v14933_v24 = vpack.i.bf16 %v14931_v52, %v14932_v60  ;;  %v14936_v53 = vld [vmem:[#allocation40_spill] sm:$0xff]  ;;  %v14969_v6 = vld [vmem:[#allocation93_spill] sm:$0xff] }
0x177f   : > { %v5430_v3 = vmul.f32 1.442695, %v5402_v58  ;;  %v12982_v44 = vpop.eup %10326 }
0x1780   : > { %5448 = vadd.xlane.f32.xlu1 %v12978_v28  ;;  %5452 = vadd.xlane.f32.xlu0 %v12976_v45  ;;  %v5515_v46 = vpop.permute.xlu0 %5514 }
0x1781   : > { %9183 = vmatprep.subr.bf16.mxu0 %v5515_v46  ;;  %10336 = vpow2.f32 %v5430_v3  ;;  %v14938_v3 = vld [vmem:[#allocation103_spill] sm:$0xff] }
0x1782   : > { %9184 = vmatpush3.bf16.msra.mxu0 %v5515_v46  ;;  %v14939_v46 = vld [vmem:[#allocation101_spill] sm:$0xff] }
0x1784   : > { %5458 = vadd.xlane.f32.xlu0 %v12982_v44  ;;  %v5517_v59 = vpop.permute.xlu0 %5516 }
0x1785   : > { %v12985_v54 = vpop.eup %10328  ;;  %9185 = vmatprep.subr.bf16.mxu0 %v5517_v59 }
0x1786   : > { %5456 = vadd.xlane.f32.xlu1 %v12985_v54  ;;  %9186 = vmatpush3.bf16.msra.mxu0 %v5517_v59  ;;  %v12988_v42 = vpop.eup %10330  ;;  %v14940_v59 = vpack.i.bf16 %v14938_v3, %v14939_v46  ;;  %v14972_v3 = vld [vmem:[#allocation98_spill] sm:$0xff]  ;;  %v14973_v46 = vld [vmem:[#allocation96_spill] sm:$0xff] }
0x1787   : > { %9187 = vmatprep.subr.bf16.mxu0 %v5519_v15  ;;  %v12991_v50 = vpop.eup %10332 }
0x1788   : > { %5454 = vadd.xlane.f32.xlu0 %v12988_v42  ;;  %v12994_v4 = vpop.eup %10334  ;;  %v5523_v62 = vpop.permute.xlu0 %5522 }
0x178a   : > { %5466 = vadd.xlane.f32.xlu1 %v12991_v50  ;;  %9188 = vmatpush3.bf16.msra.mxu0 %v5519_v15  ;;  %v14941_v15 = vld [vmem:[#allocation58_spill] sm:$0xff] }
0x178b   : > { %v12997_v31 = vpop.eup %10336 }
0x178c   : > { %5460 = vadd.xlane.f32.xlu0 %v12994_v4 }
0x178e   : > { %5462 = vadd.xlane.f32.xlu1 %v12997_v31 }
0x179f   : > { %5524 = vrot.lane.b32.xlu1 %v11551_v30, %s10550_s19  ;;  %v10513_v30 = vld [vmem:[%s14644_s2 + $0x10] ss:$8 sps:$4 sm:$0xff]  }
0x17a3   : > { %9539 = vrot.lane.b32.xlu1 %v14908_v37, %s10551_s28  ;;  %v14942_v37 = vld [vmem:[#allocation57_spill] sm:$0xff] }
0x17a7   : > { %9544 = vrot.lane.b32.xlu1 %v14909_v27, %s10551_s28  ;;  %v14943_v27 = vpack.i.bf16 %v14941_v15, %v14942_v37 }
0x17ab   : > { %v5389_v40 = vpop.xlane.xlu1 %5388  ;;  %9554 = vrot.lane.b32.xlu1 %v14910_v14, %s10552_s29  ;;  %v14945_v14 = vld [vmem:[#allocation65_spill] sm:$0xff] }
0x17ac   : > { %v5405_v20 = vsub.f32 %v12936_v7, %v5389_v40  ;;  %v14944_v40 = vld [vmem:[#allocation66_spill] sm:$0xff] }
0x17ae   : > { %v5436_v11 = vmul.f32 1.442695, %v5405_v20  ;;  %v14950_v20 = vld [vmem:[#allocation60_spill] sm:$0xff] }
0x17af   : > { %v5385_v57 = vpop.xlane.xlu1 %5384  ;;  %5881 = vrot.lane.b32.xlu1 %v10513_v30, %s10539_s23 }
0x17b0   : > { %v5403_v33 = vsub.f32 %v12938_v63, %v5385_v57  ;;  %v14913_v63 = vpack.i.bf16 %v12223_v12, %v12217_v18  ;;  %v14917_v18 = vpack.i.bf16 %v11791_v26, %v11785_v43  ;;  %v14920_v12 = vld [vmem:[#allocation74_spill] sm:$0xff]  ;;  %v10514_v43 = vld [vmem:[%s14644_s2] ss:$8 sps:$4 sm:$0xff]   ;;  %v14924_v26 = vpack.i.bf16 %v12882_v2, %v12876_v35 }
0x17b1   : > { %v14921_v41 = vpack.i.bf16 %v14919_v51, %v14920_v12  ;;  %v14934_v35 = vpack.i.bf16 %v12894_v16, %v12888_v56  ;;  %v14935_v2 = vld [vmem:[#allocation44_spill] sm:$0xff]  ;;  %v14946_v56 = vpack.i.bf16 %v14944_v40, %v14945_v14  ;;  %v14947_v16 = vld [vmem:[#allocation45_spill] sm:$0xff]  ;;  %v14948_v57 = vld [vmem:[#allocation47_spill] sm:$0xff] }
0x17b2   : > { %v5432_v47 = vmul.f32 1.442695, %v5403_v33  ;;  %v14937_v58 = vpack.i.bf16 %v14935_v2, %v14936_v53  ;;  %v14949_v30 = vpack.i.bf16 %v14947_v16, %v14948_v57  ;;  %v14951_v33 = vld [vmem:[#allocation59_spill] sm:$0xff]  ;;  %v14962_v12 = vld [vmem:[#allocation70_spill] sm:$0xff]  ;;  %v14976_v14 = vld [vmem:[#allocation108_spill] sm:$0xff] }
0x17b3   : > { %v5521_v55 = vpop.permute.xlu1 %5520  ;;  %9569 = vrot.lane.b32.xlu1 %v14911_v1, %s10551_s28  ;;  %v14954_v1 = vld [vmem:[#allocation67_spill] sm:$0xff] }
0x17b4   : > { %10338 = vpow2.f32 %v5432_v47  ;;  %9189 = vmatprep.subr.bf16.mxu0 %v5521_v55  ;;  %v14952_v47 = vpack.i.bf16 %v14950_v20, %v14951_v33  ;;  %v14979_v20 = vld [vmem:[#allocation100_spill] sm:$0xff] }
0x17b5   : > { %9190 = vmatpush3.bf16.msra.mxu0 %v5521_v55  ;;  %10340 = vpow2.f32 %v5436_v11  ;;  %v14953_v55 = vld [vmem:[#allocation68_spill] sm:$0xff] }
0x17b6   : > { %9191 = vmatprep.subr.bf16.mxu0 %v5523_v62  ;;  %v14955_v11 = vpack.i.bf16 %v14953_v55, %v14954_v1 }
0x17b7   : > { %9579 = vrot.lane.b32.xlu1 %v14912_v49, %s10552_s29  ;;  %v14956_v49 = vld [vmem:[#allocation72_spill] sm:$0xff] }
0x17b9   : > { %9192 = vmatpush3.bf16.msra.mxu0 %v5523_v62 }
0x17bb   : > { %9589 = vrot.lane.b32.xlu1 %v14913_v63, %s10553_s7  ;;  %v14957_v63 = vld [vmem:[#allocation71_spill] sm:$0xff] }
0x17be   : > { %v13032_v39 = vpop.eup %10338 }
0x17bf   : > { %5464 = vadd.xlane.f32.xlu0 %v13032_v39  ;;  %9599 = vrot.lane.b32.xlu1 %v14914_v48, %s10551_s28  ;;  %v13039_v7 = vpop.eup %10340  ;;  %v14958_v48 = vpack.i.bf16 %v14956_v49, %v14957_v63 }
0x17c3   : > { %5468 = vadd.xlane.f32.xlu0 %v13039_v7  ;;  %9609 = vrot.lane.b32.xlu1 %v14915_v38, %s10552_s29 }
0x17c7   : > { %9619 = vrot.lane.b32.xlu1 %v14916_v36, %s10553_s7  ;;  %v14959_v36 = vld [vmem:[#allocation62_spill] sm:$0xff] }
0x17cb   : > { %9629 = vrot.lane.b32.xlu1 %v14917_v18, %s10551_s28  ;;  %v14960_v18 = vld [vmem:[#allocation61_spill] sm:$0xff] }
0x17cf   : > { %9639 = vrot.lane.b32.xlu1 %v14918_v8, %s10552_s29  ;;  %v14961_v8 = vpack.i.bf16 %v14959_v36, %v14960_v18 }
0x17d3   : > { %9649 = vrot.lane.b32.xlu1 %v14921_v41, %s10553_s7  ;;  %v14963_v41 = vld [vmem:[#allocation69_spill] sm:$0xff] }
0x17d4   : > { %v14964_v0 = vpack.i.bf16 %v14962_v12, %v14963_v41 }
0x17d7   : > { %9659 = vrot.lane.b32.xlu1 %v14923_v17, %s10551_s28 }
0x17d9   : > { %5879 = vrot.lane.b32.xlu0 %v10514_v43, %s10539_s23 }
0x17db   : > { %9669 = vrot.lane.b32.xlu1 %v14924_v26, %s10552_s29  ;;  %v14965_v26 = vld [vmem:[#allocation75_spill] sm:$0xff] }
0x17dc   : > { %v14967_v61 = vpack.i.bf16 %v14965_v26, %v14966_v13 }
0x17dd   : > { %9549 = vrot.lane.b32.xlu0 %v14927_v22, %s10552_s29 }
0x17df   : > { %9679 = vrot.lane.b32.xlu1 %v14930_v29, %s10551_s28  ;;  %v14970_v29 = vpack.i.bf16 %v14968_v19, %v14969_v6 }
0x17e1   : > { %9559 = vrot.lane.b32.xlu0 %v14933_v24, %s10553_s7  ;;  %v14971_v24 = vpack.i.bf16 %v12878_v25, %v12874_v9  ;;  %v14975_v25 = vld [vmem:[#allocation109_spill] sm:$0xff] }
0x17e3   : > { %9689 = vrot.lane.b32.xlu1 %v14934_v35, %s10552_s29 }
0x17e5   : > { %9564 = vrot.lane.b32.xlu0 %v14937_v58, %s10553_s7 }
0x17e7   : > { %9699 = vrot.lane.b32.xlu1 %v14940_v59, %s10551_s28  ;;  %v14974_v59 = vpack.i.bf16 %v14972_v3, %v14973_v46 }
0x17e9   : > { %9574 = vrot.lane.b32.xlu0 %v14943_v27, %s10551_s28 }
0x17ed   : > { %9584 = vrot.lane.b32.xlu0 %v14946_v56, %s10552_s29  ;;  %v14977_v56 = vpack.i.bf16 %v14975_v25, %v14976_v14 }
0x17f1   : > { %9594 = vrot.lane.b32.xlu0 %v14949_v30, %s10553_s7 }
0x17f5   : > { %9604 = vrot.lane.b32.xlu0 %v14952_v47, %s10551_s28 }
0x17f9   : > { %9614 = vrot.lane.b32.xlu0 %v14955_v11, %s10552_s29 }
0x17fd   : > { %v5443_v62 = vpop.xlane.xlu1 %5442  ;;  %9624 = vrot.lane.b32.xlu0 %v14958_v48, %s10553_s7 }
0x1801   : > { %v5439_v38 = vpop.xlane.xlu1 %5438  ;;  %9634 = vrot.lane.b32.xlu0 %v14961_v8, %s10551_s28 }
0x1802   : > { %10342 = vrcp.f32 %v5439_v38 }
0x1805   : > { %v5445_v51 = vpop.xlane.xlu1 %5444  ;;  %9644 = vrot.lane.b32.xlu0 %v14964_v0, %s10552_s29  ;;  %v5451_v17 = vpop.xlane.xlu0 %5450 }
0x1809   : > { %v5441_v43 = vpop.xlane.xlu1 %5440  ;;  %9654 = vrot.lane.b32.xlu0 %v14967_v61, %s10553_s7  ;;  %v5447_v22 = vpop.xlane.xlu0 %5446 }
0x180a   : > { %10344 = vrcp.f32 %v5441_v43 }
0x180b   : > { %10346 = vrcp.f32 %v5445_v51 }
0x180c   : > { %v10343_v2 = vpop.eup %10342 }
0x180d   : > { %9664 = vrot.lane.b32.xlu0 %v14970_v29, %s10551_s28  ;;  %v5453_v52 = vpop.xlane.xlu0 %5452  ;;  %v5449_v60 = vpop.xlane.xlu1 %5448  ;;  %v5486_v15 = vmul.f32 %v10343_v2, %v12956_v5  ;;  %v14982_v2 = vld [vmem:[#allocation37_spill] sm:$0xff] }
0x180e   : > { %10348 = vrcp.f32 %v5449_v60 }
0x180f   : > { %10350 = vrcp.f32 %v5443_v62 }
0x1810   : > { %10352 = vrcp.f32 %v5447_v22 }
0x1811   : > { %9674 = vrot.lane.b32.xlu0 %v14971_v24, %s10552_s29  ;;  %v5459_v35 = vpop.xlane.xlu0 %5458  ;;  %10354 = vrcp.f32 %v5453_v52  ;;  %v14981_v24 = vld [vmem:[#allocation48_spill] sm:$0xff] }
0x1813   : > { %v5457_v53 = vpop.xlane.xlu1 %5456 }
0x1814   : > { %v10345_v58 = vpop.eup %10344 }
0x1815   : > { %9684 = vrot.lane.b32.xlu0 %v14974_v59, %s10551_s28  ;;  %v5487_v37 = vmul.f32 %v10345_v58, %v12969_v21  ;;  %v5455_v27 = vpop.xlane.xlu0 %5454  ;;  %v10347_v16 = vpop.eup %10346  ;;  %v14978_v21 = vld [vmem:[#allocation102_spill] sm:$0xff] }
0x1816   : > { %10356 = vrcp.f32 %v5455_v27  ;;  %v14980_v33 = vpack.i.bf16 %v14978_v21, %v14979_v20  ;;  %v5489_v55 = vmul.f32 %v10347_v16, %v12960_v10  ;;  %v14984_v21 = vld [vmem:[#allocation50_spill] sm:$0xff] }
0x1817   : > { %v13148_v40 = vpop.xlane.xlu1 %5466  ;;  %v5502_v9 = vpack.c.bf16 %v5487_v37, %v5486_v15  ;;  %10358 = vrcp.f32 %v5451_v17 }
0x1818   : > { %v10349_v30 = vpop.eup %10348  ;;  %10360 = vrcp.f32 %v5457_v53 }
0x1819   : > { %9195 = vmatprep.mubr.bf16.mxu0 %v5502_v9  ;;  %9694 = vrot.lane.b32.xlu0 %v14977_v56, %s10552_s29  ;;  %v10351_v5 = vpop.eup %10350  ;;  %v5461_v1 = vpop.xlane.xlu0 %5460  ;;  %v5491_v62 = vmul.f32 %v10349_v30, %v12978_v28  ;;  %v14983_v30 = vld [vmem:[#allocation52_spill] sm:$0xff] }
0x181a   : > { %v10353_v47 = vpop.eup %10352  ;;  %v5488_v49 = vmul.f32 %v10351_v5, %v12953_v23  ;;  %10362 = vrcp.f32 %v5461_v1 }
0x181b   : > { %v13154_v57 = vpop.xlane.xlu1 %5462  ;;  %v5490_v63 = vmul.f32 %v10353_v47, %v12971_v34  ;;  %v10355_v38 = vpop.eup %10354  ;;  %10364 = vrcp.f32 %v5459_v35 }
0x181c   : > { %v5503_v48 = vpack.c.bf16 %v5489_v55, %v5488_v49  ;;  %v5493_v28 = vmul.f32 %v10355_v38, %v12976_v45  ;;  %10366 = vrcp.f32 %v13154_v57  ;;  %v14986_v57 = vld [vmem:[#allocation54_spill] sm:$0xff] }
0x181d   : > { %9704 = vrot.lane.b32.xlu0 %v14980_v33, %s10551_s28  ;;  %v5504_v18 = vpack.c.bf16 %v5491_v62, %v5490_v63 }
0x181f   : > { %v5525_v11 = vpop.permute.xlu1 %5524 }
0x1820   : > { %9193 = vmatprep.subr.bf16.mxu0 %v5525_v11  ;;  %v10357_v8 = vpop.eup %10356 }
0x1821   : > { %9194 = vmatpush3.bf16.msra.mxu0 %v5525_v11  ;;  %v10359_v10 = vpop.eup %10358  ;;  %v5494_v23 = vmul.f32 %v10357_v8, %v12988_v42 }
0x1822   : > { %v10361_v51 = vpop.eup %10360  ;;  %v5492_v41 = vmul.f32 %v10359_v10, %v12962_v32 }
0x1823   : > { %v13164_v36 = vpop.permute.xlu1 %9539  ;;  %v5495_v34 = vmul.f32 %v10361_v51, %v12985_v54 }
0x1824   : > { %9196 = vmatmul.mubr.bf16.vlgmr.msra.gmra.mrb[160].mxu0 %v5503_v48  ;;  %v5505_v0 = vpack.c.bf16 %v5493_v28, %v5492_v41  ;;  %v10363_v17 = vpop.eup %10362  ;;  %v14985_v41 = vld [vmem:[#allocation56_spill] sm:$0xff] }
0x1825   : > { %9199 = vmatprep.mubr.bf16.mxu0 %v5504_v18  ;;  %v5506_v26 = vpack.c.bf16 %v5495_v34, %v5494_v23  ;;  %v10365_v13 = vpop.eup %10364  ;;  %v5497_v61 = vmul.f32 %v10363_v17, %v12994_v4 }
0x1826   : > { %v5496_v45 = vmul.f32 %v10365_v13, %v12982_v44 }
0x1827   : > { %v13167_v12 = vpop.permute.xlu1 %9544 }
0x1828   : > { %v5507_v19 = vpack.c.bf16 %v5497_v61, %v5496_v45  ;;  %v10367_v61 = vpop.eup %10366 }
0x182b   : > { %v13172_v43 = vpop.permute.xlu1 %9554 }
0x182c   : > { %9200 = vmatmul.mubr.bf16.gmra.mrb[164].mxu0 %v5505_v0 }
0x182d   : > { %9203 = vmatprep.mubr.bf16.mxu0 %v5506_v26 }
0x182f   : > { %v13175_v22 = vpop.permute.xlu1 %5881 }
0x1833   : > { %v9570_v42 = vpop.permute.xlu1 %9569 }
0x1834   : > { %9204 = vmatmul.mubr.bf16.gmra.mrb[168].mxu0 %v5507_v19  ;;  %v9572_v6 = vunpack.i.h.bf16 %v9570_v42  ;;  %v9571_v54 = vunpack.i.l.bf16 %v9570_v42 }
0x1836   : > { %v3658_v35 = vsel %vm1564_vm3, %v14981_v24, %v9572_v6  ;;  %v3657_v4 = vsel %vm1564_vm3, %v14982_v2, %v9571_v54  ;;  %v5498_v24 = vmul.f32 %v10367_v61, %v12997_v31 }
0x1837   : > { %v9580_v32 = vpop.permute.xlu1 %9579 }
0x1838   : > { %v9582_v29 = vunpack.i.h.bf16 %v9580_v32  ;;  %v9581_v52 = vunpack.i.l.bf16 %v9580_v32 }
0x183a   : > { %v3674_v44 = vsel %vm3669_vm4, %v3657_v4, %v9581_v52  ;;  %v3675_v3 = vsel %vm3669_vm4, %v3658_v35, %v9582_v29  ;;  %v9542_v29 = vunpack.i.h.bf16 %v13164_v36  ;;  %v9541_v52 = vunpack.i.l.bf16 %v13164_v36 }
0x183b   : > { %v9590_v60 = vpop.permute.xlu1 %9589  ;;  %v9547_v36 = vunpack.i.h.bf16 %v13167_v12 }
0x183c   : > { %v9592_v53 = vunpack.i.h.bf16 %v9590_v60  ;;  %v9591_v58 = vunpack.i.l.bf16 %v9590_v60 }
0x183e   : > { %v13185_v46 = vsel %vm3686_vm5, %v3674_v44, %v9591_v58  ;;  %v13188_v59 = vsel %vm3686_vm5, %v3675_v3, %v9592_v53  ;;  %v14987_v3 = vld [vmem:[#allocation42_spill] sm:$0xff] }
0x183f   : > { %v9600_v15 = vpop.permute.xlu1 %9599  ;;  %v3705_v37 = vpack.c.bf16 %v13188_v59, %v13185_v46 }
0x1840   : > { %v9602_v9 = vunpack.i.h.bf16 %v9600_v15  ;;  %v9601_v25 = vunpack.i.l.bf16 %v9600_v15  ;;  %v3654_v15 = vsel %vm1564_vm3, %v14987_v3, %v9542_v29 }
0x1842   : > { %v3662_v5 = vsel %vm1564_vm3, %v14983_v30, %v9602_v9  ;;  %v3661_v20 = vsel %vm1564_vm3, %v14984_v21, %v9601_v25  ;;  %v9546_v25 = vunpack.i.l.bf16 %v13167_v12 }
0x1843   : > { %v9610_v27 = vpop.permute.xlu1 %9609 }
0x1844   : > { %v9612_v14 = vunpack.i.h.bf16 %v9610_v27  ;;  %v9611_v56 = vunpack.i.l.bf16 %v9610_v27  ;;  %v14988_v27 = vld [vmem:[#allocation35_spill] sm:$0xff] }
0x1845   : > { %v3653_v9 = vsel %vm1564_vm3, %v14988_v27, %v9541_v52 }
0x1846   : > { %v3678_v55 = vsel %vm3669_vm4, %v3661_v20, %v9611_v56  ;;  %v3679_v1 = vsel %vm3669_vm4, %v3662_v5, %v9612_v14  ;;  %v9557_v14 = vunpack.i.h.bf16 %v13172_v43 }
0x1847   : > { %v9620_v16 = vpop.permute.xlu1 %9619 }
0x1848   : > { %v9622_v33 = vunpack.i.h.bf16 %v9620_v16  ;;  %v9621_v47 = vunpack.i.l.bf16 %v9620_v16 }
0x184a   : > { %v13199_v11 = vsel %vm3686_vm5, %v3678_v55, %v9621_v47  ;;  %v13202_v62 = vsel %vm3686_vm5, %v3679_v1, %v9622_v33  ;;  %v14989_v47 = vld [vmem:[#allocation36_spill] sm:$0xff]  ;;  %v14990_v55 = vld [vmem:[#allocation38_spill] sm:$0xff] }
0x184b   : > { %v9630_v49 = vpop.permute.xlu1 %9629  ;;  %v3707_v63 = vpack.c.bf16 %v13202_v62, %v13199_v11  ;;  %v3656_v12 = vsel %vm1564_vm3, %v14989_v47, %v9547_v36  ;;  %v3655_v1 = vsel %vm1564_vm3, %v14990_v55, %v9546_v25 }
0x184c   : > { %v5465_v48 = vpop.xlane.xlu0 %5464  ;;  %v9632_v18 = vunpack.i.h.bf16 %v9630_v49  ;;  %v9631_v8 = vunpack.i.l.bf16 %v9630_v49 }
0x184d   : > { %10368 = vrcp.f32 %v5465_v48 }
0x184e   : > { %10370 = vrcp.f32 %v13148_v40  ;;  %v3666_v34 = vsel %vm1564_vm3, %v14985_v41, %v9632_v18  ;;  %v3665_v0 = vsel %vm1564_vm3, %v14986_v57, %v9631_v8 }
0x184f   : > { %v9640_v38 = vpop.permute.xlu1 %9639 }
0x1850   : > { %v5469_v10 = vpop.xlane.xlu0 %5468  ;;  %v9642_v51 = vunpack.i.h.bf16 %v9640_v38  ;;  %v9641_v28 = vunpack.i.l.bf16 %v9640_v38  ;;  %v3673_v38 = vsel %vm3669_vm4, %v3656_v12, %v9557_v14 }
0x1851   : > { %10372 = vrcp.f32 %v5469_v10 }
0x1852   : > { %v3682_v40 = vsel %vm3669_vm4, %v3665_v0, %v9641_v28  ;;  %v3683_v45 = vsel %vm3669_vm4, %v3666_v34, %v9642_v51 }
0x1853   : > { %v9650_v23 = vpop.permute.xlu1 %9649 }
0x1854   : > { %v9652_v17 = vunpack.i.h.bf16 %v9650_v23  ;;  %v9651_v26 = vunpack.i.l.bf16 %v9650_v23  ;;  %v5880_v13 = vpop.permute.xlu0 %5879 }
0x1855   : > { %9211 = vmatprep.subr.bf16.mxu0 %v5880_v13 }
0x1856   : > { %v13215_v19 = vsel %vm3686_vm5, %v3682_v40, %v9651_v26  ;;  %v13218_v42 = vsel %vm3686_vm5, %v3683_v45, %v9652_v17  ;;  %9212 = vmatpush3.bf16.msra.mxu0 %v5880_v13  ;;  %v14991_v17 = vld [vmem:[#allocation46_spill] sm:$0xff]  ;;  %v14992_v13 = vld [vmem:[#allocation39_spill] sm:$0xff] }
0x1857   : > { %v10369_v32 = vpop.eup %10368  ;;  %9213 = vmatprep.subr.bf16.mxu0 %v13175_v22  ;;  %v3709_v6 = vpack.c.bf16 %v13218_v42, %v13215_v19 }
0x1858   : > { %v10371_v54 = vpop.eup %10370  ;;  %v9550_v60 = vpop.permute.xlu0 %9549  ;;  %v5499_v35 = vmul.f32 %v10369_v32, %v13032_v39 }
0x1859   : > { %v9552_v2 = vunpack.i.h.bf16 %v9550_v60  ;;  %v9551_v4 = vunpack.i.l.bf16 %v9550_v60  ;;  %v5500_v44 = vmul.f32 %v10371_v54, %v12991_v50  ;;  %v9556_v50 = vunpack.i.l.bf16 %v13172_v43 }
0x185a   : > { %v5508_v53 = vpack.c.bf16 %v5499_v35, %v5498_v24  ;;  %9214 = vmatpush3.bf16.msra.mxu0 %v13175_v22 }
0x185b   : > { %v10373_v58 = vpop.eup %10372  ;;  %v3671_v16 = vsel %vm3669_vm4, %v3654_v15, %v9552_v2  ;;  %v3670_v30 = vsel %vm3669_vm4, %v3653_v9, %v9551_v4  ;;  %v3672_v48 = vsel %vm3669_vm4, %v3655_v1, %v9556_v50 }
0x185c   : > { %9207 = vmatprep.mubr.bf16.mxu0 %v5508_v53  ;;  %v9560_v31 = vpop.permute.xlu0 %9559  ;;  %v5501_v39 = vmul.f32 %v10373_v58, %v13039_v7  ;;  %v14993_v53 = vld [vmem:[#allocation51_spill] sm:$0xff] }
0x185d   : > { %v9562_v22 = vunpack.i.h.bf16 %v9560_v31  ;;  %v9561_v56 = vunpack.i.l.bf16 %v9560_v31 }
0x185e   : > { %v5509_v5 = vpack.c.bf16 %v5501_v39, %v5500_v44  ;;  %v14994_v44 = vld [vmem:[#allocation49_spill] sm:$0xff] }
0x185f   : > { %v3687_v21 = vsel %vm3686_vm5, %v3670_v30, %v9561_v56  ;;  %v3688_v20 = vsel %vm3686_vm5, %v3671_v16, %v9562_v22  ;;  %v14995_v16 = vld [vmem:[#allocation55_spill] sm:$0xff] }
0x1860   : > { %9208 = vmatmul.mubr.bf16.gmra.mrb[172].mxu0 %v5509_v5  ;;  %v9565_v33 = vpop.permute.xlu0 %9564  ;;  %v3703_v7 = vpack.c.bf16 %v3688_v20, %v3687_v21  ;;  %v14996_v5 = vld [vmem:[#allocation53_spill] sm:$0xff] }
0x1861   : > { %v9567_v49 = vunpack.i.h.bf16 %v9565_v33  ;;  %v9566_v43 = vunpack.i.l.bf16 %v9565_v33 }
0x1862   : > { %9215 = vmatprep.mubr.msk.bf16.mxu0 %vm353_vm0, %v3703_v7 }
0x1863   : > { %v3690_v18 = vsel %vm3686_vm5, %v3673_v38, %v9567_v49  ;;  %v3689_v8 = vsel %vm3686_vm5, %v3672_v48, %v9566_v43 }
0x1864   : > { %v3704_v10 = vpack.c.bf16 %v3690_v18, %v3689_v8  ;;  %v9575_v51 = vpop.permute.xlu0 %9574  ;;  %v14997_v18 = vld [vmem:[#allocation112_spill] sm:$0xff]  ;;  %v14998_v8 = vld [vmem:[#allocation110_spill] sm:$0xff] }
0x1865   : > { %v9577_v23 = vunpack.i.h.bf16 %v9575_v51  ;;  %v9576_v41 = vunpack.i.l.bf16 %v9575_v51 }
0x1867   : > { %v3660_v26 = vsel %vm1564_vm3, %v14991_v17, %v9577_v23  ;;  %v3659_v61 = vsel %vm1564_vm3, %v14992_v13, %v9576_v41  ;;  %v15001_v23 = vld [vmem:[#allocation111_spill] sm:$0xff]  ;;  %v15003_v13 = vld [vmem:[#allocation106_spill] sm:$0xff] }
0x1868   : > { %v9585_v28 = vpop.permute.xlu0 %9584  ;;  %9216 = vmatmul.mubr.msk.bf16.vlgmr.msra.gmra.mrb[176].mxu0 %vm353_vm0, %v3704_v10  ;;  %v14999_v10 = vpack.i.bf16 %v14997_v18, %v14998_v8 }
0x1869   : > { %9219 = vmatprep.mubr.msk.bf16.mxu0 %vm353_vm0, %v3705_v37  ;;  %v9587_v34 = vunpack.i.h.bf16 %v9585_v28  ;;  %v9586_v57 = vunpack.i.l.bf16 %v9585_v28  ;;  %v15000_v28 = vld [vmem:[#allocation113_spill] sm:$0xff] }
0x186a   : > { %v15002_v41 = vpack.i.bf16 %v15000_v28, %v15001_v23 }
0x186b   : > { %v3676_v32 = vsel %vm3669_vm4, %v3659_v61, %v9586_v57  ;;  %v3677_v54 = vsel %vm3669_vm4, %v3660_v26, %v9587_v34  ;;  %v15004_v61 = vld [vmem:[#allocation104_spill] sm:$0xff] }
0x186c   : > { %v9595_v0 = vpop.permute.xlu0 %9594 }
0x186d   : > { %v9597_v40 = vunpack.i.h.bf16 %v9595_v0  ;;  %v9596_v45 = vunpack.i.l.bf16 %v9595_v0 }
0x186f   : > { %v3693_v29 = vsel %vm3686_vm5, %v3676_v32, %v9596_v45  ;;  %v3694_v46 = vsel %vm3686_vm5, %v3677_v54, %v9597_v40  ;;  %v15005_v40 = vpack.i.bf16 %v15003_v13, %v15004_v61  ;;  %v15006_v32 = vld [vmem:[#allocation107_spill] sm:$0xff]  ;;  %v15007_v54 = vld [vmem:[#allocation105_spill] sm:$0xff] }
0x1870   : > { %v9605_v59 = vpop.permute.xlu0 %9604  ;;  %v3706_v37 = vpack.c.bf16 %v3694_v46, %v3693_v29  ;;  %v15008_v29 = vpack.i.bf16 %v15006_v32, %v15007_v54 }
0x1871   : > { %v9607_v60 = vunpack.i.h.bf16 %v9605_v59  ;;  %v9606_v24 = vunpack.i.l.bf16 %v9605_v59 }
0x1872   : > { %9220 = vmatmul.mubr.msk.bf16.gmra.mrb[180].mxu0 %vm353_vm0, %v3706_v37 }
0x1873   : > { %9223 = vmatprep.mubr.msk.bf16.mxu0 %vm353_vm0, %v3707_v63  ;;  %v3664_v58 = vsel %vm1564_vm3, %v14993_v53, %v9607_v60  ;;  %v3663_v3 = vsel %vm1564_vm3, %v14994_v44, %v9606_v24  ;;  %v15009_v60 = vld [vmem:[#allocation116_spill] sm:$0xff]  ;;  %v15010_v24 = vld [vmem:[#allocation114_spill] sm:$0xff] }
0x1874   : > { %v9615_v52 = vpop.permute.xlu0 %9614 }
0x1875   : > { %v9617_v35 = vunpack.i.h.bf16 %v9615_v52  ;;  %v9616_v2 = vunpack.i.l.bf16 %v9615_v52 }
0x1877   : > { %v3680_v9 = vsel %vm3669_vm4, %v3663_v3, %v9616_v2  ;;  %v3681_v11 = vsel %vm3669_vm4, %v3664_v58, %v9617_v35  ;;  %v15011_v35 = vpack.i.bf16 %v15009_v60, %v15010_v24  ;;  %v15012_v2 = vld [vmem:[#allocation117_spill] sm:$0xff] }
0x1878   : > { %v9625_v4 = vpop.permute.xlu0 %9624 }
0x1879   : > { %v9627_v15 = vunpack.i.h.bf16 %v9625_v4  ;;  %v9626_v27 = vunpack.i.l.bf16 %v9625_v4  ;;  %v15013_v4 = vld [vmem:[#allocation115_spill] sm:$0xff] }
0x187a   : > { %v15014_v53 = vpack.i.bf16 %v15012_v2, %v15013_v4 }
0x187b   : > { %v3697_v62 = vsel %vm3686_vm5, %v3680_v9, %v9626_v27  ;;  %v3698_v63 = vsel %vm3686_vm5, %v3681_v11, %v9627_v15 }
0x187c   : > { %v9635_v36 = vpop.permute.xlu0 %9634  ;;  %v3708_v31 = vpack.c.bf16 %v3698_v63, %v3697_v62 }
0x187d   : > { %v9637_v25 = vunpack.i.h.bf16 %v9635_v36  ;;  %v9636_v14 = vunpack.i.l.bf16 %v9635_v36 }
0x187e   : > { %9224 = vmatmul.mubr.msk.bf16.gmra.mrb[184].mxu0 %vm353_vm0, %v3708_v31 }
0x187f   : > { %9227 = vmatprep.mubr.msk.bf16.mxu0 %vm353_vm0, %v3709_v6  ;;  %v3668_v30 = vsel %vm1564_vm3, %v14995_v16, %v9637_v25  ;;  %v3667_v21 = vsel %vm1564_vm3, %v14996_v5, %v9636_v14 }
0x1880   : > { %v9645_v39 = vpop.permute.xlu0 %9644 }
0x1881   : > { %v9647_v22 = vunpack.i.h.bf16 %v9645_v39  ;;  %v9646_v56 = vunpack.i.l.bf16 %v9645_v39 }
0x1883   : > { %v3684_v7 = vsel %vm3669_vm4, %v3667_v21, %v9646_v56  ;;  %v3685_v19 = vsel %vm3669_vm4, %v3668_v30, %v9647_v22 }
0x1884   : > { %v9655_v50 = vpop.permute.xlu0 %9654 }
0x1885   : > { %v9657_v20 = vunpack.i.h.bf16 %v9655_v50  ;;  %v9656_v33 = vunpack.i.l.bf16 %v9655_v50 }
0x1887   : > { %v3701_v42 = vsel %vm3686_vm5, %v3684_v7, %v9656_v33  ;;  %v3702_v6 = vsel %vm3686_vm5, %v3685_v19, %v9657_v20 }
0x1888   : > { %v3710_v47 = vpack.c.bf16 %v3702_v6, %v3701_v42 }
0x188a   : > { %9228 = vmatmul.mubr.msk.bf16.gmra.mrb[188].mxu0 %vm353_vm0, %v3710_v47 }
0x18f7   : > { %v9197_v12 = vpop.f32.mrb[160].mxu0 }
0x18f8   : > { %v5568_v55 = vpop.f32.mrb[161].mxu0 }
0x18f9   : > { %v9198_v1 = vpop.f32.mrb[162].mxu0 }
0x18fa   : > { %v9708_v49 = vpack.i.bf16 %v9198_v1, %v9197_v12  ;;  %v5571_v43 = vpop.f32.mrb[163].mxu0  ;;  %v9665_v1 = vpop.permute.xlu0 %9664 }
0x18fb   : > { %v9713_v48 = vpack.i.bf16 %v5571_v43, %v5568_v55  ;;  %v9660_v43 = vpop.permute.xlu1 %9659 }
0x18fc   : > { %9709 = vrot.lane.b32.xlu0 %v9708_v49, %s10553_s7  ;;  %v9662_v2 = vunpack.i.h.bf16 %v9660_v43  ;;  %v9661_v4 = vunpack.i.l.bf16 %v9660_v43 }
0x18fd   : > { %9714 = vrot.lane.b32.xlu1 %v9713_v48, %s10553_s7 }
0x18fe   : > { %v9675_v23 = vpop.permute.xlu0 %9674 }
0x18ff   : > { %v9201_v38 = vpop.f32.mrb[164].mxu0 }
0x1900   : > { %9724 = vrot.lane.b32.xlu0 %v14999_v10, %s10552_s29  ;;  %v5584_v51 = vpop.f32.mrb[165].mxu0 }
0x1901   : > { %9719 = vrot.lane.b32.xlu1 %v15002_v41, %s10552_s29  ;;  %v9202_v34 = vpop.f32.mrb[166].mxu0 }
0x1902   : > { %v9728_v57 = vpack.i.bf16 %v9202_v34, %v9201_v38  ;;  %v5587_v0 = vpop.f32.mrb[167].mxu0  ;;  %v9670_v34 = vpop.permute.xlu1 %9669 }
0x1903   : > { %v9733_v17 = vpack.i.bf16 %v5587_v0, %v5584_v51 }
0x1904   : > { %9729 = vrot.lane.b32.xlu0 %v9728_v57, %s10553_s7 }
0x1905   : > { %9734 = vrot.lane.b32.xlu1 %v9733_v17, %s10553_s7 }
0x1906   : > { %v13377_v61 = vpop.permute.xlu1 %9679 }
0x1907   : > { %v9205_v26 = vpop.f32.mrb[168].mxu0 }
0x1908   : > { %9744 = vrot.lane.b32.xlu0 %v15005_v40, %s10551_s28  ;;  %v5600_v45 = vpop.f32.mrb[169].mxu0 }
0x1909   : > { %9739 = vrot.lane.b32.xlu1 %v15008_v29, %s10551_s28  ;;  %v9206_v46 = vpop.f32.mrb[170].mxu0 }
0x190a   : > { %v9748_v59 = vpack.i.bf16 %v9206_v46, %v9205_v26  ;;  %v5603_v37 = vpop.f32.mrb[171].mxu0  ;;  %v13373_v26 = vpop.permute.xlu0 %9684 }
0x190b   : > { %v9753_v52 = vpack.i.bf16 %v5603_v37, %v5600_v45  ;;  %v9690_v60 = vpop.permute.xlu1 %9689 }
0x190c   : > { %9749 = vrot.lane.b32.xlu0 %v9748_v59, %s10553_s7 }
0x190d   : > { %9754 = vrot.lane.b32.xlu1 %v9753_v52, %s10553_s7 }
0x190e   : > { %v13389_v37 = vpop.permute.xlu0 %9694 }
0x1910   : > { %9764 = vrot.lane.b32.xlu0 %v15011_v35, %s10552_s29 }
0x1911   : > { %9759 = vrot.lane.b32.xlu1 %v15014_v53, %s10552_s29 }
0x1933   : > { %v9209_v58 = vpop.f32.mrb[172].mxu0 }
0x1934   : > { %v5616_v44 = vpop.f32.mrb[173].mxu0 }
0x1935   : > { %v9210_v3 = vpop.f32.mrb[174].mxu0 }
0x1936   : > { %v9773_v15 = vpack.i.bf16 %v9210_v3, %v9209_v58  ;;  %v5619_v27 = vpop.f32.mrb[175].mxu0  ;;  %v9672_v58 = vunpack.i.h.bf16 %v9670_v34  ;;  %v9666_v3 = vunpack.i.l.bf16 %v9665_v1 }
0x1937   : > { %v9768_v9 = vpack.i.bf16 %v5619_v27, %v5616_v44  ;;  %v9671_v44 = vunpack.i.l.bf16 %v9670_v34 }
0x1938   : > { %9774 = vrot.lane.b32.xlu0 %v9773_v15, %s10553_s7  ;;  %v13393_v15 = vpop.permute.xlu0 %9704 }
0x1939   : > { %9769 = vrot.lane.b32.xlu1 %v9768_v9, %s10553_s7  ;;  %v13395_v9 = vpop.permute.xlu1 %9699 }
0x193b   : > { %v13323_v11 = vpop.f32.mrb[176].mxu0 }
0x193c   : > { %v13325_v62 = vpop.f32.mrb[177].mxu0  ;;  %v6097_v14 = vsel %vm353_vm0, %v13323_v11, 0.0 }
0x193d   : > { %v13327_v63 = vpop.f32.mrb[178].mxu0  ;;  %v6094_v31 = vsel %vm353_vm0, %v13325_v62, 0.0 }
0x193e   : > { %v13329_v36 = vpop.f32.mrb[179].mxu0  ;;  %v6099_v56 = vsel %vm353_vm0, %v13327_v63, 0.0 }
0x193f   : > { %v6095_v39 = vsel %vm353_vm0, %v13329_v36, 0.0 }
0x1940   : > { %v6096_v25 = vadd.f32 %v6095_v39, %v6094_v31  ;;  %v9667_v31 = vunpack.i.h.bf16 %v9665_v1  ;;  %v9676_v39 = vunpack.i.l.bf16 %v9675_v23 }
0x1942   : > { %v6098_v22 = vadd.f32 %v6097_v14, %v6096_v25  ;;  %v15015_v25 = vld [vmem:[#allocation80_spill] sm:$0xff] }
0x1943   : > { %v5824_v14 = vsel %vm1564_vm3, %v15015_v25, %v9662_v2  ;;  %v9697_v2 = vunpack.i.h.bf16 %v13389_v37 }
0x1944   : > { %v6100_v50 = vadd.f32 %v6099_v56, %v6098_v22  ;;  %v15016_v22 = vld [vmem:[#allocation78_spill] sm:$0xff] }
0x1945   : > { %v13339_v16 = vpop.f32.mrb[180].mxu0  ;;  %v5823_v56 = vsel %vm1564_vm3, %v15016_v22, %v9661_v4  ;;  %v9696_v4 = vunpack.i.l.bf16 %v13389_v37  ;;  %v9702_v37 = vunpack.i.h.bf16 %v13395_v9  ;;  %v15021_v22 = vld [vmem:[#allocation83_spill] sm:$0xff] }
0x1946   : > { %v13341_v30 = vpop.f32.mrb[181].mxu0  ;;  %v6105_v42 = vsel %vm353_vm0, %v13339_v16, 0.0 }
0x1947   : > { %v6101_v5 = vsel %vm353_vm0, %v13341_v30, 0.0  ;;  %v13345_v21 = vpop.f32.mrb[182].mxu0 }
0x1948   : > { %v6102_v20 = vadd.f32 %v6101_v5, %v6100_v50  ;;  %v13347_v33 = vpop.f32.mrb[183].mxu0  ;;  %v6107_v47 = vsel %vm353_vm0, %v13345_v21, 0.0  ;;  %v9677_v50 = vunpack.i.h.bf16 %v9675_v23 }
0x1949   : > { %v6103_v7 = vsel %vm353_vm0, %v13347_v33, 0.0 }
0x194a   : > { %v6104_v19 = vadd.f32 %v6103_v7, %v6102_v20  ;;  %v5839_v20 = vsel %vm3669_vm4, %v5823_v56, %v9671_v44  ;;  %v5840_v7 = vsel %vm3669_vm4, %v5824_v14, %v9672_v58  ;;  %v15019_v44 = vld [vmem:[#allocation84_spill] sm:$0xff] }
0x194c   : > { %v6106_v6 = vadd.f32 %v6105_v42, %v6104_v19  ;;  %v9682_v19 = vunpack.i.h.bf16 %v13377_v61  ;;  %v9681_v42 = vunpack.i.l.bf16 %v13377_v61 }
0x194e   : > { %v6108_v12 = vadd.f32 %v6107_v47, %v6106_v6  ;;  %v9692_v6 = vunpack.i.h.bf16 %v9690_v60  ;;  %v9691_v47 = vunpack.i.l.bf16 %v9690_v60 }
0x1951   : > { %v13355_v55 = vpop.f32.mrb[184].mxu0 }
0x1952   : > { %v13357_v49 = vpop.f32.mrb[185].mxu0  ;;  %v6113_v28 = vsel %vm353_vm0, %v13355_v55, 0.0 }
0x1953   : > { %v6109_v48 = vsel %vm353_vm0, %v13357_v49, 0.0  ;;  %v13361_v38 = vpop.f32.mrb[186].mxu0 }
0x1954   : > { %v6110_v18 = vadd.f32 %v6109_v48, %v6108_v12  ;;  %v13363_v8 = vpop.f32.mrb[187].mxu0  ;;  %v6115_v57 = vsel %vm353_vm0, %v13361_v38, 0.0  ;;  %v15017_v12 = vld [vmem:[#allocation77_spill] sm:$0xff] }
0x1955   : > { %v6111_v10 = vsel %vm353_vm0, %v13363_v8, 0.0  ;;  %v5825_v1 = vsel %vm1564_vm3, %v15017_v12, %v9666_v3  ;;  %v5828_v3 = vsel %vm1564_vm3, %v15019_v44, %v9682_v19 }
0x1956   : > { %v6112_v51 = vadd.f32 %v6111_v10, %v6110_v18  ;;  %v15018_v18 = vld [vmem:[#allocation79_spill] sm:$0xff]  ;;  %v5844_v14 = vsel %vm3669_vm4, %v5828_v3, %v9692_v6  ;;  %v15026_v3 = vld [vmem:[#allocation85_spill] sm:$0xff] }
0x1957   : > { %v5826_v10 = vsel %vm1564_vm3, %v15018_v18, %v9667_v31 }
0x1958   : > { %v6114_v41 = vadd.f32 %v6113_v28, %v6112_v51  ;;  %v5841_v51 = vsel %vm3669_vm4, %v5825_v1, %v9676_v39  ;;  %v5842_v34 = vsel %vm3669_vm4, %v5826_v10, %v9677_v50  ;;  %v15022_v50 = vld [vmem:[#allocation81_spill] sm:$0xff]  ;;  %v9701_v10 = vunpack.i.l.bf16 %v13395_v9 }
0x195a   : > { %v6116_v0 = vadd.f32 %v6115_v57, %v6114_v41 }
0x195d   : > { %v13371_v17 = vpop.f32.mrb[188].mxu0 }
0x195e   : > { %v13375_v13 = vpop.f32.mrb[189].mxu0  ;;  %v6121_v59 = vsel %vm353_vm0, %v13371_v17, 0.0 }
0x195f   : > { %v6117_v40 = vsel %vm353_vm0, %v13375_v13, 0.0  ;;  %v13381_v45 = vpop.f32.mrb[190].mxu0 }
0x1960   : > { %v6118_v32 = vadd.f32 %v6117_v40, %v6116_v0  ;;  %v13383_v54 = vpop.f32.mrb[191].mxu0  ;;  %v6123_v24 = vsel %vm353_vm0, %v13381_v45, 0.0  ;;  %v9687_v40 = vunpack.i.h.bf16 %v13373_v26 }
0x1961   : > { %v6119_v29 = vsel %vm353_vm0, %v13383_v54, 0.0 }
0x1962   : > { %v6120_v46 = vadd.f32 %v6119_v29, %v6118_v32  ;;  %v9686_v32 = vunpack.i.l.bf16 %v13373_v26  ;;  %v13426_v26 = vld [vmem:[%s14643_s1 + $0x4] sm:$0xf]  ;;  %v5830_v56 = vsel %vm1564_vm3, %v15021_v22, %v9687_v40 }
0x1964   : > { %v6122_v52 = vadd.f32 %v6121_v59, %v6120_v46 }
0x1966   : > { %v6124_v35 = vadd.f32 %v6123_v24, %v6122_v52 }
0x1968   : > { %v6125_v53 = vrot.slane %v6124_v35, 4 }
0x196a   : > { %v6126_v27 = vadd.f32 %v6125_v53, %v6124_v35 }
0x196c   : > { %v6127_v5 = vrot.slane %v6126_v27, 2 }
0x196e   : > { %v6128_v43 = vadd.f32 %v6127_v5, %v6126_v27  ;;  %v9710_v48 = vpop.permute.xlu0 %9709  ;;  %v15020_v27 = vld [vmem:[#allocation82_spill] sm:$0xff]  ;;  %v5829_v5 = vsel %vm1564_vm3, %v15022_v50, %v9686_v32 }
0x196f   : > { %v9712_v28 = vunpack.i.h.bf16 %v9710_v48  ;;  %v9711_v23 = vunpack.i.l.bf16 %v9710_v48  ;;  %v9715_v41 = vpop.permute.xlu1 %9714  ;;  %v5827_v31 = vsel %vm1564_vm3, %v15020_v27, %v9681_v42  ;;  %v5845_v19 = vsel %vm3669_vm4, %v5829_v5, %v9696_v4 }
0x1970   : > { %v6129_v57 = vrot.slane %v6128_v43, 1  ;;  %v9717_v0 = vunpack.i.h.bf16 %v9715_v41  ;;  %v9716_v61 = vunpack.i.l.bf16 %v9715_v41  ;;  %v5843_v25 = vsel %vm3669_vm4, %v5827_v31, %v9691_v47 }
0x1971   : > { %v5857_v29 = vsel %vm3686_vm5, %v5841_v51, %v9711_v23  ;;  %v5858_v46 = vsel %vm3686_vm5, %v5842_v34, %v9712_v28  ;;  %v5846_v42 = vsel %vm3669_vm4, %v5830_v56, %v9697_v2  ;;  %v15024_v2 = vld [vmem:[#allocation86_spill] sm:$0xff] }
0x1972   : > { %v5856_v59 = vsel %vm3686_vm5, %v5840_v7, %v9717_v0  ;;  %v5855_v52 = vsel %vm3686_vm5, %v5839_v20, %v9716_v61  ;;  %v13417_v60 = vpop.permute.xlu0 %9724  ;;  %v5872_v24 = vpack.c.bf16 %v5858_v46, %v5857_v29  ;;  %v6130_v35 = vadd.f32 %v6129_v57, %v6128_v43 }
0x1973   : > { %v13421_v53 = vpop.permute.xlu1 %9719  ;;  %v5871_v58 = vpack.c.bf16 %v5856_v59, %v5855_v52  ;;  %v9707_v0 = vunpack.i.h.bf16 %v13393_v15  ;;  %v9706_v61 = vunpack.i.l.bf16 %v13393_v15  ;;  %v9727_v32 = vunpack.i.h.bf16 %v13417_v60 }
0x1974   : > { %v6132_v39 = vmul.f32 0.0078125, %v6130_v35  ;;  %v9726_v29 = vunpack.i.l.bf16 %v13417_v60  ;;  %v9722_v59 = vunpack.i.h.bf16 %v13421_v53  ;;  %v9721_v52 = vunpack.i.l.bf16 %v13421_v53  ;;  %v15023_v35 = vld [vmem:[#allocation88_spill] sm:$0xff]  ;;  %v15025_v60 = vld [vmem:[#allocation87_spill] sm:$0xff] }
0x1975   : > { %9231 = vmatprep.mubr.msk.bf16.mxu0 %vm353_vm0, %v5871_v58  ;;  %v5832_v15 = vsel %vm1564_vm3, %v15023_v35, %v9702_v37  ;;  %v5831_v4 = vsel %vm1564_vm3, %v15024_v2, %v9701_v10  ;;  %v5834_v44 = vsel %vm1564_vm3, %v15025_v60, %v9707_v0  ;;  %v5833_v53 = vsel %vm1564_vm3, %v15026_v3, %v9706_v61  ;;  %v15028_v0 = vld [vmem:[#allocation89_spill] sm:$0xff] }
0x1976   : > { %v9730_v20 = vpop.permute.xlu0 %9729  ;;  %9232 = vmatmul.mubr.msk.bf16.gmra.mrb[192].mxu0 %vm353_vm0, %v5872_v24  ;;  %v6133_v7 = vmul.f32 %v6132_v39, %v13426_v26  ;;  %v5848_v56 = vsel %vm3669_vm4, %v5832_v15, %v9722_v59  ;;  %v5847_v50 = vsel %vm3669_vm4, %v5831_v4, %v9721_v52 }
0x1977   : > { %v9732_v6 = vunpack.i.h.bf16 %v9730_v20  ;;  %v9731_v47 = vunpack.i.l.bf16 %v9730_v20  ;;  %v9735_v12 = vpop.permute.xlu1 %9734 }
0x1978   : > { %v9737_v1 = vunpack.i.h.bf16 %v9735_v12  ;;  %v9736_v43 = vunpack.i.l.bf16 %v9735_v12  ;;  %v6140_v48 = vsel %vm6139_vm6, %v6133_v7, 0.0  ;;  %v6135_v18 = vsel %vm6134_vm7, %v6133_v7, 0.0 }
0x1979   : > { %v5861_v51 = vsel %vm3686_vm5, %v5845_v19, %v9731_v47  ;;  %v5862_v28 = vsel %vm3686_vm5, %v5846_v42, %v9732_v6  ;;  %6141 = vadd.xlane.f32.xlu1 %v6140_v48  ;;  %6136 = vadd.xlane.f32.xlu0 %v6135_v18  ;;  %v6150_v46 = vsel %vm6149_vm8, %v6133_v7, 0.0  ;;  %v6145_v24 = vsel %vm6144_vm9, %v6133_v7, 0.0 }
0x197a   : > { %v5860_v23 = vsel %vm3686_vm5, %v5844_v14, %v9737_v1  ;;  %v5859_v41 = vsel %vm3686_vm5, %v5843_v25, %v9736_v43  ;;  %v9745_v34 = vpop.permute.xlu0 %9744  ;;  %v5874_v57 = vpack.c.bf16 %v5862_v28, %v5861_v51  ;;  %v5849_v25 = vsel %vm3669_vm4, %v5833_v53, %v9726_v29 }
0x197b   : > { %v9740_v40 = vpop.permute.xlu1 %9739  ;;  %v5873_v9 = vpack.c.bf16 %v5860_v23, %v5859_v41  ;;  %v5850_v14 = vsel %vm3669_vm4, %v5834_v44, %v9727_v32  ;;  %v9747_v12 = vunpack.i.h.bf16 %v9745_v34  ;;  %v9746_v1 = vunpack.i.l.bf16 %v9745_v34  ;;  %v15027_v41 = vld [vmem:[#allocation91_spill] sm:$0xff]  ;;  %v15029_v32 = vld [vmem:[#allocation92_spill] sm:$0xff] }
0x197c   : > { %v9742_v48 = vunpack.i.h.bf16 %v9740_v40  ;;  %v9741_v18 = vunpack.i.l.bf16 %v9740_v40 }
0x197d   : > { %9235 = vmatprep.mubr.msk.bf16.mxu0 %vm353_vm0, %v5873_v9  ;;  %6151 = vadd.xlane.f32.xlu1 %v6150_v46  ;;  %v5837_v61 = vsel %vm1564_vm3, %v15028_v0, %v9746_v1  ;;  %v15030_v46 = vld [vmem:[#allocation90_spill] sm:$0xff] }
0x197e   : > { %6146 = vadd.xlane.f32.xlu0 %v6145_v24  ;;  %v9750_v58 = vpop.permute.xlu0 %9749  ;;  %9236 = vmatmul.mubr.msk.bf16.gmra.mrb[196].mxu0 %vm353_vm0, %v5874_v57  ;;  %v5838_v57 = vsel %vm1564_vm3, %v15027_v41, %v9747_v12  ;;  %v5836_v29 = vsel %vm1564_vm3, %v15029_v32, %v9742_v48  ;;  %v5835_v34 = vsel %vm1564_vm3, %v15030_v46, %v9741_v18 }
0x197f   : > { %v9752_v27 = vunpack.i.h.bf16 %v9750_v58  ;;  %v9751_v31 = vunpack.i.l.bf16 %v9750_v58  ;;  %v9755_v39 = vpop.permute.xlu1 %9754 }
0x1980   : > { %v9757_v37 = vunpack.i.h.bf16 %v9755_v39  ;;  %v9756_v22 = vunpack.i.l.bf16 %v9755_v39 }
0x1981   : > { %v5865_v5 = vsel %vm3686_vm5, %v5849_v25, %v9751_v31  ;;  %v5866_v20 = vsel %vm3686_vm5, %v5850_v14, %v9752_v27 }
0x1982   : > { %v5864_v7 = vsel %vm3686_vm5, %v5848_v56, %v9757_v37  ;;  %v5863_v19 = vsel %vm3686_vm5, %v5847_v50, %v9756_v22  ;;  %v5876_v42 = vpack.c.bf16 %v5866_v20, %v5865_v5  ;;  %v9765_v47 = vpop.permute.xlu0 %9764 }
0x1983   : > { %v5875_v6 = vpack.c.bf16 %v5864_v7, %v5863_v19  ;;  %v9760_v43 = vpop.permute.xlu1 %9759  ;;  %v9767_v10 = vunpack.i.h.bf16 %v9765_v47  ;;  %v9766_v51 = vunpack.i.l.bf16 %v9765_v47 }
0x1984   : > { %v9762_v28 = vunpack.i.h.bf16 %v9760_v43  ;;  %v9761_v23 = vunpack.i.l.bf16 %v9760_v43 }
0x1985   : > { %9239 = vmatprep.mubr.msk.bf16.mxu0 %vm353_vm0, %v5875_v6  ;;  %v5853_v24 = vsel %vm3669_vm4, %v5837_v61, %v9766_v51  ;;  %v5854_v35 = vsel %vm3669_vm4, %v5838_v57, %v9767_v10 }
0x1986   : > { %9240 = vmatmul.mubr.msk.bf16.gmra.mrb[200].mxu0 %vm353_vm0, %v5876_v42  ;;  %v5852_v4 = vsel %vm3669_vm4, %v5836_v29, %v9762_v28  ;;  %v5851_v58 = vsel %vm3669_vm4, %v5835_v34, %v9761_v23 }
0x19aa   : > { %v9775_v9 = vpop.permute.xlu0 %9774 }
0x19ab   : > { %v9777_v59 = vunpack.i.h.bf16 %v9775_v9  ;;  %v9776_v52 = vunpack.i.l.bf16 %v9775_v9  ;;  %v9770_v40 = vpop.permute.xlu1 %9769 }
0x19ac   : > { %v9772_v15 = vunpack.i.h.bf16 %v9770_v40  ;;  %v9771_v2 = vunpack.i.l.bf16 %v9770_v40 }
0x19ad   : > { %v5869_v60 = vsel %vm3686_vm5, %v5853_v24, %v9776_v52  ;;  %v5870_v44 = vsel %vm3686_vm5, %v5854_v35, %v9777_v59 }
0x19ae   : > { %v5878_v3 = vpack.c.bf16 %v5870_v44, %v5869_v60  ;;  %v5868_v53 = vsel %vm3686_vm5, %v5852_v4, %v9772_v15  ;;  %v5867_v27 = vsel %vm3686_vm5, %v5851_v58, %v9771_v2  ;;  %v13548_v4 = vld [vmem:[%s14643_s1 + $0x8] sm:$0xf] }
0x19af   : > { %v5877_v31 = vpack.c.bf16 %v5868_v53, %v5867_v27 }
0x19b1   : > { %9243 = vmatprep.mubr.msk.bf16.mxu0 %vm353_vm0, %v5877_v31 }
0x19b2   : > { %9244 = vmatmul.mubr.msk.bf16.gmra.mrb[204].mxu0 %vm353_vm0, %v5878_v3 }
0x1a06   : > { %v6137_v29 = vpop.xlane.xlu0 %6136  ;;  %v6142_v40 = vpop.xlane.xlu1 %6141 }
0x1a07   : > { %v6143_v2 = vmax.f32 %v6142_v40, 0.0  ;;  %v6138_v3 = vmax.f32 %v6137_v29, 0.0  ;;  %v6176_v40 = vlaneseq }
0x1a09   : > { %v6155_v60 = vmul.f32 %v6143_v2, %v13548_v4 }
0x1a0a   : > { %v6152_v44 = vpop.xlane.xlu1 %6151 }
0x1a0b   : > { %v6147_v15 = vpop.xlane.xlu0 %6146  ;;  %v6157_v27 = vrot.slane %v6155_v60, 1  ;;  %v6153_v31 = vmax.f32 %v6152_v44, 0.0 }
0x1a0c   : > { %v6148_v58 = vmax.f32 %v6147_v15, 0.0 }
0x1a0e   : > { %v6160_v53 = vmul.f32 %v6148_v58, %v13548_v4 }
0x1a49   : > { %v13497_v39 = vpop.f32.mrb[192].mxu0 }
0x1a4a   : > { %v13499_v25 = vpop.f32.mrb[193].mxu0  ;;  %v6251_v5 = vsel %vm353_vm0, %v13497_v39, 0.0 }
0x1a4b   : > { %v13501_v14 = vpop.f32.mrb[194].mxu0  ;;  %v6248_v22 = vsel %vm353_vm0, %v13499_v25, 0.0 }
0x1a4c   : > { %v13503_v37 = vpop.f32.mrb[195].mxu0  ;;  %v6253_v7 = vsel %vm353_vm0, %v13501_v14, 0.0 }
0x1a4d   : > { %v6249_v56 = vsel %vm353_vm0, %v13503_v37, 0.0 }
0x1a4e   : > { %v6250_v50 = vadd.f32 %v6249_v56, %v6248_v22  ;;  %v6154_v22 = vmul.f32 %v6138_v3, %v13548_v4  ;;  %v6162_v56 = vrot.slane %v6160_v53, 2 }
0x1a50   : > { %v6252_v20 = vadd.f32 %v6251_v5, %v6250_v50  ;;  %v6159_v50 = vadd.f32 %v6157_v27, %v6154_v22  ;;  %v6165_v5 = vmul.f32 %v6153_v31, %v13548_v4 }
0x1a51   : > { %v13513_v19 = vpop.f32.mrb[196].mxu0 }
0x1a52   : > { %v13515_v42 = vpop.f32.mrb[197].mxu0  ;;  %v6254_v6 = vadd.f32 %v6253_v7, %v6252_v20  ;;  %v6259_v10 = vsel %vm353_vm0, %v13513_v19, 0.0  ;;  %v6164_v20 = vadd.f32 %v6162_v56, %v6159_v50  ;;  %v6167_v7 = vrot.slane %v6165_v5, 3 }
0x1a53   : > { %v6255_v47 = vsel %vm353_vm0, %v13515_v42, 0.0  ;;  %v13519_v12 = vpop.f32.mrb[198].mxu0 }
0x1a54   : > { %v6256_v1 = vadd.f32 %v6255_v47, %v6254_v6  ;;  %v13521_v43 = vpop.f32.mrb[199].mxu0  ;;  %v6261_v28 = vsel %vm353_vm0, %v13519_v12, 0.0  ;;  %v6169_v6 = vadd.f32 %v6167_v7, %v6164_v20 }
0x1a55   : > { %v6257_v48 = vsel %vm353_vm0, %v13521_v43, 0.0 }
0x1a56   : > { %v6258_v18 = vadd.f32 %v6257_v48, %v6256_v1  ;;  %v8163_v47 = vmul.f32 -1.442695, %v6169_v6 }
0x1a58   : > { %v6260_v51 = vadd.f32 %v6259_v10, %v6258_v18  ;;  %10374 = vpow2.f32 %v8163_v47 }
0x1a59   : > { %v13529_v23 = vpop.f32.mrb[200].mxu0 }
0x1a5a   : > { %v13531_v41 = vpop.f32.mrb[201].mxu0  ;;  %v6262_v57 = vadd.f32 %v6261_v28, %v6260_v51  ;;  %v6267_v59 = vsel %vm353_vm0, %v13529_v23, 0.0 }
0x1a5b   : > { %v6263_v0 = vsel %vm353_vm0, %v13531_v41, 0.0  ;;  %v13535_v61 = vpop.f32.mrb[202].mxu0 }
0x1a5c   : > { %v6264_v9 = vadd.f32 %v6263_v0, %v6262_v57  ;;  %v13537_v32 = vpop.f32.mrb[203].mxu0  ;;  %v6269_v24 = vsel %vm353_vm0, %v13535_v61, 0.0 }
0x1a5d   : > { %v6265_v46 = vsel %vm353_vm0, %v13537_v32, 0.0 }
0x1a5e   : > { %v6266_v34 = vadd.f32 %v6265_v46, %v6264_v9 }
0x1a60   : > { %v6268_v52 = vadd.f32 %v6267_v59, %v6266_v34 }
0x1a62   : > { %v6270_v35 = vadd.f32 %v6269_v24, %v6268_v52  ;;  %v10375_v51 = vpop.eup %10374 }
0x1a63   : > { %v6173_v29 = vadd.f32 1.0, %v10375_v51 }
0x1a65   : > { %10376 = vrcp.f32 %v6173_v29 }
0x1a6f   : > { %v10377_v3 = vpop.eup %10376 }
0x1a85   : > { %v13554_v1 = vpop.f32.mrb[204].mxu0 }
0x1a86   : > { %v13556_v48 = vpop.f32.mrb[205].mxu0  ;;  %v6275_v46 = vsel %vm353_vm0, %v13554_v1, 0.0 }
0x1a87   : > { %v6271_v18 = vsel %vm353_vm0, %v13556_v48, 0.0  ;;  %v13560_v10 = vpop.f32.mrb[206].mxu0 }
0x1a88   : > { %v6272_v28 = vadd.f32 %v6271_v18, %v6270_v35  ;;  %v13562_v57 = vpop.f32.mrb[207].mxu0  ;;  %v6277_v59 = vsel %vm353_vm0, %v13560_v10, 0.0  ;;  %v13570_v35 = vshrl.u32 %v6176_v40, 7  ;;  %v15031_v18 = vld [vmem:[#allocation3_spill] sm:$0xff] }
0x1a89   : > { %v6273_v0 = vsel %vm353_vm0, %v13562_v57, 0.0  ;;  %v15039_v40 = vld [vmem:[#allocation7_spill] sm:$0xff] }
0x1a8a   : > { %v6274_v9 = vadd.f32 %v6273_v0, %v6272_v28  ;;  %v14744_v60 = vsub.s32 0, %v13570_v35 }
0x1a8c   : > { %v6276_v34 = vadd.f32 %v6275_v46, %v6274_v9  ;;  %v6179_v27 = vrot.slane %v10377_v3, %v14744_v60  ;;  %v15035_v9 = vld [vmem:[#allocation5_spill] sm:$0xff]  ;;  %v15036_v46 = vld [vmem:[#allocation6_spill] sm:$0xff] }
0x1a8e   : > { %v6278_v52 = vadd.f32 %v6277_v59, %v6276_v34  ;;  %v13579_v5 = vmul.f32 %v6179_v27, %v13325_v62  ;;  %v13582_v20 = vmul.f32 %v6179_v27, %v13329_v36  ;;  %v13585_v7 = vmul.f32 %v13323_v11, %v6179_v27  ;;  %v15032_v62 = vld [vmem:[#allocation4_spill] sm:$0xff] }
0x1a8f   : > { %v13588_v6 = vmul.f32 %v13327_v63, %v6179_v27  ;;  %v13601_v11 = vmul.f32 %v6179_v27, %v13341_v30  ;;  %v13604_v63 = vmul.f32 %v6179_v27, %v13347_v33  ;;  %v13619_v30 = vmul.f32 %v13339_v16, %v6179_v27  ;;  %v15041_v16 = vld [vmem:[#allocation9_spill] sm:$0xff] }
0x1a90   : > { %v6279_v24 = vrot.slane %v6278_v52, 4  ;;  %v13594_v51 = vadd.f32 %v13579_v5, %v15031_v18  ;;  %v13598_v36 = vadd.f32 %v13582_v20, %v15032_v62  ;;  %v13612_v29 = vadd.f32 %v13585_v7, %v15035_v9  ;;  %v15046_v18 = vld [vmem:[#allocation12_spill] sm:$0xff] }
0x1a91   : > { %15033 = vst [vmem:[#allocation76_spill] sm:$0xff] %v13601_v11  ;;  %15034 = vst [vmem:[#allocation74_spill] sm:$0xff] %v13604_v63  ;;  %v13616_v34 = vadd.f32 %v13588_v6, %v15036_v46  ;;  %v13622_v33 = vmul.f32 %v13345_v21, %v6179_v27  ;;  %v13638_v21 = vadd.f32 %v13619_v30, %v15041_v16  ;;  %v15055_v16 = vld [vmem:[#allocation15_spill] sm:$0xff] }
0x1a92   : > { %v6280_v15 = vadd.f32 %v6279_v24, %v6278_v52  ;;  %v6397_v28 = vsel %vm353_vm0, %v13594_v51, 0.0  ;;  %v6400_v0 = vsel %vm353_vm0, %v13598_v36, 0.0  ;;  %15037 = vst [vmem:[#allocation94_spill] sm:$0xff] %v13619_v30  ;;  %v6403_v59 = vsel %vm353_vm0, %v13612_v29, 0.0 }
0x1a93   : > { %15038 = vst [vmem:[#allocation64_spill] sm:$0xff] %v13622_v33  ;;  %v6406_v52 = vsel %vm353_vm0, %v13616_v34, 0.0  ;;  %v13630_v24 = vadd.f32 %v13601_v11, %v15039_v40 }
0x1a94   : > { %v6281_v2 = vrot.slane %v6280_v15, 2 }
0x1a95   : > { %v6409_v3 = vsel %vm353_vm0, %v13630_v24, 0.0 }
0x1a96   : > { %v6282_v58 = vadd.f32 %v6281_v2, %v6280_v15  ;;  %v15040_v15 = vld [vmem:[#allocation8_spill] sm:$0xff] }
0x1a97   : > { %v13634_v2 = vadd.f32 %v13604_v63, %v15040_v15 }
0x1a98   : > { %v6283_v44 = vrot.slane %v6282_v58, 1 }
0x1a9a   : > { %v6284_v53 = vadd.f32 %v6283_v44, %v6282_v58  ;;  %v15042_v58 = vld [vmem:[#allocation10_spill] sm:$0xff] }
0x1a9b   : > { %v13642_v44 = vadd.f32 %v13622_v33, %v15042_v58  ;;  %v15078_v33 = vld [vmem:[#allocation30_spill] sm:$0xff] }
0x1a9c   : > { %v6285_v31 = vmul.f32 0.0078125, %v6284_v53  ;;  %v6412_v53 = vsel %vm353_vm0, %v13634_v2, 0.0 }
0x1a9e   : > { %v6286_v22 = vmul.f32 %v6285_v31, %v13426_v26  ;;  %v13649_v31 = vmul.f32 %v6179_v27, %v13357_v49  ;;  %v13667_v49 = vmul.f32 %v13355_v55, %v6179_v27 }
0x1aa0   : > { %v6291_v56 = vsel %vm6139_vm6, %v6286_v22, 0.0  ;;  %v6287_v50 = vsel %vm6134_vm7, %v6286_v22, 0.0  ;;  %v6295_v26 = vsel %vm6144_vm9, %v6286_v22, 0.0  ;;  %v6299_v47 = vsel %vm6149_vm8, %v6286_v22, 0.0  ;;  %15043 = vst [vmem:[#allocation63_spill] sm:$0xff] %v13649_v31  ;;  %15047 = vst [vmem:[#allocation97_spill] sm:$0xff] %v13667_v49 }
0x1aa1   : > { %6292 = vadd.xlane.f32.xlu0 %v6291_v56  ;;  %6288 = vadd.xlane.f32.xlu1 %v6287_v50  ;;  %v13652_v22 = vmul.f32 %v6179_v27, %v13363_v8  ;;  %v6415_v56 = vsel %vm353_vm0, %v13638_v21, 0.0  ;;  %v6418_v50 = vsel %vm353_vm0, %v13642_v44, 0.0  ;;  %v13670_v8 = vmul.f32 %v13361_v38, %v6179_v27  ;;  %v15052_v38 = vld [vmem:[#allocation14_spill] sm:$0xff] }
0x1aa3   : > { %15044 = vst [vmem:[#allocation99_spill] sm:$0xff] %v13652_v22  ;;  %v13664_v62 = vadd.f32 %v13652_v22, %v15046_v18  ;;  %15048 = vst [vmem:[#allocation43_spill] sm:$0xff] %v13670_v8 }
0x1aa5   : > { %6296 = vadd.xlane.f32.xlu0 %v6295_v26  ;;  %6300 = vadd.xlane.f32.xlu1 %v6299_v47  ;;  %v15045_v26 = vld [vmem:[#allocation11_spill] sm:$0xff]  ;;  %v6424_v46 = vsel %vm353_vm0, %v13664_v62, 0.0 }
0x1aa6   : > { %v13660_v47 = vadd.f32 %v13649_v31, %v15045_v26 }
0x1aa8   : > { %v6421_v9 = vsel %vm353_vm0, %v13660_v47, 0.0 }
0x1aa9   : > { %6398 = vadd.xlane.f32.xlu0 %v6397_v28  ;;  %6401 = vadd.xlane.f32.xlu1 %v6400_v0  ;;  %v13673_v28 = vmul.f32 %v6179_v27, %v13375_v13  ;;  %v13676_v0 = vmul.f32 %v6179_v27, %v13383_v54  ;;  %v13691_v13 = vmul.f32 %v13371_v17, %v6179_v27 }
0x1aaa   : > { %v13694_v54 = vmul.f32 %v13381_v45, %v6179_v27  ;;  %v15057_v27 = vld [vmem:[#allocation17_spill] sm:$0xff] }
0x1aab   : > { %15049 = vst [vmem:[#allocation41_spill] sm:$0xff] %v13673_v28  ;;  %15050 = vst [vmem:[#allocation44_spill] sm:$0xff] %v13676_v0  ;;  %v13702_v58 = vadd.f32 %v13673_v28, %v15055_v16 }
0x1aac   : > { %15053 = vst [vmem:[#allocation40_spill] sm:$0xff] %v13691_v13  ;;  %15054 = vst [vmem:[#allocation103_spill] sm:$0xff] %v13694_v54 }
0x1aad   : > { %6404 = vadd.xlane.f32.xlu0 %v6403_v59  ;;  %6407 = vadd.xlane.f32.xlu1 %v6406_v52  ;;  %v15051_v59 = vld [vmem:[#allocation13_spill] sm:$0xff]  ;;  %v13688_v52 = vadd.f32 %v13670_v8, %v15052_v38  ;;  %v6433_v17 = vsel %vm353_vm0, %v13702_v58, 0.0 }
0x1aae   : > { %v13684_v55 = vadd.f32 %v13667_v49, %v15051_v59  ;;  %v15073_v49 = vld [vmem:[#allocation27_spill] sm:$0xff] }
0x1aaf   : > { %v6430_v15 = vsel %vm353_vm0, %v13688_v52, 0.0 }
0x1ab0   : > { %v6427_v40 = vsel %vm353_vm0, %v13684_v55, 0.0 }
0x1ab1   : > { %6410 = vadd.xlane.f32.xlu0 %v6409_v3  ;;  %6413 = vadd.xlane.f32.xlu1 %v6412_v53  ;;  %v15056_v3 = vld [vmem:[#allocation16_spill] sm:$0xff] }
0x1ab2   : > { %v13706_v53 = vadd.f32 %v13676_v0, %v15056_v3 }
0x1ab4   : > { %v6436_v45 = vsel %vm353_vm0, %v13706_v53, 0.0 }
0x1ab5   : > { %6416 = vadd.xlane.f32.xlu0 %v6415_v56  ;;  %6419 = vadd.xlane.f32.xlu1 %v6418_v50  ;;  %v13714_v56 = vadd.f32 %v13691_v13, %v15057_v27  ;;  %v15058_v50 = vld [vmem:[#allocation18_spill] sm:$0xff] }
0x1ab6   : > { %v13718_v26 = vadd.f32 %v13694_v54, %v15058_v50 }
0x1ab7   : > { %v6439_v18 = vsel %vm353_vm0, %v13714_v56, 0.0 }
0x1ab9   : > { %6422 = vadd.xlane.f32.xlu0 %v6421_v9  ;;  %6425 = vadd.xlane.f32.xlu1 %v6424_v46  ;;  %v6442_v9 = vsel %vm353_vm0, %v13718_v26, 0.0 }
0x1abd   : > { %6428 = vadd.xlane.f32.xlu0 %v6427_v40  ;;  %6431 = vadd.xlane.f32.xlu1 %v6430_v15 }
0x1ac1   : > { %6434 = vadd.xlane.f32.xlu0 %v6433_v17  ;;  %6437 = vadd.xlane.f32.xlu1 %v6436_v45 }
0x1ac5   : > { %6440 = vadd.xlane.f32.xlu0 %v6439_v18  ;;  %6443 = vadd.xlane.f32.xlu1 %v6442_v9 }
0x1b2e   : > { %v6293_v46 = vpop.xlane.xlu0 %6292  ;;  %v6289_v59 = vpop.xlane.xlu1 %6288 }
0x1b2f   : > { %v6294_v38 = vmax.f32 %v6293_v46, 0.0  ;;  %v6290_v15 = vmax.f32 %v6289_v59, 0.0 }
0x1b31   : > { %v6304_v40 = vmul.f32 %v6294_v38, %v13548_v4  ;;  %v6303_v45 = vmul.f32 %v6290_v15, %v13548_v4 }
0x1b32   : > { %v6297_v16 = vpop.xlane.xlu0 %6296  ;;  %v6301_v3 = vpop.xlane.xlu1 %6300 }
0x1b33   : > { %v6306_v27 = vrot.slane %v6304_v40, 1  ;;  %v6298_v50 = vmax.f32 %v6297_v16, 0.0  ;;  %v6302_v17 = vmax.f32 %v6301_v3, 0.0  ;;  %v15059_v40 = vsub.s32 0, %v13570_v35 }
0x1b35   : > { %v6309_v60 = vmul.f32 %v6298_v50, %v13548_v4  ;;  %v6314_v54 = vmul.f32 %v6302_v17, %v13548_v4  ;;  %v6308_v13 = vadd.f32 %v6306_v27, %v6303_v45  ;;  %v15063_v27 = vld [vmem:[#allocation21_spill] sm:$0xff] }
0x1b36   : > { %v6402_v17 = vpop.xlane.xlu1 %6401 }
0x1b37   : > { %v6311_v18 = vrot.slane %v6309_v60, 2  ;;  %v6316_v0 = vrot.slane %v6314_v54, 3 }
0x1b39   : > { %v6313_v9 = vadd.f32 %v6311_v18, %v6308_v13  ;;  %v15061_v13 = vld [vmem:[#allocation19_spill] sm:$0xff] }
0x1b3b   : > { %v6318_v28 = vadd.f32 %v6316_v0, %v6313_v9 }
0x1b3d   : > { %v8164_v46 = vmul.f32 -1.442695, %v6318_v28  ;;  %v15060_v28 = vld [vmem:[#allocation20_spill] sm:$0xff] }
0x1b3f   : > { %10378 = vpow2.f32 %v8164_v46  ;;  %v15066_v46 = vld [vmem:[#allocation24_spill] sm:$0xff] }
0x1b49   : > { %v10379_v38 = vpop.eup %10378 }
0x1b4a   : > { %v6322_v59 = vadd.f32 1.0, %v10379_v38 }
0x1b4c   : > { %10380 = vrcp.f32 %v6322_v59  ;;  %v15067_v59 = vld [vmem:[#allocation23_spill] sm:$0xff] }
0x1b56   : > { %v10381_v8 = vpop.eup %10380 }
0x1b57   : > { %v6328_v16 = vrot.slane %v10381_v8, %v15059_v40  ;;  %v15062_v8 = vld [vmem:[#allocation22_spill] sm:$0xff] }
0x1b59   : > { %v13731_v15 = vmul.f32 %v6328_v16, %v13503_v37  ;;  %v13734_v3 = vmul.f32 %v6328_v16, %v13499_v25  ;;  %v13737_v4 = vmul.f32 %v13501_v14, %v6328_v16  ;;  %v13740_v60 = vmul.f32 %v13497_v39, %v6328_v16 }
0x1b5a   : > { %v13751_v37 = vmul.f32 %v6328_v16, %v13521_v43  ;;  %v13754_v25 = vmul.f32 %v6328_v16, %v13515_v42  ;;  %v6399_v43 = vpop.xlane.xlu0 %6398  ;;  %v13769_v42 = vmul.f32 %v13519_v12, %v6328_v16  ;;  %v13772_v45 = vmul.f32 %v13513_v19, %v6328_v16  ;;  %v15068_v12 = vld [vmem:[#allocation26_spill] sm:$0xff] }
0x1b5b   : > { %v13744_v0 = vadd.f32 %v13731_v15, %v15060_v28  ;;  %v13748_v35 = vadd.f32 %v13734_v3, %v15061_v13  ;;  %v13762_v54 = vadd.f32 %v13737_v4, %v15062_v8  ;;  %v13766_v50 = vadd.f32 %v13740_v60, %v15063_v27  ;;  %v15069_v28 = vld [vmem:[#allocation25_spill] sm:$0xff] }
0x1b5c   : > { %15064 = vst [vmem:[#allocation101_spill] sm:$0xff] %v13769_v42  ;;  %15065 = vst [vmem:[#allocation58_spill] sm:$0xff] %v13772_v45  ;;  %v13780_v38 = vadd.f32 %v13751_v37, %v15066_v46  ;;  %v13784_v40 = vadd.f32 %v13754_v25, %v15067_v59  ;;  %v13788_v19 = vadd.f32 %v13769_v42, %v15068_v12  ;;  %v15072_v12 = vld [vmem:[#allocation28_spill] sm:$0xff] }
0x1b5d   : > { %v6448_v14 = vsel %vm353_vm0, %v13744_v0, 0.0  ;;  %v6445_v39 = vsel %vm353_vm0, %v13748_v35, 0.0  ;;  %v6454_v18 = vsel %vm353_vm0, %v13762_v54, 0.0  ;;  %v6451_v9 = vsel %vm353_vm0, %v13766_v50, 0.0 }
0x1b5e   : > { %6449 = vadd.xlane.f32.xlu1 %v6448_v14  ;;  %6446 = vadd.xlane.f32.xlu0 %v6445_v39  ;;  %v13792_v13 = vadd.f32 %v13772_v45, %v15069_v28  ;;  %v6460_v14 = vsel %vm353_vm0, %v13780_v38, 0.0  ;;  %v6457_v39 = vsel %vm353_vm0, %v13784_v40, 0.0  ;;  %v13799_v8 = vmul.f32 %v6328_v16, %v13537_v32 }
0x1b5f   : > { %v13802_v27 = vmul.f32 %v6328_v16, %v13531_v41  ;;  %v6466_v46 = vsel %vm353_vm0, %v13788_v19, 0.0  ;;  %v13817_v41 = vmul.f32 %v13535_v61, %v6328_v16  ;;  %v13823_v31 = vmul.f32 %v6328_v16, %v13562_v57 }
0x1b60   : > { %15070 = vst [vmem:[#allocation57_spill] sm:$0xff] %v13799_v8  ;;  %v6463_v59 = vsel %vm353_vm0, %v13792_v13, 0.0  ;;  %v13810_v28 = vadd.f32 %v13799_v8, %v15072_v12  ;;  %v13826_v12 = vmul.f32 %v6328_v16, %v13556_v48  ;;  %v6493_v57 = vmul.f32 0.03125, %v6399_v43 }
0x1b61   : > { %15071 = vst [vmem:[#allocation66_spill] sm:$0xff] %v13802_v27  ;;  %v13814_v32 = vadd.f32 %v13802_v27, %v15073_v49  ;;  %15074 = vst [vmem:[#allocation65_spill] sm:$0xff] %v13817_v41  ;;  %v6494_v8 = vmul.f32 0.03125, %v6402_v17  ;;  %v13841_v48 = vmul.f32 %v13560_v10, %v6328_v16  ;;  %v13844_v30 = vmul.f32 %v13554_v1, %v6328_v16 }
0x1b62   : > { %6455 = vadd.xlane.f32.xlu1 %v6454_v18  ;;  %6452 = vadd.xlane.f32.xlu0 %v6451_v9  ;;  %v6405_v18 = vpop.xlane.xlu0 %6404  ;;  %v6408_v9 = vpop.xlane.xlu1 %6407  ;;  %15076 = vst [vmem:[#allocation47_spill] sm:$0xff] %v13823_v31  ;;  %15077 = vst [vmem:[#allocation60_spill] sm:$0xff] %v13826_v12  ;;  %v6472_v49 = vsel %vm353_vm0, %v13810_v28, 0.0  ;;  %v13859_v1 = vsub.f32 %v13594_v51, %v6493_v57 }
0x1b63   : > { %v6469_v61 = vsel %vm353_vm0, %v13814_v32, 0.0  ;;  %15080 = vst [vmem:[#allocation59_spill] sm:$0xff] %v13841_v48  ;;  %15081 = vst [vmem:[#allocation68_spill] sm:$0xff] %v13844_v30 }
0x1b66   : > { %6461 = vadd.xlane.f32.xlu1 %v6460_v14  ;;  %6458 = vadd.xlane.f32.xlu0 %v6457_v39  ;;  %v13820_v14 = vmul.f32 %v13529_v23, %v6328_v16  ;;  %v6411_v39 = vpop.xlane.xlu0 %6410  ;;  %v6414_v22 = vpop.xlane.xlu1 %6413  ;;  %v13834_v23 = vadd.f32 %v13817_v41, %v15078_v33  ;;  %v15082_v41 = vld [vmem:[#allocation32_spill] sm:$0xff]  ;;  %v13862_v16 = vsub.f32 %v13598_v36, %v6494_v8 }
0x1b68   : > { %15075 = vst [vmem:[#allocation45_spill] sm:$0xff] %v13820_v14  ;;  %v6478_v27 = vsel %vm353_vm0, %v13834_v23, 0.0  ;;  %v6558_v57 = vmul.f32 %v13862_v16, %v13862_v16 }
0x1b6a   : > { %6467 = vadd.xlane.f32.xlu1 %v6466_v46  ;;  %6464 = vadd.xlane.f32.xlu0 %v6463_v59  ;;  %v15079_v46 = vld [vmem:[#allocation29_spill] sm:$0xff]  ;;  %v6417_v17 = vpop.xlane.xlu0 %6416  ;;  %v6420_v10 = vpop.xlane.xlu1 %6419 }
0x1b6b   : > { %v13838_v59 = vadd.f32 %v13820_v14, %v15079_v46  ;;  %v13852_v46 = vadd.f32 %v13823_v31, %v15082_v41  ;;  %v6496_v14 = vmul.f32 0.03125, %v6408_v9  ;;  %v6557_v9 = vmul.f32 %v13859_v1, %v13859_v1 }
0x1b6d   : > { %v6475_v33 = vsel %vm353_vm0, %v13838_v59, 0.0  ;;  %v6484_v41 = vsel %vm353_vm0, %v13852_v46, 0.0  ;;  %v13880_v36 = vsub.f32 %v13616_v34, %v6496_v14  ;;  %v6589_v34 = vsel %vm353_vm0, %v6557_v9, 0.0 }
0x1b6e   : > { %6473 = vadd.xlane.f32.xlu1 %v6472_v49  ;;  %6470 = vadd.xlane.f32.xlu0 %v6469_v61  ;;  %v15083_v49 = vld [vmem:[#allocation31_spill] sm:$0xff]  ;;  %v6495_v61 = vmul.f32 0.03125, %v6405_v18  ;;  %v6423_v8 = vpop.xlane.xlu0 %6422  ;;  %v6426_v18 = vpop.xlane.xlu1 %6425 }
0x1b6f   : > { %v13856_v43 = vadd.f32 %v13826_v12, %v15083_v49  ;;  %v15084_v49 = vld [vmem:[#allocation34_spill] sm:$0xff]  ;;  %v6501_v9 = vmul.f32 0.03125, %v6423_v8 }
0x1b70   : > { %v13870_v12 = vadd.f32 %v13841_v48, %v15084_v49  ;;  %v13877_v51 = vsub.f32 %v13612_v29, %v6495_v61  ;;  %v6497_v49 = vmul.f32 0.03125, %v6411_v39  ;;  %v6498_v48 = vmul.f32 0.03125, %v6414_v22 }
0x1b71   : > { %v6481_v31 = vsel %vm353_vm0, %v13856_v43, 0.0  ;;  %v6560_v61 = vmul.f32 %v13880_v36, %v13880_v36 }
0x1b72   : > { %6479 = vadd.xlane.f32.xlu1 %v6478_v27  ;;  %6476 = vadd.xlane.f32.xlu0 %v6475_v33  ;;  %v15085_v27 = vld [vmem:[#allocation33_spill] sm:$0xff]  ;;  %v6559_v14 = vmul.f32 %v13877_v51, %v13877_v51  ;;  %v13897_v22 = vsub.f32 %v13630_v24, %v6497_v49  ;;  %v13900_v39 = vsub.f32 %v13634_v2, %v6498_v48 }
0x1b73   : > { %v13874_v33 = vadd.f32 %v13844_v30, %v15085_v27  ;;  %v6499_v27 = vmul.f32 0.03125, %v6417_v17  ;;  %v6500_v30 = vmul.f32 0.03125, %v6420_v10  ;;  %v6598_v42 = vsel %vm353_vm0, %v6560_v61, 0.0 }
0x1b74   : > { %v6595_v63 = vsel %vm353_vm0, %v6559_v14, 0.0  ;;  %v6561_v2 = vmul.f32 %v13897_v22, %v13897_v22  ;;  %v6562_v48 = vmul.f32 %v13900_v39, %v13900_v39  ;;  %v13915_v17 = vsub.f32 %v13660_v47, %v6501_v9 }
0x1b75   : > { %v6487_v29 = vsel %vm353_vm0, %v13874_v33, 0.0  ;;  %v13905_v11 = vsub.f32 %v13638_v21, %v6499_v27  ;;  %v13908_v24 = vsub.f32 %v13642_v44, %v6500_v30 }
0x1b76   : > { %6485 = vadd.xlane.f32.xlu1 %v6484_v41  ;;  %6482 = vadd.xlane.f32.xlu0 %v6481_v31  ;;  %v6490_v41 = vsel %vm353_vm0, %v13870_v12, 0.0  ;;  %v6592_v31 = vsel %vm353_vm0, %v6558_v57, 0.0  ;;  %v6502_v57 = vmul.f32 0.03125, %v6426_v18  ;;  %v6601_v30 = vsel %vm353_vm0, %v6561_v2, 0.0 }
0x1b77   : > { %v6604_v44 = vsel %vm353_vm0, %v6562_v48, 0.0 }
0x1b78   : > { %v13918_v10 = vsub.f32 %v13664_v62, %v6502_v57 }
0x1b7a   : > { %6491 = vadd.xlane.f32.xlu1 %v6490_v41  ;;  %6488 = vadd.xlane.f32.xlu0 %v6487_v29  ;;  %v6429_v41 = vpop.xlane.xlu0 %6428  ;;  %v6432_v29 = vpop.xlane.xlu1 %6431 }
0x1b7b   : > { %v6503_v8 = vmul.f32 0.03125, %v6429_v41  ;;  %v6504_v21 = vmul.f32 0.03125, %v6432_v29 }
0x1b7d   : > { %v13927_v47 = vsub.f32 %v13684_v55, %v6503_v8  ;;  %v13930_v62 = vsub.f32 %v13688_v52, %v6504_v21 }
0x1b7e   : > { %6590 = vadd.xlane.f32.xlu0 %v6589_v34  ;;  %6593 = vadd.xlane.f32.xlu1 %v6592_v31  ;;  %v6435_v18 = vpop.xlane.xlu0 %6434  ;;  %v6438_v49 = vpop.xlane.xlu1 %6437  ;;  %v6563_v34 = vmul.f32 %v13905_v11, %v13905_v11  ;;  %v6566_v31 = vmul.f32 %v13918_v10, %v13918_v10 }
0x1b7f   : > { %v6505_v14 = vmul.f32 0.03125, %v6435_v18  ;;  %v6506_v61 = vmul.f32 0.03125, %v6438_v49  ;;  %v6567_v57 = vmul.f32 %v13927_v47, %v13927_v47  ;;  %v6568_v2 = vmul.f32 %v13930_v62, %v13930_v62 }
0x1b80   : > { %v6607_v27 = vsel %vm353_vm0, %v6563_v34, 0.0  ;;  %v6616_v52 = vsel %vm353_vm0, %v6566_v31, 0.0 }
0x1b81   : > { %v13945_v48 = vsub.f32 %v13702_v58, %v6505_v14  ;;  %v13948_v8 = vsub.f32 %v13706_v53, %v6506_v61  ;;  %v6619_v49 = vsel %vm353_vm0, %v6567_v57, 0.0 }
0x1b82   : > { %6596 = vadd.xlane.f32.xlu0 %v6595_v63  ;;  %6599 = vadd.xlane.f32.xlu1 %v6598_v42  ;;  %v6564_v63 = vmul.f32 %v13908_v24, %v13908_v24  ;;  %v6565_v42 = vmul.f32 %v13915_v17, %v13915_v17  ;;  %v6441_v29 = vpop.xlane.xlu0 %6440  ;;  %v6444_v9 = vpop.xlane.xlu1 %6443 }
0x1b83   : > { %v6507_v21 = vmul.f32 0.03125, %v6441_v29  ;;  %v6508_v18 = vmul.f32 0.03125, %v6444_v9  ;;  %v6569_v58 = vmul.f32 %v13945_v48, %v13945_v48  ;;  %v6570_v53 = vmul.f32 %v13948_v8, %v13948_v8 }
0x1b84   : > { %v6610_v41 = vsel %vm353_vm0, %v6564_v63, 0.0  ;;  %v6613_v55 = vsel %vm353_vm0, %v6565_v42, 0.0 }
0x1b85   : > { %v13956_v34 = vsub.f32 %v13718_v26, %v6508_v18  ;;  %v6625_v63 = vsel %vm353_vm0, %v6569_v58, 0.0  ;;  %v6628_v42 = vsel %vm353_vm0, %v6570_v53, 0.0 }
0x1b86   : > { %6602 = vadd.xlane.f32.xlu0 %v6601_v30  ;;  %6605 = vadd.xlane.f32.xlu1 %v6604_v44  ;;  %v6622_v30 = vsel %vm353_vm0, %v6568_v2, 0.0  ;;  %v13953_v44 = vsub.f32 %v13714_v56, %v6507_v21 }
0x1b87   : > { %v6572_v56 = vmul.f32 %v13956_v34, %v13956_v34 }
0x1b88   : > { %v6571_v31 = vmul.f32 %v13953_v44, %v13953_v44 }
0x1b89   : > { %v6634_v14 = vsel %vm353_vm0, %v6572_v56, 0.0 }
0x1b8a   : > { %6608 = vadd.xlane.f32.xlu0 %v6607_v27  ;;  %6611 = vadd.xlane.f32.xlu1 %v6610_v41  ;;  %v6631_v26 = vsel %vm353_vm0, %v6571_v31, 0.0 }
0x1b8e   : > { %6614 = vadd.xlane.f32.xlu0 %v6613_v55  ;;  %6617 = vadd.xlane.f32.xlu1 %v6616_v52 }
0x1b92   : > { %6620 = vadd.xlane.f32.xlu0 %v6619_v49  ;;  %6623 = vadd.xlane.f32.xlu1 %v6622_v30 }
0x1b96   : > { %6626 = vadd.xlane.f32.xlu0 %v6625_v63  ;;  %6629 = vadd.xlane.f32.xlu1 %v6628_v42 }
0x1b9a   : > { %6632 = vadd.xlane.f32.xlu0 %v6631_v26  ;;  %6635 = vadd.xlane.f32.xlu1 %v6634_v14 }
0x1beb   : > { %v6447_v61 = vpop.xlane.xlu0 %6446  ;;  %v6450_v27 = vpop.xlane.xlu1 %6449 }
0x1bec   : > { %v6509_v41 = vmul.f32 0.03125, %v6447_v61  ;;  %v6510_v29 = vmul.f32 0.03125, %v6450_v27 }
0x1bee   : > { %v13971_v9 = vsub.f32 %v13748_v35, %v6509_v41  ;;  %v13974_v55 = vsub.f32 %v13744_v0, %v6510_v29 }
0x1bef   : > { %v6453_v52 = vpop.xlane.xlu0 %6452  ;;  %v6456_v57 = vpop.xlane.xlu1 %6455 }
0x1bf0   : > { %v6511_v2 = vmul.f32 0.03125, %v6453_v52  ;;  %v6512_v21 = vmul.f32 0.03125, %v6456_v57  ;;  %v6573_v18 = vmul.f32 %v13971_v9, %v13971_v9  ;;  %v6574_v49 = vmul.f32 %v13974_v55, %v13974_v55 }
0x1bf2   : > { %v13981_v30 = vsub.f32 %v13766_v50, %v6511_v2  ;;  %v13984_v58 = vsub.f32 %v13762_v54, %v6512_v21  ;;  %v6637_v35 = vsel %vm353_vm0, %v6573_v18, 0.0  ;;  %v6640_v0 = vsel %vm353_vm0, %v6574_v49, 0.0 }
0x1bf3   : > { %6638 = vadd.xlane.f32.xlu0 %v6637_v35  ;;  %v6459_v53 = vpop.xlane.xlu0 %6458  ;;  %6641 = vadd.xlane.f32.xlu1 %v6640_v0  ;;  %v6462_v63 = vpop.xlane.xlu1 %6461 }
0x1bf4   : > { %v6513_v42 = vmul.f32 0.03125, %v6459_v53  ;;  %v6514_v31 = vmul.f32 0.03125, %v6462_v63  ;;  %v6575_v56 = vmul.f32 %v13981_v30, %v13981_v30  ;;  %v6576_v50 = vmul.f32 %v13984_v58, %v13984_v58 }
0x1bf6   : > { %v13993_v26 = vsub.f32 %v13784_v40, %v6513_v42  ;;  %v13996_v54 = vsub.f32 %v13780_v38, %v6514_v31  ;;  %v6643_v14 = vsel %vm353_vm0, %v6575_v56, 0.0  ;;  %v6646_v61 = vsel %vm353_vm0, %v6576_v50, 0.0 }
0x1bf7   : > { %6644 = vadd.xlane.f32.xlu0 %v6643_v14  ;;  %v6465_v27 = vpop.xlane.xlu0 %6464  ;;  %6647 = vadd.xlane.f32.xlu1 %v6646_v61  ;;  %v6468_v41 = vpop.xlane.xlu1 %6467 }
0x1bf8   : > { %v6515_v29 = vmul.f32 0.03125, %v6465_v27  ;;  %v6516_v52 = vmul.f32 0.03125, %v6468_v41  ;;  %v6577_v57 = vmul.f32 %v13993_v26, %v13993_v26  ;;  %v6578_v40 = vmul.f32 %v13996_v54, %v13996_v54 }
0x1bfa   : > { %v14005_v2 = vsub.f32 %v13792_v13, %v6515_v29  ;;  %v14008_v38 = vsub.f32 %v13788_v19, %v6516_v52  ;;  %v6649_v21 = vsel %vm353_vm0, %v6577_v57, 0.0  ;;  %v6652_v18 = vsel %vm353_vm0, %v6578_v40, 0.0 }
0x1bfb   : > { %6650 = vadd.xlane.f32.xlu0 %v6649_v21  ;;  %v6471_v49 = vpop.xlane.xlu0 %6470  ;;  %6653 = vadd.xlane.f32.xlu1 %v6652_v18  ;;  %v6474_v35 = vpop.xlane.xlu1 %6473 }
0x1bfc   : > { %v6517_v0 = vmul.f32 0.03125, %v6471_v49  ;;  %v6518_v53 = vmul.f32 0.03125, %v6474_v35  ;;  %v6579_v63 = vmul.f32 %v14005_v2, %v14005_v2  ;;  %v6580_v13 = vmul.f32 %v14008_v38, %v14008_v38 }
0x1bfe   : > { %v14017_v42 = vsub.f32 %v13814_v32, %v6517_v0  ;;  %v14020_v19 = vsub.f32 %v13810_v28, %v6518_v53  ;;  %v6655_v31 = vsel %vm353_vm0, %v6579_v63, 0.0  ;;  %v6658_v56 = vsel %vm353_vm0, %v6580_v13, 0.0 }
0x1bff   : > { %6656 = vadd.xlane.f32.xlu0 %v6655_v31  ;;  %v6477_v50 = vpop.xlane.xlu0 %6476  ;;  %6659 = vadd.xlane.f32.xlu1 %v6658_v56  ;;  %v6480_v14 = vpop.xlane.xlu1 %6479 }
0x1c00   : > { %v6519_v61 = vmul.f32 0.03125, %v6477_v50  ;;  %v6520_v27 = vmul.f32 0.03125, %v6480_v14  ;;  %v6581_v41 = vmul.f32 %v14017_v42, %v14017_v42  ;;  %v6582_v32 = vmul.f32 %v14020_v19, %v14020_v19 }
0x1c02   : > { %v14029_v29 = vsub.f32 %v13838_v59, %v6519_v61  ;;  %v14032_v28 = vsub.f32 %v13834_v23, %v6520_v27  ;;  %v6661_v52 = vsel %vm353_vm0, %v6581_v41, 0.0  ;;  %v6664_v57 = vsel %vm353_vm0, %v6582_v32, 0.0 }
0x1c03   : > { %6662 = vadd.xlane.f32.xlu0 %v6661_v52  ;;  %v6483_v40 = vpop.xlane.xlu0 %6482  ;;  %6665 = vadd.xlane.f32.xlu1 %v6664_v57  ;;  %v6486_v21 = vpop.xlane.xlu1 %6485 }
0x1c04   : > { %v6521_v18 = vmul.f32 0.03125, %v6483_v40  ;;  %v6522_v49 = vmul.f32 0.03125, %v6486_v21  ;;  %v6583_v35 = vmul.f32 %v14029_v29, %v14029_v29  ;;  %v6584_v59 = vmul.f32 %v14032_v28, %v14032_v28 }
0x1c06   : > { %v14041_v0 = vsub.f32 %v13856_v43, %v6521_v18  ;;  %v14044_v23 = vsub.f32 %v13852_v46, %v6522_v49  ;;  %v6667_v53 = vsel %vm353_vm0, %v6583_v35, 0.0  ;;  %v6670_v63 = vsel %vm353_vm0, %v6584_v59, 0.0 }
0x1c07   : > { %6668 = vadd.xlane.f32.xlu0 %v6667_v53  ;;  %v6489_v13 = vpop.xlane.xlu0 %6488  ;;  %6671 = vadd.xlane.f32.xlu1 %v6670_v63  ;;  %v6492_v31 = vpop.xlane.xlu1 %6491 }
0x1c08   : > { %v6523_v56 = vmul.f32 0.03125, %v6489_v13  ;;  %v6524_v50 = vmul.f32 0.03125, %v6492_v31  ;;  %v6585_v14 = vmul.f32 %v14041_v0, %v14041_v0  ;;  %v6586_v43 = vmul.f32 %v14044_v23, %v14044_v23 }
0x1c0a   : > { %v14053_v61 = vsub.f32 %v13874_v33, %v6523_v56  ;;  %v14056_v46 = vsub.f32 %v13870_v12, %v6524_v50  ;;  %v6673_v27 = vsel %vm353_vm0, %v6585_v14, 0.0  ;;  %v6676_v41 = vsel %vm353_vm0, %v6586_v43, 0.0 }
0x1c0b   : > { %6674 = vadd.xlane.f32.xlu0 %v6673_v27  ;;  %v6591_v32 = vpop.xlane.xlu0 %6590  ;;  %6677 = vadd.xlane.f32.xlu1 %v6676_v41  ;;  %v6594_v52 = vpop.xlane.xlu1 %6593 }
0x1c0c   : > { %v6685_v57 = vmul.f32 0.03125, %v6591_v32  ;;  %v6686_v40 = vmul.f32 0.03125, %v6594_v52  ;;  %v6587_v21 = vmul.f32 %v14053_v61, %v14053_v61  ;;  %v6588_v33 = vmul.f32 %v14056_v46, %v14056_v46 }
0x1c0e   : > { %v6717_v18 = vadd.f32 1e-05, %v6685_v57  ;;  %v6718_v49 = vadd.f32 1e-05, %v6686_v40  ;;  %v6679_v12 = vsel %vm353_vm0, %v6587_v21, 0.0  ;;  %v6682_v35 = vsel %vm353_vm0, %v6588_v33, 0.0 }
0x1c0f   : > { %6680 = vadd.xlane.f32.xlu0 %v6679_v12  ;;  %v6597_v59 = vpop.xlane.xlu0 %6596  ;;  %6683 = vadd.xlane.f32.xlu1 %v6682_v35  ;;  %v6600_v53 = vpop.xlane.xlu1 %6599 }
0x1c10   : > { %10382 = vrsqrt.f32 %v6717_v18  ;;  %v6687_v63 = vmul.f32 0.03125, %v6597_v59  ;;  %v6688_v13 = vmul.f32 0.03125, %v6600_v53 }
0x1c11   : > { %10384 = vrsqrt.f32 %v6718_v49  ;;  %v14069_v49 = vld [vmem:[%s14643_s1 + $0x2] ss:$0 sm:$0xff] }
0x1c12   : > { %v6719_v31 = vadd.f32 1e-05, %v6687_v63  ;;  %v6720_v56 = vadd.f32 1e-05, %v6688_v13 }
0x1c13   : > { %v6603_v50 = vpop.xlane.xlu0 %6602  ;;  %v6606_v14 = vpop.xlane.xlu1 %6605 }
0x1c14   : > { %10386 = vrsqrt.f32 %v6719_v31  ;;  %v6689_v43 = vmul.f32 0.03125, %v6603_v50  ;;  %v6690_v27 = vmul.f32 0.03125, %v6606_v14 }
0x1c15   : > { %10388 = vrsqrt.f32 %v6720_v56  ;;  %v14075_v56 = vld [vmem:[%s14643_s1 + $0x3] ss:$0 sm:$0xff] }
0x1c16   : > { %v6721_v41 = vadd.f32 1e-05, %v6689_v43  ;;  %v6722_v32 = vadd.f32 1e-05, %v6690_v27 }
0x1c17   : > { %v6609_v52 = vpop.xlane.xlu0 %6608  ;;  %v6612_v57 = vpop.xlane.xlu1 %6611 }
0x1c18   : > { %10390 = vrsqrt.f32 %v6721_v41  ;;  %v6691_v40 = vmul.f32 0.03125, %v6609_v52  ;;  %v6692_v21 = vmul.f32 0.03125, %v6612_v57 }
0x1c19   : > { %10392 = vrsqrt.f32 %v6722_v32 }
0x1c1a   : > { %v10383_v33 = vpop.eup %10382  ;;  %v6723_v18 = vadd.f32 1e-05, %v6691_v40  ;;  %v6724_v12 = vadd.f32 1e-05, %v6692_v21 }
0x1c1b   : > { %v10385_v35 = vpop.eup %10384  ;;  %v6615_v59 = vpop.xlane.xlu0 %6614  ;;  %v6781_v63 = vmul.f32 %v10383_v33, %v13859_v1 }
0x1c1c   : > { %v6618_v53 = vpop.xlane.xlu1 %6617  ;;  %10394 = vrsqrt.f32 %v6723_v18  ;;  %v6693_v13 = vmul.f32 0.03125, %v6615_v59  ;;  %v6782_v50 = vmul.f32 %v10385_v35, %v13862_v16 }
0x1c1d   : > { %v6694_v31 = vmul.f32 0.03125, %v6618_v53  ;;  %10396 = vrsqrt.f32 %v6724_v12  ;;  %v6817_v14 = vmul.f32 %v14069_v49, %v6781_v63 }
0x1c1e   : > { %v10387_v43 = vpop.eup %10386  ;;  %v6725_v27 = vadd.f32 1e-05, %v6693_v13  ;;  %v6818_v32 = vmul.f32 %v14069_v49, %v6782_v50 }
0x1c1f   : > { %v6726_v41 = vadd.f32 1e-05, %v6694_v31  ;;  %v10389_v52 = vpop.eup %10388  ;;  %v6621_v1 = vpop.xlane.xlu0 %6620  ;;  %v6853_v40 = vadd.f32 %v14075_v56, %v6817_v14  ;;  %v6783_v21 = vmul.f32 %v10387_v43, %v13877_v51 }
0x1c20   : > { %v6624_v57 = vpop.xlane.xlu1 %6623  ;;  %10398 = vrsqrt.f32 %v6725_v27  ;;  %v6695_v33 = vmul.f32 0.03125, %v6621_v1  ;;  %v6854_v16 = vadd.f32 %v14075_v56, %v6818_v32  ;;  %v6784_v12 = vmul.f32 %v10389_v52, %v13880_v36 }
0x1c21   : > { %v6696_v18 = vmul.f32 0.03125, %v6624_v57  ;;  %10400 = vrsqrt.f32 %v6726_v41  ;;  %v6819_v35 = vmul.f32 %v14069_v49, %v6783_v21 }
0x1c22   : > { %v10391_v59 = vpop.eup %10390  ;;  %v6727_v53 = vadd.f32 1e-05, %v6695_v33  ;;  %v6885_v13 = vpack.c.bf16 %v6854_v16, %v6853_v40  ;;  %v6820_v14 = vmul.f32 %v14069_v49, %v6784_v12 }
0x1c23   : > { %v6728_v63 = vadd.f32 1e-05, %v6696_v18  ;;  %v10393_v31 = vpop.eup %10392  ;;  %v6627_v50 = vpop.xlane.xlu0 %6626  ;;  %v6855_v51 = vadd.f32 %v14075_v56, %v6819_v35  ;;  %v6785_v43 = vmul.f32 %v10391_v59, %v13897_v22 }
0x1c24   : > { %v6630_v45 = vpop.xlane.xlu1 %6629  ;;  %10402 = vrsqrt.f32 %v6727_v53  ;;  %v6697_v27 = vmul.f32 0.03125, %v6627_v50  ;;  %9247 = vmatprep.subr.bf16.mxu1 %v6885_v13  ;;  %v6786_v36 = vmul.f32 %v10393_v31, %v13900_v39  ;;  %v6856_v32 = vadd.f32 %v14075_v56, %v6820_v14 }
0x1c25   : > { %v6698_v41 = vmul.f32 0.03125, %v6630_v45  ;;  %10404 = vrsqrt.f32 %v6728_v63  ;;  %9248 = vmatpush3.bf16.msra.mxu1 %v6885_v13  ;;  %v6821_v52 = vmul.f32 %v14069_v49, %v6785_v43 }
0x1c26   : > { %v10395_v1 = vpop.eup %10394  ;;  %v6729_v57 = vadd.f32 1e-05, %v6697_v27  ;;  %v6822_v21 = vmul.f32 %v14069_v49, %v6786_v36  ;;  %v6886_v22 = vpack.c.bf16 %v6856_v32, %v6855_v51 }
0x1c27   : > { %v6730_v40 = vadd.f32 1e-05, %v6698_v41  ;;  %v10397_v33 = vpop.eup %10396  ;;  %v6633_v18 = vpop.xlane.xlu0 %6632  ;;  %v6857_v12 = vadd.f32 %v14075_v56, %v6821_v52  ;;  %v6787_v45 = vmul.f32 %v10395_v1, %v13905_v11 }
0x1c28   : > { %v6636_v16 = vpop.xlane.xlu1 %6635  ;;  %10406 = vrsqrt.f32 %v6729_v57  ;;  %v6699_v39 = vmul.f32 0.03125, %v6633_v18  ;;  %v6858_v59 = vadd.f32 %v14075_v56, %v6822_v21  ;;  %9249 = vmatprep.subr.bf16.mxu1 %v6886_v22  ;;  %v6788_v53 = vmul.f32 %v10397_v33, %v13908_v24 }
0x1c29   : > { %v6700_v35 = vmul.f32 0.03125, %v6636_v16  ;;  %10408 = vrsqrt.f32 %v6730_v40  ;;  %v6823_v63 = vmul.f32 %v14069_v49, %v6787_v45  ;;  %9250 = vmatpush3.bf16.msra.mxu1 %v6886_v22 }
0x1c2a   : > { %v10399_v13 = vpop.eup %10398  ;;  %v6731_v31 = vadd.f32 1e-05, %v6699_v39  ;;  %v6887_v14 = vpack.c.bf16 %v6858_v59, %v6857_v12  ;;  %v6824_v43 = vmul.f32 %v14069_v49, %v6788_v53 }
0x1c2b   : > { %v6732_v50 = vadd.f32 1e-05, %v6700_v35  ;;  %v10401_v51 = vpop.eup %10400  ;;  %v6859_v11 = vadd.f32 %v14075_v56, %v6823_v63  ;;  %v6789_v27 = vmul.f32 %v10399_v13, %v13915_v17 }
0x1c2c   : > { %10410 = vrsqrt.f32 %v6731_v31  ;;  %9251 = vmatprep.subr.bf16.mxu1 %v6887_v14  ;;  %v6790_v41 = vmul.f32 %v10401_v51, %v13918_v10  ;;  %v6860_v24 = vadd.f32 %v14075_v56, %v6824_v43 }
0x1c2d   : > { %10412 = vrsqrt.f32 %v6732_v50  ;;  %v6825_v36 = vmul.f32 %v14069_v49, %v6789_v27  ;;  %9252 = vmatpush3.bf16.msra.mxu1 %v6887_v14 }
0x1c2e   : > { %v10403_v32 = vpop.eup %10402  ;;  %v6826_v52 = vmul.f32 %v14069_v49, %v6790_v41  ;;  %v6888_v57 = vpack.c.bf16 %v6860_v24, %v6859_v11  ;;  %v14139_v24 = vld [vmem:[%s14646_s4 + $0x18] sm:$0xff]  }
0x1c2f   : > { %v10405_v1 = vpop.eup %10404  ;;  %v6861_v40 = vadd.f32 %v14075_v56, %v6825_v36  ;;  %v6791_v21 = vmul.f32 %v10403_v32, %v13927_v47  ;;  %v14145_v36 = vld [vmem:[%s14646_s4 + $0x20] sm:$0xff]  }
0x1c30   : > { %v6862_v17 = vadd.f32 %v14075_v56, %v6826_v52  ;;  %v6792_v33 = vmul.f32 %v10405_v1, %v13930_v62  ;;  %9253 = vmatprep.subr.bf16.mxu1 %v6888_v57  ;;  %v9788_v32 = vld [vmem:[%s14644_s2 + $0x4] ss:$8 sps:$4 sm:$0xff]   ;;  %v14160_v1 = vld [vmem:[%s14646_s4 + $0x30] sm:$0xff]  }
0x1c31   : > { %v6827_v10 = vmul.f32 %v14069_v49, %v6791_v21  ;;  %9254 = vmatpush3.bf16.msra.mxu1 %v6888_v57  ;;  %9311 = vmatprep.subr.bf16.mxu0 %v9788_v32  ;;  %v14154_v52 = vld [vmem:[%s14646_s4 + $0x28] sm:$0xff]   ;;  %v14166_v57 = vld [vmem:[%s14646_s4 + $0x38] sm:$0xff]  }
0x1c32   : > { %v10407_v18 = vpop.eup %10406  ;;  %v6889_v22 = vpack.c.bf16 %v6862_v17, %v6861_v40  ;;  %v6828_v16 = vmul.f32 %v14069_v49, %v6792_v33  ;;  %9312 = vmatpush3.bf16.msra.mxu0 %v9788_v32  ;;  %v10522_v40 = vld [vmem:[%s14646_s4] sm:$0xff]  }
0x1c33   : > { %v10409_v12 = vpop.eup %10408  ;;  %v6863_v45 = vadd.f32 %v14075_v56, %v6827_v10  ;;  %v6793_v39 = vmul.f32 %v10407_v18, %v13945_v48 }
0x1c34   : > { %9255 = vmatprep.subr.bf16.mxu1 %v6889_v22  ;;  %v6864_v47 = vadd.f32 %v14075_v56, %v6828_v16  ;;  %v6794_v35 = vmul.f32 %v10409_v12, %v13948_v8 }
0x1c35   : > { %v6829_v62 = vmul.f32 %v14069_v49, %v6793_v39  ;;  %9256 = vmatpush3.bf16.msra.mxu1 %v6889_v22 }
0x1c36   : > { %v10411_v59 = vpop.eup %10410  ;;  %v6890_v53 = vpack.c.bf16 %v6864_v47, %v6863_v45  ;;  %v6830_v63 = vmul.f32 %v14069_v49, %v6794_v35 }
0x1c37   : > { %v10413_v13 = vpop.eup %10412  ;;  %v6865_v31 = vadd.f32 %v14075_v56, %v6829_v62  ;;  %v6795_v50 = vmul.f32 %v10411_v59, %v13953_v44  ;;  %v14127_v44 = vld [vmem:[%s14646_s4 + $0x8] sm:$0xff]  }
0x1c38   : > { %9257 = vmatprep.subr.bf16.mxu1 %v6890_v53  ;;  %v6866_v48 = vadd.f32 %v14075_v56, %v6830_v63  ;;  %v6796_v14 = vmul.f32 %v10413_v13, %v13956_v34  ;;  %v14133_v34 = vld [vmem:[%s14646_s4 + $0x10] sm:$0xff]  }
0x1c39   : > { %v6831_v51 = vmul.f32 %v14069_v49, %v6795_v50  ;;  %9258 = vmatpush3.bf16.msra.mxu1 %v6890_v53 }
0x1c3a   : > { %v6891_v8 = vpack.c.bf16 %v6866_v48, %v6865_v31  ;;  %v6832_v43 = vmul.f32 %v14069_v49, %v6796_v14 }
0x1c3b   : > { %v6867_v11 = vadd.f32 %v14075_v56, %v6831_v51 }
0x1c3c   : > { %9259 = vmatprep.subr.bf16.mxu1 %v6891_v8  ;;  %v6868_v27 = vadd.f32 %v14075_v56, %v6832_v43 }
0x1c3d   : > { %9260 = vmatpush3.bf16.msra.mxu1 %v6891_v8 }
0x1c3e   : > { %v6892_v41 = vpack.c.bf16 %v6868_v27, %v6867_v11 }
0x1c40   : > { %9261 = vmatprep.subr.bf16.mxu1 %v6892_v41 }
0x1c41   : > { %9262 = vmatpush3.bf16.msra.mxu1 %v6892_v41 }
0x1c44   : > { %9264 = vmatmul.mubr.bf16.vlgmr.msra.gmra.mrb[144].mxu1 %v14127_v44 }
0x1c45   : > { %9267 = vmatprep.mubr.bf16.mxu1 %v14133_v34 }
0x1c4c   : > { %9268 = vmatmul.mubr.bf16.gmra.mrb[148].mxu1 %v14139_v24 }
0x1c4d   : > { %9271 = vmatprep.mubr.bf16.mxu1 %v14145_v36 }
0x1c54   : > { %9272 = vmatmul.mubr.bf16.gmra.mrb[152].mxu1 %v14154_v52 }
0x1c55   : > { %9275 = vmatprep.mubr.bf16.mxu1 %v14160_v1 }
0x1c5c   : > { %9276 = vmatmul.mubr.bf16.gmra.mrb[156].mxu1 %v14166_v57 }
0x1c5d   : > { %9295 = vmatprep.mubr.bf16.mxu1 %v10522_v40 }
0x1c80   : > { %v6639_v21 = vpop.xlane.xlu0 %6638  ;;  %v6642_v17 = vpop.xlane.xlu1 %6641 }
0x1c81   : > { %v6701_v33 = vmul.f32 0.03125, %v6639_v21  ;;  %v6702_v10 = vmul.f32 0.03125, %v6642_v17 }
0x1c83   : > { %v6733_v18 = vadd.f32 1e-05, %v6701_v33  ;;  %v6734_v22 = vadd.f32 1e-05, %v6702_v10 }
0x1c84   : > { %v6645_v16 = vpop.xlane.xlu0 %6644  ;;  %v6648_v12 = vpop.xlane.xlu1 %6647 }
0x1c85   : > { %10414 = vrsqrt.f32 %v6733_v18  ;;  %v6703_v45 = vmul.f32 0.03125, %v6645_v16  ;;  %v6704_v39 = vmul.f32 0.03125, %v6648_v12 }
0x1c86   : > { %10416 = vrsqrt.f32 %v6734_v22 }
0x1c87   : > { %v6735_v47 = vadd.f32 1e-05, %v6703_v45  ;;  %v6736_v35 = vadd.f32 1e-05, %v6704_v39 }
0x1c88   : > { %v6651_v62 = vpop.xlane.xlu0 %6650  ;;  %v6654_v59 = vpop.xlane.xlu1 %6653 }
0x1c89   : > { %10418 = vrsqrt.f32 %v6735_v47  ;;  %v6705_v53 = vmul.f32 0.03125, %v6651_v62  ;;  %v6706_v63 = vmul.f32 0.03125, %v6654_v59 }
0x1c8a   : > { %10420 = vrsqrt.f32 %v6736_v35 }
0x1c8b   : > { %v6737_v13 = vadd.f32 1e-05, %v6705_v53  ;;  %v6738_v31 = vadd.f32 1e-05, %v6706_v63 }
0x1c8c   : > { %v6657_v50 = vpop.xlane.xlu0 %6656  ;;  %v6660_v48 = vpop.xlane.xlu1 %6659 }
0x1c8d   : > { %10422 = vrsqrt.f32 %v6737_v13  ;;  %v6707_v14 = vmul.f32 0.03125, %v6657_v50  ;;  %v6708_v51 = vmul.f32 0.03125, %v6660_v48 }
0x1c8e   : > { %10424 = vrsqrt.f32 %v6738_v31 }
0x1c8f   : > { %v10415_v8 = vpop.eup %10414  ;;  %v6739_v43 = vadd.f32 1e-05, %v6707_v14  ;;  %v6740_v11 = vadd.f32 1e-05, %v6708_v51 }
0x1c90   : > { %v10417_v27 = vpop.eup %10416  ;;  %v6663_v41 = vpop.xlane.xlu0 %6662  ;;  %v6797_v40 = vmul.f32 %v10415_v8, %v13971_v9 }
0x1c91   : > { %v6666_v32 = vpop.xlane.xlu1 %6665  ;;  %10426 = vrsqrt.f32 %v6739_v43  ;;  %v6709_v21 = vmul.f32 0.03125, %v6663_v41  ;;  %v6798_v33 = vmul.f32 %v10417_v27, %v13974_v55 }
0x1c92   : > { %v6710_v17 = vmul.f32 0.03125, %v6666_v32  ;;  %10428 = vrsqrt.f32 %v6740_v11  ;;  %v6833_v10 = vmul.f32 %v14069_v49, %v6797_v40 }
0x1c93   : > { %v10419_v18 = vpop.eup %10418  ;;  %v6741_v22 = vadd.f32 1e-05, %v6709_v21  ;;  %v6834_v12 = vmul.f32 %v14069_v49, %v6798_v33 }
0x1c94   : > { %v6742_v16 = vadd.f32 1e-05, %v6710_v17  ;;  %v10421_v45 = vpop.eup %10420  ;;  %v6669_v39 = vpop.xlane.xlu0 %6668  ;;  %v6869_v35 = vadd.f32 %v14075_v56, %v6833_v10  ;;  %v6799_v9 = vmul.f32 %v10419_v18, %v13981_v30 }
0x1c95   : > { %v6672_v47 = vpop.xlane.xlu1 %6671  ;;  %10430 = vrsqrt.f32 %v6741_v22  ;;  %v6711_v62 = vmul.f32 0.03125, %v6669_v39  ;;  %v6870_v55 = vadd.f32 %v14075_v56, %v6834_v12  ;;  %v6800_v53 = vmul.f32 %v10421_v45, %v13984_v58 }
0x1c96   : > { %v6712_v59 = vmul.f32 0.03125, %v6672_v47  ;;  %10432 = vrsqrt.f32 %v6742_v16  ;;  %v6835_v63 = vmul.f32 %v14069_v49, %v6799_v9 }
0x1c97   : > { %v10423_v13 = vpop.eup %10422  ;;  %v6743_v31 = vadd.f32 1e-05, %v6711_v62  ;;  %v6893_v48 = vpack.c.bf16 %v6870_v55, %v6869_v35  ;;  %v6836_v43 = vmul.f32 %v14069_v49, %v6800_v53 }
0x1c98   : > { %v6744_v50 = vadd.f32 1e-05, %v6712_v59  ;;  %v10425_v14 = vpop.eup %10424  ;;  %v6675_v51 = vpop.xlane.xlu0 %6674  ;;  %v6871_v30 = vadd.f32 %v14075_v56, %v6835_v63  ;;  %v6801_v11 = vmul.f32 %v10423_v13, %v13993_v26 }
0x1c99   : > { %v6678_v8 = vpop.xlane.xlu1 %6677  ;;  %10434 = vrsqrt.f32 %v6743_v31  ;;  %v6713_v27 = vmul.f32 0.03125, %v6675_v51  ;;  %9279 = vmatprep.subr.bf16.mxu1 %v6893_v48  ;;  %v6802_v58 = vmul.f32 %v10425_v14, %v13996_v54  ;;  %v6872_v32 = vadd.f32 %v14075_v56, %v6836_v43  ;;  %v9789_v54 = vld [vmem:[%s14644_s2 + $0x14] ss:$8 sps:$4 sm:$0xff]  }
0x1c9a   : > { %v6714_v41 = vmul.f32 0.03125, %v6678_v8  ;;  %10436 = vrsqrt.f32 %v6744_v50  ;;  %9280 = vmatpush3.bf16.msra.mxu1 %v6893_v48  ;;  %v6837_v40 = vmul.f32 %v14069_v49, %v6801_v11  ;;  %9313 = vmatprep.subr.bf16.mxu0 %v9789_v54 }
0x1c9b   : > { %v10427_v21 = vpop.eup %10426  ;;  %v6745_v17 = vadd.f32 1e-05, %v6713_v27  ;;  %v6838_v10 = vmul.f32 %v14069_v49, %v6802_v58  ;;  %v6894_v26 = vpack.c.bf16 %v6872_v32, %v6871_v30  ;;  %9314 = vmatpush3.bf16.msra.mxu0 %v9789_v54 }
0x1c9c   : > { %v6746_v33 = vadd.f32 1e-05, %v6714_v41  ;;  %v10429_v18 = vpop.eup %10428  ;;  %v6681_v22 = vpop.xlane.xlu0 %6680  ;;  %v6873_v12 = vadd.f32 %v14075_v56, %v6837_v40  ;;  %v6803_v45 = vmul.f32 %v10427_v21, %v14005_v2 }
0x1c9d   : > { %v6684_v16 = vpop.xlane.xlu1 %6683  ;;  %10438 = vrsqrt.f32 %v6745_v17  ;;  %v6715_v39 = vmul.f32 0.03125, %v6681_v22  ;;  %v6874_v35 = vadd.f32 %v14075_v56, %v6838_v10  ;;  %9281 = vmatprep.subr.bf16.mxu1 %v6894_v26  ;;  %v6804_v9 = vmul.f32 %v10429_v18, %v14008_v38 }
0x1c9e   : > { %v6716_v47 = vmul.f32 0.03125, %v6684_v16  ;;  %10440 = vrsqrt.f32 %v6746_v33  ;;  %v6839_v62 = vmul.f32 %v14069_v49, %v6803_v45  ;;  %9282 = vmatpush3.bf16.msra.mxu1 %v6894_v26 }
0x1c9f   : > { %v10431_v59 = vpop.eup %10430  ;;  %v6747_v55 = vadd.f32 1e-05, %v6715_v39  ;;  %v6895_v2 = vpack.c.bf16 %v6874_v35, %v6873_v12  ;;  %v6840_v13 = vmul.f32 %v14069_v49, %v6804_v9 }
0x1ca0   : > { %v6748_v53 = vadd.f32 1e-05, %v6716_v47  ;;  %v10433_v63 = vpop.eup %10432  ;;  %v6875_v31 = vadd.f32 %v14075_v56, %v6839_v62  ;;  %v6805_v50 = vmul.f32 %v10431_v59, %v14017_v42 }
0x1ca1   : > { %10442 = vrsqrt.f32 %v6747_v55  ;;  %9283 = vmatprep.subr.bf16.mxu1 %v6895_v2  ;;  %v6806_v38 = vmul.f32 %v10433_v63, %v14020_v19  ;;  %v6876_v48 = vadd.f32 %v14075_v56, %v6840_v13 }
0x1ca2   : > { %10444 = vrsqrt.f32 %v6748_v53  ;;  %v6841_v14 = vmul.f32 %v14069_v49, %v6805_v50  ;;  %9284 = vmatpush3.bf16.msra.mxu1 %v6895_v2 }
0x1ca3   : > { %v10435_v51 = vpop.eup %10434  ;;  %v6842_v8 = vmul.f32 %v14069_v49, %v6806_v38  ;;  %v6896_v30 = vpack.c.bf16 %v6876_v48, %v6875_v31 }
0x1ca4   : > { %v10437_v43 = vpop.eup %10436  ;;  %v6877_v11 = vadd.f32 %v14075_v56, %v6841_v14  ;;  %v6807_v27 = vmul.f32 %v10435_v51, %v14029_v29 }
0x1ca5   : > { %v6878_v42 = vadd.f32 %v14075_v56, %v6842_v8  ;;  %v6808_v41 = vmul.f32 %v10437_v43, %v14032_v28  ;;  %9285 = vmatprep.subr.bf16.mxu1 %v6896_v30  ;;  %v9790_v43 = vld [vmem:[%s14645_s3] sm:$0xff]  }
0x1ca6   : > { %v6843_v19 = vmul.f32 %v14069_v49, %v6807_v27  ;;  %9286 = vmatpush3.bf16.msra.mxu1 %v6896_v30  ;;  %v9791_v30 = vld [vmem:[%s14645_s3 + $0x8] sm:$0xff]   ;;  %v9793_v27 = vld [vmem:[%s14645_s3 + $0x18] sm:$0xff]  }
0x1ca7   : > { %v10439_v58 = vpop.eup %10438  ;;  %v6897_v32 = vpack.c.bf16 %v6878_v42, %v6877_v11  ;;  %v6844_v40 = vmul.f32 %v14069_v49, %v6808_v41  ;;  %v9792_v11 = vld [vmem:[%s14645_s3 + $0x10] sm:$0xff]   ;;  %v9794_v42 = vld [vmem:[%s14645_s3 + $0x20] sm:$0xff]  }
0x1ca8   : > { %v10441_v21 = vpop.eup %10440  ;;  %v6879_v17 = vadd.f32 %v14075_v56, %v6843_v19  ;;  %v6809_v33 = vmul.f32 %v10439_v58, %v14041_v0 }
0x1ca9   : > { %9287 = vmatprep.subr.bf16.mxu1 %v6897_v32  ;;  %v6880_v29 = vadd.f32 %v14075_v56, %v6844_v40  ;;  %v6810_v10 = vmul.f32 %v10441_v21, %v14044_v23  ;;  %v9795_v21 = vld [vmem:[%s14645_s3 + $0x28] sm:$0xff]  }
0x1caa   : > { %v6845_v28 = vmul.f32 %v14069_v49, %v6809_v33  ;;  %9288 = vmatpush3.bf16.msra.mxu1 %v6897_v32  ;;  %v9796_v33 = vld [vmem:[%s14645_s3 + $0x30] sm:$0xff]  }
0x1cab   : > { %v10443_v18 = vpop.eup %10442  ;;  %v6898_v22 = vpack.c.bf16 %v6880_v29, %v6879_v17  ;;  %v6846_v26 = vmul.f32 %v14069_v49, %v6810_v10 }
0x1cac   : > { %v10445_v16 = vpop.eup %10444  ;;  %v6881_v12 = vadd.f32 %v14075_v56, %v6845_v28  ;;  %v6811_v45 = vmul.f32 %v10443_v18, %v14053_v61 }
0x1cad   : > { %9289 = vmatprep.subr.bf16.mxu1 %v6898_v22  ;;  %v6882_v0 = vadd.f32 %v14075_v56, %v6846_v26  ;;  %v6812_v54 = vmul.f32 %v10445_v16, %v14056_v46  ;;  %v9797_v26 = vld [vmem:[%s14645_s3 + $0x38] sm:$0xff]  }
0x1cae   : > { %v6847_v39 = vmul.f32 %v14069_v49, %v6811_v45  ;;  %9290 = vmatpush3.bf16.msra.mxu1 %v6898_v22 }
0x1caf   : > { %v6899_v23 = vpack.c.bf16 %v6882_v0, %v6881_v12  ;;  %v6848_v47 = vmul.f32 %v14069_v49, %v6812_v54 }
0x1cb0   : > { %v6883_v35 = vadd.f32 %v14075_v56, %v6847_v39 }
0x1cb1   : > { %9291 = vmatprep.subr.bf16.mxu1 %v6899_v23  ;;  %v6884_v9 = vadd.f32 %v14075_v56, %v6848_v47 }
0x1cb2   : > { %9292 = vmatpush3.bf16.msra.mxu1 %v6899_v23 }
0x1cb3   : > { %v6900_v62 = vpack.c.bf16 %v6884_v9, %v6883_v35 }
0x1cb5   : > { %9293 = vmatprep.subr.bf16.mxu1 %v6900_v62 }
0x1cb6   : > { %9294 = vmatpush3.bf16.msra.mxu1 %v6900_v62 }
0x1cb7   : > { %9347 = vmatprep.subr.bf16.mxu1 %v9790_v43 }
0x1cb9   : > { %9296 = vmatmul.mubr.bf16.vlgmr.msra.gmra.mrb[160].mxu1 %v14127_v44 }
0x1cba   : > { %9299 = vmatprep.mubr.bf16.mxu1 %v14133_v34  ;;  %9348 = vmatpush3.bf16.msra.mxu1 %v9790_v43 }
0x1cbb   : > { %9349 = vmatprep.subr.bf16.mxu1 %v9791_v30 }
0x1cbe   : > { %9350 = vmatpush3.bf16.msra.mxu1 %v9791_v30 }
0x1cbf   : > { %9351 = vmatprep.subr.bf16.mxu1 %v9792_v11 }
0x1cc1   : > { %9300 = vmatmul.mubr.bf16.gmra.mrb[164].mxu1 %v14139_v24 }
0x1cc2   : > { %9303 = vmatprep.mubr.bf16.mxu1 %v14145_v36  ;;  %9352 = vmatpush3.bf16.msra.mxu1 %v9792_v11 }
0x1cc3   : > { %9353 = vmatprep.subr.bf16.mxu1 %v9793_v27 }
0x1cc6   : > { %9354 = vmatpush3.bf16.msra.mxu1 %v9793_v27 }
0x1cc7   : > { %9355 = vmatprep.subr.bf16.mxu1 %v9794_v42 }
0x1cc9   : > { %9304 = vmatmul.mubr.bf16.gmra.mrb[168].mxu1 %v14154_v52 }
0x1cca   : > { %9307 = vmatprep.mubr.bf16.mxu1 %v14160_v1  ;;  %9356 = vmatpush3.bf16.msra.mxu1 %v9794_v42 }
0x1ccb   : > { %9357 = vmatprep.subr.bf16.mxu1 %v9795_v21 }
0x1cce   : > { %9358 = vmatpush3.bf16.msra.mxu1 %v9795_v21 }
0x1ccf   : > { %9359 = vmatprep.subr.bf16.mxu1 %v9796_v33 }
0x1cd1   : > { %9308 = vmatmul.mubr.bf16.gmra.mrb[172].mxu1 %v14166_v57 }
0x1cd2   : > { %9360 = vmatpush3.bf16.msra.mxu1 %v9796_v33 }
0x1cd3   : > { %9361 = vmatprep.subr.bf16.mxu1 %v9797_v26 }
0x1cd6   : > { %9362 = vmatpush3.bf16.msra.mxu1 %v9797_v26 }
0x1d17   : > { %v9265_v61 = vpop.f32.mrb[144].mxu1 }
0x1d18   : > { %v6935_v46 = vpop.f32.mrb[145].mxu1 }
0x1d19   : > { %v9266_v49 = vpop.f32.mrb[146].mxu1 }
0x1d1a   : > { %v7096_v56 = vpack.c.bf16 %v9266_v49, %v9265_v61  ;;  %v6938_v59 = vpop.f32.mrb[147].mxu1 }
0x1d1b   : > { %v7095_v55 = vpack.c.bf16 %v6938_v59, %v6935_v46 }
0x1d1d   : > { %9315 = vmatprep.mubr.msk.bf16.mxu0 %vm353_vm0, %v7095_v55 }
0x1d1e   : > { %9316 = vmatmul.mubr.msk.bf16.vlgmr.msra.gmra.mrb[208].mxu0 %vm353_vm0, %v7096_v56 }
0x1d1f   : > { %v9269_v44 = vpop.f32.mrb[148].mxu1 }
0x1d20   : > { %v6951_v34 = vpop.f32.mrb[149].mxu1 }
0x1d21   : > { %v9270_v24 = vpop.f32.mrb[150].mxu1 }
0x1d22   : > { %v7098_v36 = vpack.c.bf16 %v9270_v24, %v9269_v44  ;;  %v6954_v53 = vpop.f32.mrb[151].mxu1 }
0x1d23   : > { %v7097_v52 = vpack.c.bf16 %v6954_v53, %v6951_v34 }
0x1d25   : > { %9319 = vmatprep.mubr.msk.bf16.mxu0 %vm353_vm0, %v7097_v52 }
0x1d26   : > { %9320 = vmatmul.mubr.msk.bf16.gmra.mrb[212].mxu0 %vm353_vm0, %v7098_v36 }
0x1d27   : > { %v9273_v1 = vpop.f32.mrb[152].mxu1 }
0x1d28   : > { %v6967_v57 = vpop.f32.mrb[153].mxu1 }
0x1d29   : > { %v9274_v2 = vpop.f32.mrb[154].mxu1 }
0x1d2a   : > { %v7100_v63 = vpack.c.bf16 %v9274_v2, %v9273_v1  ;;  %v6970_v13 = vpop.f32.mrb[155].mxu1 }
0x1d2b   : > { %v7099_v31 = vpack.c.bf16 %v6970_v13, %v6967_v57 }
0x1d2d   : > { %9323 = vmatprep.mubr.msk.bf16.mxu0 %vm353_vm0, %v7099_v31 }
0x1d2e   : > { %9324 = vmatmul.mubr.msk.bf16.gmra.mrb[216].mxu0 %vm353_vm0, %v7100_v63 }
0x1d2f   : > { %v9277_v50 = vpop.f32.mrb[156].mxu1 }
0x1d30   : > { %v6983_v38 = vpop.f32.mrb[157].mxu1 }
0x1d31   : > { %v9278_v48 = vpop.f32.mrb[158].mxu1 }
0x1d32   : > { %v7102_v14 = vpack.c.bf16 %v9278_v48, %v9277_v50  ;;  %v6986_v51 = vpop.f32.mrb[159].mxu1 }
0x1d33   : > { %v7101_v8 = vpack.c.bf16 %v6986_v51, %v6983_v38 }
0x1d35   : > { %9327 = vmatprep.mubr.msk.bf16.mxu0 %vm353_vm0, %v7101_v8 }
0x1d36   : > { %9328 = vmatmul.mubr.msk.bf16.gmra.mrb[220].mxu0 %vm353_vm0, %v7102_v14 }
0x1d8c   : > { %v9297_v41 = vpop.f32.mrb[160].mxu1 }
0x1d8d   : > { %v7032_v19 = vpop.f32.mrb[161].mxu1 }
0x1d8e   : > { %v9298_v58 = vpop.f32.mrb[162].mxu1 }
0x1d8f   : > { %v7104_v32 = vpack.c.bf16 %v9298_v58, %v9297_v41  ;;  %v7035_v40 = vpop.f32.mrb[163].mxu1 }
0x1d90   : > { %v7103_v17 = vpack.c.bf16 %v7035_v40, %v7032_v19 }
0x1d92   : > { %9331 = vmatprep.mubr.msk.bf16.mxu0 %vm353_vm0, %v7103_v17 }
0x1d93   : > { %9332 = vmatmul.mubr.msk.bf16.gmra.mrb[224].mxu0 %vm353_vm0, %v7104_v32 }
0x1d94   : > { %v9301_v29 = vpop.f32.mrb[164].mxu1 }
0x1d95   : > { %v7048_v10 = vpop.f32.mrb[165].mxu1 }
0x1d96   : > { %v9302_v28 = vpop.f32.mrb[166].mxu1 }
0x1d97   : > { %v7106_v18 = vpack.c.bf16 %v9302_v28, %v9301_v29  ;;  %v7051_v22 = vpop.f32.mrb[167].mxu1 }
0x1d98   : > { %v7105_v16 = vpack.c.bf16 %v7051_v22, %v7048_v10 }
0x1d9a   : > { %9335 = vmatprep.mubr.msk.bf16.mxu0 %vm353_vm0, %v7105_v16 }
0x1d9b   : > { %9336 = vmatmul.mubr.msk.bf16.gmra.mrb[228].mxu0 %vm353_vm0, %v7106_v18 }
0x1d9c   : > { %v9305_v12 = vpop.f32.mrb[168].mxu1 }
0x1d9d   : > { %v7064_v45 = vpop.f32.mrb[169].mxu1 }
0x1d9e   : > { %v9306_v0 = vpop.f32.mrb[170].mxu1 }
0x1d9f   : > { %v7108_v54 = vpack.c.bf16 %v9306_v0, %v9305_v12  ;;  %v7067_v39 = vpop.f32.mrb[171].mxu1 }
0x1da0   : > { %v7107_v23 = vpack.c.bf16 %v7067_v39, %v7064_v45 }
0x1da2   : > { %9339 = vmatprep.mubr.msk.bf16.mxu0 %vm353_vm0, %v7107_v23 }
0x1da3   : > { %9340 = vmatmul.mubr.msk.bf16.gmra.mrb[232].mxu0 %vm353_vm0, %v7108_v54 }
0x1da4   : > { %v9309_v47 = vpop.f32.mrb[172].mxu1 }
0x1da5   : > { %v7080_v35 = vpop.f32.mrb[173].mxu1 }
0x1da6   : > { %v9310_v9 = vpop.f32.mrb[174].mxu1 }
0x1da7   : > { %v7110_v62 = vpack.c.bf16 %v9310_v9, %v9309_v47  ;;  %v7083_v61 = vpop.f32.mrb[175].mxu1 }
0x1da8   : > { %v7109_v46 = vpack.c.bf16 %v7083_v61, %v7080_v35 }
0x1daa   : > { %9343 = vmatprep.mubr.msk.bf16.mxu0 %vm353_vm0, %v7109_v46 }
0x1dab   : > { %9344 = vmatmul.mubr.msk.bf16.gmra.mrb[236].mxu0 %vm353_vm0, %v7110_v62 }
0x1df1   : > { %v14270_v49 = vpop.f32.mrb[208].mxu0 }
0x1df2   : > { %v7334_v56 = vmul.f32 %v14270_v49, %v14270_v49  ;;  %v14274_v59 = vpop.f32.mrb[209].mxu0 }
0x1df3   : > { %v7332_v55 = vmul.f32 %v14274_v59, %v14274_v59  ;;  %v14278_v44 = vpop.f32.mrb[210].mxu0 }
0x1df4   : > { %v7366_v34 = vmul.f32 %v14270_v49, %v7334_v56  ;;  %v7335_v24 = vmul.f32 %v14278_v44, %v14278_v44  ;;  %v14283_v36 = vpop.f32.mrb[211].mxu0 }
0x1df5   : > { %v7364_v53 = vmul.f32 %v7332_v55, %v14274_v59  ;;  %v7333_v52 = vmul.f32 %v14283_v36, %v14283_v36 }
0x1df6   : > { %v7398_v1 = vmul.f32 0.044715, %v7366_v34  ;;  %v7367_v57 = vmul.f32 %v14278_v44, %v7335_v24 }
0x1df7   : > { %v7396_v2 = vmul.f32 0.044715, %v7364_v53  ;;  %v7365_v63 = vmul.f32 %v7333_v52, %v14283_v36 }
0x1df8   : > { %v7430_v13 = vadd.f32 %v14270_v49, %v7398_v1  ;;  %v7399_v31 = vmul.f32 0.044715, %v7367_v57 }
0x1df9   : > { %v7428_v50 = vadd.f32 %v7396_v2, %v14274_v59  ;;  %v7397_v38 = vmul.f32 0.044715, %v7365_v63  ;;  %v14292_v48 = vpop.f32.mrb[212].mxu0 }
0x1dfa   : > { %v7462_v14 = vmul.f32 0.7978846, %v7430_v13  ;;  %v7431_v51 = vadd.f32 %v14278_v44, %v7399_v31  ;;  %v7338_v8 = vmul.f32 %v14292_v48, %v14292_v48  ;;  %v14297_v43 = vpop.f32.mrb[213].mxu0 }
0x1dfb   : > { %v7460_v30 = vmul.f32 0.7978846, %v7428_v50  ;;  %v7429_v11 = vadd.f32 %v7397_v38, %v14283_v36  ;;  %v7336_v27 = vmul.f32 %v14297_v43, %v14297_v43  ;;  %v14302_v42 = vpop.f32.mrb[214].mxu0 }
0x1dfc   : > { %10446 = vtanh.f32 %v7462_v14  ;;  %v7463_v41 = vmul.f32 0.7978846, %v7431_v51  ;;  %v7370_v19 = vmul.f32 %v14292_v48, %v7338_v8  ;;  %v7339_v58 = vmul.f32 %v14302_v42, %v14302_v42  ;;  %v14307_v32 = vpop.f32.mrb[215].mxu0 }
0x1dfd   : > { %10448 = vtanh.f32 %v7460_v30  ;;  %v7461_v40 = vmul.f32 0.7978846, %v7429_v11  ;;  %v7368_v21 = vmul.f32 %v7336_v27, %v14297_v43  ;;  %v7337_v17 = vmul.f32 %v14307_v32, %v14307_v32 }
0x1dfe   : > { %10450 = vtanh.f32 %v7463_v41  ;;  %v7402_v33 = vmul.f32 0.044715, %v7370_v19  ;;  %v7371_v29 = vmul.f32 %v14302_v42, %v7339_v58 }
0x1dff   : > { %10452 = vtanh.f32 %v7461_v40  ;;  %v7400_v10 = vmul.f32 0.044715, %v7368_v21  ;;  %v7369_v28 = vmul.f32 %v7337_v17, %v14307_v32 }
0x1e00   : > { %v7434_v18 = vadd.f32 %v14292_v48, %v7402_v33  ;;  %v7403_v22 = vmul.f32 0.044715, %v7371_v29 }
0x1e01   : > { %v7432_v26 = vadd.f32 %v7400_v10, %v14297_v43  ;;  %v7401_v16 = vmul.f32 0.044715, %v7369_v28  ;;  %v14316_v12 = vpop.f32.mrb[216].mxu0 }
0x1e02   : > { %v7466_v45 = vmul.f32 0.7978846, %v7434_v18  ;;  %v7435_v0 = vadd.f32 %v14302_v42, %v7403_v22  ;;  %v7342_v54 = vmul.f32 %v14316_v12, %v14316_v12  ;;  %v14321_v39 = vpop.f32.mrb[217].mxu0 }
0x1e03   : > { %v7464_v23 = vmul.f32 0.7978846, %v7432_v26  ;;  %v7433_v47 = vadd.f32 %v7401_v16, %v14307_v32  ;;  %v7340_v35 = vmul.f32 %v14321_v39, %v14321_v39  ;;  %v14326_v9 = vpop.f32.mrb[218].mxu0 }
0x1e04   : > { %10454 = vtanh.f32 %v7466_v45  ;;  %v7467_v62 = vmul.f32 0.7978846, %v7435_v0  ;;  %v7374_v61 = vmul.f32 %v14316_v12, %v7342_v54  ;;  %v7343_v46 = vmul.f32 %v14326_v9, %v14326_v9  ;;  %v14331_v56 = vpop.f32.mrb[219].mxu0 }
0x1e05   : > { %10456 = vtanh.f32 %v7464_v23  ;;  %v7465_v55 = vmul.f32 0.7978846, %v7433_v47  ;;  %v7372_v34 = vmul.f32 %v7340_v35, %v14321_v39  ;;  %v7341_v24 = vmul.f32 %v14331_v56, %v14331_v56 }
0x1e06   : > { %v10447_v53 = vpop.eup %10446  ;;  %10458 = vtanh.f32 %v7467_v62  ;;  %v7406_v52 = vmul.f32 0.044715, %v7374_v61  ;;  %v7375_v1 = vmul.f32 %v14326_v9, %v7343_v46 }
0x1e07   : > { %v10449_v57 = vpop.eup %10448  ;;  %v7526_v2 = vadd.f32 1.0, %v10447_v53  ;;  %10460 = vtanh.f32 %v7465_v55  ;;  %v7404_v63 = vmul.f32 0.044715, %v7372_v34  ;;  %v7373_v13 = vmul.f32 %v7341_v24, %v14331_v56 }
0x1e08   : > { %v10451_v31 = vpop.eup %10450  ;;  %v7524_v50 = vadd.f32 1.0, %v10449_v57  ;;  %v7438_v38 = vadd.f32 %v14316_v12, %v7406_v52  ;;  %v7407_v14 = vmul.f32 0.044715, %v7375_v1 }
0x1e09   : > { %v10453_v51 = vpop.eup %10452  ;;  %v7558_v8 = vmul.f32 0.5, %v7526_v2  ;;  %v7527_v30 = vadd.f32 1.0, %v10451_v31  ;;  %v7436_v11 = vadd.f32 %v7404_v63, %v14321_v39  ;;  %v7405_v27 = vmul.f32 0.044715, %v7373_v13  ;;  %v14340_v41 = vpop.f32.mrb[220].mxu0 }
0x1e0a   : > { %v7556_v19 = vmul.f32 0.5, %v7524_v50  ;;  %v7525_v58 = vadd.f32 1.0, %v10453_v51  ;;  %v7470_v40 = vmul.f32 0.7978846, %v7438_v38  ;;  %v7439_v21 = vadd.f32 %v14326_v9, %v7407_v14  ;;  %v14343_v17 = vpop.f32.mrb[221].mxu0 }
0x1e0b   : > { %v7590_v33 = vmul.f32 %v14270_v49, %v7558_v8  ;;  %v7559_v29 = vmul.f32 0.5, %v7527_v30  ;;  %v7468_v10 = vmul.f32 0.7978846, %v7436_v11  ;;  %v7437_v28 = vadd.f32 %v7405_v27, %v14331_v56  ;;  %v14347_v18 = vpop.f32.mrb[222].mxu0 }
0x1e0c   : > { %v7588_v22 = vmul.f32 %v7556_v19, %v14274_v59  ;;  %v7557_v26 = vmul.f32 0.5, %v7525_v58  ;;  %10462 = vtanh.f32 %v7470_v40  ;;  %v7471_v16 = vmul.f32 0.7978846, %v7439_v21  ;;  %v14350_v45 = vpop.f32.mrb[223].mxu0 }
0x1e0d   : > { %v7591_v0 = vmul.f32 %v14278_v44, %v7559_v29  ;;  %10464 = vtanh.f32 %v7468_v10  ;;  %v7469_v54 = vmul.f32 0.7978846, %v7437_v28  ;;  %v7346_v49 = vmul.f32 %v14340_v41, %v14340_v41 }
0x1e0e   : > { %v10455_v23 = vpop.eup %10454  ;;  %v7589_v47 = vmul.f32 %v7557_v26, %v14283_v36  ;;  %10466 = vtanh.f32 %v7471_v16  ;;  %v7344_v35 = vmul.f32 %v14343_v17, %v14343_v17  ;;  %v7347_v59 = vmul.f32 %v14347_v18, %v14347_v18 }
0x1e0f   : > { %v10457_v62 = vpop.eup %10456  ;;  %v7621_v61 = vpack.c.bf16 %v7591_v0, %v7590_v33  ;;  %v7530_v46 = vadd.f32 1.0, %v10455_v23  ;;  %10468 = vtanh.f32 %v7469_v54  ;;  %v7378_v44 = vmul.f32 %v14340_v41, %v7346_v49 }
0x1e10   : > { %v10459_v55 = vpop.eup %10458  ;;  %v7528_v34 = vadd.f32 1.0, %v10457_v62  ;;  %v7376_v24 = vmul.f32 %v7344_v35, %v14343_v17  ;;  %v7379_v53 = vmul.f32 %v14347_v18, %v7347_v59  ;;  %v7345_v36 = vmul.f32 %v14350_v45, %v14350_v45 }
0x1e11   : > { %v10461_v52 = vpop.eup %10460  ;;  %v7562_v1 = vmul.f32 0.5, %v7530_v46  ;;  %v7531_v57 = vadd.f32 1.0, %v10459_v55  ;;  %v7410_v2 = vmul.f32 0.044715, %v7378_v44  ;;  %v7620_v63 = vpack.c.bf16 %v7589_v47, %v7588_v22 }
0x1e12   : > { %v7560_v13 = vmul.f32 0.5, %v7528_v34  ;;  %v7529_v31 = vadd.f32 1.0, %v10461_v52  ;;  %v7408_v50 = vmul.f32 0.044715, %v7376_v24  ;;  %v7411_v38 = vmul.f32 0.044715, %v7379_v53 }
0x1e13   : > { %v7594_v14 = vmul.f32 %v14292_v48, %v7562_v1  ;;  %v7563_v51 = vmul.f32 0.5, %v7531_v57  ;;  %v7442_v8 = vadd.f32 %v14340_v41, %v7410_v2  ;;  %v7377_v30 = vmul.f32 %v7345_v36, %v14350_v45  ;;  %9363 = vmatprep.mubr.bf16.mxu1 %v7620_v63 }
0x1e14   : > { %v7592_v11 = vmul.f32 %v7560_v13, %v14297_v43  ;;  %v7561_v27 = vmul.f32 0.5, %v7529_v31  ;;  %v7440_v19 = vadd.f32 %v7408_v50, %v14343_v17  ;;  %v7443_v58 = vadd.f32 %v14347_v18, %v7411_v38  ;;  %9364 = vmatmul.mubr.bf16.vlgmr.msra.gmra.mrb[176].mxu1 %v7621_v61 }
0x1e15   : > { %v7595_v40 = vmul.f32 %v14302_v42, %v7563_v51  ;;  %v7474_v21 = vmul.f32 0.7978846, %v7442_v8  ;;  %v7409_v33 = vmul.f32 0.044715, %v7377_v30 }
0x1e16   : > { %v10463_v29 = vpop.eup %10462  ;;  %v7593_v48 = vmul.f32 %v7561_v27, %v14307_v32  ;;  %v7472_v10 = vmul.f32 0.7978846, %v7440_v19  ;;  %v7475_v28 = vmul.f32 0.7978846, %v7443_v58 }
0x1e17   : > { %v10465_v22 = vpop.eup %10464  ;;  %v7534_v26 = vadd.f32 1.0, %v10463_v29  ;;  %10470 = vtanh.f32 %v7474_v21  ;;  %v7441_v43 = vadd.f32 %v7409_v33, %v14350_v45  ;;  %v7623_v16 = vpack.c.bf16 %v7595_v40, %v7594_v14 }
0x1e18   : > { %v10467_v0 = vpop.eup %10466  ;;  %v7532_v54 = vadd.f32 1.0, %v10465_v22  ;;  %10472 = vtanh.f32 %v7472_v10  ;;  %v7622_v49 = vpack.c.bf16 %v7593_v48, %v7592_v11 }
0x1e19   : > { %v10469_v23 = vpop.eup %10468  ;;  %v7566_v47 = vmul.f32 0.5, %v7534_v26  ;;  %v7535_v42 = vadd.f32 1.0, %v10467_v0  ;;  %10474 = vtanh.f32 %v7475_v28  ;;  %v7473_v35 = vmul.f32 0.7978846, %v7441_v43 }
0x1e1a   : > { %v7564_v59 = vmul.f32 0.5, %v7532_v54  ;;  %v7533_v62 = vadd.f32 1.0, %v10469_v23  ;;  %9367 = vmatprep.mubr.bf16.mxu1 %v7622_v49 }
0x1e1b   : > { %v7598_v32 = vmul.f32 %v14316_v12, %v7566_v47  ;;  %v7567_v61 = vmul.f32 0.5, %v7535_v42  ;;  %10476 = vtanh.f32 %v7473_v35 }
0x1e1c   : > { %v7596_v46 = vmul.f32 %v7564_v59, %v14321_v39  ;;  %v7565_v44 = vmul.f32 0.5, %v7533_v62  ;;  %9368 = vmatmul.mubr.bf16.gmra.mrb[180].mxu1 %v7623_v16 }
0x1e1d   : > { %v7599_v55 = vmul.f32 %v14326_v9, %v7567_v61 }
0x1e1e   : > { %v7597_v34 = vmul.f32 %v7565_v44, %v14331_v56 }
0x1e1f   : > { %v7625_v24 = vpack.c.bf16 %v7599_v55, %v7598_v32 }
0x1e20   : > { %v7624_v53 = vpack.c.bf16 %v7597_v34, %v7596_v46 }
0x1e21   : > { %v10471_v36 = vpop.eup %10470 }
0x1e22   : > { %v10473_v52 = vpop.eup %10472  ;;  %v7538_v1 = vadd.f32 1.0, %v10471_v36  ;;  %9371 = vmatprep.mubr.bf16.mxu1 %v7624_v53 }
0x1e23   : > { %v10475_v57 = vpop.eup %10474  ;;  %v7536_v2 = vadd.f32 1.0, %v10473_v52 }
0x1e24   : > { %v7570_v63 = vmul.f32 0.5, %v7538_v1  ;;  %v7539_v12 = vadd.f32 1.0, %v10475_v57  ;;  %9372 = vmatmul.mubr.bf16.gmra.mrb[184].mxu1 %v7625_v24 }
0x1e25   : > { %v10477_v13 = vpop.eup %10476  ;;  %v7568_v31 = vmul.f32 0.5, %v7536_v2 }
0x1e26   : > { %v7602_v39 = vmul.f32 %v14340_v41, %v7570_v63  ;;  %v7571_v50 = vmul.f32 0.5, %v7539_v12  ;;  %v7537_v38 = vadd.f32 1.0, %v10477_v13 }
0x1e27   : > { %v7600_v9 = vmul.f32 %v7568_v31, %v14343_v17 }
0x1e28   : > { %v7603_v56 = vmul.f32 %v14347_v18, %v7571_v50  ;;  %v7569_v14 = vmul.f32 0.5, %v7537_v38 }
0x1e2a   : > { %v7601_v51 = vmul.f32 %v7569_v14, %v14350_v45  ;;  %v7627_v8 = vpack.c.bf16 %v7603_v56, %v7602_v39 }
0x1e2c   : > { %v7626_v30 = vpack.c.bf16 %v7601_v51, %v7600_v9 }
0x1e2e   : > { %9375 = vmatprep.mubr.bf16.mxu1 %v7626_v30 }
0x1e2f   : > { %9376 = vmatmul.mubr.bf16.gmra.mrb[188].mxu1 %v7627_v8 }
0x1e66   : > { %v14382_v11 = vpop.f32.mrb[224].mxu0 }
0x1e67   : > { %v7350_v27 = vmul.f32 %v14382_v11, %v14382_v11  ;;  %v14386_v19 = vpop.f32.mrb[225].mxu0 }
0x1e68   : > { %v7348_v41 = vmul.f32 %v14386_v19, %v14386_v19  ;;  %v14390_v17 = vpop.f32.mrb[226].mxu0 }
0x1e69   : > { %v7382_v18 = vmul.f32 %v14382_v11, %v7350_v27  ;;  %v7351_v45 = vmul.f32 %v14390_v17, %v14390_v17  ;;  %v14395_v58 = vpop.f32.mrb[227].mxu0 }
0x1e6a   : > { %v7380_v40 = vmul.f32 %v7348_v41, %v14386_v19  ;;  %v7349_v21 = vmul.f32 %v14395_v58, %v14395_v58 }
0x1e6b   : > { %v7414_v33 = vmul.f32 0.044715, %v7382_v18  ;;  %v7383_v29 = vmul.f32 %v14390_v17, %v7351_v45 }
0x1e6c   : > { %v7412_v48 = vmul.f32 0.044715, %v7380_v40  ;;  %v7381_v10 = vmul.f32 %v7349_v21, %v14395_v58 }
0x1e6d   : > { %v7446_v28 = vadd.f32 %v14382_v11, %v7414_v33  ;;  %v7415_v22 = vmul.f32 0.044715, %v7383_v29 }
0x1e6e   : > { %v7444_v26 = vadd.f32 %v7412_v48, %v14386_v19  ;;  %v7413_v43 = vmul.f32 0.044715, %v7381_v10  ;;  %v14404_v16 = vpop.f32.mrb[228].mxu0 }
0x1e6f   : > { %v7478_v0 = vmul.f32 0.7978846, %v7446_v28  ;;  %v7447_v54 = vadd.f32 %v14390_v17, %v7415_v22  ;;  %v7354_v49 = vmul.f32 %v14404_v16, %v14404_v16  ;;  %v14409_v23 = vpop.f32.mrb[229].mxu0 }
0x1e70   : > { %v7476_v47 = vmul.f32 0.7978846, %v7444_v26  ;;  %v7445_v42 = vadd.f32 %v7413_v43, %v14395_v58  ;;  %v7352_v35 = vmul.f32 %v14409_v23, %v14409_v23  ;;  %v14414_v59 = vpop.f32.mrb[230].mxu0 }
0x1e71   : > { %10478 = vtanh.f32 %v7478_v0  ;;  %v7479_v62 = vmul.f32 0.7978846, %v7447_v54  ;;  %v7386_v32 = vmul.f32 %v14404_v16, %v7354_v49  ;;  %v7355_v61 = vmul.f32 %v14414_v59, %v14414_v59  ;;  %v14419_v46 = vpop.f32.mrb[231].mxu0 }
0x1e72   : > { %10480 = vtanh.f32 %v7476_v47  ;;  %v7477_v44 = vmul.f32 0.7978846, %v7445_v42  ;;  %v7384_v55 = vmul.f32 %v7352_v35, %v14409_v23  ;;  %v7353_v34 = vmul.f32 %v14419_v46, %v14419_v46 }
0x1e73   : > { %10482 = vtanh.f32 %v7479_v62  ;;  %v7418_v24 = vmul.f32 0.044715, %v7386_v32  ;;  %v7387_v53 = vmul.f32 %v14414_v59, %v7355_v61 }
0x1e74   : > { %10484 = vtanh.f32 %v7477_v44  ;;  %v7416_v36 = vmul.f32 0.044715, %v7384_v55  ;;  %v7385_v52 = vmul.f32 %v7353_v34, %v14419_v46 }
0x1e75   : > { %v7450_v1 = vadd.f32 %v14404_v16, %v7418_v24  ;;  %v7419_v57 = vmul.f32 0.044715, %v7387_v53 }
0x1e76   : > { %v7448_v2 = vadd.f32 %v7416_v36, %v14409_v23  ;;  %v7417_v63 = vmul.f32 0.044715, %v7385_v52  ;;  %v14428_v12 = vpop.f32.mrb[232].mxu0 }
0x1e77   : > { %v7482_v13 = vmul.f32 0.7978846, %v7450_v1  ;;  %v7451_v31 = vadd.f32 %v14414_v59, %v7419_v57  ;;  %v7358_v39 = vmul.f32 %v14428_v12, %v14428_v12  ;;  %v14433_v50 = vpop.f32.mrb[233].mxu0 }
0x1e78   : > { %v7480_v38 = vmul.f32 0.7978846, %v7448_v2  ;;  %v7449_v9 = vadd.f32 %v7417_v63, %v14419_v46  ;;  %v7356_v56 = vmul.f32 %v14433_v50, %v14433_v50  ;;  %v14438_v14 = vpop.f32.mrb[234].mxu0 }
0x1e79   : > { %10486 = vtanh.f32 %v7482_v13  ;;  %v7483_v51 = vmul.f32 0.7978846, %v7451_v31  ;;  %v7390_v8 = vmul.f32 %v14428_v12, %v7358_v39  ;;  %v7359_v30 = vmul.f32 %v14438_v14, %v14438_v14  ;;  %v14443_v27 = vpop.f32.mrb[235].mxu0 }
0x1e7a   : > { %10488 = vtanh.f32 %v7480_v38  ;;  %v7481_v41 = vmul.f32 0.7978846, %v7449_v9  ;;  %v7388_v18 = vmul.f32 %v7356_v56, %v14433_v50  ;;  %v7357_v45 = vmul.f32 %v14443_v27, %v14443_v27 }
0x1e7b   : > { %v10479_v40 = vpop.eup %10478  ;;  %10490 = vtanh.f32 %v7483_v51  ;;  %v7422_v21 = vmul.f32 0.044715, %v7390_v8  ;;  %v7391_v33 = vmul.f32 %v14438_v14, %v7359_v30 }
0x1e7c   : > { %v10481_v29 = vpop.eup %10480  ;;  %v7542_v48 = vadd.f32 1.0, %v10479_v40  ;;  %10492 = vtanh.f32 %v7481_v41  ;;  %v7420_v10 = vmul.f32 0.044715, %v7388_v18  ;;  %v7389_v28 = vmul.f32 %v7357_v45, %v14443_v27 }
0x1e7d   : > { %v10483_v22 = vpop.eup %10482  ;;  %v7540_v26 = vadd.f32 1.0, %v10481_v29  ;;  %v7454_v43 = vadd.f32 %v14428_v12, %v7422_v21  ;;  %v7423_v0 = vmul.f32 0.044715, %v7391_v33 }
0x1e7e   : > { %v10485_v54 = vpop.eup %10484  ;;  %v7543_v49 = vadd.f32 1.0, %v10483_v22  ;;  %v7452_v47 = vadd.f32 %v7420_v10, %v14433_v50  ;;  %v7421_v42 = vmul.f32 0.044715, %v7389_v28  ;;  %v14452_v35 = vpop.f32.mrb[236].mxu0  ;;  %v7574_v34 = vmul.f32 0.5, %v7542_v48 }
0x1e7f   : > { %v7572_v62 = vmul.f32 0.5, %v7540_v26  ;;  %v7541_v32 = vadd.f32 1.0, %v10485_v54  ;;  %v7486_v61 = vmul.f32 0.7978846, %v7454_v43  ;;  %v7455_v44 = vadd.f32 %v14438_v14, %v7423_v0  ;;  %v14455_v55 = vpop.f32.mrb[237].mxu0 }
0x1e80   : > { %v7575_v24 = vmul.f32 0.5, %v7543_v49  ;;  %v7484_v53 = vmul.f32 0.7978846, %v7452_v47  ;;  %v7453_v36 = vadd.f32 %v7421_v42, %v14443_v27  ;;  %v14458_v52 = vpop.f32.mrb[238].mxu0  ;;  %v7362_v39 = vmul.f32 %v14452_v35, %v14452_v35 }
0x1e81   : > { %v7604_v1 = vmul.f32 %v7572_v62, %v14386_v19  ;;  %v7573_v57 = vmul.f32 0.5, %v7541_v32  ;;  %10494 = vtanh.f32 %v7486_v61  ;;  %v7487_v2 = vmul.f32 0.7978846, %v7455_v44  ;;  %v14461_v63 = vpop.f32.mrb[239].mxu0 }
0x1e82   : > { %v7607_v13 = vmul.f32 %v14390_v17, %v7575_v24  ;;  %10496 = vtanh.f32 %v7484_v53  ;;  %v7485_v31 = vmul.f32 0.7978846, %v7453_v36  ;;  %v7360_v56 = vmul.f32 %v14455_v55, %v14455_v55 }
0x1e83   : > { %v10487_v38 = vpop.eup %10486  ;;  %v7605_v9 = vmul.f32 %v7573_v57, %v14395_v58  ;;  %10498 = vtanh.f32 %v7487_v2  ;;  %v7363_v19 = vmul.f32 %v14458_v52, %v14458_v52  ;;  %v7394_v17 = vmul.f32 %v14452_v35, %v7362_v39 }
0x1e84   : > { %v10489_v51 = vpop.eup %10488  ;;  %v7546_v8 = vadd.f32 1.0, %v10487_v38  ;;  %10500 = vtanh.f32 %v7485_v31  ;;  %v7361_v30 = vmul.f32 %v14461_v63, %v14461_v63  ;;  %v7392_v45 = vmul.f32 %v7360_v56, %v14455_v55 }
0x1e85   : > { %v10491_v41 = vpop.eup %10490  ;;  %v7544_v18 = vadd.f32 1.0, %v10489_v51  ;;  %v7395_v58 = vmul.f32 %v14458_v52, %v7363_v19  ;;  %v7628_v40 = vpack.c.bf16 %v7605_v9, %v7604_v1  ;;  %v7426_v48 = vmul.f32 0.044715, %v7394_v17 }
0x1e86   : > { %v10493_v21 = vpop.eup %10492  ;;  %v7578_v33 = vmul.f32 0.5, %v7546_v8  ;;  %v7547_v29 = vadd.f32 1.0, %v10491_v41  ;;  %v7393_v10 = vmul.f32 %v7361_v30, %v14461_v63  ;;  %v7424_v26 = vmul.f32 0.044715, %v7392_v45 }
0x1e87   : > { %v7576_v28 = vmul.f32 0.5, %v7544_v18  ;;  %v7545_v22 = vadd.f32 1.0, %v10493_v21  ;;  %v7427_v43 = vmul.f32 0.044715, %v7395_v58  ;;  %9379 = vmatprep.mubr.bf16.mxu1 %v7628_v40  ;;  %v7606_v0 = vmul.f32 %v14382_v11, %v7574_v34 }
0x1e88   : > { %v7579_v54 = vmul.f32 0.5, %v7547_v29  ;;  %v7458_v49 = vadd.f32 %v14452_v35, %v7426_v48  ;;  %v7425_v47 = vmul.f32 0.044715, %v7393_v10  ;;  %v7610_v42 = vmul.f32 %v14404_v16, %v7578_v33 }
0x1e89   : > { %v7577_v62 = vmul.f32 0.5, %v7545_v22  ;;  %v7456_v32 = vadd.f32 %v7424_v26, %v14455_v55  ;;  %v7459_v61 = vadd.f32 %v14458_v52, %v7427_v43  ;;  %v7629_v36 = vpack.c.bf16 %v7607_v13, %v7606_v0 }
0x1e8a   : > { %v7611_v44 = vmul.f32 %v14414_v59, %v7579_v54  ;;  %v7490_v24 = vmul.f32 0.7978846, %v7458_v49  ;;  %v7457_v53 = vadd.f32 %v7425_v47, %v14461_v63  ;;  %v7608_v11 = vmul.f32 %v7576_v28, %v14409_v23 }
0x1e8b   : > { %v10495_v1 = vpop.eup %10494  ;;  %v7609_v34 = vmul.f32 %v7577_v62, %v14419_v46  ;;  %v7488_v57 = vmul.f32 0.7978846, %v7456_v32  ;;  %v7491_v2 = vmul.f32 0.7978846, %v7459_v61  ;;  %9380 = vmatmul.mubr.bf16.gmra.mrb[192].mxu1 %v7629_v36 }
0x1e8c   : > { %v10497_v31 = vpop.eup %10496  ;;  %v7550_v16 = vadd.f32 1.0, %v10495_v1  ;;  %10502 = vtanh.f32 %v7490_v24  ;;  %v7489_v39 = vmul.f32 0.7978846, %v7457_v53  ;;  %v7631_v38 = vpack.c.bf16 %v7611_v44, %v7610_v42 }
0x1e8d   : > { %v10499_v9 = vpop.eup %10498  ;;  %v7548_v56 = vadd.f32 1.0, %v10497_v31  ;;  %10504 = vtanh.f32 %v7488_v57  ;;  %v7630_v59 = vpack.c.bf16 %v7609_v34, %v7608_v11 }
0x1e8e   : > { %v10501_v19 = vpop.eup %10500  ;;  %v7582_v51 = vmul.f32 0.5, %v7550_v16  ;;  %v7551_v13 = vadd.f32 1.0, %v10499_v9  ;;  %10506 = vtanh.f32 %v7491_v2 }
0x1e8f   : > { %v7580_v8 = vmul.f32 0.5, %v7548_v56  ;;  %v7549_v23 = vadd.f32 1.0, %v10501_v19  ;;  %10508 = vtanh.f32 %v7489_v39  ;;  %9383 = vmatprep.mubr.bf16.mxu1 %v7630_v59 }
0x1e90   : > { %v7583_v46 = vmul.f32 0.5, %v7551_v13  ;;  %v7614_v30 = vmul.f32 %v14428_v12, %v7582_v51 }
0x1e91   : > { %v7581_v17 = vmul.f32 0.5, %v7549_v23  ;;  %v7612_v18 = vmul.f32 %v7580_v8, %v14433_v50 }
0x1e92   : > { %v7615_v41 = vmul.f32 %v14438_v14, %v7583_v46 }
0x1e93   : > { %v7613_v45 = vmul.f32 %v7581_v17, %v14443_v27  ;;  %9384 = vmatmul.mubr.bf16.gmra.mrb[196].mxu1 %v7631_v38 }
0x1e94   : > { %v7633_v58 = vpack.c.bf16 %v7615_v41, %v7614_v30 }
0x1e95   : > { %v7632_v40 = vpack.c.bf16 %v7613_v45, %v7612_v18  ;;  %v15086_v18 = vld [vmem:[#allocation58_spill] sm:$0xff]  ;;  %v15097_v45 = vld [vmem:[#allocation99_spill] sm:$0xff] }
0x1e96   : > { %v10503_v21 = vpop.eup %10502 }
0x1e97   : > { %v10505_v33 = vpop.eup %10504  ;;  %v7554_v29 = vadd.f32 1.0, %v10503_v21  ;;  %9387 = vmatprep.mubr.bf16.mxu1 %v7632_v40  ;;  %v15099_v40 = vld [vmem:[#allocation97_spill] sm:$0xff]  ;;  %v15100_v21 = vld [vmem:[#allocation47_spill] sm:$0xff] }
0x1e98   : > { %v10507_v48 = vpop.eup %10506  ;;  %v7552_v10 = vadd.f32 1.0, %v10505_v33  ;;  %v15101_v33 = vld [vmem:[#allocation43_spill] sm:$0xff] }
0x1e99   : > { %v10509_v28 = vpop.eup %10508  ;;  %v7586_v22 = vmul.f32 0.5, %v7554_v29  ;;  %v7555_v26 = vadd.f32 1.0, %v10507_v48  ;;  %v15102_v29 = vld [vmem:[#allocation68_spill] sm:$0xff]  ;;  %v15103_v48 = vld [vmem:[#allocation41_spill] sm:$0xff] }
0x1e9a   : > { %v7584_v43 = vmul.f32 0.5, %v7552_v10  ;;  %v7553_v12 = vadd.f32 1.0, %v10509_v28  ;;  %v15104_v28 = vld [vmem:[#allocation59_spill] sm:$0xff] }
0x1e9b   : > { %v7587_v0 = vmul.f32 0.5, %v7555_v26  ;;  %9388 = vmatmul.mubr.bf16.gmra.mrb[200].mxu1 %v7633_v58  ;;  %v7618_v50 = vmul.f32 %v14452_v35, %v7586_v22  ;;  %v15098_v58 = vld [vmem:[#allocation60_spill] sm:$0xff] }
0x1e9c   : > { %v7585_v14 = vmul.f32 0.5, %v7553_v12  ;;  %v7616_v54 = vmul.f32 %v7584_v43, %v14455_v55  ;;  %v15105_v22 = vld [vmem:[#allocation44_spill] sm:$0xff] }
0x1e9d   : > { %v7619_v27 = vmul.f32 %v14458_v52, %v7587_v0  ;;  %v15106_v26 = vld [vmem:[#allocation40_spill] sm:$0xff]  ;;  %v15107_v0 = vld [vmem:[#allocation103_spill] sm:$0xff] }
0x1e9e   : > { %v7617_v49 = vmul.f32 %v7585_v14, %v14461_v63 }
0x1e9f   : > { %v7635_v47 = vpack.c.bf16 %v7619_v27, %v7618_v50 }
0x1ea0   : > { %v7634_v42 = vpack.c.bf16 %v7617_v49, %v7616_v54 }
0x1ea2   : > { %9391 = vmatprep.mubr.bf16.mxu1 %v7634_v42 }
0x1ea3   : > { %9392 = vmatmul.mubr.bf16.gmra.mrb[204].mxu1 %v7635_v47 }
0x1ee7   : > { %v14494_v62 = vpop.f32.mrb[176].mxu1 }
0x1ee8   : > { %v14496_v32 = vpop.f32.mrb[177].mxu1 }
0x1ee9   : > { %v14498_v61 = vpop.f32.mrb[178].mxu1 }
0x1eea   : > { %v14500_v44 = vpop.f32.mrb[179].mxu1 }
0x1eef   : > { %v9369_v24 = vpop.f32.mrb[180].mxu1 }
0x1ef0   : > { %7853 = vrot.lane.b32.xlu1 %v9369_v24, %s10539_s23  ;;  %v7734_v35 = vpop.f32.mrb[181].mxu1 }
0x1ef1   : > { %7849 = vrot.lane.b32.xlu0 %v7734_v35, %s10539_s23  ;;  %v9370_v55 = vpop.f32.mrb[182].mxu1 }
0x1ef2   : > { %v7737_v52 = vpop.f32.mrb[183].mxu1 }
0x1ef4   : > { %7851 = vrot.lane.b32.xlu1 %v7737_v52, %s10539_s23 }
0x1ef5   : > { %7855 = vrot.lane.b32.xlu0 %v9370_v55, %s10539_s23 }
0x1ef7   : > { %v9373_v63 = vpop.f32.mrb[184].mxu1 }
0x1ef8   : > { %7869 = vrot.lane.b32.xlu1 %v9373_v63, %s10540_s25  ;;  %v7750_v53 = vpop.f32.mrb[185].mxu1 }
0x1ef9   : > { %v9374_v36 = vpop.f32.mrb[186].mxu1 }
0x1efa   : > { %7871 = vrot.lane.b32.xlu0 %v9374_v36, %s10540_s25  ;;  %v7753_v1 = vpop.f32.mrb[187].mxu1 }
0x1efc   : > { %7865 = vrot.lane.b32.xlu1 %v7750_v53, %s10540_s25 }
0x1efe   : > { %7867 = vrot.lane.b32.xlu0 %v7753_v1, %s10540_s25 }
0x1f02   : > { %v9377_v11 = vpop.f32.mrb[188].mxu1 }
0x1f03   : > { %7885 = vrot.lane.b32.xlu1 %v9377_v11, %s10541_s26  ;;  %v7766_v34 = vpop.f32.mrb[189].mxu1 }
0x1f04   : > { %v9378_v57 = vpop.f32.mrb[190].mxu1 }
0x1f05   : > { %7887 = vrot.lane.b32.xlu0 %v9378_v57, %s10541_s26  ;;  %v7769_v2 = vpop.f32.mrb[191].mxu1 }
0x1f07   : > { %7881 = vrot.lane.b32.xlu1 %v7766_v34, %s10541_s26 }
0x1f09   : > { %7883 = vrot.lane.b32.xlu0 %v7769_v2, %s10541_s26 }
0x1f5e   : > { %v14514_v31 = vpop.f32.mrb[192].mxu1 }
0x1f5f   : > { %v14516_v16 = vpop.f32.mrb[193].mxu1 }
0x1f60   : > { %v14518_v39 = vpop.f32.mrb[194].mxu1 }
0x1f61   : > { %v14520_v38 = vpop.f32.mrb[195].mxu1 }
0x1f62   : > { %v7854_v12 = vpop.permute.xlu1 %7853 }
0x1f63   : > { %v7850_v10 = vpop.permute.xlu0 %7849 }
0x1f66   : > { %v9385_v9 = vpop.f32.mrb[196].mxu1  ;;  %v7852_v50 = vpop.permute.xlu1 %7851 }
0x1f67   : > { %7921 = vrot.lane.b32.xlu1 %v9385_v9, %s10539_s23  ;;  %v7798_v56 = vpop.f32.mrb[197].mxu1  ;;  %v14565_v43 = vpop.permute.xlu0 %7855 }
0x1f68   : > { %v9386_v59 = vpop.f32.mrb[198].mxu1 }
0x1f69   : > { %7923 = vrot.lane.b32.xlu0 %v9386_v59, %s10539_s23  ;;  %v7801_v19 = vpop.f32.mrb[199].mxu1 }
0x1f6a   : > { %v7870_v54 = vpop.permute.xlu1 %7869 }
0x1f6b   : > { %7917 = vrot.lane.b32.xlu1 %v7798_v56, %s10539_s23 }
0x1f6c   : > { %v14568_v14 = vpop.permute.xlu0 %7871 }
0x1f6d   : > { %7919 = vrot.lane.b32.xlu0 %v7801_v19, %s10539_s23 }
0x1f6e   : > { %v9389_v51 = vpop.f32.mrb[200].mxu1  ;;  %v7866_v47 = vpop.permute.xlu1 %7865 }
0x1f6f   : > { %7937 = vrot.lane.b32.xlu1 %v9389_v51, %s10540_s25  ;;  %v7814_v13 = vpop.f32.mrb[201].mxu1  ;;  %v7893_v51 = vsel %vm353_vm0, %v14496_v32, %v7850_v10 }
0x1f70   : > { %v9390_v8 = vpop.f32.mrb[202].mxu1  ;;  %v7868_v27 = vpop.permute.xlu0 %7867 }
0x1f71   : > { %7939 = vrot.lane.b32.xlu0 %v9390_v8, %s10540_s25  ;;  %v7817_v23 = vpop.f32.mrb[203].mxu1 }
0x1f73   : > { %7933 = vrot.lane.b32.xlu1 %v7814_v13, %s10540_s25  ;;  %v10523_v13 = vld [vmem:[%s10600_s24 + $0x20] sm:$0xff] }
0x1f75   : > { %7935 = vrot.lane.b32.xlu0 %v7817_v23, %s10540_s25  ;;  %v7886_v24 = vpop.permute.xlu1 %7885 }
0x1f76   : > { %v9393_v46 = vpop.f32.mrb[204].mxu1 }
0x1f77   : > { %7953 = vrot.lane.b32.xlu1 %v9393_v46, %s10541_s26  ;;  %v7830_v17 = vpop.f32.mrb[205].mxu1  ;;  %v14570_v49 = vpop.permute.xlu0 %7887  ;;  %v7897_v46 = vsel %vm1056_vm1, %v7893_v51, %v7866_v47 }
0x1f78   : > { %v9394_v30 = vpop.f32.mrb[206].mxu1 }
0x1f79   : > { %7955 = vrot.lane.b32.xlu0 %v9394_v30, %s10541_s26  ;;  %v7833_v41 = vpop.f32.mrb[207].mxu1  ;;  %v7882_v55 = vpop.permute.xlu1 %7881  ;;  %v10524_v30 = vld [vmem:[%s10600_s24] sm:$0xff] }
0x1f7a   : > { %v7901_v32 = vsel %vm1061_vm2, %v7897_v46, %v7882_v55 }
0x1f7b   : > { %7949 = vrot.lane.b32.xlu1 %v7830_v17, %s10541_s26  ;;  %v7884_v42 = vpop.permute.xlu0 %7883 }
0x1f7d   : > { %7951 = vrot.lane.b32.xlu0 %v7833_v41, %s10541_s26  ;;  %s14590_s26 = scalar_lea.vmem %s14647_s5, %s8199_s21 }
0x1f9b   : > { %6361 = vxpose.xlu0.b32.start [1/16] (narrow) %v13734_v3, 32  ;;  %v15087_v3 = vld [vmem:[#allocation76_spill] sm:$0xff] }
0x1f9f   : > { %6362 = vxpose.xlu0.b32.cont [2/16] (narrow) %v13731_v15, 32  ;;  %v15088_v15 = vld [vmem:[#allocation101_spill] sm:$0xff] }
0x1fa3   : > { %6363 = vxpose.xlu0.b32.cont [3/16] (narrow) %v13740_v60, 32  ;;  %v15089_v60 = vld [vmem:[#allocation74_spill] sm:$0xff] }
0x1fa4   : > { %6212 = vxpose.xlu1.b32.start [1/16] (narrow) %v13579_v5, 32  ;;  %v15090_v5 = vld [vmem:[#allocation66_spill] sm:$0xff] }
0x1fa7   : > { %6364 = vxpose.xlu0.b32.cont [4/16] (narrow) %v13737_v4, 32  ;;  %v15091_v4 = vld [vmem:[#allocation94_spill] sm:$0xff] }
0x1fa8   : > { %6213 = vxpose.xlu1.b32.cont [2/16] (narrow) %v13582_v20, 32  ;;  %v15092_v20 = vld [vmem:[#allocation57_spill] sm:$0xff] }
0x1fab   : > { %6365 = vxpose.xlu0.b32.cont [5/16] (narrow) %v13754_v25, 32  ;;  %v15093_v25 = vld [vmem:[#allocation64_spill] sm:$0xff] }
0x1fac   : > { %6214 = vxpose.xlu1.b32.cont [3/16] (narrow) %v13585_v7, 32  ;;  %v15094_v7 = vld [vmem:[#allocation45_spill] sm:$0xff] }
0x1faf   : > { %6366 = vxpose.xlu0.b32.cont [6/16] (narrow) %v13751_v37, 32  ;;  %v15095_v37 = vld [vmem:[#allocation63_spill] sm:$0xff] }
0x1fb0   : > { %6215 = vxpose.xlu1.b32.cont [4/16] (narrow) %v13588_v6, 32  ;;  %v15096_v6 = vld [vmem:[#allocation65_spill] sm:$0xff] }
0x1fb3   : > { %6367 = vxpose.xlu0.b32.cont [7/16] (narrow) %v15086_v18, 32 }
0x1fb4   : > { %6216 = vxpose.xlu1.b32.cont [5/16] (narrow) %v15087_v3, 32 }
0x1fb7   : > { %6368 = vxpose.xlu0.b32.cont [8/16] (narrow) %v15088_v15, 32 }
0x1fb8   : > { %6217 = vxpose.xlu1.b32.cont [6/16] (narrow) %v15089_v60, 32 }
0x1fbb   : > { %6369 = vxpose.xlu0.b32.cont [9/16] (narrow) %v15090_v5, 32 }
0x1fbc   : > { %6218 = vxpose.xlu1.b32.cont [7/16] (narrow) %v15091_v4, 32  ;;  %v10525_v4 = vld [vmem:[%s10600_s24 + $0x28] sm:$0xff] }
0x1fbf   : > { %6370 = vxpose.xlu0.b32.cont [10/16] (narrow) %v15092_v20, 32 }
0x1fc0   : > { %6219 = vxpose.xlu1.b32.cont [8/16] (narrow) %v15093_v25, 32 }
0x1fc3   : > { %6371 = vxpose.xlu0.b32.cont [11/16] (narrow) %v15094_v7, 32 }
0x1fc4   : > { %6220 = vxpose.xlu1.b32.cont [9/16] (narrow) %v15095_v37, 32 }
0x1fc7   : > { %6372 = vxpose.xlu0.b32.cont [12/16] (narrow) %v15096_v6, 32  ;;  %v10526_v6 = vld [vmem:[%s10600_s24 + $0x8] sm:$0xff] }
0x1fc8   : > { %6221 = vxpose.xlu1.b32.cont [10/16] (narrow) %v15097_v45, 32 }
0x1fcb   : > { %6373 = vxpose.xlu0.b32.cont [13/16] (narrow) %v15098_v58, 32 }
0x1fcc   : > { %6222 = vxpose.xlu1.b32.cont [11/16] (narrow) %v15099_v40, 32 }
0x1fcf   : > { %6374 = vxpose.xlu0.b32.cont [14/16] (narrow) %v15100_v21, 32 }
0x1fd0   : > { %6223 = vxpose.xlu1.b32.cont [12/16] (narrow) %v15101_v33, 32  ;;  %v7895_v33 = vsel %vm353_vm0, %v14494_v62, %v7854_v12 }
0x1fd3   : > { %6375 = vxpose.xlu0.b32.cont [15/16] (narrow) %v15102_v29, 32 }
0x1fd4   : > { %6224 = vxpose.xlu1.b32.cont [13/16] (narrow) %v15103_v48, 32  ;;  %v10527_v48 = vld [vmem:[%s10600_s24 + $0x30] sm:$0xff] }
0x1fd7   : > { %6376 = vxpose.xlu0.b32.end [16/16] (narrow) %v15104_v28, 32  ;;  %v7899_v28 = vsel %vm1056_vm1, %v7895_v33, %v7870_v54  ;;  %v7896_v54 = vsel %vm353_vm0, %v14498_v61, %v14565_v43 }
0x1fd8   : > { %6225 = vxpose.xlu1.b32.cont [14/16] (narrow) %v15105_v22, 32 }
0x1fd9   : > { %v7922_v63 = vpop.permute.xlu1 %7921 }
0x1fda   : > { %v7963_v22 = vsel %vm353_vm0, %v14514_v31, %v7922_v63 }
0x1fdb   : > { %v14572_v35 = vpop.permute.xlu0 %7923 }
0x1fdc   : > { %6226 = vxpose.xlu1.b32.cont [15/16] (narrow) %v15106_v26, 32  ;;  %v7964_v63 = vsel %vm353_vm0, %v14518_v39, %v14572_v35 }
0x1fdd   : > { %v7918_v36 = vpop.permute.xlu1 %7917 }
0x1fde   : > { %v7961_v17 = vsel %vm353_vm0, %v14516_v16, %v7918_v36  ;;  %v7894_v16 = vsel %vm353_vm0, %v14500_v44, %v7852_v50  ;;  %v10530_v36 = vld [vmem:[%s10600_s24 + $0x18] sm:$0xff] }
0x1fdf   : > { %v7920_v52 = vpop.permute.xlu0 %7919  ;;  %v7898_v7 = vsel %vm1056_vm1, %v7894_v16, %v7868_v27  ;;  %v7903_v27 = vsel %vm1061_vm2, %v7899_v28, %v7886_v24  ;;  %v7900_v24 = vsel %vm1056_vm1, %v7896_v54, %v14568_v14 }
0x1fe0   : > { %6227 = vxpose.xlu1.b32.end [16/16] (narrow) %v15107_v0, 32  ;;  %v7962_v37 = vsel %vm353_vm0, %v14520_v38, %v7920_v52  ;;  %v7902_v58 = vsel %vm1061_vm2, %v7898_v7, %v7884_v42  ;;  %v10528_v0 = vld [vmem:[%s10600_s24 + $0x10] sm:$0xff]  ;;  %v10529_v42 = vld [vmem:[%s10600_s24 + $0x38] sm:$0xff] }
0x1fe1   : > { %v7938_v11 = vpop.permute.xlu1 %7937 }
0x1fe2   : > { %v7967_v62 = vsel %vm1056_vm1, %v7963_v22, %v7938_v11  ;;  %v7904_v11 = vsel %vm1061_vm2, %v7900_v24, %v14570_v49 }
0x1fe3   : > { %v14574_v53 = vpop.permute.xlu0 %7939 }
0x1fe4   : > { %v7968_v61 = vsel %vm1056_vm1, %v7964_v63, %v14574_v53 }
0x1fe5   : > { %v7934_v57 = vpop.permute.xlu1 %7933 }
0x1fe6   : > { %v7965_v18 = vsel %vm1056_vm1, %v7961_v17, %v7934_v57 }
0x1fe7   : > { %v7936_v1 = vpop.permute.xlu0 %7935 }
0x1fe8   : > { %v7966_v40 = vsel %vm1056_vm1, %v7962_v37, %v7936_v1 }
0x1fe9   : > { %v7954_v9 = vpop.permute.xlu1 %7953 }
0x1fea   : > { %v7971_v12 = vsel %vm1061_vm2, %v7967_v62, %v7954_v9 }
0x1feb   : > { %v14576_v34 = vpop.permute.xlu0 %7955 }
0x1fec   : > { %v7972_v43 = vsel %vm1061_vm2, %v7968_v61, %v14576_v34 }
0x1fed   : > { %v7950_v59 = vpop.permute.xlu1 %7949 }
0x1fee   : > { %v7969_v3 = vsel %vm1061_vm2, %v7965_v18, %v7950_v59 }
0x1fef   : > { %v7952_v2 = vpop.permute.xlu0 %7951 }
0x1ff0   : > { %v7970_v44 = vsel %vm1061_vm2, %v7966_v40, %v7952_v2 }
0x201b   : > { %v6377_v56 = vpop.trf.xlu0 }
0x201c   : > { %v6393_v8 = vadd.f32 %v10523_v13, %v6377_v56 }
0x201e   : > { %v7973_v5 = vadd.f32 %v7969_v3, %v6393_v8 }
0x201f   : > { %v6378_v19 = vpop.trf.xlu0 }
0x2020   : > { %v6394_v20 = vadd.f32 %v10525_v4, %v6378_v19  ;;  %8193 = vst [vmem:[%s14590_s26 + $0x20] sm:$0xff] %v7973_v5 }
0x2022   : > { %v7974_v29 = vadd.f32 %v7970_v44, %v6394_v20 }
0x2023   : > { %v6379_v15 = vpop.trf.xlu0 }
0x2024   : > { %v6228_v23 = vpop.trf.xlu1  ;;  %v6395_v38 = vadd.f32 %v10527_v48, %v6379_v15  ;;  %8194 = vst [vmem:[%s14590_s26 + $0x28] sm:$0xff] %v7974_v29 }
0x2025   : > { %v6244_v41 = vadd.f32 %v10524_v30, %v6228_v23 }
0x2026   : > { %v7975_v31 = vadd.f32 %v7971_v12, %v6395_v38 }
0x2027   : > { %v7905_v60 = vadd.f32 %v7901_v32, %v6244_v41  ;;  %v6380_v26 = vpop.trf.xlu0 }
0x2028   : > { %v6229_v25 = vpop.trf.xlu1  ;;  %v6396_v55 = vadd.f32 %v10529_v42, %v6380_v26  ;;  %8195 = vst [vmem:[%s14590_s26 + $0x30] sm:$0xff] %v7975_v31 }
0x2029   : > { %7909 = vst [vmem:[%s14590_s26] sm:$0xff] %v7905_v60  ;;  %v6245_v45 = vadd.f32 %v10526_v6, %v6229_v25 }
0x202a   : > { %v7976_v2 = vadd.f32 %v7972_v43, %v6396_v55 }
0x202b   : > { %v7906_v21 = vadd.f32 %v7902_v58, %v6245_v45 }
0x202c   : > { %v6230_v10 = vpop.trf.xlu1  ;;  %8196 = vst [vmem:[%s14590_s26 + $0x38] sm:$0xff] %v7976_v2 }
0x202d   : > { %7910 = vst [vmem:[%s14590_s26 + $0x8] sm:$0xff] %v7906_v21  ;;  %v6246_v50 = vadd.f32 %v10528_v0, %v6230_v10 }
0x202f   : > { %v7907_v47 = vadd.f32 %v7903_v27, %v6246_v50 }
0x2030   : > { %v6231_v52 = vpop.trf.xlu1 }
0x2031   : > { %7911 = vst [vmem:[%s14590_s26 + $0x10] sm:$0xff] %v7907_v47  ;;  %v6247_v1 = vadd.f32 %v10530_v36, %v6231_v52 }
0x2033   : > { %v7908_v57 = vadd.f32 %v7904_v11, %v6247_v1 }
0x2035   : > { %7912 = vst [vmem:[%s14590_s26 + $0x18] sm:$0xff] %v7908_v57 }
0x2036 PF: > { %s15_s18 = sadd.s32 1, %s10537_s18  }
0x2037   : > { %p12_p4 = scmp.ge.s32.totalorder %s15_s18, 4  }
0x2039   :  { %14 = sbr.rel (!%p12_p4) target bundleno = 1 (0x1), region = 72 }

</bundles_post_ra>
